<compile_context>
chip_gen: v7x
topology: tpu7x:2x2x1
jax: 0.10.0
libtpu: 0.0.40
codegen_flags: <defaults>
</compile_context>

<pallas_src>
import functools

import jax
import jax.numpy as jnp
from jax.experimental import pallas as pl
from jax.experimental.pallas import tpu as pltpu


# --------------------------------------------------------------------------
# config (stands in for the external `cfg` used by the PyTorch module)
# --------------------------------------------------------------------------
class _Cfg:
    NUM_CLASSES = 5
    POOLING_LENGTH = 4
    POOLING_HEIGHT = 2
    POOLING_WIDTH = 2
    POOLING_MODE = "pool"
    USE_ATTENTION = False


cfg = _Cfg()

_VMEM_LIMIT_BYTES = 32 * 1024 * 1024   # <= scoped/physical VMEM on v5e / v6e / v7x


def _row_tile(m, target=512):
    """Largest row tile <= target that divides m and is a multiple of 8 (else m itself)."""
    if m <= target:
        return m
    for t in range(target, 7, -8):
        if m % t == 0:
            return t
    return m


def _k_tile(k, target=2048):
    """Reduction tile: bounds (tm,tk)/(tk,n) block size (matters for v7x's 64 MiB VMEM)."""
    if k <= target:
        return k
    for t in range(target, 127, -128):
        if k % t == 0:
            return t
    return k


# --------------------------------------------------------------------------
# Pallas kernels
# --------------------------------------------------------------------------
def _matmul_kernel(x_ref, w_ref, b_ref, o_ref, acc_ref, *, activation):
    """K-tiled matmul with f32 VMEM accumulator, fused bias + optional ReLU."""
    @pl.when(pl.program_id(1) == 0)
    def _init():
        acc_ref[...] = jnp.zeros_like(acc_ref)

    acc_ref[...] += jnp.dot(x_ref[...], w_ref[...], preferred_element_type=jnp.float32)

    @pl.when(pl.program_id(1) == pl.num_programs(1) - 1)
    def _finalize():
        r = acc_ref[...] + b_ref[...]
        if activation == "relu":
            r = jnp.maximum(r, 0.0)
        o_ref[...] = r.astype(o_ref.dtype)


def linear(x, w, b, activation=None):
    """y = act(x @ w + b).  bf16 MXU inputs, f32 accumulate.  x:(M,K) w:(K,N) b:(N,) -> f32."""
    M, K = x.shape
    N = w.shape[1]
    tm, tk = _row_tile(M), _k_tile(K)
    return pl.pallas_call(
        functools.partial(_matmul_kernel, activation=activation),
        out_shape=jax.ShapeDtypeStruct((M, N), jnp.float32),
        grid_spec=pltpu.PrefetchScalarGridSpec(
            num_scalar_prefetch=0,
            grid=(M // tm, K // tk),
            in_specs=[
                pl.BlockSpec((tm, tk), lambda i, k: (i, k)),
                pl.BlockSpec((tk, N), lambda i, k: (k, 0)),
                pl.BlockSpec((1, N), lambda i, k: (0, 0)),
            ],
            out_specs=pl.BlockSpec((tm, N), lambda i, k: (i, 0)),
            scratch_shapes=[pltpu.VMEM((tm, N), jnp.float32)],
        ),
        compiler_params=pltpu.CompilerParams(
            dimension_semantics=("parallel", "arbitrary"),
            vmem_limit_bytes=_VMEM_LIMIT_BYTES),
    )(x.astype(jnp.bfloat16), w.astype(jnp.bfloat16), b.reshape(1, N).astype(jnp.float32))


def _roi_tpool_kernel(bidx_ref, mask_ref, feat_ref, o_ref):
    """Masked temporal max-pool of one RoI.  mask:(1,T,P)  feat:(1,T,F)  out:(1,P,F)."""
    del bidx_ref                                    # consumed by the index_map only
    feat = feat_ref[0]                              # (T, F)
    n_bins = mask_ref.shape[2]
    neg = jnp.float32(-3.0e38)
    rows = []
    for p in range(n_bins):                         # static unroll over the few temporal bins
        m = mask_ref[0, :, p:p + 1]                 # (T, 1)
        mx = jnp.max(jnp.where(m > 0.0, feat, neg), axis=0, keepdims=True)   # (1, F)
        nonempty = jnp.max(m, axis=0, keepdims=True) > 0.0                   # (1, 1)
        rows.append(jnp.where(nonempty, mx, 0.0))   # degenerate (clipped) bin -> 0, not -inf
    o_ref[0] = jnp.concatenate(rows, axis=0)        # (P, F)


def roi_temporal_max_pool(feat_tf, masks, batch_idx):
    """feat_tf:(N,T,F)  masks:(R,T,P)  batch_idx:(R,) int32  ->  (R,P,F) f32."""
    N, T, F = feat_tf.shape
    R, _, P = masks.shape
    return pl.pallas_call(
        _roi_tpool_kernel,
        out_shape=jax.ShapeDtypeStruct((R, P, F), jnp.float32),
        grid_spec=pltpu.PrefetchScalarGridSpec(
            num_scalar_prefetch=1,
            grid=(R,),
            in_specs=[
                pl.BlockSpec((1, T, P), lambda r, bidx: (r, 0, 0)),
                pl.BlockSpec((1, T, F), lambda r, bidx: (bidx[r], 0, 0)),
            ],
            out_specs=pl.BlockSpec((1, P, F), lambda r, bidx: (r, 0, 0)),
        ),
        compiler_params=pltpu.CompilerParams(
            dimension_semantics=("parallel",),      # rois independent -> uses both cores on v7x
            vmem_limit_bytes=_VMEM_LIMIT_BYTES),
    )(batch_idx.astype(jnp.int32), masks.astype(jnp.float32), feat_tf.astype(jnp.float32))


def _head_kernel(x_ref, fc6w_ref, fc6b_ref, hw_ref, hb_ref, insw_ref, insb_ref, o_ref,
                 *, n_cls, n_twin):
    """Fused fc6(+ReLU) -> one lane-dense matmul for {cls, twin, instance-DA fc1} ->
    in-register softmax and instance-DA fc2+sigmoid.  Output slab (tm, 128):
    lanes [0,n_cls)=cls_prob | [n_cls,n_cls+n_twin)=twin_pred | [n_cls+n_twin]=instance sigmoid."""
    h = jnp.dot(x_ref[...], fc6w_ref[...], preferred_element_type=jnp.float32) + fc6b_ref[...]
    h = jnp.maximum(h, 0.0)                                   # dropout == identity in eval
    heads = jnp.dot(h.astype(jnp.bfloat16), hw_ref[...],
                    preferred_element_type=jnp.float32) + hb_ref[...]        # (tm, NPAD)
    tm, npad = heads.shape
    lane = jax.lax.broadcasted_iota(jnp.int32, (tm, npad), 1)
    # classification softmax restricted to the first n_cls lanes (masked full-width ops)
    cls_in = jnp.where(lane < n_cls, heads, jnp.float32(-1e30))
    cmax = jnp.max(cls_in, axis=-1, keepdims=True)
    cexp = jnp.exp(cls_in - cmax)
    cls_prob = cexp / jnp.sum(cexp, axis=-1, keepdims=True)
    # instance-DA: ReLU over its hidden lanes, lane-reduction against zero-padded w2, sigmoid
    ins_logit = jnp.sum(jnp.maximum(heads, 0.0) * insw_ref[...],
                        axis=-1, keepdims=True) + insb_ref[...]              # (tm, 1)
    ins_sig = 1.0 / (1.0 + jnp.exp(-ins_logit))
    sig_lane = n_cls + n_twin
    out = heads                                               # twin lanes pass through unchanged
    out = jnp.where(lane < n_cls, cls_prob, out)
    out = jnp.where(lane == sig_lane, ins_sig, out)
    out = jnp.where(lane > sig_lane, 0.0, out)
    o_ref[...] = out.astype(o_ref.dtype)


def fused_roi_heads(pooled_flat, p, n_cls):
    """pooled_flat:(R, flat) -> (R, 128) lane-dense slab holding cls_prob/twin_pred/ins_sigmoid."""
    M, K = pooled_flat.shape
    fc_dim = p["fc6_w"].shape[1]
    npad = p["head_w"].shape[1]
    tm = _row_tile(M)
    return pl.pallas_call(
        functools.partial(_head_kernel, n_cls=n_cls, n_twin=2 * n_cls),
        out_shape=jax.ShapeDtypeStruct((M, npad), jnp.float32),
        grid_spec=pltpu.PrefetchScalarGridSpec(
            num_scalar_prefetch=0,
            grid=(M // tm,),
            in_specs=[
                pl.BlockSpec((tm, K), lambda i: (i, 0)),
                pl.BlockSpec((K, fc_dim), lambda i: (0, 0)),
                pl.BlockSpec((1, fc_dim), lambda i: (0, 0)),
                pl.BlockSpec((fc_dim, npad), lambda i: (0, 0)),
                pl.BlockSpec((1, npad), lambda i: (0, 0)),
                pl.BlockSpec((1, npad), lambda i: (0, 0)),
                pl.BlockSpec((1, 1), lambda i: (0, 0)),
            ],
            out_specs=pl.BlockSpec((tm, npad), lambda i: (i, 0)),
        ),
        compiler_params=pltpu.CompilerParams(
            dimension_semantics=("parallel",),
            vmem_limit_bytes=_VMEM_LIMIT_BYTES),
    )(pooled_flat.astype(jnp.bfloat16),
      p["fc6_w"].astype(jnp.bfloat16), p["fc6_b"].reshape(1, -1),
      p["head_w"].astype(jnp.bfloat16), p["head_b"].reshape(1, -1),
      p["ins_w"].reshape(1, -1), p["ins_b"].reshape(1, 1))


def _image_da_kernel(x_ref, w1_ref, b1_ref, w2_ref, b2_ref, o_ref, *, m_src):
    """Fused image-level DA head + per-tile loss partial sums.

    Per row tile (one row = one (n,t,h,w) position, channels-last): 1x1x1 conv (fc C->16)+ReLU,
    1x1x1 conv (fc 16->2), log-softmax/softmax over the two domain channels, then reduce the
    NLL and consistency-prob partial sums.  Only a lane-dense (1,128) partial-sum row leaves
    the kernel -- no (M,16)/(M,2) intermediates ever reach HBM."""
    tm = x_ref.shape[0]
    h = jnp.dot(x_ref[...], w1_ref[...], preferred_element_type=jnp.float32) + b1_ref[...]
    h = jnp.maximum(h, 0.0)
    s = jnp.dot(h.astype(jnp.bfloat16), w2_ref[...],
                preferred_element_type=jnp.float32) + b2_ref[...]            # (tm, 2)
    smax = jnp.max(s, axis=-1, keepdims=True)
    lse = smax + jnp.log(jnp.sum(jnp.exp(s - smax), axis=-1, keepdims=True))
    logp = s - lse
    prob = jnp.exp(logp)
    rows = jax.lax.broadcasted_iota(jnp.int32, (tm, 1), 0) + pl.program_id(0) * tm
    is_src = rows < m_src                                     # source rows come first
    terms = (
        jnp.where(is_src, -logp[:, 1:2], 0.0),    # source NLL   (domain label 1)
        jnp.where(is_src, 0.0, -logp[:, 0:1]),    # target NLL   (domain label 0)
        jnp.where(is_src, prob[:, 1:2], 0.0),     # source consistency prob (channel 1)
        jnp.where(is_src, 0.0, prob[:, 0:1]),     # target consistency prob (channel 0)
    )
    lane = jax.lax.broadcasted_iota(jnp.int32, (1, o_ref.shape[2]), 1)
    packed = jnp.zeros((1, o_ref.shape[2]), jnp.float32)
    for j, t in enumerate(terms):
        packed = jnp.where(lane == j, jnp.sum(t, axis=0, keepdims=True), packed)
    o_ref[0] = packed


def image_da_partial_sums(feat_rows, p, m_src):
    """feat_rows:(M,C) channels-last pixels (source rows first) -> (G,1,128) partial sums."""
    M, C = feat_rows.shape
    hid = p["da_img_w1"].shape[1]
    tm = _row_tile(M)
    grid = M // tm
    return pl.pallas_call(
        functools.partial(_image_da_kernel, m_src=m_src),
        out_shape=jax.ShapeDtypeStruct((grid, 1, 128), jnp.float32),
        grid_spec=pltpu.PrefetchScalarGridSpec(
            num_scalar_prefetch=0,
            grid=(grid,),
            in_specs=[
                pl.BlockSpec((tm, C), lambda i: (i, 0)),
                pl.BlockSpec((C, hid), lambda i: (0, 0)),
                pl.BlockSpec((1, hid), lambda i: (0, 0)),
                pl.BlockSpec((hid, 2), lambda i: (0, 0)),
                pl.BlockSpec((1, 2), lambda i: (0, 0)),
            ],
            out_specs=pl.BlockSpec((1, 1, 128), lambda i: (i, 0, 0)),
        ),
        compiler_params=pltpu.CompilerParams(
            dimension_semantics=("parallel",),
            vmem_limit_bytes=_VMEM_LIMIT_BYTES),
    )(feat_rows.astype(jnp.bfloat16),
      p["da_img_w1"].astype(jnp.bfloat16), p["da_img_b1"].reshape(1, -1),
      p["da_img_w2"].astype(jnp.bfloat16), p["da_img_b2"].reshape(1, -1))


# --------------------------------------------------------------------------
# JAX glue (patch extraction, masks, tiny scalar losses)
# --------------------------------------------------------------------------
def conv3d_channels_last(x, w, b, stride, pad, activation=None):
    """3-D conv with channels-last activations.  x:(N,T,H,W,C); w: torch OIDHW (Cout,Cin,kt,kh,kw).

    Patch extraction uses lax.conv_general_dilated_patches (no python-loop im2col, no big
    transpose); the heavy compute -- (rows, Cin*k^3) x (Cin*k^3, Cout) with fused bias+ReLU --
    runs in the Pallas MXU matmul kernel above."""
    # TODO(synk): fully fusing patch extraction into the Pallas matmul (overlapping-window
    # BlockSpecs) would also remove the patch tensor's HBM round-trip.
    Cout = w.shape[0]
    kt, kh, kw = w.shape[2:]
    patches = jax.lax.conv_general_dilated_patches(
        x, (kt, kh, kw), stride,
        [(pad[0], pad[0]), (pad[1], pad[1]), (pad[2], pad[2])],
        dimension_numbers=("NDHWC", "DHWIO", "NDHWC"),
    )                                                         # (N, To, Ho, Wo, Cin*kt*kh*kw)
    N = patches.shape[0]
    To, Ho, Wo, K = patches.shape[1:]
    wm = w.reshape(Cout, K).T                                 # (Cin,kt,kh,kw) order == patches order
    y = linear(patches.reshape(-1, K), wm, b, activation=activation)
    return y.reshape(N, To, Ho, Wo, Cout)


def make_temporal_masks(rois, T, P):
    """Temporal-pooling bin membership masks (R, T, P) from rois = [batch, start, end]."""
    start = jnp.round(rois[:, 1])
    end = jnp.round(rois[:, 2])
    length = jnp.maximum(end - start + 1.0, 1.0)
    pb = jnp.arange(P, dtype=jnp.float32)
    bin_start = jnp.clip(jnp.floor(pb[None, :] * length[:, None] / P) + start[:, None], 0, T)
    bin_end = jnp.clip(jnp.ceil((pb[None, :] + 1.0) * length[:, None] / P) + start[:, None], 0, T)
    t = jnp.arange(T, dtype=jnp.float32)
    mask = ((t[None, :, None] >= bin_start[:, None, :]) &
            (t[None, :, None] < bin_end[:, None, :]))
    return mask.astype(jnp.float32)


def bce_loss(p, y):
    eps = 1e-7
    p = jnp.clip(p, eps, 1.0 - eps)
    return -jnp.mean(y * jnp.log(p) + (1.0 - y) * jnp.log(1.0 - p))


# --------------------------------------------------------------------------
# The model
# --------------------------------------------------------------------------
class TDCNNPallas:
    def __init__(self, key, n_classes=cfg.NUM_CLASSES, in_ch=3, dout_base=32, fc_dim=64,
                 ins_hidden=32, img_hidden=16, num_rois=4):
        self.n_classes = n_classes
        self.dout_base = dout_base
        self.fc_dim = fc_dim
        self.num_rois = num_rois
        P, ph, pw = cfg.POOLING_LENGTH, cfg.POOLING_HEIGHT, cfg.POOLING_WIDTH
        self.pool_dims = (P, ph, pw)
        flat = P * ph * pw * dout_base     # channels-last flatten order (P, ph, pw, C)
        npad = 128   # lane-dense fused head width (5+10+32 padded); bump to 256 on v6e/v7x once M>=256

        ks = jax.random.split(key, 8)

        def nrm(k, shape, std):
            return (std * jax.random.normal(k, shape)).astype(jnp.float32)

        cls_w = nrm(ks[2], (fc_dim, n_classes), 0.01)
        twin_w = nrm(ks[3], (fc_dim, 2 * n_classes), 0.001)
        ins_w1 = nrm(ks[6], (fc_dim, ins_hidden), 0.01)
        ins_w2 = nrm(ks[7], (ins_hidden, 1), 0.01)
        ins_lo = 3 * n_classes
        head_w = (jnp.zeros((fc_dim, npad), jnp.float32)
                  .at[:, :n_classes].set(cls_w)
                  .at[:, n_classes:3 * n_classes].set(twin_w)
                  .at[:, ins_lo:ins_lo + ins_hidden].set(ins_w1))
        ins_w = jnp.zeros((npad,), jnp.float32).at[ins_lo:ins_lo + ins_hidden].set(ins_w2[:, 0])

        # deterministic synthetic parameters (matches normal_init: N(0, std), bias = 0)
        # TODO(synk): fc6_w rows follow the channels-last (P,ph,pw,C) flatten; permute rows once
        #             when porting real torch weights whose flatten order is (C,P,ph,pw).
        self.p = dict(
            base_w=nrm(ks[0], (dout_base, in_ch, 3, 3, 3), 0.01),
            base_b=jnp.zeros((dout_base,), jnp.float32),
            fc6_w=nrm(ks[1], (flat, fc_dim), 0.01),
            fc6_b=jnp.zeros((fc_dim,), jnp.float32),
            head_w=head_w,                      # [cls | twin | instanceDA fc1], zero-padded to 128 lanes
            head_b=jnp.zeros((npad,), jnp.float32),
            ins_w=ins_w,                        # instanceDA fc2, zero-padded to 128 lanes
            ins_b=jnp.zeros((1,), jnp.float32),
            da_img_w1=nrm(ks[4], (dout_base, img_hidden), 0.01),
            da_img_b1=jnp.zeros((img_hidden,), jnp.float32),
            da_img_w2=nrm(ks[5], (img_hidden, 2), 0.01),
            da_img_b2=jnp.zeros((2,), jnp.float32),
        )
        self._forward_jit = jax.jit(self._forward_impl)

    # ---- RCNN_rpn (stand-in) ----
    def _rpn_proposals(self, n, T):
        # TODO(synk): the real _RPN (anchor scoring + NMS + proposal-target sampling) has no
        # clean Pallas equivalent; deterministic synthetic temporal proposals are used instead.
        starts = jnp.array([0.0, 1.0, 2.0, 0.0], jnp.float32)[:self.num_rois]
        ends = jnp.array([3.0, 5.0, T - 1.0, T - 1.0], jnp.float32)[:self.num_rois]
        bidx = jnp.repeat(jnp.arange(n, dtype=jnp.float32), self.num_rois).reshape(n, -1)
        return jnp.stack([bidx, jnp.tile(starts, (n, 1)), jnp.tile(ends, (n, 1))], axis=-1)

    # ---- fully jitted forward over the concatenated source+target batch ----
    def _forward_impl(self, video_data, gt_twins, tgt_video_data, tgt_gt_twins):
        del gt_twins, tgt_gt_twins                 # only consumed by the (synthetic) RPN
        n_cls = self.n_classes
        P, ph, pw = self.pool_dims
        batch_size = video_data.shape[0]

        # ---- shared RCNN_base (C3D stand-in), channels-last, source+target together ----
        x = jnp.concatenate([video_data, tgt_video_data], axis=0)          # (2B, C, T, H, W)
        x = jnp.transpose(x, (0, 2, 3, 4, 1)).astype(jnp.bfloat16)         # NDHWC, bf16 once
        base_feat = conv3d_channels_last(x, self.p["base_w"], self.p["base_b"],
                                         stride=(1, 2, 2), pad=(1, 1, 1),
                                         activation="relu")                # (2B, T, Ho, Wo, C')
        NB, T, Ho, Wo, C = base_feat.shape

        # ---- RPN proposals + RoI temporal pooling ----
        rois_all = self._rpn_proposals(NB, T)                              # (2B, nr, 3)
        rois_flat = rois_all.reshape(-1, 3)
        sp = base_feat.reshape(NB, T, ph, Ho // ph, pw, Wo // pw, C).max(axis=(3, 5))
        feat_tf = sp.reshape(NB, T, ph * pw * C)                           # (2B, T, 128) lane-dense
        masks = make_temporal_masks(rois_flat, T, P)                       # (R, T, P)
        pooled = roi_temporal_max_pool(feat_tf, masks,
                                       rois_flat[:, 0].astype(jnp.int32))  # (R, P, F)
        pooled_flat = pooled.reshape(pooled.shape[0], -1)                  # (R, P*ph*pw*C)

        # ---- fused _head_to_tail + cls/twin heads + instance-DA head ----
        head_out = fused_roi_heads(pooled_flat, self.p, n_cls)             # (R, 128)
        cls_prob_all = head_out[:, :n_cls]
        twin_all = head_out[:, n_cls:3 * n_cls]
        ins_sig_all = head_out[:, 3 * n_cls:3 * n_cls + 1]                 # (R, 1)

        r_src = batch_size * self.num_rois
        rois = rois_all[:batch_size]
        cls_prob = cls_prob_all[:r_src].reshape(batch_size, self.num_rois, -1)
        twin_pred = twin_all[:r_src].reshape(batch_size, self.num_rois, -1)

        # ---- DA losses (domain labels fixed by the module's assert: source=1, target=0) ----
        m_src = batch_size * T * Ho * Wo
        m_tgt = (NB - batch_size) * T * Ho * Wo
        partial = image_da_partial_sums(base_feat.reshape(NB * T * Ho * Wo, C), self.p, m_src)
        totals = jnp.sum(partial[:, 0, :4], axis=0)
        DA_img_loss_cls = totals[0] / m_src
        tgt_DA_img_loss_cls = totals[1] / m_tgt
        consistency_prob = totals[2] / m_src
        tgt_consistency_prob = totals[3] / m_tgt

        ins_src, ins_tgt = ins_sig_all[:r_src], ins_sig_all[r_src:]
        DA_ins_loss_cls = bce_loss(ins_src, jnp.ones_like(ins_src))
        tgt_DA_ins_loss_cls = bce_loss(ins_tgt, jnp.zeros_like(ins_tgt))
        DA_cst_loss = jnp.sum((ins_src - consistency_prob) ** 2)           # MSELoss(size_average=False)
        tgt_DA_cst_loss = jnp.sum((ins_tgt - tgt_consistency_prob) ** 2)

        return (rois, cls_prob, twin_pred,
                DA_img_loss_cls, DA_ins_loss_cls,
                tgt_DA_img_loss_cls, tgt_DA_ins_loss_cls,
                DA_cst_loss, tgt_DA_cst_loss)

    def forward(self, video_data, gt_twins, need_backprop,
                tgt_video_data, tgt_gt_twins, tgt_need_backprop):
        # The original forward asserts need_backprop==1 / tgt_need_backprop==0 and uses them as
        # the domain labels; those labels are baked in (no host sync / no jit-blocking asserts).
        del need_backprop, tgt_need_backprop
        return self._forward_jit(video_data, gt_twins, tgt_video_data, tgt_gt_twins)


# --------------------------------------------------------------------------
if __name__ == "__main__":
    key = jax.random.PRNGKey(0)
    k1, k2, k3, kp = jax.random.split(key, 4)

    video_data = jax.random.normal(k1, (2, 3, 8, 16, 16), dtype=jnp.float32)
    tgt_video_data = jax.random.normal(k2, (2, 3, 8, 16, 16), dtype=jnp.float32)
    gt_twins = jax.random.uniform(k3, (2, 3, 3), dtype=jnp.float32) * 8.0
    tgt_gt_twins = gt_twins
    need_backprop = jnp.array([1.0], dtype=jnp.float32)
    tgt_need_backprop = jnp.array([0.0], dtype=jnp.float32)

    model = TDCNNPallas(kp)
    out = model.forward(video_data, gt_twins, need_backprop,
                        tgt_video_data, tgt_gt_twins, tgt_need_backprop)
    out = jax.tree_util.tree_map(jax.block_until_ready, out)

    rois, cls_prob, twin_pred = out[0], out[1], out[2]
    assert rois.shape == (2, 4, 3)
    assert cls_prob.shape == (2, 4, cfg.NUM_CLASSES)
    assert twin_pred.shape == (2, 4, 2 * cfg.NUM_CLASSES)
    assert bool(jnp.all(jnp.isfinite(cls_prob)))
    assert all(bool(jnp.isfinite(v)) for v in out[3:])
    print("KERNEL_OK")
</pallas_src>

<mosaic_0001>
module attributes {stable_mosaic.version = 11 : i64} {
  func.func @_matmul_kernel(%arg0: i32, %arg1: i32, %arg2: memref<512x81xbf16, #tpu.memory_space<vmem>>, %arg3: memref<81x32xbf16, #tpu.memory_space<vmem>>, %arg4: memref<1x32xf32, #tpu.memory_space<vmem>>, %arg5: memref<512x32xf32, #tpu.memory_space<vmem>>, %arg6: memref<512x32xf32, #tpu.memory_space<vmem>>) attributes {dimension_semantics = [#tpu.dimension_semantics<parallel>, #tpu.dimension_semantics<arbitrary>], iteration_bounds = array<i64: 4, 1>, scalar_prefetch = 0 : i64, scratch_operands = 1 : i64, tpu.core_type = #tpu.core_type<tc>, window_params = [{transform_indices = @transform_0, window_bounds = array<i64: 512, 81>}, {transform_indices = @transform_1, window_bounds = array<i64: 81, 32>}, {pipeline_mode = #tpu.pipeline_mode<synchronous>, transform_indices = @transform_2, window_bounds = array<i64: 1, 32>}, {transform_indices = @transform_3, window_bounds = array<i64: 512, 32>}]} {
    %c0_i32 = arith.constant 0 : i32
    %0 = arith.cmpi eq, %arg1, %c0_i32 : i32
    %1 = arith.extui %0 : i1 to i32
    %c0_i32_0 = arith.constant 0 : i32
    %2 = arith.cmpi ne, %1, %c0_i32_0 : i32
    scf.if %2 {
      %cst_10 = arith.constant 0.000000e+00 : f32
      %12 = vector.broadcast %cst_10 : f32 to vector<512x32xf32>
      %c0_11 = arith.constant 0 : index
      %c0_12 = arith.constant 0 : index
      %13 = vector.load %arg6[%c0_11, %c0_12] : memref<512x32xf32, #tpu.memory_space<vmem>>, vector<512x32xf32>
      tpu.vector_store %arg6[%c0_11, %c0_12], %12 {strides = array<i32>} : memref<512x32xf32, #tpu.memory_space<vmem>>, vector<512x32xf32>,
    } else {
    }
    %c0 = arith.constant 0 : index
    %c0_1 = arith.constant 0 : index
    %3 = vector.load %arg6[%c0, %c0_1] : memref<512x32xf32, #tpu.memory_space<vmem>>, vector<512x32xf32>
    %c0_2 = arith.constant 0 : index
    %c0_3 = arith.constant 0 : index
    %4 = vector.load %arg2[%c0_2, %c0_3] : memref<512x81xbf16, #tpu.memory_space<vmem>>, vector<512x81xbf16>
    %c0_4 = arith.constant 0 : index
    %c0_5 = arith.constant 0 : index
    %5 = vector.load %arg3[%c0_4, %c0_5] : memref<81x32xbf16, #tpu.memory_space<vmem>>, vector<81x32xbf16>
    %cst = arith.constant dense<0.000000e+00> : vector<512x32xf32>
    %6 = tpu.matmul %4, %5, %cst {dimension_numbers = #tpu.dot_dimension_numbers<[1], [0], [0], [1], [0, 0, 1, 1], [], []>} : vector<512x81xbf16>, vector<81x32xbf16>, vector<512x32xf32> -> vector<512x32xf32>
    %7 = arith.addf %3, %6 : vector<512x32xf32>
    %c0_6 = arith.constant 0 : index
    %c0_7 = arith.constant 0 : index
    %8 = vector.load %arg6[%c0_6, %c0_7] : memref<512x32xf32, #tpu.memory_space<vmem>>, vector<512x32xf32>
    tpu.vector_store %arg6[%c0_6, %c0_7], %7 {strides = array<i32>} : memref<512x32xf32, #tpu.memory_space<vmem>>, vector<512x32xf32>,
    %c0_i32_8 = arith.constant 0 : i32
    %9 = arith.cmpi eq, %arg1, %c0_i32_8 : i32
    %10 = arith.extui %9 : i1 to i32
    %c0_i32_9 = arith.constant 0 : i32
    %11 = arith.cmpi ne, %10, %c0_i32_9 : i32
    scf.if %11 {
      %c0_10 = arith.constant 0 : index
      %c0_11 = arith.constant 0 : index
      %12 = vector.load %arg6[%c0_10, %c0_11] : memref<512x32xf32, #tpu.memory_space<vmem>>, vector<512x32xf32>
      %c0_12 = arith.constant 0 : index
      %c0_13 = arith.constant 0 : index
      %13 = vector.load %arg4[%c0_12, %c0_13] : memref<1x32xf32, #tpu.memory_space<vmem>>, vector<1x32xf32>
      %14 = vector.broadcast %13 : vector<1x32xf32> to vector<512x32xf32>
      %15 = arith.addf %12, %14 : vector<512x32xf32>
      %cst_14 = arith.constant 0.000000e+00 : f32
      %16 = vector.broadcast %cst_14 : f32 to vector<512x32xf32>
      %17 = arith.maximumf %15, %16 : vector<512x32xf32>
      %c0_15 = arith.constant 0 : index
      %c0_16 = arith.constant 0 : index
      %18 = vector.load %arg5[%c0_15, %c0_16] : memref<512x32xf32, #tpu.memory_space<vmem>>, vector<512x32xf32>
      tpu.vector_store %arg5[%c0_15, %c0_16], %17 {strides = array<i32>} : memref<512x32xf32, #tpu.memory_space<vmem>>, vector<512x32xf32>,
    } else {
    }
    return
  }
  func.func @transform_0(%arg0: i32, %arg1: i32) -> (i32, i32) {
    %c0_i32 = arith.constant 0 : i32
    return %arg0, %arg1 : i32, i32
  }
  func.func @transform_1(%arg0: i32, %arg1: i32) -> (i32, i32) {
    %c0_i32 = arith.constant 0 : i32
    %c0_i32_0 = arith.constant 0 : i32
    return %arg1, %c0_i32 : i32, i32
  }
  func.func @transform_2(%arg0: i32, %arg1: i32) -> (i32, i32) {
    %c0_i32 = arith.constant 0 : i32
    %c0_i32_0 = arith.constant 0 : i32
    %c0_i32_1 = arith.constant 0 : i32
    return %c0_i32, %c0_i32_0 : i32, i32
  }
  func.func @transform_3(%arg0: i32, %arg1: i32) -> (i32, i32) {
    %c0_i32 = arith.constant 0 : i32
    %c0_i32_0 = arith.constant 0 : i32
    return %arg0, %c0_i32 : i32, i32
  }
}

module attributes {stable_mosaic.version = 11 : i64} {
  func.func @_roi_tpool_kernel(%arg0: i32, %arg1: memref<16xi32, #tpu.memory_space<smem>>, %arg2: memref<1x8x4xf32, #tpu.memory_space<vmem>>, %arg3: memref<1x8x128xf32, #tpu.memory_space<vmem>>, %arg4: memref<1x4x128xf32, #tpu.memory_space<vmem>>) attributes {dimension_semantics = [#tpu.dimension_semantics<parallel>], iteration_bounds = array<i64: 16>, scalar_prefetch = 1 : i64, scratch_operands = 0 : i64, tpu.core_type = #tpu.core_type<tc>, window_params = [{transform_indices = @transform_0, window_bounds = array<i64: 1, 8, 4>}, {transform_indices = @transform_1, window_bounds = array<i64: 1, 8, 128>}, {transform_indices = @transform_2, window_bounds = array<i64: 1, 4, 128>}]} {
    %c0 = arith.constant 0 : index
    %c0_0 = arith.constant 0 : index
    %c0_1 = arith.constant 0 : index
    %0 = vector.load %arg3[%c0, %c0_0, %c0_1] : memref<1x8x128xf32, #tpu.memory_space<vmem>>, vector<1x8x128xf32>
    %1 = vector.shape_cast %0 : vector<1x8x128xf32> to vector<8x128xf32>
    %c0_2 = arith.constant 0 : index
    %c0_3 = arith.constant 0 : index
    %c0_4 = arith.constant 0 : index
    %2 = vector.load %arg2[%c0_2, %c0_3, %c0_4] : memref<1x8x4xf32, #tpu.memory_space<vmem>>, vector<1x8x1xf32>
    %3 = vector.shape_cast %2 : vector<1x8x1xf32> to vector<8x1xf32>
    %cst = arith.constant 0.000000e+00 : f32
    %4 = vector.broadcast %cst : f32 to vector<8x1xf32>
    %5 = arith.cmpf ogt, %3, %4 : vector<8x1xf32>
    %cst_5 = arith.constant -3.000000e+38 : f32
    %6 = vector.shape_cast %5 : vector<8x1xi1> to vector<8x1xi1>
    %7 = vector.broadcast %6 : vector<8x1xi1> to vector<8x128xi1>
    %8 = vector.broadcast %cst_5 : f32 to vector<8x128xf32>
    %9 = arith.select %7, %1, %8 : vector<8x128xi1>, vector<8x128xf32>
    %cst_6 = arith.constant dense<0xFF800000> : vector<128xf32>
    %10 = vector.multi_reduction <maximumf>, %9, %cst_6 [0] : vector<8x128xf32> to vector<128xf32>
    %11 = vector.shape_cast %10 : vector<128xf32> to vector<1x128xf32>
    %cst_7 = arith.constant dense<0xFF800000> : vector<1xf32>
    %12 = vector.multi_reduction <maximumf>, %3, %cst_7 [0] : vector<8x1xf32> to vector<1xf32>
    %13 = vector.shape_cast %12 : vector<1xf32> to vector<1x1xf32>
    %cst_8 = arith.constant 0.000000e+00 : f32
    %14 = vector.broadcast %cst_8 : f32 to vector<1x1xf32>
    %15 = arith.cmpf ogt, %13, %14 : vector<1x1xf32>
    %cst_9 = arith.constant 0.000000e+00 : f32
    %16 = vector.shape_cast %15 : vector<1x1xi1> to vector<1x1xi1>
    %17 = vector.broadcast %16 : vector<1x1xi1> to vector<1x128xi1>
    %18 = vector.broadcast %cst_9 : f32 to vector<1x128xf32>
    %19 = arith.select %17, %11, %18 : vector<1x128xi1>, vector<1x128xf32>
    %c0_10 = arith.constant 0 : index
    %c0_11 = arith.constant 0 : index
    %c1 = arith.constant 1 : index
    %20 = vector.load %arg2[%c0_10, %c0_11, %c1] : memref<1x8x4xf32, #tpu.memory_space<vmem>>, vector<1x8x1xf32>
    %21 = vector.shape_cast %20 : vector<1x8x1xf32> to vector<8x1xf32>
    %cst_12 = arith.constant 0.000000e+00 : f32
    %22 = vector.broadcast %cst_12 : f32 to vector<8x1xf32>
    %23 = arith.cmpf ogt, %21, %22 : vector<8x1xf32>
    %cst_13 = arith.constant -3.000000e+38 : f32
    %24 = vector.shape_cast %23 : vector<8x1xi1> to vector<8x1xi1>
    %25 = vector.broadcast %24 : vector<8x1xi1> to vector<8x128xi1>
    %26 = vector.broadcast %cst_13 : f32 to vector<8x128xf32>
    %27 = arith.select %25, %1, %26 : vector<8x128xi1>, vector<8x128xf32>
    %cst_14 = arith.constant dense<0xFF800000> : vector<128xf32>
    %28 = vector.multi_reduction <maximumf>, %27, %cst_14 [0] : vector<8x128xf32> to vector<128xf32>
    %29 = vector.shape_cast %28 : vector<128xf32> to vector<1x128xf32>
    %cst_15 = arith.constant dense<0xFF800000> : vector<1xf32>
    %30 = vector.multi_reduction <maximumf>, %21, %cst_15 [0] : vector<8x1xf32> to vector<1xf32>
    %31 = vector.shape_cast %30 : vector<1xf32> to vector<1x1xf32>
    %cst_16 = arith.constant 0.000000e+00 : f32
    %32 = vector.broadcast %cst_16 : f32 to vector<1x1xf32>
    %33 = arith.cmpf ogt, %31, %32 : vector<1x1xf32>
    %cst_17 = arith.constant 0.000000e+00 : f32
    %34 = vector.shape_cast %33 : vector<1x1xi1> to vector<1x1xi1>
    %35 = vector.broadcast %34 : vector<1x1xi1> to vector<1x128xi1>
    %36 = vector.broadcast %cst_17 : f32 to vector<1x128xf32>
    %37 = arith.select %35, %29, %36 : vector<1x128xi1>, vector<1x128xf32>
    %c0_18 = arith.constant 0 : index
    %c0_19 = arith.constant 0 : index
    %c2 = arith.constant 2 : index
    %38 = vector.load %arg2[%c0_18, %c0_19, %c2] : memref<1x8x4xf32, #tpu.memory_space<vmem>>, vector<1x8x1xf32>
    %39 = vector.shape_cast %38 : vector<1x8x1xf32> to vector<8x1xf32>
    %cst_20 = arith.constant 0.000000e+00 : f32
    %40 = vector.broadcast %cst_20 : f32 to vector<8x1xf32>
    %41 = arith.cmpf ogt, %39, %40 : vector<8x1xf32>
    %cst_21 = arith.constant -3.000000e+38 : f32
    %42 = vector.shape_cast %41 : vector<8x1xi1> to vector<8x1xi1>
    %43 = vector.broadcast %42 : vector<8x1xi1> to vector<8x128xi1>
    %44 = vector.broadcast %cst_21 : f32 to vector<8x128xf32>
    %45 = arith.select %43, %1, %44 : vector<8x128xi1>, vector<8x128xf32>
    %cst_22 = arith.constant dense<0xFF800000> : vector<128xf32>
    %46 = vector.multi_reduction <maximumf>, %45, %cst_22 [0] : vector<8x128xf32> to vector<128xf32>
    %47 = vector.shape_cast %46 : vector<128xf32> to vector<1x128xf32>
    %cst_23 = arith.constant dense<0xFF800000> : vector<1xf32>
    %48 = vector.multi_reduction <maximumf>, %39, %cst_23 [0] : vector<8x1xf32> to vector<1xf32>
    %49 = vector.shape_cast %48 : vector<1xf32> to vector<1x1xf32>
    %cst_24 = arith.constant 0.000000e+00 : f32
    %50 = vector.broadcast %cst_24 : f32 to vector<1x1xf32>
    %51 = arith.cmpf ogt, %49, %50 : vector<1x1xf32>
    %cst_25 = arith.constant 0.000000e+00 : f32
    %52 = vector.shape_cast %51 : vector<1x1xi1> to vector<1x1xi1>
    %53 = vector.broadcast %52 : vector<1x1xi1> to vector<1x128xi1>
    %54 = vector.broadcast %cst_25 : f32 to vector<1x128xf32>
    %55 = arith.select %53, %47, %54 : vector<1x128xi1>, vector<1x128xf32>
    %c0_26 = arith.constant 0 : index
    %c0_27 = arith.constant 0 : index
    %c3 = arith.constant 3 : index
    %56 = vector.load %arg2[%c0_26, %c0_27, %c3] : memref<1x8x4xf32, #tpu.memory_space<vmem>>, vector<1x8x1xf32>
    %57 = vector.shape_cast %56 : vector<1x8x1xf32> to vector<8x1xf32>
    %cst_28 = arith.constant 0.000000e+00 : f32
    %58 = vector.broadcast %cst_28 : f32 to vector<8x1xf32>
    %59 = arith.cmpf ogt, %57, %58 : vector<8x1xf32>
    %cst_29 = arith.constant -3.000000e+38 : f32
    %60 = vector.shape_cast %59 : vector<8x1xi1> to vector<8x1xi1>
    %61 = vector.broadcast %60 : vector<8x1xi1> to vector<8x128xi1>
    %62 = vector.broadcast %cst_29 : f32 to vector<8x128xf32>
    %63 = arith.select %61, %1, %62 : vector<8x128xi1>, vector<8x128xf32>
    %cst_30 = arith.constant dense<0xFF800000> : vector<128xf32>
    %64 = vector.multi_reduction <maximumf>, %63, %cst_30 [0] : vector<8x128xf32> to vector<128xf32>
    %65 = vector.shape_cast %64 : vector<128xf32> to vector<1x128xf32>
    %cst_31 = arith.constant dense<0xFF800000> : vector<1xf32>
    %66 = vector.multi_reduction <maximumf>, %57, %cst_31 [0] : vector<8x1xf32> to vector<1xf32>
    %67 = vector.shape_cast %66 : vector<1xf32> to vector<1x1xf32>
    %cst_32 = arith.constant 0.000000e+00 : f32
    %68 = vector.broadcast %cst_32 : f32 to vector<1x1xf32>
    %69 = arith.cmpf ogt, %67, %68 : vector<1x1xf32>
    %cst_33 = arith.constant 0.000000e+00 : f32
    %70 = vector.shape_cast %69 : vector<1x1xi1> to vector<1x1xi1>
    %71 = vector.broadcast %70 : vector<1x1xi1> to vector<1x128xi1>
    %72 = vector.broadcast %cst_33 : f32 to vector<1x128xf32>
    %73 = arith.select %71, %65, %72 : vector<1x128xi1>, vector<1x128xf32>
    %74 = tpu.concatenate %19, %37, %55, %73 in 0 : vector<1x128xf32>, vector<1x128xf32>, vector<1x128xf32>, vector<1x128xf32> -> vector<4x128xf32>
    %c0_34 = arith.constant 0 : index
    %c0_35 = arith.constant 0 : index
    %c0_36 = arith.constant 0 : index
    %75 = vector.load %arg4[%c0_34, %c0_35, %c0_36] : memref<1x4x128xf32, #tpu.memory_space<vmem>>, vector<1x4x128xf32>
    %76 = vector.shape_cast %75 : vector<1x4x128xf32> to vector<4x128xf32>
    %77 = vector.shape_cast %74 : vector<4x128xf32> to vector<1x4x128xf32>
    tpu.vector_store %arg4[%c0_34, %c0_35, %c0_36], %77 {strides = array<i32>} : memref<1x4x128xf32, #tpu.memory_space<vmem>>, vector<1x4x128xf32>,
    return
  }
  func.func @transform_0(%arg0: i32, %arg1: memref<16xi32, #tpu.memory_space<smem>>) -> (i32, i32, i32) {
    %c0_i32 = arith.constant 0 : i32
    %c0_i32_0 = arith.constant 0 : i32
    %c0_i32_1 = arith.constant 0 : i32
    return %arg0, %c0_i32, %c0_i32_0 : i32, i32, i32
  }
  func.func @transform_1(%arg0: i32, %arg1: memref<16xi32, #tpu.memory_space<smem>>) -> (i32, i32, i32) {
    %0 = arith.index_cast %arg0 : i32 to index
    %1 = memref.load %arg1[%0] : memref<16xi32, #tpu.memory_space<smem>>
    %c0_i32 = arith.constant 0 : i32
    %c0_i32_0 = arith.constant 0 : i32
    %c0_i32_1 = arith.constant 0 : i32
    return %1, %c0_i32, %c0_i32_0 : i32, i32, i32
  }
  func.func @transform_2(%arg0: i32, %arg1: memref<16xi32, #tpu.memory_space<smem>>) -> (i32, i32, i32) {
    %c0_i32 = arith.constant 0 : i32
    %c0_i32_0 = arith.constant 0 : i32
    %c0_i32_1 = arith.constant 0 : i32
    return %arg0, %c0_i32, %c0_i32_0 : i32, i32, i32
  }
}

module attributes {stable_mosaic.version = 11 : i64} {
  func.func @_head_kernel(%arg0: i32, %arg1: memref<16x512xbf16, #tpu.memory_space<vmem>>, %arg2: memref<512x64xbf16, #tpu.memory_space<vmem>>, %arg3: memref<1x64xf32, #tpu.memory_space<vmem>>, %arg4: memref<64x128xbf16, #tpu.memory_space<vmem>>, %arg5: memref<1x128xf32, #tpu.memory_space<vmem>>, %arg6: memref<1x128xf32, #tpu.memory_space<vmem>>, %arg7: memref<1x1xf32, #tpu.memory_space<vmem>>, %arg8: memref<16x128xf32, #tpu.memory_space<vmem>>) attributes {dimension_semantics = [#tpu.dimension_semantics<parallel>], iteration_bounds = array<i64: 1>, scalar_prefetch = 0 : i64, scratch_operands = 0 : i64, tpu.core_type = #tpu.core_type<tc>, window_params = [{transform_indices = @transform_0, window_bounds = array<i64: 16, 512>}, {pipeline_mode = #tpu.pipeline_mode<synchronous>, transform_indices = @transform_1, window_bounds = array<i64: 512, 64>}, {pipeline_mode = #tpu.pipeline_mode<synchronous>, transform_indices = @transform_2, window_bounds = array<i64: 1, 64>}, {pipeline_mode = #tpu.pipeline_mode<synchronous>, transform_indices = @transform_3, window_bounds = array<i64: 64, 128>}, {pipeline_mode = #tpu.pipeline_mode<synchronous>, transform_indices = @transform_4, window_bounds = array<i64: 1, 128>}, {pipeline_mode = #tpu.pipeline_mode<synchronous>, transform_indices = @transform_5, window_bounds = array<i64: 1, 128>}, {pipeline_mode = #tpu.pipeline_mode<synchronous>, transform_indices = @transform_6, window_bounds = array<i64: 1, 1>}, {transform_indices = @transform_7, window_bounds = array<i64: 16, 128>}]} {
    %c0 = arith.constant 0 : index
    %c0_0 = arith.constant 0 : index
    %0 = vector.load %arg1[%c0, %c0_0] : memref<16x512xbf16, #tpu.memory_space<vmem>>, vector<16x512xbf16>
    %c0_1 = arith.constant 0 : index
    %c0_2 = arith.constant 0 : index
    %1 = vector.load %arg2[%c0_1, %c0_2] : memref<512x64xbf16, #tpu.memory_space<vmem>>, vector<512x64xbf16>
    %cst = arith.constant dense<0.000000e+00> : vector<16x64xf32>
    %2 = tpu.matmul %0, %1, %cst {dimension_numbers = #tpu.dot_dimension_numbers<[1], [0], [0], [1], [0, 0, 1, 1], [], []>} : vector<16x512xbf16>, vector<512x64xbf16>, vector<16x64xf32> -> vector<16x64xf32>
    %c0_3 = arith.constant 0 : index
    %c0_4 = arith.constant 0 : index
    %3 = vector.load %arg3[%c0_3, %c0_4] : memref<1x64xf32, #tpu.memory_space<vmem>>, vector<1x64xf32>
    %4 = vector.broadcast %3 : vector<1x64xf32> to vector<16x64xf32>
    %5 = arith.addf %2, %4 : vector<16x64xf32>
    %cst_5 = arith.constant 0.000000e+00 : f32
    %6 = vector.broadcast %cst_5 : f32 to vector<16x64xf32>
    %7 = arith.maximumf %5, %6 : vector<16x64xf32>
    %8 = arith.truncf %7 : vector<16x64xf32> to vector<16x64xbf16>
    %c0_6 = arith.constant 0 : index
    %c0_7 = arith.constant 0 : index
    %9 = vector.load %arg4[%c0_6, %c0_7] : memref<64x128xbf16, #tpu.memory_space<vmem>>, vector<64x128xbf16>
    %cst_8 = arith.constant dense<0.000000e+00> : vector<16x128xf32>
    %10 = tpu.matmul %8, %9, %cst_8 {dimension_numbers = #tpu.dot_dimension_numbers<[1], [0], [0], [1], [0, 0, 1, 1], [], []>} : vector<16x64xbf16>, vector<64x128xbf16>, vector<16x128xf32> -> vector<16x128xf32>
    %c0_9 = arith.constant 0 : index
    %c0_10 = arith.constant 0 : index
    %11 = vector.load %arg5[%c0_9, %c0_10] : memref<1x128xf32, #tpu.memory_space<vmem>>, vector<1x128xf32>
    %12 = vector.broadcast %11 : vector<1x128xf32> to vector<16x128xf32>
    %13 = arith.addf %10, %12 : vector<16x128xf32>
    %14 = tpu.iota {dimensions = array<i32: 1>} : vector<16x128xi32>
    %c5_i32 = arith.constant 5 : i32
    %15 = vector.broadcast %c5_i32 : i32 to vector<16x128xi32>
    %16 = arith.cmpi slt, %14, %15 : vector<16x128xi32>
    %cst_11 = arith.constant -1.000000e+30 : f32
    %17 = vector.broadcast %cst_11 : f32 to vector<16x128xf32>
    %18 = arith.select %16, %13, %17 : vector<16x128xi1>, vector<16x128xf32>
    %cst_12 = arith.constant dense<0xFF800000> : vector<16xf32>
    %19 = vector.multi_reduction <maximumf>, %18, %cst_12 [1] : vector<16x128xf32> to vector<16xf32>
    %20 = vector.shape_cast %19 : vector<16xf32> to vector<16x1xf32>
    %21 = vector.broadcast %20 : vector<16x1xf32> to vector<16x128xf32>
    %22 = arith.subf %18, %21 : vector<16x128xf32>
    %23 = math.exp %22 : vector<16x128xf32>
    %cst_13 = arith.constant dense<0.000000e+00> : vector<16xf32>
    %24 = vector.multi_reduction <add>, %23, %cst_13 [1] : vector<16x128xf32> to vector<16xf32>
    %25 = vector.shape_cast %24 : vector<16xf32> to vector<16x1xf32>
    %26 = vector.broadcast %25 : vector<16x1xf32> to vector<16x128xf32>
    %27 = arith.divf %23, %26 : vector<16x128xf32>
    %cst_14 = arith.constant 0.000000e+00 : f32
    %28 = vector.broadcast %cst_14 : f32 to vector<16x128xf32>
    %29 = arith.maximumf %13, %28 : vector<16x128xf32>
    %c0_15 = arith.constant 0 : index
    %c0_16 = arith.constant 0 : index
    %30 = vector.load %arg6[%c0_15, %c0_16] : memref<1x128xf32, #tpu.memory_space<vmem>>, vector<1x128xf32>
    %31 = vector.broadcast %30 : vector<1x128xf32> to vector<16x128xf32>
    %32 = arith.mulf %29, %31 : vector<16x128xf32>
    %cst_17 = arith.constant dense<0.000000e+00> : vector<16xf32>
    %33 = vector.multi_reduction <add>, %32, %cst_17 [1] : vector<16x128xf32> to vector<16xf32>
    %34 = vector.shape_cast %33 : vector<16xf32> to vector<16x1xf32>
    %c0_18 = arith.constant 0 : index
    %c0_19 = arith.constant 0 : index
    %35 = vector.load %arg7[%c0_18, %c0_19] : memref<1x1xf32, #tpu.memory_space<vmem>>, vector<1x1xf32>
    %36 = vector.broadcast %35 : vector<1x1xf32> to vector<16x1xf32>
    %37 = arith.addf %34, %36 : vector<16x1xf32>
    %cst_20 = arith.constant 0.000000e+00 : f32
    %38 = vector.broadcast %cst_20 : f32 to vector<16x1xf32>
    %39 = arith.subf %38, %37 : vector<16x1xf32>
    %40 = math.exp %39 : vector<16x1xf32>
    %cst_21 = arith.constant 1.000000e+00 : f32
    %41 = vector.broadcast %cst_21 : f32 to vector<16x1xf32>
    %42 = arith.addf %41, %40 : vector<16x1xf32>
    %cst_22 = arith.constant 1.000000e+00 : f32
    %43 = vector.broadcast %cst_22 : f32 to vector<16x1xf32>
    %44 = arith.divf %43, %42 : vector<16x1xf32>
    %c5_i32_23 = arith.constant 5 : i32
    %45 = vector.broadcast %c5_i32_23 : i32 to vector<16x128xi32>
    %46 = arith.cmpi slt, %14, %45 : vector<16x128xi32>
    %47 = arith.select %46, %27, %13 : vector<16x128xi1>, vector<16x128xf32>
    %c15_i32 = arith.constant 15 : i32
    %48 = vector.broadcast %c15_i32 : i32 to vector<16x128xi32>
    %49 = arith.cmpi eq, %14, %48 : vector<16x128xi32>
    %50 = vector.shape_cast %44 : vector<16x1xf32> to vector<16x1xf32>
    %51 = vector.broadcast %50 : vector<16x1xf32> to vector<16x128xf32>
    %52 = arith.select %49, %51, %47 : vector<16x128xi1>, vector<16x128xf32>
    %c15_i32_24 = arith.constant 15 : i32
    %53 = vector.broadcast %c15_i32_24 : i32 to vector<16x128xi32>
    %54 = arith.cmpi sgt, %14, %53 : vector<16x128xi32>
    %cst_25 = arith.constant 0.000000e+00 : f32
    %55 = vector.broadcast %cst_25 : f32 to vector<16x128xf32>
    %56 = arith.select %54, %55, %52 : vector<16x128xi1>, vector<16x128xf32>
    %c0_26 = arith.constant 0 : index
    %c0_27 = arith.constant 0 : index
    %57 = vector.load %arg8[%c0_26, %c0_27] : memref<16x128xf32, #tpu.memory_space<vmem>>, vector<16x128xf32>
    tpu.vector_store %arg8[%c0_26, %c0_27], %56 {strides = array<i32>} : memref<16x128xf32, #tpu.memory_space<vmem>>, vector<16x128xf32>,
    return
  }
  func.func @transform_0(%arg0: i32) -> (i32, i32) {
    %c0_i32 = arith.constant 0 : i32
    %c0_i32_0 = arith.constant 0 : i32
    return %arg0, %c0_i32 : i32, i32
  }
  func.func @transform_1(%arg0: i32) -> (i32, i32) {
    %c0_i32 = arith.constant 0 : i32
    %c0_i32_0 = arith.constant 0 : i32
    %c0_i32_1 = arith.constant 0 : i32
    return %c0_i32, %c0_i32_0 : i32, i32
  }
  func.func @transform_2(%arg0: i32) -> (i32, i32) {
    %c0_i32 = arith.constant 0 : i32
    %c0_i32_0 = arith.constant 0 : i32
    %c0_i32_1 = arith.constant 0 : i32
    return %c0_i32, %c0_i32_0 : i32, i32
  }
  func.func @transform_3(%arg0: i32) -> (i32, i32) {
    %c0_i32 = arith.constant 0 : i32
    %c0_i32_0 = arith.constant 0 : i32
    %c0_i32_1 = arith.constant 0 : i32
    return %c0_i32, %c0_i32_0 : i32, i32
  }
  func.func @transform_4(%arg0: i32) -> (i32, i32) {
    %c0_i32 = arith.constant 0 : i32
    %c0_i32_0 = arith.constant 0 : i32
    %c0_i32_1 = arith.constant 0 : i32
    return %c0_i32, %c0_i32_0 : i32, i32
  }
  func.func @transform_5(%arg0: i32) -> (i32, i32) {
    %c0_i32 = arith.constant 0 : i32
    %c0_i32_0 = arith.constant 0 : i32
    %c0_i32_1 = arith.constant 0 : i32
    return %c0_i32, %c0_i32_0 : i32, i32
  }
  func.func @transform_6(%arg0: i32) -> (i32, i32) {
    %c0_i32 = arith.constant 0 : i32
    %c0_i32_0 = arith.constant 0 : i32
    %c0_i32_1 = arith.constant 0 : i32
    return %c0_i32, %c0_i32_0 : i32, i32
  }
  func.func @transform_7(%arg0: i32) -> (i32, i32) {
    %c0_i32 = arith.constant 0 : i32
    %c0_i32_0 = arith.constant 0 : i32
    return %arg0, %c0_i32 : i32, i32
  }
}

module attributes {stable_mosaic.version = 11 : i64} {
  func.func @_image_da_kernel(%arg0: i32, %arg1: memref<512x32xbf16, #tpu.memory_space<vmem>>, %arg2: memref<32x16xbf16, #tpu.memory_space<vmem>>, %arg3: memref<1x16xf32, #tpu.memory_space<vmem>>, %arg4: memref<16x2xbf16, #tpu.memory_space<vmem>>, %arg5: memref<1x2xf32, #tpu.memory_space<vmem>>, %arg6: memref<1x1x128xf32, #tpu.memory_space<vmem>>) attributes {dimension_semantics = [#tpu.dimension_semantics<parallel>], iteration_bounds = array<i64: 4>, scalar_prefetch = 0 : i64, scratch_operands = 0 : i64, tpu.core_type = #tpu.core_type<tc>, window_params = [{transform_indices = @transform_0, window_bounds = array<i64: 512, 32>}, {pipeline_mode = #tpu.pipeline_mode<synchronous>, transform_indices = @transform_1, window_bounds = array<i64: 32, 16>}, {pipeline_mode = #tpu.pipeline_mode<synchronous>, transform_indices = @transform_2, window_bounds = array<i64: 1, 16>}, {pipeline_mode = #tpu.pipeline_mode<synchronous>, transform_indices = @transform_3, window_bounds = array<i64: 16, 2>}, {pipeline_mode = #tpu.pipeline_mode<synchronous>, transform_indices = @transform_4, window_bounds = array<i64: 1, 2>}, {transform_indices = @transform_5, window_bounds = array<i64: 1, 1, 128>}]} {
    %c0 = arith.constant 0 : index
    %c0_0 = arith.constant 0 : index
    %0 = vector.load %arg1[%c0, %c0_0] : memref<512x32xbf16, #tpu.memory_space<vmem>>, vector<512x32xbf16>
    %c0_1 = arith.constant 0 : index
    %c0_2 = arith.constant 0 : index
    %1 = vector.load %arg2[%c0_1, %c0_2] : memref<32x16xbf16, #tpu.memory_space<vmem>>, vector<32x16xbf16>
    %cst = arith.constant dense<0.000000e+00> : vector<512x16xf32>
    %2 = tpu.matmul %0, %1, %cst {dimension_numbers = #tpu.dot_dimension_numbers<[1], [0], [0], [1], [0, 0, 1, 1], [], []>} : vector<512x32xbf16>, vector<32x16xbf16>, vector<512x16xf32> -> vector<512x16xf32>
    %c0_3 = arith.constant 0 : index
    %c0_4 = arith.constant 0 : index
    %3 = vector.load %arg3[%c0_3, %c0_4] : memref<1x16xf32, #tpu.memory_space<vmem>>, vector<1x16xf32>
    %4 = vector.broadcast %3 : vector<1x16xf32> to vector<512x16xf32>
    %5 = arith.addf %2, %4 : vector<512x16xf32>
    %cst_5 = arith.constant 0.000000e+00 : f32
    %6 = vector.broadcast %cst_5 : f32 to vector<512x16xf32>
    %7 = arith.maximumf %5, %6 : vector<512x16xf32>
    %8 = arith.truncf %7 : vector<512x16xf32> to vector<512x16xbf16>
    %c0_6 = arith.constant 0 : index
    %c0_7 = arith.constant 0 : index
    %9 = vector.load %arg4[%c0_6, %c0_7] : memref<16x2xbf16, #tpu.memory_space<vmem>>, vector<16x2xbf16>
    %cst_8 = arith.constant dense<0.000000e+00> : vector<512x2xf32>
    %10 = tpu.matmul %8, %9, %cst_8 {dimension_numbers = #tpu.dot_dimension_numbers<[1], [0], [0], [1], [0, 0, 1, 1], [], []>} : vector<512x16xbf16>, vector<16x2xbf16>, vector<512x2xf32> -> vector<512x2xf32>
    %c0_9 = arith.constant 0 : index
    %c0_10 = arith.constant 0 : index
    %11 = vector.load %arg5[%c0_9, %c0_10] : memref<1x2xf32, #tpu.memory_space<vmem>>, vector<1x2xf32>
    %12 = vector.broadcast %11 : vector<1x2xf32> to vector<512x2xf32>
    %13 = arith.addf %10, %12 : vector<512x2xf32>
    %cst_11 = arith.constant dense<0xFF800000> : vector<512xf32>
    %14 = vector.multi_reduction <maximumf>, %13, %cst_11 [1] : vector<512x2xf32> to vector<512xf32>
    %15 = vector.shape_cast %14 : vector<512xf32> to vector<512x1xf32>
    %16 = vector.broadcast %15 : vector<512x1xf32> to vector<512x2xf32>
    %17 = arith.subf %13, %16 : vector<512x2xf32>
    %18 = math.exp %17 : vector<512x2xf32>
    %cst_12 = arith.constant dense<0.000000e+00> : vector<512xf32>
    %19 = vector.multi_reduction <add>, %18, %cst_12 [1] : vector<512x2xf32> to vector<512xf32>
    %20 = vector.shape_cast %19 : vector<512xf32> to vector<512x1xf32>
    %21 = math.log %20 : vector<512x1xf32>
    %22 = arith.addf %15, %21 : vector<512x1xf32>
    %23 = vector.broadcast %22 : vector<512x1xf32> to vector<512x2xf32>
    %24 = arith.subf %13, %23 : vector<512x2xf32>
    %25 = math.exp %24 : vector<512x2xf32>
    %26 = tpu.iota {dimensions = array<i32: 0>} : vector<512x1xi32>
    %c512_i32 = arith.constant 512 : i32
    %27 = arith.muli %arg0, %c512_i32 : i32
    %28 = vector.broadcast %27 : i32 to vector<512x1xi32>
    %29 = arith.addi %26, %28 : vector<512x1xi32>
    %c1024_i32 = arith.constant 1024 : i32
    %30 = vector.broadcast %c1024_i32 : i32 to vector<512x1xi32>
    %31 = arith.cmpi slt, %29, %30 : vector<512x1xi32>
    %32 = vector.extract_strided_slice %24 {offsets = [0, 1], sizes = [512, 1], strides = [1, 1]} : vector<512x2xf32> to vector<512x1xf32>
    %cst_13 = arith.constant 0.000000e+00 : f32
    %33 = vector.broadcast %cst_13 : f32 to vector<512x1xf32>
    %34 = arith.subf %33, %32 : vector<512x1xf32>
    %cst_14 = arith.constant 0.000000e+00 : f32
    %35 = vector.broadcast %cst_14 : f32 to vector<512x1xf32>
    %36 = arith.select %31, %34, %35 : vector<512x1xi1>, vector<512x1xf32>
    %37 = vector.extract_strided_slice %24 {offsets = [0, 0], sizes = [512, 1], strides = [1, 1]} : vector<512x2xf32> to vector<512x1xf32>
    %cst_15 = arith.constant 0.000000e+00 : f32
    %38 = vector.broadcast %cst_15 : f32 to vector<512x1xf32>
    %39 = arith.subf %38, %37 : vector<512x1xf32>
    %cst_16 = arith.constant 0.000000e+00 : f32
    %40 = vector.broadcast %cst_16 : f32 to vector<512x1xf32>
    %41 = arith.select %31, %40, %39 : vector<512x1xi1>, vector<512x1xf32>
    %42 = vector.extract_strided_slice %25 {offsets = [0, 1], sizes = [512, 1], strides = [1, 1]} : vector<512x2xf32> to vector<512x1xf32>
    %cst_17 = arith.constant 0.000000e+00 : f32
    %43 = vector.broadcast %cst_17 : f32 to vector<512x1xf32>
    %44 = arith.select %31, %42, %43 : vector<512x1xi1>, vector<512x1xf32>
    %45 = vector.extract_strided_slice %25 {offsets = [0, 0], sizes = [512, 1], strides = [1, 1]} : vector<512x2xf32> to vector<512x1xf32>
    %cst_18 = arith.constant 0.000000e+00 : f32
    %46 = vector.broadcast %cst_18 : f32 to vector<512x1xf32>
    %47 = arith.select %31, %46, %45 : vector<512x1xi1>, vector<512x1xf32>
    %48 = tpu.iota {dimensions = array<i32: 1>} : vector<1x128xi32>
    %cst_19 = arith.constant 0.000000e+00 : f32
    %49 = vector.broadcast %cst_19 : f32 to vector<1x128xf32>
    %c0_i32 = arith.constant 0 : i32
    %50 = vector.broadcast %c0_i32 : i32 to vector<1x128xi32>
    %51 = arith.cmpi eq, %48, %50 : vector<1x128xi32>
    %cst_20 = arith.constant dense<0.000000e+00> : vector<1xf32>
    %52 = vector.multi_reduction <add>, %36, %cst_20 [0] : vector<512x1xf32> to vector<1xf32>
    %53 = vector.shape_cast %52 : vector<1xf32> to vector<1x1xf32>
    %54 = vector.shape_cast %53 : vector<1x1xf32> to vector<1x1xf32>
    %55 = vector.broadcast %54 : vector<1x1xf32> to vector<1x128xf32>
    %56 = arith.select %51, %55, %49 : vector<1x128xi1>, vector<1x128xf32>
    %c1_i32 = arith.constant 1 : i32
    %57 = vector.broadcast %c1_i32 : i32 to vector<1x128xi32>
    %58 = arith.cmpi eq, %48, %57 : vector<1x128xi32>
    %cst_21 = arith.constant dense<0.000000e+00> : vector<1xf32>
    %59 = vector.multi_reduction <add>, %41, %cst_21 [0] : vector<512x1xf32> to vector<1xf32>
    %60 = vector.shape_cast %59 : vector<1xf32> to vector<1x1xf32>
    %61 = vector.shape_cast %60 : vector<1x1xf32> to vector<1x1xf32>
    %62 = vector.broadcast %61 : vector<1x1xf32> to vector<1x128xf32>
    %63 = arith.select %58, %62, %56 : vector<1x128xi1>, vector<1x128xf32>
    %c2_i32 = arith.constant 2 : i32
    %64 = vector.broadcast %c2_i32 : i32 to vector<1x128xi32>
    %65 = arith.cmpi eq, %48, %64 : vector<1x128xi32>
    %cst_22 = arith.constant dense<0.000000e+00> : vector<1xf32>
    %66 = vector.multi_reduction <add>, %44, %cst_22 [0] : vector<512x1xf32> to vector<1xf32>
    %67 = vector.shape_cast %66 : vector<1xf32> to vector<1x1xf32>
    %68 = vector.shape_cast %67 : vector<1x1xf32> to vector<1x1xf32>
    %69 = vector.broadcast %68 : vector<1x1xf32> to vector<1x128xf32>
    %70 = arith.select %65, %69, %63 : vector<1x128xi1>, vector<1x128xf32>
    %c3_i32 = arith.constant 3 : i32
    %71 = vector.broadcast %c3_i32 : i32 to vector<1x128xi32>
    %72 = arith.cmpi eq, %48, %71 : vector<1x128xi32>
    %cst_23 = arith.constant dense<0.000000e+00> : vector<1xf32>
    %73 = vector.multi_reduction <add>, %47, %cst_23 [0] : vector<512x1xf32> to vector<1xf32>
    %74 = vector.shape_cast %73 : vector<1xf32> to vector<1x1xf32>
    %75 = vector.shape_cast %74 : vector<1x1xf32> to vector<1x1xf32>
    %76 = vector.broadcast %75 : vector<1x1xf32> to vector<1x128xf32>
    %77 = arith.select %72, %76, %70 : vector<1x128xi1>, vector<1x128xf32>
    %c0_24 = arith.constant 0 : index
    %c0_25 = arith.constant 0 : index
    %c0_26 = arith.constant 0 : index
    %78 = vector.load %arg6[%c0_24, %c0_25, %c0_26] : memref<1x1x128xf32, #tpu.memory_space<vmem>>, vector<1x1x128xf32>
    %79 = vector.shape_cast %78 : vector<1x1x128xf32> to vector<1x128xf32>
    %80 = vector.shape_cast %77 : vector<1x128xf32> to vector<1x1x128xf32>
    tpu.vector_store %arg6[%c0_24, %c0_25, %c0_26], %80 {strides = array<i32>} : memref<1x1x128xf32, #tpu.memory_space<vmem>>, vector<1x1x128xf32>,
    return
  }
  func.func @transform_0(%arg0: i32) -> (i32, i32) {
    %c0_i32 = arith.constant 0 : i32
    %c0_i32_0 = arith.constant 0 : i32
    return %arg0, %c0_i32 : i32, i32
  }
  func.func @transform_1(%arg0: i32) -> (i32, i32) {
    %c0_i32 = arith.constant 0 : i32
    %c0_i32_0 = arith.constant 0 : i32
    %c0_i32_1 = arith.constant 0 : i32
    return %c0_i32, %c0_i32_0 : i32, i32
  }
  func.func @transform_2(%arg0: i32) -> (i32, i32) {
    %c0_i32 = arith.constant 0 : i32
    %c0_i32_0 = arith.constant 0 : i32
    %c0_i32_1 = arith.constant 0 : i32
    return %c0_i32, %c0_i32_0 : i32, i32
  }
  func.func @transform_3(%arg0: i32) -> (i32, i32) {
    %c0_i32 = arith.constant 0 : i32
    %c0_i32_0 = arith.constant 0 : i32
    %c0_i32_1 = arith.constant 0 : i32
    return %c0_i32, %c0_i32_0 : i32, i32
  }
  func.func @transform_4(%arg0: i32) -> (i32, i32) {
    %c0_i32 = arith.constant 0 : i32
    %c0_i32_0 = arith.constant 0 : i32
    %c0_i32_1 = arith.constant 0 : i32
    return %c0_i32, %c0_i32_0 : i32, i32
  }
  func.func @transform_5(%arg0: i32) -> (i32, i32, i32) {
    %c0_i32 = arith.constant 0 : i32
    %c0_i32_0 = arith.constant 0 : i32
    %c0_i32_1 = arith.constant 0 : i32
    return %arg0, %c0_i32, %c0_i32_0 : i32, i32, i32
  }
}

</mosaic_0001>

<bundles_post_ra>
// kernel: _forward_impl.4
= control target key start
LH: loop header
LB: loop body
LE: loop exit
PB: predicated region body
PF: predicated region fallthrough
CT: control target
= control target key end

     0   :  { %s1810_s12 = smov 0   ;;  %s1812_s13 = smov 0   ;;  %s2328_s0 = inlined_call_operand.vmem [shape: bf16[2048,81], index: 0, kind: input, shape index: {}]   ;;  %s2329_s1 = inlined_call_operand.vmem [shape: bf16[81,32], index: 1, kind: input, shape index: {}]   ;;  %s2330_s2 = inlined_call_operand.vmem [shape: f32[1,32], index: 2, kind: input, shape index: {}]   ;;  %s2331_s3 = inlined_call_operand.vmem [shape: f32[2048,32], index: 3, kind: output, shape index: {}]  }
   0x1   :  { %s1814_s14 = smov 0  }
   0x2 LB: > { %s25_s15 = sadd.s32 1, %s1782_s13  ;;  %p1496_p0 = scmp.ge.s32.totalorder %s1786_s14, 1  ;;  %s1786_s14 = sphi %s1814_s14, %s13_s14   ;;  %s1782_s13 = sphi %s1812_s13, %s2333_s13   ;;  %s1778_s12 = sphi %s1810_s12, %s2332_s12  }
   0x3   : > { %p27_p1 = scmp.ge.s32.totalorder %s25_s15, 4  ;;  %p166_p2 = scmp.lt.s32.totalorder %s1786_s14, 5 }
   0x5   : > { %s2335_s15 = smov (%p27_p1, %s25_s15), 0  ;;  %p167_p3 = pnand %p1496_p0, %p166_p2 }
   0x6   : > { %v1726_v0 = vld [vmem:[%s2329_s1] sm:$0xff] (!%p167_p3)   ;;  %v1727_v1 = vld [vmem:[%s2329_s1 + $0x8] sm:$0xff] (!%p167_p3)   ;;  %s1497_s20 = sshll.u32 (!%p167_p3), %s1778_s12, 6  ;;  %v1837_v2 = vld [vmem:[%s2329_s1 + $0x10] sm:$0xff] (!%p167_p3)   ;;  %vm224_vm0 = vcmask (!%p167_p3), 261120   ;;  %v1788_v3 = vmov (!%p167_p3), 0.0  }
   0x7   : > { %170 = sbr.rel (%p167_p3) target bundleno = 320 (0x140), region = 32  ;;  %1612 = vmatprep.subr.bf16.mxu0 (!%p167_p3), %v1726_v0  ;;  %1688 = vmatprep.subr.bf16.mxu1 (!%p167_p3), %v1726_v0  ;;  %p199_p4 = scmp.lt.s32.totalorder (!%p167_p3), %s1497_s20, 255  ;;  %227 = vst.msk [vmem:[#allocation2 + $0x10] sm:$0xff] (!%p167_p3), %vm224_vm0, %v1788_v3  ;;  %225 = vst.msk [vmem:[#allocation2] sm:$0xff] (!%p167_p3), %vm224_vm0, %v1788_v3  ;;  %v1729_v4 = vld [vmem:[%s2329_s1 + $0x18] sm:$0xff] (!%p167_p3)   ;;  %vm718_vm1 = vcmask (!%p167_p3), 1040384  }
   0x8   : > { %1613 = vmatpush3.bf16.msra.mxu0 (!%p167_p3), %v1726_v0  ;;  %1694 = vmatpush3.bf16.msra.mxu1 (!%p167_p3), %v1726_v0  ;;  %226 = vst.msk [vmem:[#allocation2 + $0x8] sm:$0xff] (!%p167_p3), %vm224_vm0, %v1788_v3  ;;  %228 = vst.msk [vmem:[#allocation2 + $0x18] sm:$0xff] (!%p167_p3), %vm224_vm0, %v1788_v3  ;;  %v1731_v5 = vld [vmem:[%s2329_s1 + $0x28] ss:$0 sps:$4 sm:$0x11] (!%p167_p3)   ;;  %vm621_vm2 = vcmask (!%p167_p3), 662528  }
   0x9   : > { %1614 = vmatprep.subr.bf16.mxu0 (!%p167_p3), %v1727_v1  ;;  %1689 = vmatprep.subr.bf16.mxu1 (!%p167_p3), %v1727_v1  ;;  %229 = vst.msk [vmem:[#allocation2 + $0x20] sm:$0xff] (!%p167_p3), %vm224_vm0, %v1788_v3  ;;  %230 = vst.msk [vmem:[#allocation2 + $0x28] sm:$0xff] (!%p167_p3), %vm224_vm0, %v1788_v3  ;;  %v1730_v8 = vld [vmem:[%s2329_s1 + $0x20] sm:$0xff] (!%p167_p3)   ;;  %v1789_v9 = vmov (!%p167_p3), 0  }
   0xa   : > { %231 = vst.msk [vmem:[#allocation2 + $0x30] sm:$0xff] (!%p167_p3), %vm224_vm0, %v1788_v3  ;;  %232 = vst.msk [vmem:[#allocation2 + $0x38] sm:$0xff] (!%p167_p3), %vm224_vm0, %v1788_v3  ;;  %v720_v10 = vsel (!%p167_p3), %vm718_vm1, 65535, %v1789_v9 }
   0xb   : > { %233 = vst.msk [vmem:[#allocation2 + $0x40] sm:$0xff] (!%p167_p3), %vm224_vm0, %v1788_v3  ;;  %234 = vst.msk [vmem:[#allocation2 + $0x48] sm:$0xff] (!%p167_p3), %vm224_vm0, %v1788_v3  ;;  %v722_v11 = vand.u32 (!%p167_p3), %v1731_v5, %v720_v10 }
   0xc   : > { %1615 = vmatpush3.bf16.msra.mxu0 (!%p167_p3), %v1727_v1  ;;  %1695 = vmatpush3.bf16.msra.mxu1 (!%p167_p3), %v1727_v1  ;;  %235 = vst.msk [vmem:[#allocation2 + $0x50] sm:$0xff] (!%p167_p3), %vm224_vm0, %v1788_v3  ;;  %236 = vst.msk [vmem:[#allocation2 + $0x58] sm:$0xff] (!%p167_p3), %vm224_vm0, %v1788_v3 }
   0xd   : > { %237 = vst.msk [vmem:[#allocation2 + $0x60] sm:$0xff] (!%p167_p3), %vm224_vm0, %v1788_v3  ;;  %238 = vst.msk [vmem:[#allocation2 + $0x68] sm:$0xff] (!%p167_p3), %vm224_vm0, %v1788_v3  ;;  %1616 = vmatprep.subr.bf16.mxu0 (!%p167_p3), %v1837_v2  ;;  %1690 = vmatprep.subr.bf16.mxu1 (!%p167_p3), %v1837_v2 }
   0xe   : > { %s2337_s20 = smov (!%p199_p4, %s1497_s20), 255  ;;  %239 = vst.msk [vmem:[#allocation2 + $0x70] sm:$0xff] %vm224_vm0, %v1788_v3  ;;  %240 = vst.msk [vmem:[#allocation2 + $0x78] sm:$0xff] %vm224_vm0, %v1788_v3  ;;  %v291_v42 = vld [vmem:[#allocation2 + $0x10] sm:$0xff]  ;;  %v289_v44 = vld [vmem:[#allocation2] sm:$0xff] }
   0xf   : > { %241 = vst.msk [vmem:[#allocation2 + $0x80] sm:$0xff] %vm224_vm0, %v1788_v3  ;;  %242 = vst.msk [vmem:[#allocation2 + $0x88] sm:$0xff] %vm224_vm0, %v1788_v3  ;;  %s1498_s25 = sshll.u32 %s2337_s20, 2  ;;  %v292_v48 = vld [vmem:[#allocation2 + $0x18] sm:$0xff]  ;;  %v290_v54 = vld [vmem:[#allocation2 + $0x8] sm:$0xff]  ;;  %s1500_s8 = sshll.u32 %s2337_s20, 3 }
  0x10   : > { %243 = vst.msk [vmem:[#allocation2 + $0x90] sm:$0xff] %vm224_vm0, %v1788_v3  ;;  %244 = vst.msk [vmem:[#allocation2 + $0x98] sm:$0xff] %vm224_vm0, %v1788_v3  ;;  %s1978_s28 = scalar_lea.vmem %s2328_s0, %s1498_s25  ;;  %1617 = vmatpush3.bf16.msra.mxu0 %v1837_v2  ;;  %1696 = vmatpush3.bf16.msra.mxu1 %v1837_v2  ;;  %s2073_s11 = scalar_lea.vmem %s2331_s3, %s1500_s8 }
  0x11   : > { %245 = vst.msk [vmem:[#allocation2 + $0xa0] sm:$0xff] %vm224_vm0, %v1788_v3  ;;  %246 = vst.msk [vmem:[#allocation2 + $0xa8] sm:$0xff] %vm224_vm0, %v1788_v3  ;;  %v1732_v6 = vld [vmem:[%s1978_s28] sm:$0xff]   ;;  %1618 = vmatprep.subr.bf16.mxu0 %v1729_v4  ;;  %1691 = vmatprep.subr.bf16.mxu1 %v1729_v4  ;;  %v1734_v12 = vld [vmem:[%s1978_s28 + $0x8] sm:$0xff]  }
  0x12   : > { %247 = vst.msk [vmem:[#allocation2 + $0xb0] sm:$0xff] %vm224_vm0, %v1788_v3  ;;  %248 = vst.msk [vmem:[#allocation2 + $0xb8] sm:$0xff] %vm224_vm0, %v1788_v3  ;;  %v1733_v7 = vld [vmem:[%s1978_s28 + $0x80] sm:$0xff]   ;;  %1624 = vmatprep.mubr.msk.bf16.mxu0 %vm621_vm2, %v1732_v6  ;;  %v1735_v13 = vld [vmem:[%s1978_s28 + $0x88] sm:$0xff]  }
  0x13   : > { %249 = vst.msk [vmem:[#allocation2 + $0xc0] sm:$0xff] %vm224_vm0, %v1788_v3  ;;  %250 = vst.msk [vmem:[#allocation2 + $0xc8] sm:$0xff] %vm224_vm0, %v1788_v3  ;;  %1656 = vmatprep.mubr.msk.bf16.mxu1 %vm621_vm2, %v1733_v7  ;;  %v1736_v14 = vld [vmem:[%s1978_s28 + $0x10] sm:$0xff]   ;;  %v1738_v16 = vld [vmem:[%s1978_s28 + $0x18] sm:$0xff]  }
  0x14   : > { %251 = vst.msk [vmem:[#allocation2 + $0xd0] sm:$0xff] %vm224_vm0, %v1788_v3  ;;  %252 = vst.msk [vmem:[#allocation2 + $0xd8] sm:$0xff] %vm224_vm0, %v1788_v3  ;;  %1619 = vmatpush3.bf16.msra.mxu0 %v1729_v4  ;;  %1697 = vmatpush3.bf16.msra.mxu1 %v1729_v4  ;;  %v1737_v15 = vld [vmem:[%s1978_s28 + $0x90] sm:$0xff]   ;;  %v1739_v17 = vld [vmem:[%s1978_s28 + $0x98] sm:$0xff]  }
  0x15   : > { %253 = vst.msk [vmem:[#allocation2 + $0xe0] sm:$0xff] %vm224_vm0, %v1788_v3  ;;  %254 = vst.msk [vmem:[#allocation2 + $0xe8] sm:$0xff] %vm224_vm0, %v1788_v3  ;;  %1620 = vmatprep.subr.bf16.mxu0 %v1730_v8  ;;  %1692 = vmatprep.subr.bf16.mxu1 %v1730_v8  ;;  %v1740_v18 = vld [vmem:[%s1978_s28 + $0x20] sm:$0xff]   ;;  %v1742_v20 = vld [vmem:[%s1978_s28 + $0x28] sm:$0xff]  }
  0x16   : > { %255 = vst.msk [vmem:[#allocation2 + $0xf0] sm:$0xff] %vm224_vm0, %v1788_v3  ;;  %256 = vst.msk [vmem:[#allocation2 + $0xf8] sm:$0xff] %vm224_vm0, %v1788_v3  ;;  %v1741_v19 = vld [vmem:[%s1978_s28 + $0xa0] sm:$0xff]   ;;  %v1743_v21 = vld [vmem:[%s1978_s28 + $0xa8] sm:$0xff]  }
  0x17   : > { %257 = vst.msk [vmem:[#allocation2 + $0x100] sm:$0xff] %vm224_vm0, %v1788_v3  ;;  %258 = vst.msk [vmem:[#allocation2 + $0x108] sm:$0xff] %vm224_vm0, %v1788_v3  ;;  %v1744_v22 = vld [vmem:[%s1978_s28 + $0x30] sm:$0xff]   ;;  %v1746_v24 = vld [vmem:[%s1978_s28 + $0x38] sm:$0xff]  }
  0x18   : > { %259 = vst.msk [vmem:[#allocation2 + $0x110] sm:$0xff] %vm224_vm0, %v1788_v3  ;;  %260 = vst.msk [vmem:[#allocation2 + $0x118] sm:$0xff] %vm224_vm0, %v1788_v3  ;;  %1621 = vmatpush3.bf16.msra.mxu0 %v1730_v8  ;;  %1698 = vmatpush3.bf16.msra.mxu1 %v1730_v8  ;;  %v1745_v23 = vld [vmem:[%s1978_s28 + $0xb0] sm:$0xff]   ;;  %v1747_v25 = vld [vmem:[%s1978_s28 + $0xb8] sm:$0xff]  }
  0x19   : > { %261 = vst.msk [vmem:[#allocation2 + $0x120] sm:$0xff] %vm224_vm0, %v1788_v3  ;;  %262 = vst.msk [vmem:[#allocation2 + $0x128] sm:$0xff] %vm224_vm0, %v1788_v3  ;;  %1622 = vmatprep.subr.bf16.mxu0 %v722_v11  ;;  %1693 = vmatprep.subr.bf16.mxu1 %v722_v11  ;;  %v1748_v26 = vld [vmem:[%s1978_s28 + $0x40] sm:$0xff]   ;;  %v1750_v28 = vld [vmem:[%s1978_s28 + $0x48] sm:$0xff]  }
  0x1a   : > { %263 = vst.msk [vmem:[#allocation2 + $0x130] sm:$0xff] %vm224_vm0, %v1788_v3  ;;  %264 = vst.msk [vmem:[#allocation2 + $0x138] sm:$0xff] %vm224_vm0, %v1788_v3  ;;  %v1749_v27 = vld [vmem:[%s1978_s28 + $0xc0] sm:$0xff]   ;;  %v1751_v29 = vld [vmem:[%s1978_s28 + $0xc8] sm:$0xff]  }
  0x1b   : > { %265 = vst.msk [vmem:[#allocation2 + $0x140] sm:$0xff] %vm224_vm0, %v1788_v3  ;;  %266 = vst.msk [vmem:[#allocation2 + $0x148] sm:$0xff] %vm224_vm0, %v1788_v3  ;;  %v1752_v30 = vld [vmem:[%s1978_s28 + $0x50] sm:$0xff]   ;;  %v1754_v32 = vld [vmem:[%s1978_s28 + $0x58] sm:$0xff]  }
  0x1c   : > { %267 = vst.msk [vmem:[#allocation2 + $0x150] sm:$0xff] %vm224_vm0, %v1788_v3  ;;  %268 = vst.msk [vmem:[#allocation2 + $0x158] sm:$0xff] %vm224_vm0, %v1788_v3  ;;  %1623 = vmatpush3.bf16.msra.mxu0 %v722_v11  ;;  %1699 = vmatpush3.bf16.msra.mxu1 %v722_v11  ;;  %v1753_v31 = vld [vmem:[%s1978_s28 + $0xd0] sm:$0xff]   ;;  %v1755_v33 = vld [vmem:[%s1978_s28 + $0xd8] sm:$0xff]  }
  0x1d   : > { %269 = vst.msk [vmem:[#allocation2 + $0x160] sm:$0xff] %vm224_vm0, %v1788_v3  ;;  %270 = vst.msk [vmem:[#allocation2 + $0x168] sm:$0xff] %vm224_vm0, %v1788_v3  ;;  %v1756_v34 = vld [vmem:[%s1978_s28 + $0x60] sm:$0xff]   ;;  %v1758_v36 = vld [vmem:[%s1978_s28 + $0x68] sm:$0xff]  }
  0x1e   : > { %271 = vst.msk [vmem:[#allocation2 + $0x170] sm:$0xff] %vm224_vm0, %v1788_v3  ;;  %272 = vst.msk [vmem:[#allocation2 + $0x178] sm:$0xff] %vm224_vm0, %v1788_v3  ;;  %v1757_v35 = vld [vmem:[%s1978_s28 + $0xe0] sm:$0xff]   ;;  %v1759_v37 = vld [vmem:[%s1978_s28 + $0xe8] sm:$0xff]  }
  0x1f   : > { %273 = vst.msk [vmem:[#allocation2 + $0x180] sm:$0xff] %vm224_vm0, %v1788_v3  ;;  %274 = vst.msk [vmem:[#allocation2 + $0x188] sm:$0xff] %vm224_vm0, %v1788_v3  ;;  %1625 = vmatmul.mubr.msk.bf16.vlgmr.msra.gmra.mrb[0].mxu0 %vm621_vm2, %v1734_v12  ;;  %1657 = vmatmul.mubr.msk.bf16.vlgmr.msra.gmra.mrb[0].mxu1 %vm621_vm2, %v1735_v13  ;;  %v1760_v38 = vld [vmem:[%s1978_s28 + $0x70] sm:$0xff]   ;;  %v1762_v40 = vld [vmem:[%s1978_s28 + $0x78] sm:$0xff]  }
  0x20   : > { %275 = vst.msk [vmem:[#allocation2 + $0x190] sm:$0xff] %vm224_vm0, %v1788_v3  ;;  %276 = vst.msk [vmem:[#allocation2 + $0x198] sm:$0xff] %vm224_vm0, %v1788_v3  ;;  %1628 = vmatprep.mubr.msk.bf16.mxu0 %vm621_vm2, %v1736_v14  ;;  %1660 = vmatprep.mubr.msk.bf16.mxu1 %vm621_vm2, %v1737_v15  ;;  %v1761_v39 = vld [vmem:[%s1978_s28 + $0xf0] sm:$0xff]   ;;  %v1763_v41 = vld [vmem:[%s1978_s28 + $0xf8] sm:$0xff]  }
  0x21   : > { %277 = vst.msk [vmem:[#allocation2 + $0x1a0] sm:$0xff] %vm224_vm0, %v1788_v3  ;;  %278 = vst.msk [vmem:[#allocation2 + $0x1a8] sm:$0xff] %vm224_vm0, %v1788_v3  ;;  %v323_v43 = vld [vmem:[#allocation2 + $0x110] sm:$0xff]  ;;  %v321_v45 = vld [vmem:[#allocation2 + $0x100] sm:$0xff] }
  0x22   : > { %279 = vst.msk [vmem:[#allocation2 + $0x1b0] sm:$0xff] %vm224_vm0, %v1788_v3  ;;  %280 = vst.msk [vmem:[#allocation2 + $0x1b8] sm:$0xff] %vm224_vm0, %v1788_v3  ;;  %v324_v49 = vld [vmem:[#allocation2 + $0x118] sm:$0xff]  ;;  %v322_v55 = vld [vmem:[#allocation2 + $0x108] sm:$0xff] }
  0x23   : > { %281 = vst.msk [vmem:[#allocation2 + $0x1c0] sm:$0xff] %vm224_vm0, %v1788_v3  ;;  %282 = vst.msk [vmem:[#allocation2 + $0x1c8] sm:$0xff] %vm224_vm0, %v1788_v3  ;;  %v295_v2 = vld [vmem:[#allocation2 + $0x30] sm:$0xff]  ;;  %v293_v4 = vld [vmem:[#allocation2 + $0x20] sm:$0xff] }
  0x24   : > { %283 = vst.msk [vmem:[#allocation2 + $0x1d0] sm:$0xff] %vm224_vm0, %v1788_v3  ;;  %284 = vst.msk [vmem:[#allocation2 + $0x1d8] sm:$0xff] %vm224_vm0, %v1788_v3  ;;  %v325_v5 = vld [vmem:[#allocation2 + $0x120] sm:$0xff]  ;;  %v296_v9 = vld [vmem:[#allocation2 + $0x38] sm:$0xff] }
  0x25   : > { %285 = vst.msk [vmem:[#allocation2 + $0x1e0] sm:$0xff] %vm224_vm0, %v1788_v3  ;;  %286 = vst.msk [vmem:[#allocation2 + $0x1e8] sm:$0xff] %vm224_vm0, %v1788_v3  ;;  %v2063_v6 = vld [vmem:[%s2330_s2] ss:$0 sm:$0xff]  ;;  %v328_v10 = vld [vmem:[#allocation2 + $0x138] sm:$0xff] }
  0x26   : > { %287 = vst.msk [vmem:[#allocation2 + $0x1f0] sm:$0xff] %vm224_vm0, %v1788_v3  ;;  %288 = vst.msk [vmem:[#allocation2 + $0x1f8] sm:$0xff] %vm224_vm0, %v1788_v3  ;;  %v327_v3 = vld [vmem:[#allocation2 + $0x130] sm:$0xff]  ;;  %v294_v15 = vld [vmem:[#allocation2 + $0x28] sm:$0xff] }
  0x27   : > { %1629 = vmatmul.mubr.msk.bf16.gmra.mrb[4].mxu0 %vm621_vm2, %v1738_v16  ;;  %1661 = vmatmul.mubr.msk.bf16.gmra.mrb[4].mxu1 %vm621_vm2, %v1739_v17  ;;  %v326_v16 = vld [vmem:[#allocation2 + $0x128] sm:$0xff] }
  0x28   : > { %1632 = vmatprep.mubr.msk.bf16.mxu0 %vm621_vm2, %v1740_v18  ;;  %1664 = vmatprep.mubr.msk.bf16.mxu1 %vm621_vm2, %v1741_v19 }
  0x2f   : > { %1633 = vmatmul.mubr.msk.bf16.gmra.mrb[8].mxu0 %vm621_vm2, %v1742_v20  ;;  %1665 = vmatmul.mubr.msk.bf16.gmra.mrb[8].mxu1 %vm621_vm2, %v1743_v21 }
  0x30   : > { %1636 = vmatprep.mubr.msk.bf16.mxu0 %vm621_vm2, %v1744_v22  ;;  %1668 = vmatprep.mubr.msk.bf16.mxu1 %vm621_vm2, %v1745_v23 }
  0x37   : > { %1637 = vmatmul.mubr.msk.bf16.gmra.mrb[12].mxu0 %vm621_vm2, %v1746_v24  ;;  %1669 = vmatmul.mubr.msk.bf16.gmra.mrb[12].mxu1 %vm621_vm2, %v1747_v25 }
  0x38   : > { %1640 = vmatprep.mubr.msk.bf16.mxu0 %vm621_vm2, %v1748_v26  ;;  %1672 = vmatprep.mubr.msk.bf16.mxu1 %vm621_vm2, %v1749_v27 }
  0x3f   : > { %1641 = vmatmul.mubr.msk.bf16.gmra.mrb[16].mxu0 %vm621_vm2, %v1750_v28  ;;  %1673 = vmatmul.mubr.msk.bf16.gmra.mrb[16].mxu1 %vm621_vm2, %v1751_v29 }
  0x40   : > { %1644 = vmatprep.mubr.msk.bf16.mxu0 %vm621_vm2, %v1752_v30  ;;  %1676 = vmatprep.mubr.msk.bf16.mxu1 %vm621_vm2, %v1753_v31 }
  0x47   : > { %1645 = vmatmul.mubr.msk.bf16.gmra.mrb[20].mxu0 %vm621_vm2, %v1754_v32  ;;  %1677 = vmatmul.mubr.msk.bf16.gmra.mrb[20].mxu1 %vm621_vm2, %v1755_v33 }
  0x48   : > { %1648 = vmatprep.mubr.msk.bf16.mxu0 %vm621_vm2, %v1756_v34  ;;  %1680 = vmatprep.mubr.msk.bf16.mxu1 %vm621_vm2, %v1757_v35 }
  0x4f   : > { %1649 = vmatmul.mubr.msk.bf16.gmra.mrb[24].mxu0 %vm621_vm2, %v1758_v36  ;;  %1681 = vmatmul.mubr.msk.bf16.gmra.mrb[24].mxu1 %vm621_vm2, %v1759_v37 }
  0x50   : > { %1652 = vmatprep.mubr.msk.bf16.mxu0 %vm621_vm2, %v1760_v38  ;;  %1684 = vmatprep.mubr.msk.bf16.mxu1 %vm621_vm2, %v1761_v39 }
  0x57   : > { %1653 = vmatmul.mubr.msk.bf16.gmra.mrb[28].mxu0 %vm621_vm2, %v1762_v40  ;;  %1685 = vmatmul.mubr.msk.bf16.gmra.mrb[28].mxu1 %vm621_vm2, %v1763_v41 }
  0xf2   : > { %v1626_v46 = vpop.f32.mrb[0].mxu0  ;;  %v1658_v47 = vpop.f32.mrb[0].mxu1 }
  0xf3   : > { %v1015_v50 = vadd.f32 %v1626_v46, %v291_v42  ;;  %v1047_v51 = vadd.f32 %v1658_v47, %v323_v43  ;;  %v758_v52 = vpop.f32.mrb[1].mxu0  ;;  %v886_v53 = vpop.f32.mrb[1].mxu1  ;;  %v299_v47 = vld [vmem:[#allocation2 + $0x50] sm:$0xff] }
  0xf4   : > { %v1013_v56 = vadd.f32 %v758_v52, %v289_v44  ;;  %v1045_v57 = vadd.f32 %v886_v53, %v321_v45  ;;  %v1627_v58 = vpop.f32.mrb[2].mxu0  ;;  %v1659_v59 = vpop.f32.mrb[2].mxu1  ;;  %v329_v52 = vld [vmem:[#allocation2 + $0x140] sm:$0xff] }
  0xf5   : > { %1080 = vst.msk [vmem:[#allocation2 + $0x10] sm:$0xff] %vm224_vm0, %v1015_v50  ;;  %1112 = vst.msk [vmem:[#allocation2 + $0x110] sm:$0xff] %vm224_vm0, %v1047_v51  ;;  %v1016_v60 = vadd.f32 %v1627_v58, %v292_v48  ;;  %v1048_v61 = vadd.f32 %v1659_v59, %v324_v49  ;;  %v761_v62 = vpop.f32.mrb[3].mxu0  ;;  %v889_v63 = vpop.f32.mrb[3].mxu1  ;;  %v331_v48 = vld [vmem:[#allocation2 + $0x150] sm:$0xff]  ;;  %v297_v51 = vld [vmem:[#allocation2 + $0x40] sm:$0xff] }
  0xf6   : > { %1078 = vst.msk [vmem:[#allocation2] sm:$0xff] %vm224_vm0, %v1013_v56  ;;  %1110 = vst.msk [vmem:[#allocation2 + $0x100] sm:$0xff] %vm224_vm0, %v1045_v57  ;;  %v1014_v0 = vadd.f32 %v761_v62, %v290_v54  ;;  %v1046_v1 = vadd.f32 %v889_v63, %v322_v55  ;;  %v300_v57 = vld [vmem:[#allocation2 + $0x58] sm:$0xff]  ;;  %v298_v63 = vld [vmem:[#allocation2 + $0x48] sm:$0xff] }
  0xf7   : > { %1081 = vst.msk [vmem:[#allocation2 + $0x18] sm:$0xff] %vm224_vm0, %v1016_v60  ;;  %1113 = vst.msk [vmem:[#allocation2 + $0x118] sm:$0xff] %vm224_vm0, %v1048_v61  ;;  %v332_v58 = vld [vmem:[#allocation2 + $0x158] sm:$0xff] }
  0xf8   : > { %1079 = vst.msk [vmem:[#allocation2 + $0x8] sm:$0xff] %vm224_vm0, %v1014_v0  ;;  %1111 = vst.msk [vmem:[#allocation2 + $0x108] sm:$0xff] %vm224_vm0, %v1046_v1  ;;  %v330_v0 = vld [vmem:[#allocation2 + $0x148] sm:$0xff] }
  0xfa   : > { %v1630_v7 = vpop.f32.mrb[4].mxu0  ;;  %v1662_v8 = vpop.f32.mrb[4].mxu1 }
  0xfb   : > { %v1019_v11 = vadd.f32 %v1630_v7, %v295_v2  ;;  %v1051_v12 = vadd.f32 %v1662_v8, %v327_v3  ;;  %v774_v13 = vpop.f32.mrb[5].mxu0  ;;  %v902_v14 = vpop.f32.mrb[5].mxu1 }
  0xfc   : > { %v1147_v17 = vld [vmem:[#allocation2 + $0x10] sm:$0xff]  ;;  %v1017_v19 = vadd.f32 %v774_v13, %v293_v4  ;;  %v1049_v20 = vadd.f32 %v902_v14, %v325_v5  ;;  %v1631_v21 = vpop.f32.mrb[6].mxu0  ;;  %v1663_v22 = vpop.f32.mrb[6].mxu1 }
  0xfd   : > { %v1179_v18 = vld [vmem:[#allocation2 + $0x110] sm:$0xff]  ;;  %v1218_v23 = vadd.f32 %v2063_v6, %v1147_v17  ;;  %v1145_v25 = vld [vmem:[#allocation2] sm:$0xff]  ;;  %1084 = vst.msk [vmem:[#allocation2 + $0x30] sm:$0xff] %vm224_vm0, %v1019_v11  ;;  %1116 = vst.msk [vmem:[#allocation2 + $0x130] sm:$0xff] %vm224_vm0, %v1051_v12  ;;  %v1020_v27 = vadd.f32 %v1631_v21, %v296_v9  ;;  %v1052_v28 = vadd.f32 %v1663_v22, %v328_v10  ;;  %v777_v29 = vpop.f32.mrb[7].mxu0  ;;  %v905_v30 = vpop.f32.mrb[7].mxu1 }
  0xfe   : > { %v1250_v24 = vadd.f32 %v2063_v6, %v1179_v18  ;;  %v1177_v26 = vld [vmem:[#allocation2 + $0x100] sm:$0xff]  ;;  %v1216_v31 = vadd.f32 %v2063_v6, %v1145_v25  ;;  %v1148_v33 = vld [vmem:[#allocation2 + $0x18] sm:$0xff]  ;;  %1082 = vst.msk [vmem:[#allocation2 + $0x20] sm:$0xff] %vm224_vm0, %v1017_v19  ;;  %1114 = vst.msk [vmem:[#allocation2 + $0x120] sm:$0xff] %vm224_vm0, %v1049_v20  ;;  %v1018_v35 = vadd.f32 %v777_v29, %v294_v15 }
  0xff   : > { %v1248_v32 = vadd.f32 %v2063_v6, %v1177_v26  ;;  %v1180_v34 = vld [vmem:[#allocation2 + $0x118] sm:$0xff]  ;;  %v1050_v36 = vadd.f32 %v905_v30, %v326_v16  ;;  %v1282_v37 = vmax.f32 %v1218_v23, 0.0  ;;  %v1219_v39 = vadd.f32 %v2063_v6, %v1148_v33  ;;  %v1146_v41 = vld [vmem:[#allocation2 + $0x8] sm:$0xff]  ;;  %1085 = vst.msk [vmem:[#allocation2 + $0x38] sm:$0xff] %vm224_vm0, %v1020_v27  ;;  %1117 = vst.msk [vmem:[#allocation2 + $0x138] sm:$0xff] %vm224_vm0, %v1052_v28 }
 0x100   : > { %v1314_v38 = vmax.f32 %v1250_v24, 0.0  ;;  %v1251_v40 = vadd.f32 %v2063_v6, %v1180_v34  ;;  %v1178_v42 = vld [vmem:[#allocation2 + $0x108] sm:$0xff]  ;;  %v1280_v43 = vmax.f32 %v1216_v31, 0.0  ;;  %v1217_v45 = vadd.f32 %v2063_v6, %v1146_v41  ;;  %1083 = vst.msk [vmem:[#allocation2 + $0x28] sm:$0xff] %vm224_vm0, %v1018_v35  ;;  %v335_v33 = vld [vmem:[#allocation2 + $0x170] sm:$0xff] }
 0x101   : > { %v1312_v44 = vmax.f32 %v1248_v32, 0.0  ;;  %v1249_v46 = vadd.f32 %v2063_v6, %v1178_v42  ;;  %1115 = vst.msk [vmem:[#allocation2 + $0x128] sm:$0xff] %vm224_vm0, %v1050_v36  ;;  %1346 = vst.msk [vmem:[%s2073_s11 + $0x10] sm:$0xff] %vm224_vm0, %v1282_v37  ;;  %v1283_v49 = vmax.f32 %v1219_v39, 0.0  ;;  %v303_v32 = vld [vmem:[#allocation2 + $0x70] sm:$0xff]  ;;  %v301_v36 = vld [vmem:[#allocation2 + $0x60] sm:$0xff] }
 0x102   : > { %1378 = vst.msk [vmem:[%s2073_s11 + $0x110] sm:$0xff] %vm224_vm0, %v1314_v38  ;;  %v1315_v50 = vmax.f32 %v1251_v40, 0.0  ;;  %1344 = vst.msk [vmem:[%s2073_s11] sm:$0xff] %vm224_vm0, %v1280_v43  ;;  %v1281_v53 = vmax.f32 %v1217_v45, 0.0  ;;  %v1634_v55 = vpop.f32.mrb[8].mxu0  ;;  %v1666_v56 = vpop.f32.mrb[8].mxu1 }
 0x103   : > { %1376 = vst.msk [vmem:[%s2073_s11 + $0x100] sm:$0xff] %vm224_vm0, %v1312_v44  ;;  %v1313_v54 = vmax.f32 %v1249_v46, 0.0  ;;  %1347 = vst.msk [vmem:[%s2073_s11 + $0x18] sm:$0xff] %vm224_vm0, %v1283_v49  ;;  %v1023_v59 = vadd.f32 %v1634_v55, %v299_v47  ;;  %v1055_v60 = vadd.f32 %v1666_v56, %v331_v48  ;;  %v790_v61 = vpop.f32.mrb[9].mxu0  ;;  %v918_v62 = vpop.f32.mrb[9].mxu1  ;;  %v333_v37 = vld [vmem:[#allocation2 + $0x160] sm:$0xff] }
 0x104   : > { %1379 = vst.msk [vmem:[%s2073_s11 + $0x118] sm:$0xff] %vm224_vm0, %v1315_v50  ;;  %1345 = vst.msk [vmem:[%s2073_s11 + $0x8] sm:$0xff] %vm224_vm0, %v1281_v53  ;;  %v1151_v1 = vld [vmem:[#allocation2 + $0x30] sm:$0xff]  ;;  %v1021_v3 = vadd.f32 %v790_v61, %v297_v51  ;;  %v1053_v4 = vadd.f32 %v918_v62, %v329_v52  ;;  %v1635_v5 = vpop.f32.mrb[10].mxu0  ;;  %v1667_v7 = vpop.f32.mrb[10].mxu1  ;;  %v304_v42 = vld [vmem:[#allocation2 + $0x78] sm:$0xff] }
 0x105   : > { %1377 = vst.msk [vmem:[%s2073_s11 + $0x108] sm:$0xff] %vm224_vm0, %v1313_v54  ;;  %v1183_v2 = vld [vmem:[#allocation2 + $0x130] sm:$0xff]  ;;  %v1222_v8 = vadd.f32 %v2063_v6, %v1151_v1  ;;  %v1149_v10 = vld [vmem:[#allocation2 + $0x20] sm:$0xff]  ;;  %1088 = vst.msk [vmem:[#allocation2 + $0x50] sm:$0xff] %vm224_vm0, %v1023_v59  ;;  %v1024_v12 = vadd.f32 %v1635_v5, %v300_v57  ;;  %v1056_v13 = vadd.f32 %v1667_v7, %v332_v58  ;;  %v793_v14 = vpop.f32.mrb[11].mxu0  ;;  %v921_v15 = vpop.f32.mrb[11].mxu1 }
 0x106   : > { %v1254_v9 = vadd.f32 %v2063_v6, %v1183_v2  ;;  %v1181_v11 = vld [vmem:[#allocation2 + $0x120] sm:$0xff]  ;;  %1120 = vst.msk [vmem:[#allocation2 + $0x150] sm:$0xff] %vm224_vm0, %v1055_v60  ;;  %v1220_v16 = vadd.f32 %v2063_v6, %v1149_v10  ;;  %v1152_v18 = vld [vmem:[#allocation2 + $0x38] sm:$0xff]  ;;  %1086 = vst.msk [vmem:[#allocation2 + $0x40] sm:$0xff] %vm224_vm0, %v1021_v3  ;;  %v1022_v20 = vadd.f32 %v793_v14, %v298_v63 }
 0x107   : > { %v1252_v17 = vadd.f32 %v2063_v6, %v1181_v11  ;;  %v1184_v19 = vld [vmem:[#allocation2 + $0x138] sm:$0xff]  ;;  %1118 = vst.msk [vmem:[#allocation2 + $0x140] sm:$0xff] %vm224_vm0, %v1053_v4  ;;  %v1054_v21 = vadd.f32 %v921_v15, %v330_v0  ;;  %v1286_v22 = vmax.f32 %v1222_v8, 0.0  ;;  %v1223_v24 = vadd.f32 %v2063_v6, %v1152_v18  ;;  %v1150_v26 = vld [vmem:[#allocation2 + $0x28] sm:$0xff]  ;;  %1089 = vst.msk [vmem:[#allocation2 + $0x58] sm:$0xff] %vm224_vm0, %v1024_v12 }
 0x108   : > { %v1318_v23 = vmax.f32 %v1254_v9, 0.0  ;;  %v1255_v25 = vadd.f32 %v2063_v6, %v1184_v19  ;;  %v1182_v27 = vld [vmem:[#allocation2 + $0x128] sm:$0xff]  ;;  %1121 = vst.msk [vmem:[#allocation2 + $0x158] sm:$0xff] %vm224_vm0, %v1056_v13  ;;  %v1284_v28 = vmax.f32 %v1220_v16, 0.0  ;;  %v1221_v30 = vadd.f32 %v2063_v6, %v1150_v26  ;;  %1087 = vst.msk [vmem:[#allocation2 + $0x48] sm:$0xff] %vm224_vm0, %v1022_v20  ;;  %v336_v43 = vld [vmem:[#allocation2 + $0x178] sm:$0xff] }
 0x109   : > { %v1316_v29 = vmax.f32 %v1252_v17, 0.0  ;;  %v1253_v31 = vadd.f32 %v2063_v6, %v1182_v27  ;;  %1119 = vst.msk [vmem:[#allocation2 + $0x148] sm:$0xff] %vm224_vm0, %v1054_v21  ;;  %1350 = vst.msk [vmem:[%s2073_s11 + $0x30] sm:$0xff] %vm224_vm0, %v1286_v22  ;;  %v1287_v34 = vmax.f32 %v1223_v24, 0.0  ;;  %v302_v48 = vld [vmem:[#allocation2 + $0x68] sm:$0xff]  ;;  %v307_v17 = vld [vmem:[#allocation2 + $0x90] sm:$0xff] }
 0x10a   : > { %1382 = vst.msk [vmem:[%s2073_s11 + $0x130] sm:$0xff] %vm224_vm0, %v1318_v23  ;;  %v1319_v35 = vmax.f32 %v1255_v25, 0.0  ;;  %1348 = vst.msk [vmem:[%s2073_s11 + $0x20] sm:$0xff] %vm224_vm0, %v1284_v28  ;;  %v1285_v38 = vmax.f32 %v1221_v30, 0.0  ;;  %v1638_v40 = vpop.f32.mrb[12].mxu0  ;;  %v1670_v41 = vpop.f32.mrb[12].mxu1 }
 0x10b   : > { %1380 = vst.msk [vmem:[%s2073_s11 + $0x120] sm:$0xff] %vm224_vm0, %v1316_v29  ;;  %v1317_v39 = vmax.f32 %v1253_v31, 0.0  ;;  %1351 = vst.msk [vmem:[%s2073_s11 + $0x38] sm:$0xff] %vm224_vm0, %v1287_v34  ;;  %v1027_v44 = vadd.f32 %v1638_v40, %v303_v32  ;;  %v1059_v45 = vadd.f32 %v1670_v41, %v335_v33  ;;  %v806_v46 = vpop.f32.mrb[13].mxu0  ;;  %v934_v47 = vpop.f32.mrb[13].mxu1  ;;  %v334_v49 = vld [vmem:[#allocation2 + $0x168] sm:$0xff] }
 0x10c   : > { %1383 = vst.msk [vmem:[%s2073_s11 + $0x138] sm:$0xff] %vm224_vm0, %v1319_v35  ;;  %1349 = vst.msk [vmem:[%s2073_s11 + $0x28] sm:$0xff] %vm224_vm0, %v1285_v38  ;;  %v1155_v50 = vld [vmem:[#allocation2 + $0x50] sm:$0xff]  ;;  %v1025_v52 = vadd.f32 %v806_v46, %v301_v36  ;;  %v1057_v53 = vadd.f32 %v934_v47, %v333_v37  ;;  %v1639_v54 = vpop.f32.mrb[14].mxu0  ;;  %v1671_v55 = vpop.f32.mrb[14].mxu1  ;;  %v305_v21 = vld [vmem:[#allocation2 + $0x80] sm:$0xff] }
 0x10d   : > { %1381 = vst.msk [vmem:[%s2073_s11 + $0x128] sm:$0xff] %vm224_vm0, %v1317_v39  ;;  %v1187_v51 = vld [vmem:[#allocation2 + $0x150] sm:$0xff]  ;;  %v1226_v56 = vadd.f32 %v2063_v6, %v1155_v50  ;;  %v1153_v58 = vld [vmem:[#allocation2 + $0x40] sm:$0xff]  ;;  %1092 = vst.msk [vmem:[#allocation2 + $0x70] sm:$0xff] %vm224_vm0, %v1027_v44  ;;  %v1028_v60 = vadd.f32 %v1639_v54, %v304_v42  ;;  %v1060_v61 = vadd.f32 %v1671_v55, %v336_v43  ;;  %v809_v62 = vpop.f32.mrb[15].mxu0  ;;  %v937_v63 = vpop.f32.mrb[15].mxu1 }
 0x10e   : > { %v1258_v57 = vadd.f32 %v2063_v6, %v1187_v51  ;;  %v1185_v59 = vld [vmem:[#allocation2 + $0x140] sm:$0xff]  ;;  %1124 = vst.msk [vmem:[#allocation2 + $0x170] sm:$0xff] %vm224_vm0, %v1059_v45  ;;  %v1224_v0 = vadd.f32 %v2063_v6, %v1153_v58  ;;  %v1156_v2 = vld [vmem:[#allocation2 + $0x58] sm:$0xff]  ;;  %1090 = vst.msk [vmem:[#allocation2 + $0x60] sm:$0xff] %vm224_vm0, %v1025_v52  ;;  %v1026_v4 = vadd.f32 %v809_v62, %v302_v48 }
 0x10f   : > { %v1256_v1 = vadd.f32 %v2063_v6, %v1185_v59  ;;  %v1188_v3 = vld [vmem:[#allocation2 + $0x158] sm:$0xff]  ;;  %1122 = vst.msk [vmem:[#allocation2 + $0x160] sm:$0xff] %vm224_vm0, %v1057_v53  ;;  %v1058_v5 = vadd.f32 %v937_v63, %v334_v49  ;;  %v1290_v7 = vmax.f32 %v1226_v56, 0.0  ;;  %v1227_v9 = vadd.f32 %v2063_v6, %v1156_v2  ;;  %v1154_v11 = vld [vmem:[#allocation2 + $0x48] sm:$0xff]  ;;  %1093 = vst.msk [vmem:[#allocation2 + $0x78] sm:$0xff] %vm224_vm0, %v1028_v60 }
 0x110   : > { %v1322_v8 = vmax.f32 %v1258_v57, 0.0  ;;  %v1259_v10 = vadd.f32 %v2063_v6, %v1188_v3  ;;  %v1186_v12 = vld [vmem:[#allocation2 + $0x148] sm:$0xff]  ;;  %1125 = vst.msk [vmem:[#allocation2 + $0x178] sm:$0xff] %vm224_vm0, %v1060_v61  ;;  %v1288_v13 = vmax.f32 %v1224_v0, 0.0  ;;  %v1225_v15 = vadd.f32 %v2063_v6, %v1154_v11  ;;  %1091 = vst.msk [vmem:[#allocation2 + $0x68] sm:$0xff] %vm224_vm0, %v1026_v4  ;;  %v339_v18 = vld [vmem:[#allocation2 + $0x190] sm:$0xff] }
 0x111   : > { %v1320_v14 = vmax.f32 %v1256_v1, 0.0  ;;  %v1257_v16 = vadd.f32 %v2063_v6, %v1186_v12  ;;  %1123 = vst.msk [vmem:[#allocation2 + $0x168] sm:$0xff] %vm224_vm0, %v1058_v5  ;;  %1354 = vst.msk [vmem:[%s2073_s11 + $0x50] sm:$0xff] %vm224_vm0, %v1290_v7  ;;  %v1291_v19 = vmax.f32 %v1227_v9, 0.0  ;;  %v337_v22 = vld [vmem:[#allocation2 + $0x180] sm:$0xff]  ;;  %v308_v27 = vld [vmem:[#allocation2 + $0x98] sm:$0xff] }
 0x112   : > { %1386 = vst.msk [vmem:[%s2073_s11 + $0x150] sm:$0xff] %vm224_vm0, %v1322_v8  ;;  %v1323_v20 = vmax.f32 %v1259_v10, 0.0  ;;  %1352 = vst.msk [vmem:[%s2073_s11 + $0x40] sm:$0xff] %vm224_vm0, %v1288_v13  ;;  %v1289_v23 = vmax.f32 %v1225_v15, 0.0  ;;  %v1642_v25 = vpop.f32.mrb[16].mxu0  ;;  %v1674_v26 = vpop.f32.mrb[16].mxu1 }
 0x113   : > { %1384 = vst.msk [vmem:[%s2073_s11 + $0x140] sm:$0xff] %vm224_vm0, %v1320_v14  ;;  %v1321_v24 = vmax.f32 %v1257_v16, 0.0  ;;  %v340_v28 = vld [vmem:[#allocation2 + $0x198] sm:$0xff]  ;;  %1355 = vst.msk [vmem:[%s2073_s11 + $0x58] sm:$0xff] %vm224_vm0, %v1291_v19  ;;  %v1031_v29 = vadd.f32 %v1642_v25, %v307_v17  ;;  %v1063_v30 = vadd.f32 %v1674_v26, %v339_v18  ;;  %v822_v31 = vpop.f32.mrb[17].mxu0  ;;  %v950_v32 = vpop.f32.mrb[17].mxu1 }
 0x114   : > { %1387 = vst.msk [vmem:[%s2073_s11 + $0x158] sm:$0xff] %vm224_vm0, %v1323_v20  ;;  %v306_v33 = vld [vmem:[#allocation2 + $0x88] sm:$0xff]  ;;  %1353 = vst.msk [vmem:[%s2073_s11 + $0x48] sm:$0xff] %vm224_vm0, %v1289_v23  ;;  %v1159_v35 = vld [vmem:[#allocation2 + $0x70] sm:$0xff]  ;;  %v1029_v37 = vadd.f32 %v822_v31, %v305_v21  ;;  %v1061_v38 = vadd.f32 %v950_v32, %v337_v22  ;;  %v1643_v39 = vpop.f32.mrb[18].mxu0  ;;  %v1675_v40 = vpop.f32.mrb[18].mxu1 }
 0x115   : > { %v338_v34 = vld [vmem:[#allocation2 + $0x188] sm:$0xff]  ;;  %1385 = vst.msk [vmem:[%s2073_s11 + $0x148] sm:$0xff] %vm224_vm0, %v1321_v24  ;;  %v1191_v36 = vld [vmem:[#allocation2 + $0x170] sm:$0xff]  ;;  %v1230_v41 = vadd.f32 %v2063_v6, %v1159_v35  ;;  %v1157_v43 = vld [vmem:[#allocation2 + $0x60] sm:$0xff]  ;;  %v1032_v45 = vadd.f32 %v1643_v39, %v308_v27  ;;  %v1064_v46 = vadd.f32 %v1675_v40, %v340_v28  ;;  %v825_v47 = vpop.f32.mrb[19].mxu0  ;;  %v953_v48 = vpop.f32.mrb[19].mxu1 }
 0x116   : > { %v1262_v42 = vadd.f32 %v2063_v6, %v1191_v36  ;;  %v1189_v44 = vld [vmem:[#allocation2 + $0x160] sm:$0xff]  ;;  %1096 = vst.msk [vmem:[#allocation2 + $0x90] sm:$0xff] %vm224_vm0, %v1031_v29  ;;  %1128 = vst.msk [vmem:[#allocation2 + $0x190] sm:$0xff] %vm224_vm0, %v1063_v30  ;;  %v1228_v49 = vadd.f32 %v2063_v6, %v1157_v43  ;;  %v1160_v51 = vld [vmem:[#allocation2 + $0x78] sm:$0xff]  ;;  %v1030_v53 = vadd.f32 %v825_v47, %v306_v33 }
 0x117   : > { %v1260_v50 = vadd.f32 %v2063_v6, %v1189_v44  ;;  %v1192_v52 = vld [vmem:[#allocation2 + $0x178] sm:$0xff]  ;;  %1094 = vst.msk [vmem:[#allocation2 + $0x80] sm:$0xff] %vm224_vm0, %v1029_v37  ;;  %1126 = vst.msk [vmem:[#allocation2 + $0x180] sm:$0xff] %vm224_vm0, %v1061_v38  ;;  %v1062_v54 = vadd.f32 %v953_v48, %v338_v34  ;;  %v1294_v55 = vmax.f32 %v1230_v41, 0.0  ;;  %v1231_v57 = vadd.f32 %v2063_v6, %v1160_v51  ;;  %v1158_v59 = vld [vmem:[#allocation2 + $0x68] sm:$0xff] }
 0x118   : > { %v1326_v56 = vmax.f32 %v1262_v42, 0.0  ;;  %v1263_v58 = vadd.f32 %v2063_v6, %v1192_v52  ;;  %v1190_v60 = vld [vmem:[#allocation2 + $0x168] sm:$0xff]  ;;  %1097 = vst.msk [vmem:[#allocation2 + $0x98] sm:$0xff] %vm224_vm0, %v1032_v45  ;;  %1129 = vst.msk [vmem:[#allocation2 + $0x198] sm:$0xff] %vm224_vm0, %v1064_v46  ;;  %v1292_v61 = vmax.f32 %v1228_v49, 0.0  ;;  %v1229_v63 = vadd.f32 %v2063_v6, %v1158_v59  ;;  %v311_v1 = vld [vmem:[#allocation2 + $0xb0] sm:$0xff] }
 0x119   : > { %v1324_v62 = vmax.f32 %v1260_v50, 0.0  ;;  %v1261_v0 = vadd.f32 %v2063_v6, %v1190_v60  ;;  %1095 = vst.msk [vmem:[#allocation2 + $0x88] sm:$0xff] %vm224_vm0, %v1030_v53  ;;  %1127 = vst.msk [vmem:[#allocation2 + $0x188] sm:$0xff] %vm224_vm0, %v1062_v54  ;;  %v343_v2 = vld [vmem:[#allocation2 + $0x1b0] sm:$0xff]  ;;  %v1295_v3 = vmax.f32 %v1231_v57, 0.0  ;;  %v309_v5 = vld [vmem:[#allocation2 + $0xa0] sm:$0xff] }
 0x11a   : > { %1358 = vst.msk [vmem:[%s2073_s11 + $0x70] sm:$0xff] %vm224_vm0, %v1294_v55  ;;  %1390 = vst.msk [vmem:[%s2073_s11 + $0x170] sm:$0xff] %vm224_vm0, %v1326_v56  ;;  %v1327_v4 = vmax.f32 %v1263_v58, 0.0  ;;  %v341_v7 = vld [vmem:[#allocation2 + $0x1a0] sm:$0xff]  ;;  %v1293_v8 = vmax.f32 %v1229_v63, 0.0  ;;  %v1646_v10 = vpop.f32.mrb[20].mxu0 }
 0x11b   : > { %1356 = vst.msk [vmem:[%s2073_s11 + $0x60] sm:$0xff] %vm224_vm0, %v1292_v61  ;;  %1388 = vst.msk [vmem:[%s2073_s11 + $0x160] sm:$0xff] %vm224_vm0, %v1324_v62  ;;  %v1325_v9 = vmax.f32 %v1261_v0, 0.0  ;;  %v1678_v11 = vpop.f32.mrb[20].mxu1  ;;  %v312_v12 = vld [vmem:[#allocation2 + $0xb8] sm:$0xff]  ;;  %v1035_v14 = vadd.f32 %v1646_v10, %v311_v1  ;;  %v838_v16 = vpop.f32.mrb[21].mxu0 }
 0x11c   : > { %v344_v13 = vld [vmem:[#allocation2 + $0x1b8] sm:$0xff]  ;;  %1359 = vst.msk [vmem:[%s2073_s11 + $0x78] sm:$0xff] %vm224_vm0, %v1295_v3  ;;  %1391 = vst.msk [vmem:[%s2073_s11 + $0x178] sm:$0xff] %vm224_vm0, %v1327_v4  ;;  %v1067_v15 = vadd.f32 %v1678_v11, %v343_v2  ;;  %v966_v17 = vpop.f32.mrb[21].mxu1  ;;  %v310_v18 = vld [vmem:[#allocation2 + $0xa8] sm:$0xff]  ;;  %v1033_v22 = vadd.f32 %v838_v16, %v309_v5  ;;  %v1647_v24 = vpop.f32.mrb[22].mxu0 }
 0x11d   : > { %v342_v19 = vld [vmem:[#allocation2 + $0x1a8] sm:$0xff]  ;;  %1357 = vst.msk [vmem:[%s2073_s11 + $0x68] sm:$0xff] %vm224_vm0, %v1293_v8  ;;  %1389 = vst.msk [vmem:[%s2073_s11 + $0x168] sm:$0xff] %vm224_vm0, %v1325_v9  ;;  %v1163_v20 = vld [vmem:[#allocation2 + $0x90] sm:$0xff]  ;;  %v1065_v23 = vadd.f32 %v966_v17, %v341_v7  ;;  %v1679_v25 = vpop.f32.mrb[22].mxu1  ;;  %v1036_v30 = vadd.f32 %v1647_v24, %v312_v12  ;;  %v841_v32 = vpop.f32.mrb[23].mxu0 }
 0x11e   : > { %v1195_v21 = vld [vmem:[#allocation2 + $0x190] sm:$0xff]  ;;  %v1234_v26 = vadd.f32 %v2063_v6, %v1163_v20  ;;  %v1161_v28 = vld [vmem:[#allocation2 + $0x80] sm:$0xff]  ;;  %1100 = vst.msk [vmem:[#allocation2 + $0xb0] sm:$0xff] %vm224_vm0, %v1035_v14  ;;  %1132 = vst.msk [vmem:[#allocation2 + $0x1b0] sm:$0xff] %vm224_vm0, %v1067_v15  ;;  %v1068_v31 = vadd.f32 %v1679_v25, %v344_v13  ;;  %v969_v33 = vpop.f32.mrb[23].mxu1  ;;  %v1034_v38 = vadd.f32 %v841_v32, %v310_v18 }
 0x11f   : > { %v1266_v27 = vadd.f32 %v2063_v6, %v1195_v21  ;;  %v1193_v29 = vld [vmem:[#allocation2 + $0x180] sm:$0xff]  ;;  %v1232_v34 = vadd.f32 %v2063_v6, %v1161_v28  ;;  %v1164_v36 = vld [vmem:[#allocation2 + $0x98] sm:$0xff]  ;;  %1098 = vst.msk [vmem:[#allocation2 + $0xa0] sm:$0xff] %vm224_vm0, %v1033_v22  ;;  %1130 = vst.msk [vmem:[#allocation2 + $0x1a0] sm:$0xff] %vm224_vm0, %v1065_v23  ;;  %v1066_v39 = vadd.f32 %v969_v33, %v342_v19 }
 0x120   : > { %v1264_v35 = vadd.f32 %v2063_v6, %v1193_v29  ;;  %v1196_v37 = vld [vmem:[#allocation2 + $0x198] sm:$0xff]  ;;  %v1298_v40 = vmax.f32 %v1234_v26, 0.0  ;;  %v1235_v42 = vadd.f32 %v2063_v6, %v1164_v36  ;;  %v1162_v44 = vld [vmem:[#allocation2 + $0x88] sm:$0xff]  ;;  %1101 = vst.msk [vmem:[#allocation2 + $0xb8] sm:$0xff] %vm224_vm0, %v1036_v30  ;;  %1133 = vst.msk [vmem:[#allocation2 + $0x1b8] sm:$0xff] %vm224_vm0, %v1068_v31 }
 0x121   : > { %v1330_v41 = vmax.f32 %v1266_v27, 0.0  ;;  %v1267_v43 = vadd.f32 %v2063_v6, %v1196_v37  ;;  %v1194_v45 = vld [vmem:[#allocation2 + $0x188] sm:$0xff]  ;;  %v1296_v46 = vmax.f32 %v1232_v34, 0.0  ;;  %v1233_v48 = vadd.f32 %v2063_v6, %v1162_v44  ;;  %1099 = vst.msk [vmem:[#allocation2 + $0xa8] sm:$0xff] %vm224_vm0, %v1034_v38  ;;  %1131 = vst.msk [vmem:[#allocation2 + $0x1a8] sm:$0xff] %vm224_vm0, %v1066_v39  ;;  %v315_v50 = vld [vmem:[#allocation2 + $0xd0] sm:$0xff] }
 0x122   : > { %v1328_v47 = vmax.f32 %v1264_v35, 0.0  ;;  %v1265_v49 = vadd.f32 %v2063_v6, %v1194_v45  ;;  %v347_v51 = vld [vmem:[#allocation2 + $0x1d0] sm:$0xff]  ;;  %1362 = vst.msk [vmem:[%s2073_s11 + $0x90] sm:$0xff] %vm224_vm0, %v1298_v40  ;;  %v1299_v52 = vmax.f32 %v1235_v42, 0.0  ;;  %v313_v54 = vld [vmem:[#allocation2 + $0xc0] sm:$0xff]  ;;  %v1650_v58 = vpop.f32.mrb[24].mxu0 }
 0x123   : > { %1394 = vst.msk [vmem:[%s2073_s11 + $0x190] sm:$0xff] %vm224_vm0, %v1330_v41  ;;  %v1331_v53 = vmax.f32 %v1267_v43, 0.0  ;;  %v345_v55 = vld [vmem:[#allocation2 + $0x1c0] sm:$0xff]  ;;  %1360 = vst.msk [vmem:[%s2073_s11 + $0x80] sm:$0xff] %vm224_vm0, %v1296_v46  ;;  %v1297_v56 = vmax.f32 %v1233_v48, 0.0  ;;  %v1682_v59 = vpop.f32.mrb[24].mxu1  ;;  %v1039_v62 = vadd.f32 %v1650_v58, %v315_v50 }
 0x124   : > { %1392 = vst.msk [vmem:[%s2073_s11 + $0x180] sm:$0xff] %vm224_vm0, %v1328_v47  ;;  %v1329_v57 = vmax.f32 %v1265_v49, 0.0  ;;  %v316_v60 = vld [vmem:[#allocation2 + $0xd8] sm:$0xff]  ;;  %1363 = vst.msk [vmem:[%s2073_s11 + $0x98] sm:$0xff] %vm224_vm0, %v1299_v52  ;;  %v1071_v63 = vadd.f32 %v1682_v59, %v347_v51  ;;  %v854_v0 = vpop.f32.mrb[25].mxu0  ;;  %v982_v1 = vpop.f32.mrb[25].mxu1 }
 0x125   : > { %v348_v61 = vld [vmem:[#allocation2 + $0x1d8] sm:$0xff]  ;;  %1395 = vst.msk [vmem:[%s2073_s11 + $0x198] sm:$0xff] %vm224_vm0, %v1331_v53  ;;  %v314_v2 = vld [vmem:[#allocation2 + $0xc8] sm:$0xff]  ;;  %1361 = vst.msk [vmem:[%s2073_s11 + $0x88] sm:$0xff] %vm224_vm0, %v1297_v56  ;;  %v1037_v7 = vadd.f32 %v854_v0, %v313_v54  ;;  %v1069_v8 = vadd.f32 %v982_v1, %v345_v55  ;;  %v1651_v9 = vpop.f32.mrb[26].mxu0  ;;  %v1683_v10 = vpop.f32.mrb[26].mxu1 }
 0x126   : > { %v346_v3 = vld [vmem:[#allocation2 + $0x1c8] sm:$0xff]  ;;  %1393 = vst.msk [vmem:[%s2073_s11 + $0x188] sm:$0xff] %vm224_vm0, %v1329_v57  ;;  %v1167_v4 = vld [vmem:[#allocation2 + $0xb0] sm:$0xff]  ;;  %v1165_v13 = vld [vmem:[#allocation2 + $0xa0] sm:$0xff]  ;;  %v1040_v15 = vadd.f32 %v1651_v9, %v316_v60  ;;  %v1072_v16 = vadd.f32 %v1683_v10, %v348_v61  ;;  %v857_v17 = vpop.f32.mrb[27].mxu0  ;;  %v985_v18 = vpop.f32.mrb[27].mxu1 }
 0x127   : > { %v1199_v5 = vld [vmem:[#allocation2 + $0x1b0] sm:$0xff]  ;;  %v1238_v11 = vadd.f32 %v2063_v6, %v1167_v4  ;;  %v1197_v14 = vld [vmem:[#allocation2 + $0x1a0] sm:$0xff]  ;;  %1104 = vst.msk [vmem:[#allocation2 + $0xd0] sm:$0xff] %vm224_vm0, %v1039_v62  ;;  %1136 = vst.msk [vmem:[#allocation2 + $0x1d0] sm:$0xff] %vm224_vm0, %v1071_v63  ;;  %v1236_v19 = vadd.f32 %v2063_v6, %v1165_v13  ;;  %v1038_v23 = vadd.f32 %v857_v17, %v314_v2 }
 0x128   : > { %v1270_v12 = vadd.f32 %v2063_v6, %v1199_v5  ;;  %v1268_v20 = vadd.f32 %v2063_v6, %v1197_v14  ;;  %v1168_v21 = vld [vmem:[#allocation2 + $0xb8] sm:$0xff]  ;;  %1102 = vst.msk [vmem:[#allocation2 + $0xc0] sm:$0xff] %vm224_vm0, %v1037_v7  ;;  %1134 = vst.msk [vmem:[#allocation2 + $0x1c0] sm:$0xff] %vm224_vm0, %v1069_v8  ;;  %v1070_v24 = vadd.f32 %v985_v18, %v346_v3  ;;  %v1166_v29 = vld [vmem:[#allocation2 + $0xa8] sm:$0xff] }
 0x129   : > { %v1200_v22 = vld [vmem:[#allocation2 + $0x1b8] sm:$0xff]  ;;  %v1302_v25 = vmax.f32 %v1238_v11, 0.0  ;;  %v1239_v27 = vadd.f32 %v2063_v6, %v1168_v21  ;;  %v1198_v30 = vld [vmem:[#allocation2 + $0x1a8] sm:$0xff]  ;;  %1105 = vst.msk [vmem:[#allocation2 + $0xd8] sm:$0xff] %vm224_vm0, %v1040_v15  ;;  %1137 = vst.msk [vmem:[#allocation2 + $0x1d8] sm:$0xff] %vm224_vm0, %v1072_v16  ;;  %v1300_v31 = vmax.f32 %v1236_v19, 0.0  ;;  %v1237_v33 = vadd.f32 %v2063_v6, %v1166_v29 }
 0x12a   : > { %v1334_v26 = vmax.f32 %v1270_v12, 0.0  ;;  %v1271_v28 = vadd.f32 %v2063_v6, %v1200_v22  ;;  %v1332_v32 = vmax.f32 %v1268_v20, 0.0  ;;  %v1269_v34 = vadd.f32 %v2063_v6, %v1198_v30  ;;  %1103 = vst.msk [vmem:[#allocation2 + $0xc8] sm:$0xff] %vm224_vm0, %v1038_v23  ;;  %1135 = vst.msk [vmem:[#allocation2 + $0x1c8] sm:$0xff] %vm224_vm0, %v1070_v24  ;;  %v319_v35 = vld [vmem:[#allocation2 + $0xf0] sm:$0xff]  ;;  %v317_v39 = vld [vmem:[#allocation2 + $0xe0] sm:$0xff] }
 0x12b   : > { %v351_v36 = vld [vmem:[#allocation2 + $0x1f0] sm:$0xff]  ;;  %1366 = vst.msk [vmem:[%s2073_s11 + $0xb0] sm:$0xff] %vm224_vm0, %v1302_v25  ;;  %v1303_v37 = vmax.f32 %v1239_v27, 0.0  ;;  %v349_v40 = vld [vmem:[#allocation2 + $0x1e0] sm:$0xff]  ;;  %1364 = vst.msk [vmem:[%s2073_s11 + $0xa0] sm:$0xff] %vm224_vm0, %v1300_v31  ;;  %v1301_v41 = vmax.f32 %v1237_v33, 0.0 }
 0x12c   : > { %1398 = vst.msk [vmem:[%s2073_s11 + $0x1b0] sm:$0xff] %vm224_vm0, %v1334_v26  ;;  %v1335_v38 = vmax.f32 %v1271_v28, 0.0  ;;  %1396 = vst.msk [vmem:[%s2073_s11 + $0x1a0] sm:$0xff] %vm224_vm0, %v1332_v32  ;;  %v1333_v42 = vmax.f32 %v1269_v34, 0.0  ;;  %v1654_v43 = vpop.f32.mrb[28].mxu0  ;;  %v1686_v44 = vpop.f32.mrb[28].mxu1 }
 0x12d   : > { %v320_v45 = vld [vmem:[#allocation2 + $0xf8] sm:$0xff]  ;;  %1367 = vst.msk [vmem:[%s2073_s11 + $0xb8] sm:$0xff] %vm224_vm0, %v1303_v37  ;;  %v1043_v47 = vadd.f32 %v1654_v43, %v319_v35  ;;  %v1075_v48 = vadd.f32 %v1686_v44, %v351_v36  ;;  %v870_v49 = vpop.f32.mrb[29].mxu0  ;;  %v998_v50 = vpop.f32.mrb[29].mxu1  ;;  %v318_v51 = vld [vmem:[#allocation2 + $0xe8] sm:$0xff]  ;;  %1365 = vst.msk [vmem:[%s2073_s11 + $0xa8] sm:$0xff] %vm224_vm0, %v1301_v41 }
 0x12e   : > { %v352_v46 = vld [vmem:[#allocation2 + $0x1f8] sm:$0xff]  ;;  %1399 = vst.msk [vmem:[%s2073_s11 + $0x1b8] sm:$0xff] %vm224_vm0, %v1335_v38  ;;  %v350_v52 = vld [vmem:[#allocation2 + $0x1e8] sm:$0xff]  ;;  %1397 = vst.msk [vmem:[%s2073_s11 + $0x1a8] sm:$0xff] %vm224_vm0, %v1333_v42  ;;  %v1041_v55 = vadd.f32 %v870_v49, %v317_v39  ;;  %v1073_v56 = vadd.f32 %v998_v50, %v349_v40  ;;  %v1655_v57 = vpop.f32.mrb[30].mxu0  ;;  %v1687_v58 = vpop.f32.mrb[30].mxu1 }
 0x12f   : > { %v1171_v53 = vld [vmem:[#allocation2 + $0xd0] sm:$0xff]  ;;  %v1169_v61 = vld [vmem:[#allocation2 + $0xc0] sm:$0xff]  ;;  %1108 = vst.msk [vmem:[#allocation2 + $0xf0] sm:$0xff] %vm224_vm0, %v1043_v47  ;;  %1140 = vst.msk [vmem:[#allocation2 + $0x1f0] sm:$0xff] %vm224_vm0, %v1075_v48  ;;  %v1044_v63 = vadd.f32 %v1655_v57, %v320_v45  ;;  %v1076_v0 = vadd.f32 %v1687_v58, %v352_v46  ;;  %v873_v1 = vpop.f32.mrb[31].mxu0  ;;  %v1001_v2 = vpop.f32.mrb[31].mxu1 }
 0x130   : > { %v1203_v54 = vld [vmem:[#allocation2 + $0x1d0] sm:$0xff]  ;;  %v1242_v59 = vadd.f32 %v2063_v6, %v1171_v53  ;;  %v1201_v62 = vld [vmem:[#allocation2 + $0x1c0] sm:$0xff]  ;;  %v1240_v3 = vadd.f32 %v2063_v6, %v1169_v61  ;;  %v1172_v5 = vld [vmem:[#allocation2 + $0xd8] sm:$0xff]  ;;  %1106 = vst.msk [vmem:[#allocation2 + $0xe0] sm:$0xff] %vm224_vm0, %v1041_v55  ;;  %v1042_v8 = vadd.f32 %v873_v1, %v318_v51  ;;  %v1074_v9 = vadd.f32 %v1001_v2, %v350_v52 }
 0x131   : > { %v1274_v60 = vadd.f32 %v2063_v6, %v1203_v54  ;;  %v1272_v4 = vadd.f32 %v2063_v6, %v1201_v62  ;;  %v1204_v7 = vld [vmem:[#allocation2 + $0x1d8] sm:$0xff]  ;;  %1138 = vst.msk [vmem:[#allocation2 + $0x1e0] sm:$0xff] %vm224_vm0, %v1073_v56  ;;  %v1243_v12 = vadd.f32 %v2063_v6, %v1172_v5  ;;  %v1170_v14 = vld [vmem:[#allocation2 + $0xc8] sm:$0xff]  ;;  %1109 = vst.msk [vmem:[#allocation2 + $0xf8] sm:$0xff] %vm224_vm0, %v1044_v63 }
 0x132   : > { %v1306_v10 = vmax.f32 %v1242_v59, 0.0  ;;  %v1275_v13 = vadd.f32 %v2063_v6, %v1204_v7  ;;  %v1202_v15 = vld [vmem:[#allocation2 + $0x1c8] sm:$0xff]  ;;  %1141 = vst.msk [vmem:[#allocation2 + $0x1f8] sm:$0xff] %vm224_vm0, %v1076_v0  ;;  %v1304_v16 = vmax.f32 %v1240_v3, 0.0  ;;  %v1241_v18 = vadd.f32 %v2063_v6, %v1170_v14  ;;  %1107 = vst.msk [vmem:[#allocation2 + $0xe8] sm:$0xff] %vm224_vm0, %v1042_v8 }
 0x133   : > { %v1338_v11 = vmax.f32 %v1274_v60, 0.0  ;;  %v1336_v17 = vmax.f32 %v1272_v4, 0.0  ;;  %v1273_v19 = vadd.f32 %v2063_v6, %v1202_v15  ;;  %1139 = vst.msk [vmem:[#allocation2 + $0x1e8] sm:$0xff] %vm224_vm0, %v1074_v9  ;;  %v1307_v20 = vmax.f32 %v1243_v12, 0.0 }
 0x134   : > { %1370 = vst.msk [vmem:[%s2073_s11 + $0xd0] sm:$0xff] %vm224_vm0, %v1306_v10  ;;  %v1339_v21 = vmax.f32 %v1275_v13, 0.0  ;;  %1368 = vst.msk [vmem:[%s2073_s11 + $0xc0] sm:$0xff] %vm224_vm0, %v1304_v16  ;;  %v1305_v22 = vmax.f32 %v1241_v18, 0.0 }
 0x135   : > { %1402 = vst.msk [vmem:[%s2073_s11 + $0x1d0] sm:$0xff] %vm224_vm0, %v1338_v11  ;;  %1400 = vst.msk [vmem:[%s2073_s11 + $0x1c0] sm:$0xff] %vm224_vm0, %v1336_v17  ;;  %v1337_v23 = vmax.f32 %v1273_v19, 0.0 }
 0x136   : > { %1371 = vst.msk [vmem:[%s2073_s11 + $0xd8] sm:$0xff] %vm224_vm0, %v1307_v20  ;;  %1403 = vst.msk [vmem:[%s2073_s11 + $0x1d8] sm:$0xff] %vm224_vm0, %v1339_v21  ;;  %v1175_v24 = vld [vmem:[#allocation2 + $0xf0] sm:$0xff] }
 0x137   : > { %1369 = vst.msk [vmem:[%s2073_s11 + $0xc8] sm:$0xff] %vm224_vm0, %v1305_v22  ;;  %1401 = vst.msk [vmem:[%s2073_s11 + $0x1c8] sm:$0xff] %vm224_vm0, %v1337_v23  ;;  %v1207_v25 = vld [vmem:[#allocation2 + $0x1f0] sm:$0xff]  ;;  %v1246_v26 = vadd.f32 %v2063_v6, %v1175_v24  ;;  %v1173_v28 = vld [vmem:[#allocation2 + $0xe0] sm:$0xff] }
 0x138   : > { %v1278_v27 = vadd.f32 %v2063_v6, %v1207_v25  ;;  %v1205_v29 = vld [vmem:[#allocation2 + $0x1e0] sm:$0xff]  ;;  %v1244_v30 = vadd.f32 %v2063_v6, %v1173_v28  ;;  %v1176_v32 = vld [vmem:[#allocation2 + $0xf8] sm:$0xff] }
 0x139   : > { %v1276_v31 = vadd.f32 %v2063_v6, %v1205_v29  ;;  %v1208_v33 = vld [vmem:[#allocation2 + $0x1f8] sm:$0xff]  ;;  %v1310_v34 = vmax.f32 %v1246_v26, 0.0  ;;  %v1247_v36 = vadd.f32 %v2063_v6, %v1176_v32  ;;  %v1174_v38 = vld [vmem:[#allocation2 + $0xe8] sm:$0xff] }
 0x13a   : > { %v1342_v35 = vmax.f32 %v1278_v27, 0.0  ;;  %v1279_v37 = vadd.f32 %v2063_v6, %v1208_v33  ;;  %v1206_v39 = vld [vmem:[#allocation2 + $0x1e8] sm:$0xff]  ;;  %v1308_v40 = vmax.f32 %v1244_v30, 0.0  ;;  %v1245_v42 = vadd.f32 %v2063_v6, %v1174_v38 }
 0x13b   : > { %v1340_v41 = vmax.f32 %v1276_v31, 0.0  ;;  %v1277_v43 = vadd.f32 %v2063_v6, %v1206_v39  ;;  %1374 = vst.msk [vmem:[%s2073_s11 + $0xf0] sm:$0xff] %vm224_vm0, %v1310_v34  ;;  %v1311_v44 = vmax.f32 %v1247_v36, 0.0 }
 0x13c   : > { %1406 = vst.msk [vmem:[%s2073_s11 + $0x1f0] sm:$0xff] %vm224_vm0, %v1342_v35  ;;  %v1343_v45 = vmax.f32 %v1279_v37, 0.0  ;;  %1372 = vst.msk [vmem:[%s2073_s11 + $0xe0] sm:$0xff] %vm224_vm0, %v1308_v40  ;;  %v1309_v46 = vmax.f32 %v1245_v42, 0.0 }
 0x13d   : > { %1404 = vst.msk [vmem:[%s2073_s11 + $0x1e0] sm:$0xff] %vm224_vm0, %v1340_v41  ;;  %v1341_v47 = vmax.f32 %v1277_v43, 0.0  ;;  %1375 = vst.msk [vmem:[%s2073_s11 + $0xf8] sm:$0xff] %vm224_vm0, %v1311_v44 }
 0x13e   : > { %1407 = vst.msk [vmem:[%s2073_s11 + $0x1f8] sm:$0xff] %vm224_vm0, %v1343_v45  ;;  %1373 = vst.msk [vmem:[%s2073_s11 + $0xe8] sm:$0xff] %vm224_vm0, %v1309_v46 }
 0x13f   : > { %1405 = vst.msk [vmem:[%s2073_s11 + $0x1e8] sm:$0xff] %vm224_vm0, %v1341_v47 }
 0x140 PF: > { %s13_s14 = sadd.s32 1, %s1786_s14   ;;  %s2332_s12 = smov %s1782_s13 }
 0x141   : > { %p10_p5 = scmp.ge.s32.totalorder %s13_s14, 6   ;;  %s2333_s13 = smov %s2335_s15 }
 0x143   :  { %12 = sbr.rel (!%p10_p5) target bundleno = 2 (0x2), region = 73 }

// kernel: _forward_impl.5
= control target key start
LH: loop header
LB: loop body
LE: loop exit
PB: predicated region body
PF: predicated region fallthrough
CT: control target
= control target key end

     0   :  { %s459_s0 = inlined_call_operand.vmem [shape: s32[16], index: 0, kind: input, shape index: {}]   ;;  %s460_s1 = inlined_call_operand.vmem [shape: f32[16,8,4], index: 1, kind: input, shape index: {}]   ;;  %s461_s2 = inlined_call_operand.vmem [shape: f32[4,8,128], index: 2, kind: input, shape index: {}]   ;;  %s462_s3 = inlined_call_operand.vmem [shape: f32[16,4,128], index: 3, kind: output, shape index: {}]  }
   0x1   :  { %s8_s14 = sshll.u32 %s459_s0, 4  ;;  %s9_s14 = int_to_ptr.vmem [resolvable:$true] %s8_s14 }
   0x2   :  { %s380_s15 = scalar_lea.vmem %s9_s14, 16  ;;  %p385_p1 = scmp.lt.s32.totalorder %s9_s14, %s9_s14 }
   0x3   :  { %p381_p0 = scmp.ne.s32.totalorder %s9_s14, %s380_s15  ;;  %p386_p2 = scmp.lt.s32.totalorder %s380_s15, %s380_s15 }
   0x5   :  { %p387_p3 = por %p386_p2, %p385_p1 }
   0x7   :  { %p388_p4 = pnand %p387_p3, %p381_p0 }
   0x9   :  { %391 = shalt.err (!%p388_p4)  }
   0xa   :  { %s402_s16 = smov [#allocation3]  }
   0xb   :  { %11 = dma.vmem_to_smem %s9_s14, 16, %s402_s16, [#allocation2] }
   0xc   :  { %396 = dma.done.wait [#allocation2], 16 }
   0xd   :  { %397 = vsyncadd [#allocation2], 4294967280 }
   0xe   :  { %13 = sfence }
   0xf   :  { %s430_s17 = smov 0  }
  0x10 LB: > { %s436_s0 = sadd.s32 4294967295, %s400_s17   ;;  %p354_p5 = scmp.ge.s32.totalorder %s400_s17, 1  ;;  %s400_s17 = sphi %s430_s17, %s19_s17  }
  0x11   : > { %p131_p6 = scmp.lt.s32.totalorder %s400_s17, 17 }
  0x13   : > { %p132_p7 = pnand %p354_p5, %p131_p6 }
  0x14   : > { %p156_p8 = scmp.lt.s32.totalorder (!%p132_p7), %s436_s0, 15  ;;  %v403_v0 = vmov (!%p132_p7), 2   ;;  %v404_v1 = vmov (!%p132_p7), 0   ;;  %vm185_vm0 = vcmask (!%p132_p7), 7168   ;;  %vm211_vm1 = vcmask (!%p132_p7), 15368   ;;  %s160_s23 = sld [smem:[#allocation3 + %s436_s0]] (!%p132_p7) }
  0x15   : > { %135 = sbr.rel (%p132_p7) target bundleno = 187 (0xbb), region = 28  ;;  %375 = vset.pattern.permute.xlu1 (!%p132_p7), %v403_v0  ;;  %373 = vset.pattern.permute.xlu0 (!%p132_p7), %v404_v1  ;;  %vm237_vm2 = vcmask (!%p132_p7), 23568   ;;  %vm263_vm3 = vcmask (!%p132_p7), 31768   ;;  %v405_v19 = vmov (!%p132_p7), 3   ;;  %v406_v20 = vmov (!%p132_p7), 1  }
  0x16   : > { %vm278_vm14 = vcmask (!%p132_p7), 1040384  }
  0x1a   : > { %p161_p9 = scmp.lt.s32.totalorder (!%p132_p7), %s160_s23, 3 }
  0x1c   : > { %s442_s18 = scalar_select %p156_p8, %s436_s0, 15 }
  0x1d   : > { %s464_s23 = smov (!%p161_p9, %s160_s23), 3 }
  0x1e   : > { %s355_s19 = sshll.u32 %s442_s18, 3  ;;  %s356_s24 = sshll.u32 %s464_s23, 3 }
  0x1f   : > { %s159_s22 = scalar_lea.vmem %s460_s1, %s355_s19  ;;  %s164_s27 = scalar_lea.vmem %s461_s2, %s356_s24 }
  0x20   : > { %v171_v2 = vld [vmem:[%s159_s22] sm:$0xff]  ;;  %s357_s28 = sshll.u32 %s442_s18, 2 }
  0x21   : > { %vm172_vm4 = vcmp.gt.f32.partialorder %v171_v2, 0.0  ;;  %v186_v3 = vsel %vm185_vm0, %v171_v2, -inf  ;;  %v212_v4 = vsel %vm211_vm1, %v171_v2, -inf  ;;  %v238_v5 = vsel %vm237_vm2, %v171_v2, -inf  ;;  %v170_v38 = vld [vmem:[%s164_s27] sm:$0xff]  ;;  %s169_s4 = scalar_lea.vmem %s462_s3, %s357_s28 }
  0x22   : > { %v173_v6 = vsel %vm172_vm4, 1, %v404_v1  ;;  %v187_v7 = vrot.slane %v186_v3, 4  ;;  %v213_v8 = vrot.slane %v212_v4, 4  ;;  %v239_v9 = vrot.slane %v238_v5, 4 }
  0x23   : > { %227 = vperm.xlu1 %375, %v173_v6   ;;  %175 = vperm.xlu0 %373, %v173_v6   ;;  %v264_v10 = vsel %vm263_vm3, %v171_v2, -inf  ;;  %vm280_vm0 = vcmask 1041408   ;;  %vm282_vm3 = vcmask 1042432  }
  0x24   : > { %v188_v11 = vmax.f32 %v186_v3, %v187_v7  ;;  %v214_v12 = vmax.f32 %v212_v4, %v213_v8  ;;  %v240_v13 = vmax.f32 %v238_v5, %v239_v9  ;;  %v265_v14 = vrot.slane %v264_v10, 4 }
  0x26   : > { %v189_v15 = vrot.slane %v188_v11, 2  ;;  %v215_v16 = vrot.slane %v214_v12, 2  ;;  %v241_v17 = vrot.slane %v240_v13, 2  ;;  %v266_v18 = vmax.f32 %v264_v10, %v265_v14 }
  0x27   : > { %376 = vset.pattern.permute.xlu1 %v405_v19  ;;  %374 = vset.pattern.permute.xlu0 %v406_v20 }
  0x28   : > { %253 = vperm.xlu1 %376, %v173_v6   ;;  %201 = vperm.xlu0 %374, %v173_v6   ;;  %v190_v21 = vmax.f32 %v188_v11, %v189_v15  ;;  %v216_v22 = vmax.f32 %v214_v12, %v215_v16  ;;  %v242_v23 = vmax.f32 %v240_v13, %v241_v17  ;;  %v267_v24 = vrot.slane %v266_v18, 2 }
  0x2a   : > { %v191_v25 = vrot.slane %v190_v21, 1  ;;  %v217_v26 = vrot.slane %v216_v22, 1  ;;  %v243_v27 = vrot.slane %v242_v23, 1  ;;  %v268_v28 = vmax.f32 %v266_v18, %v267_v24 }
  0x2c   : > { %377 = vset.pattern.permute.xlu1 %v404_v1  ;;  %v192_v29 = vmax.f32 %v190_v21, %v191_v25  ;;  %v218_v30 = vmax.f32 %v216_v22, %v217_v26  ;;  %v244_v31 = vmax.f32 %v242_v23, %v243_v27  ;;  %v269_v32 = vrot.slane %v268_v28, 1 }
  0x2e   : > { %vm193_vm5 = vcmp.gt.f32.partialorder %v192_v29, 0.0  ;;  %vm219_vm6 = vcmp.gt.f32.partialorder %v218_v30, 0.0  ;;  %v270_v33 = vmax.f32 %v268_v28, %v269_v32  ;;  %vm245_vm7 = vcmp.gt.f32.partialorder %v244_v31, 0.0 }
  0x2f   : > { %v194_v34 = vsel %vm193_vm5, 1, %v404_v1  ;;  %v220_v35 = vsel %vm219_vm6, 1, %v404_v1  ;;  %v246_v36 = vsel %vm245_vm7, 1, %v404_v1 }
  0x30   : > { %196 = vperm.xlu1 %377, %v194_v34   ;;  %222 = vperm.xlu0 %374, %v220_v35   ;;  %vm271_vm8 = vcmp.gt.f32.partialorder %v270_v33, 0.0 }
  0x31   : > { %v272_v37 = vsel %vm271_vm8, 1, %v404_v1 }
  0x34   : > { %378 = vset.pattern.permute.xlu1 %v403_v0  ;;  %379 = vset.pattern.permute.xlu0 %v405_v19 }
  0x35   : > { %248 = vperm.xlu1 %378, %v246_v36   ;;  %274 = vperm.xlu0 %379, %v272_v37  }
  0xa2   : > { %v228_v39 = vpop.permute.xlu1 %227  ;;  %v176_v40 = vpop.permute.xlu0 %175 }
  0xa3   : > { %vm229_vm9 = vcmp.eq.s32.totalorder %v228_v39, 1  ;;  %vm177_vm10 = vcmp.eq.s32.totalorder %v176_v40, 1 }
  0xa4   : > { %v230_v41 = vsel %vm229_vm9, %v170_v38, -3e+38  ;;  %v178_v42 = vsel %vm177_vm10, %v170_v38, -3e+38 }
  0xa5   : > { %v231_v43 = vrot.slane %v230_v41, 4  ;;  %v179_v44 = vrot.slane %v178_v42, 4 }
  0xa7   : > { %v232_v45 = vmax.f32 %v230_v41, %v231_v43  ;;  %v180_v46 = vmax.f32 %v178_v42, %v179_v44  ;;  %v254_v47 = vpop.permute.xlu1 %253  ;;  %v202_v48 = vpop.permute.xlu0 %201 }
  0xa8   : > { %vm255_vm11 = vcmp.eq.s32.totalorder %v254_v47, 1  ;;  %vm203_vm12 = vcmp.eq.s32.totalorder %v202_v48, 1 }
  0xa9   : > { %v233_v49 = vrot.slane %v232_v45, 2  ;;  %v181_v50 = vrot.slane %v180_v46, 2  ;;  %v256_v51 = vsel %vm255_vm11, %v170_v38, -3e+38  ;;  %v204_v52 = vsel %vm203_vm12, %v170_v38, -3e+38 }
  0xaa   : > { %v257_v53 = vrot.slane %v256_v51, 4  ;;  %v205_v54 = vrot.slane %v204_v52, 4 }
  0xab   : > { %v182_v55 = vmax.f32 %v180_v46, %v181_v50  ;;  %v234_v56 = vmax.f32 %v232_v45, %v233_v49 }
  0xac   : > { %v258_v57 = vmax.f32 %v256_v51, %v257_v53  ;;  %v206_v58 = vmax.f32 %v204_v52, %v205_v54 }
  0xad   : > { %v183_v61 = vrot.slane %v182_v55, 1  ;;  %v235_v2 = vrot.slane %v234_v56, 1 }
  0xae   : > { %v259_v59 = vrot.slane %v258_v57, 2  ;;  %v207_v60 = vrot.slane %v206_v58, 2 }
  0xaf   : > { %v197_v62 = vpop.permute.xlu1 %196  ;;  %v223_v63 = vpop.permute.xlu0 %222  ;;  %v184_v3 = vmax.f32 %v182_v55, %v183_v61  ;;  %v236_v7 = vmax.f32 %v234_v56, %v235_v2 }
  0xb0   : > { %v260_v0 = vmax.f32 %v258_v57, %v259_v59  ;;  %v208_v1 = vmax.f32 %v206_v58, %v207_v60  ;;  %vm198_vm13 = vcmp.eq.s32.totalorder %v197_v62, 1  ;;  %vm224_vm15 = vcmp.eq.s32.totalorder %v223_v63, 1 }
  0xb1   : > { %v199_v11 = vsel %vm198_vm13, %v184_v3, 0.0 }
  0xb2   : > { %v209_v4 = vrot.slane %v208_v1, 1  ;;  %v261_v5 = vrot.slane %v260_v0, 1 }
  0xb4   : > { %v210_v6 = vmax.f32 %v208_v1, %v209_v4  ;;  %v249_v8 = vpop.permute.xlu1 %248  ;;  %v262_v9 = vmax.f32 %v260_v0, %v261_v5  ;;  %v275_v10 = vpop.permute.xlu0 %274 }
  0xb5   : > { %vm250_vm1 = vcmp.eq.s32.totalorder %v249_v8, 1  ;;  %vm276_vm2 = vcmp.eq.s32.totalorder %v275_v10, 1 }
  0xb6   : > { %v225_v12 = vsel %vm224_vm15, %v210_v6, 0.0  ;;  %v251_v13 = vsel %vm250_vm1, %v236_v7, 0.0  ;;  %v277_v16 = vsel %vm276_vm2, %v262_v9, 0.0 }
  0xb7   : > { %v279_v14 = vsel %vm278_vm14, %v199_v11, %v225_v12 }
  0xb8   : > { %v281_v15 = vsel %vm280_vm0, %v279_v14, %v251_v13 }
  0xb9   : > { %v283_v17 = vsel %vm282_vm3, %v281_v15, %v277_v16 }
  0xba   : > { %284 = vst [vmem:[%s169_s4] sm:$0xf] %v283_v17 }
  0xbb PF: > { %s19_s17 = sadd.s32 1, %s400_s17  }
  0xbc   : > { %p16_p10 = scmp.ge.s32.totalorder %s19_s17, 18  }
  0xbe   :  { %18 = sbr.rel (!%p16_p10) target bundleno = 16 (0x10), region = 61 }

// kernel: _forward_impl.6
= control target key start
LH: loop header
LB: loop body
LE: loop exit
PB: predicated region body
PF: predicated region fallthrough
CT: control target
= control target key end

     0   :  { %v737_v34 = vmov 0.0   ;;  %vm738_vm0 = vmmov 0   ;;  %vm440_vm1 = vcmask 523264   ;;  %v485_v61 = vlaneseq  ;;  %s941_s1 = inlined_call_operand.vmem [shape: bf16[512,64], index: 1, kind: input, shape index: {}]   ;;  %s942_s0 = inlined_call_operand.vmem [shape: bf16[16,512], index: 0, kind: input, shape index: {}]   ;;  %s943_s3 = inlined_call_operand.vmem [shape: bf16[64,128], index: 3, kind: input, shape index: {}]   ;;  %s944_s2 = inlined_call_operand.vmem [shape: f32[1,64], index: 2, kind: input, shape index: {}]   ;;  %s945_s4 = inlined_call_operand.vmem [shape: f32[1,128], index: 4, kind: input, shape index: {}]   ;;  %s946_s5 = inlined_call_operand.vmem [shape: f32[1,128], index: 5, kind: input, shape index: {}]   ;;  %s947_s6 = inlined_call_operand.<no memory space> [shape: f32[1,1], index: 6, kind: input, shape index: {}]   ;;  %s948_s7 = inlined_call_operand.vmem [shape: f32[16,128], index: 7, kind: output, shape index: {}]  }
   0x1   :  { %v679_v0 = vld [vmem:[%s941_s1 + $0x40] sm:$0xff]   ;;  %v683_v4 = vld [vmem:[%s941_s1 + $0x48] sm:$0xff]   ;;  %v687_v8 = vld [vmem:[%s941_s1 + $0x50] sm:$0xff]  }
   0x2   :  { %v680_v1 = vld [vmem:[%s941_s1 + $0xc0] sm:$0xff]   ;;  %613 = vmatprep.subr.bf16.mxu0 %v679_v0  ;;  %v684_v5 = vld [vmem:[%s941_s1 + $0xc8] sm:$0xff]   ;;  %v688_v9 = vld [vmem:[%s941_s1 + $0xd0] sm:$0xff]   ;;  %v903_v62 = vand.u32 127, %v485_v61 }
   0x3   :  { %v681_v2 = vld [vmem:[%s941_s1] sm:$0xff]   ;;  %635 = vmatprep.subr.bf16.mxu1 %v680_v1  ;;  %v685_v6 = vld [vmem:[%s941_s1 + $0x8] sm:$0xff]   ;;  %v689_v10 = vld [vmem:[%s941_s1 + $0x10] sm:$0xff]  }
   0x4   :  { %v682_v3 = vld [vmem:[%s941_s1 + $0x80] sm:$0xff]   ;;  %614 = vmatpush3.bf16.msra.mxu0 %v681_v2  ;;  %v686_v7 = vld [vmem:[%s941_s1 + $0x88] sm:$0xff]   ;;  %v690_v11 = vld [vmem:[%s941_s1 + $0x90] sm:$0xff]   ;;  %vm487_vm2 = vcmp.lt.s32.totalorder %v903_v62, 5  ;;  %vm546_vm3 = vcmp.eq.s32.totalorder %v903_v62, 15  ;;  %vm559_vm4 = vcmp.gt.s32.totalorder %v903_v62, 15 }
   0x5   :  { %636 = vmatpush3.bf16.msra.mxu1 %v682_v3  ;;  %615 = vmatprep.subr.bf16.mxu0 %v683_v4  ;;  %v691_v12 = vld [vmem:[%s941_s1 + $0x58] sm:$0xff]   ;;  %v695_v16 = vld [vmem:[%s941_s1 + $0x60] sm:$0xff]   ;;  %v699_v20 = vld [vmem:[%s941_s1 + $0x68] sm:$0xff]  }
   0x6   :  { %637 = vmatprep.subr.bf16.mxu1 %v684_v5  ;;  %v692_v13 = vld [vmem:[%s941_s1 + $0xd8] sm:$0xff]   ;;  %v696_v17 = vld [vmem:[%s941_s1 + $0xe0] sm:$0xff]   ;;  %v700_v21 = vld [vmem:[%s941_s1 + $0xe8] sm:$0xff]  }
   0x7   :  { %v693_v14 = vld [vmem:[%s941_s1 + $0x18] sm:$0xff]   ;;  %v697_v18 = vld [vmem:[%s941_s1 + $0x20] sm:$0xff]   ;;  %v701_v22 = vld [vmem:[%s941_s1 + $0x28] sm:$0xff]  }
   0x8   :  { %616 = vmatpush3.bf16.msra.mxu0 %v685_v6  ;;  %v694_v15 = vld [vmem:[%s941_s1 + $0x98] sm:$0xff]   ;;  %v698_v19 = vld [vmem:[%s941_s1 + $0xa0] sm:$0xff]   ;;  %v702_v23 = vld [vmem:[%s941_s1 + $0xa8] sm:$0xff]  }
   0x9   :  { %638 = vmatpush3.bf16.msra.mxu1 %v686_v7  ;;  %617 = vmatprep.subr.bf16.mxu0 %v687_v8  ;;  %v703_v24 = vld [vmem:[%s941_s1 + $0x70] sm:$0xff]   ;;  %v707_v28 = vld [vmem:[%s941_s1 + $0x78] sm:$0xff]   ;;  %v717_v37 = vld [vmem:[%s943_s3] sm:$0xff]  }
   0xa   :  { %639 = vmatprep.subr.bf16.mxu1 %v688_v9  ;;  %v704_v25 = vld [vmem:[%s941_s1 + $0xf0] sm:$0xff]   ;;  %v708_v29 = vld [vmem:[%s941_s1 + $0xf8] sm:$0xff]   ;;  %v718_v38 = vld [vmem:[%s943_s3 + $0x8] sm:$0xff]  }
   0xb   :  { %v705_v26 = vld [vmem:[%s941_s1 + $0x30] sm:$0xff]   ;;  %v709_v30 = vld [vmem:[%s941_s1 + $0x38] sm:$0xff]   ;;  %v568_v43 = vld [vmem:[%s944_s2] ss:$0 sm:$0xff] }
   0xc   :  { %618 = vmatpush3.bf16.msra.mxu0 %v689_v10  ;;  %v706_v27 = vld [vmem:[%s941_s1 + $0xb0] sm:$0xff]   ;;  %v710_v31 = vld [vmem:[%s941_s1 + $0xb8] sm:$0xff]   ;;  %v605_v63 = vld [vmem:[%s945_s4] ss:$0 sm:$0xff] }
   0xd   :  { %640 = vmatpush3.bf16.msra.mxu1 %v690_v11  ;;  %619 = vmatprep.subr.bf16.mxu0 %v691_v12  ;;  %v711_v32 = vld [vmem:[%s942_s0] ss:$16 sps:$4 sm:$0xff]   ;;  %v713_v33 = vld [vmem:[%s942_s0 + $0x4] ss:$16 sps:$4 sm:$0xff]   ;;  %v714_v35 = vld [vmem:[%s942_s0 + $0x8] ss:$16 sps:$4 sm:$0xff]  }
   0xe   :  { %641 = vmatprep.subr.bf16.mxu1 %v692_v13  ;;  %v716_v36 = vld [vmem:[%s942_s0 + $0xc] ss:$16 sps:$4 sm:$0xff]   ;;  %348 = vmatprep.mubr.bf16.mxu0 %v713_v33  ;;  %v719_v39 = vld [vmem:[%s943_s3 + $0x10] sm:$0xff]   ;;  %v611_v4 = vld [vmem:[%s946_s5] ss:$0 sm:$0xff]  ;;  %v12_v13 = vstv %s947_s6 }
   0xf   :  { %389 = vmatprep.mubr.bf16.mxu1 %v716_v36  ;;  %v720_v40 = vld [vmem:[%s943_s3 + $0x18] sm:$0xff]   ;;  %13 = vst [vmem:[#allocation2] sm:$0x1] %v12_v13 }
  0x10   :  { %620 = vmatpush3.bf16.msra.mxu0 %v693_v14  ;;  %v739_v14 = vmov 0  }
  0x11   :  { %642 = vmatpush3.bf16.msra.mxu1 %v694_v15  ;;  %621 = vmatprep.subr.bf16.mxu0 %v695_v16 }
  0x12   :  { %643 = vmatprep.subr.bf16.mxu1 %v696_v17  ;;  %678 = vset.pattern.permute.xlu1 %v739_v14 }
  0x13   :  { %677 = vset.pattern.permute.xlu0 %v739_v14 }
  0x14   :  { %622 = vmatpush3.bf16.msra.mxu0 %v697_v18 }
  0x15   :  { %644 = vmatpush3.bf16.msra.mxu1 %v698_v19  ;;  %623 = vmatprep.subr.bf16.mxu0 %v699_v20 }
  0x16   :  { %645 = vmatprep.subr.bf16.mxu1 %v700_v21  ;;  %v612_v17 = vld [vmem:[#allocation2] ss:$0 sm:$0xff] }
  0x18   :  { %624 = vmatpush3.bf16.msra.mxu0 %v701_v22 }
  0x19   :  { %646 = vmatpush3.bf16.msra.mxu1 %v702_v23  ;;  %625 = vmatprep.subr.bf16.mxu0 %v703_v24 }
  0x1a   :  { %647 = vmatprep.subr.bf16.mxu1 %v704_v25 }
  0x1c   :  { %626 = vmatpush3.bf16.msra.mxu0 %v705_v26 }
  0x1d   :  { %648 = vmatpush3.bf16.msra.mxu1 %v706_v27  ;;  %627 = vmatprep.subr.bf16.mxu0 %v707_v28 }
  0x1e   :  { %649 = vmatprep.subr.bf16.mxu1 %v708_v29 }
  0x20   :  { %628 = vmatpush3.bf16.msra.mxu0 %v709_v30 }
  0x21   :  { %650 = vmatpush3.bf16.msra.mxu1 %v710_v31  ;;  %662 = vmatprep.subr.bf16.mxu0 %v737_v34 }
  0x23   :  { %349 = vmatmul.mubr.bf16.vlgmr.msra.gmra.mrb[0].mxu0 %v711_v32 }
  0x24   :  { %390 = vmatmul.mubr.bf16.vlgmr.msra.gmra.mrb[0].mxu1 %v714_v35  ;;  %663 = vmatpush3.bf16.msra.mxu0 %v717_v37 }
  0x25   :  { %664 = vmatprep.subr.bf16.mxu0 %v737_v34  ;;  %670 = vmatprep.mubr.msk.bf16.mxu0 %vm738_vm0, %v737_v34 }
  0x28   :  { %665 = vmatpush3.bf16.msra.mxu0 %v718_v38 }
  0x29   :  { %666 = vmatprep.subr.bf16.mxu0 %v737_v34 }
  0x2c   :  { %667 = vmatpush3.bf16.msra.mxu0 %v719_v39 }
  0x2d   :  { %668 = vmatprep.subr.bf16.mxu0 %v737_v34 }
  0x30   :  { %669 = vmatpush3.bf16.msra.mxu0 %v720_v40 }
  0xf6   :  { %v629_v41 = vpop.f32.mrb[0].mxu0 }
  0xf7   :  { %v651_v42 = vpop.f32.mrb[0].mxu1  ;;  %v630_v44 = vpop.f32.mrb[1].mxu0 }
  0xf8   :  { %v631_v45 = vadd.f32 %v630_v44, %v629_v41  ;;  %v652_v46 = vpop.f32.mrb[1].mxu1  ;;  %v632_v47 = vpop.f32.mrb[2].mxu0 }
  0xf9   :  { %v653_v48 = vadd.f32 %v652_v46, %v651_v42  ;;  %v654_v49 = vpop.f32.mrb[2].mxu1  ;;  %v633_v50 = vpop.f32.mrb[3].mxu0 }
  0xfa   :  { %v351_v51 = vadd.f32 %v631_v45, %v568_v43  ;;  %v634_v52 = vadd.f32 %v633_v50, %v632_v47  ;;  %v655_v53 = vpop.f32.mrb[3].mxu1 }
  0xfb   :  { %v656_v54 = vadd.f32 %v655_v53, %v654_v49 }
  0xfc   :  { %v392_v55 = vadd.f32 %v653_v48, %v351_v51  ;;  %v354_v56 = vadd.f32 %v634_v52, %v568_v43 }
  0xfe   :  { %v395_v57 = vadd.f32 %v656_v54, %v354_v56  ;;  %v398_v58 = vmax.f32 %v392_v55, 0.0 }
 0x100   :  { %v399_v59 = vmax.f32 %v395_v57, 0.0 }
 0x102   :  { %v400_v60 = vpack.c.bf16 %v399_v59, %v398_v58 }
 0x104   :  { %671 = vmatmul.mubr.msk.bf16.vlgmr.msra.gmra.mrb[4].mxu0 %vm440_vm1, %v400_v60 }
 0x1d7   :  { %v478_v0 = vpop.f32.mrb[4].mxu0 }
 0x1d8   :  { %v909_v1 = vadd.f32 %v605_v63, %v478_v0  ;;  %v672_v2 = vpop.f32.mrb[5].mxu0 }
 0x1d9   :  { %v481_v3 = vpop.f32.mrb[6].mxu0 }
 0x1da   :  { %v914_v5 = vadd.f32 %v605_v63, %v481_v3  ;;  %v673_v6 = vpop.f32.mrb[7].mxu0  ;;  %v488_v7 = vsel %vm487_vm2, %v909_v1, -1e+30  ;;  %v508_v8 = vmax.f32 %v909_v1, 0.0 }
 0x1db   :  { %490 = vmax.xlane.f32.xlu0 %v488_v7 }
 0x1dc   :  { %v517_v9 = vmul.f32 %v611_v4, %v508_v8  ;;  %v509_v10 = vmax.f32 %v914_v5, 0.0  ;;  %v489_v11 = vsel %vm487_vm2, %v914_v5, -1e+30 }
 0x1de   :  { %519 = vadd.xlane.f32.xlu1 %v517_v9  ;;  %v518_v12 = vmul.f32 %v611_v4, %v509_v10 }
 0x1df   :  { %492 = vmax.xlane.f32.xlu0 %v489_v11 }
 0x1e2   :  { %521 = vadd.xlane.f32.xlu1 %v518_v12 }
 0x268   :  { %v491_v15 = vpop.xlane.xlu0 %490 }
 0x269   :  { %v494_v16 = vsub.f32 %v488_v7, %v491_v15 }
 0x26b   :  { %v496_v18 = vmul.f32 1.442695, %v494_v16  ;;  %v520_v19 = vpop.xlane.xlu1 %519 }
 0x26c   :  { %v530_v20 = vadd.f32 %v612_v17, %v520_v19  ;;  %v493_v21 = vpop.xlane.xlu0 %492 }
 0x26d   :  { %721 = vpow2.f32 %v496_v18  ;;  %v495_v22 = vsub.f32 %v489_v11, %v493_v21 }
 0x26e   :  { %v532_v23 = vsub.f32 0.0, %v530_v20 }
 0x26f   :  { %v498_v24 = vmul.f32 1.442695, %v495_v22  ;;  %v522_v25 = vpop.xlane.xlu1 %521 }
 0x270   :  { %v534_v26 = vmul.f32 1.442695, %v532_v23  ;;  %v531_v27 = vadd.f32 %v612_v17, %v522_v25 }
 0x271   :  { %723 = vpow2.f32 %v498_v24 }
 0x272   :  { %725 = vpow2.f32 %v534_v26  ;;  %v533_v28 = vsub.f32 0.0, %v531_v27 }
 0x274   :  { %v536_v29 = vmul.f32 1.442695, %v533_v28 }
 0x276   :  { %727 = vpow2.f32 %v536_v29 }
 0x277   :  { %v722_v30 = vpop.eup %721 }
 0x278   :  { %500 = vadd.xlane.f32.xlu0 %v722_v30 }
 0x27b   :  { %v724_v31 = vpop.eup %723 }
 0x27c   :  { %v726_v32 = vpop.eup %725  ;;  %502 = vadd.xlane.f32.xlu1 %v724_v31 }
 0x27d   :  { %v538_v33 = vadd.f32 1.0, %v726_v32 }
 0x27f   :  { %729 = vrcp.f32 %v538_v33 }
 0x280   :  { %v728_v34 = vpop.eup %727 }
 0x281   :  { %v539_v35 = vadd.f32 1.0, %v728_v34 }
 0x283   :  { %731 = vrcp.f32 %v539_v35 }
 0x289   :  { %v730_v36 = vpop.eup %729 }
 0x28d   :  { %v732_v37 = vpop.eup %731 }
 0x28e   :  { %549 = vperm.xlu0 %677, %v730_v36   ;;  %554 = vperm.xlu1 %678, %v732_v37  }
 0x305   :  { %v501_v38 = vpop.xlane.xlu0 %500 }
 0x306   :  { %733 = vrcp.f32 %v501_v38 }
 0x309   :  { %v503_v39 = vpop.xlane.xlu1 %502 }
 0x30a   :  { %735 = vrcp.f32 %v503_v39 }
 0x30d   :  { %v550_v43 = vpop.permute.xlu0 %549  ;;  %v555_v49 = vpop.permute.xlu1 %554 }
 0x310   :  { %v734_v40 = vpop.eup %733 }
 0x311   :  { %v505_v41 = vmul.f32 %v734_v40, %v722_v30 }
 0x313   :  { %v544_v42 = vsel %vm487_vm2, %v505_v41, %v909_v1 }
 0x314   :  { %v736_v44 = vpop.eup %735  ;;  %v557_v45 = vsel %vm546_vm3, %v550_v43, %v544_v42 }
 0x315   :  { %v507_v46 = vmul.f32 %v736_v44, %v724_v31  ;;  %v560_v47 = vsel %vm559_vm4, 0.0, %v557_v45 }
 0x316   :  { %562 = vst [vmem:[%s948_s7] sm:$0xff] %v560_v47 }
 0x317   :  { %v545_v48 = vsel %vm487_vm2, %v507_v46, %v914_v5 }
 0x318   :  { %v558_v50 = vsel %vm546_vm3, %v555_v49, %v545_v48 }
 0x319   :  { %v561_v51 = vsel %vm559_vm4, 0.0, %v558_v50 }
 0x31a   :  { %563 = vst [vmem:[%s948_s7 + $0x8] sm:$0xff] %v561_v51 }

// kernel: _forward_impl.7
= control target key start
LH: loop header
LB: loop body
LE: loop exit
PB: predicated region body
PF: predicated region fallthrough
CT: control target
= control target key end

     0   :  { %s4228_s18 = smov 0   ;;  %s6748_s0 = inlined_call_operand.vmem [shape: bf16[2048,32], index: 0, kind: input, shape index: {}]   ;;  %s6749_s1 = inlined_call_operand.vmem [shape: bf16[32,16], index: 1, kind: input, shape index: {}]   ;;  %s6750_s2 = inlined_call_operand.vmem [shape: f32[1,16], index: 2, kind: input, shape index: {}]   ;;  %s6751_s3 = inlined_call_operand.vmem [shape: bf16[16,2], index: 3, kind: input, shape index: {}]   ;;  %s6752_s4 = inlined_call_operand.vmem [shape: f32[1,2], index: 4, kind: input, shape index: {}]   ;;  %s6753_s5 = inlined_call_operand.vmem [shape: f32[4,1,128], index: 5, kind: output, shape index: {}]  }
   0x1 LB: > { %s4234_s19 = sadd.s32 4294967295, %s4194_s18   ;;  %p3446_p0 = scmp.ge.s32.totalorder %s4194_s18, 1  ;;  %s4194_s18 = sphi %s4228_s18, %s15_s18  }
   0x2   : > { %p188_p1 = scmp.lt.s32.totalorder %s4194_s18, 5 }
   0x4   : > { %p189_p2 = pnand %p3446_p0, %p188_p1 }
   0x6   : > { %192 = sbr.rel (%p189_p2) target bundleno = 1276 (0x4fc), region = 40 }
   0xd   : > { %v3769_v0 = vld [vmem:[%s6749_s1] sm:$0xff]   ;;  %s3447_s22 = sshll.u32 %s4234_s19, 6  ;;  %v3770_v1 = vld [vmem:[%s6749_s1 + $0x8] sm:$0xff]   ;;  %vm471_vm0 = vcmask 261120   ;;  %vm968_vm1 = vcmask 130048   ;;  %vm1354_vm2 = vcmask 15360  }
   0xe   : > { %p215_p3 = scmp.lt.s32.totalorder %s3447_s22, 255  ;;  %3620 = vmatprep.subr.bf16.mxu0 %v3769_v0  ;;  %v3803_v27 = vld [vmem:[%s6751_s3] sm:$0xff]   ;;  %s3550_s10 = sshll.u32 %s4234_s19, 9  ;;  %vm2833_vm5 = vcmask 15368   ;;  %vm2974_vm7 = vcmask 7168  }
   0xf   : > { %3621 = vmatpush3.bf16.msra.mxu0 %v3769_v0  ;;  %3688 = vmatprep.subr.bf16.mxu1 %v3803_v27  ;;  %v4320_v35 = vld [vmem:[%s6750_s2] ss:$0 sm:$0xff]  ;;  %p220_p4 = scmp.lt.s32.totalorder %s4234_s19, 3 }
  0x10   : > { %s7185_s22 = smov (!%p215_p3, %s3447_s22), 255  ;;  %3622 = vmatprep.subr.bf16.mxu0 %v3770_v1  ;;  %3689 = vmatpush3.bf16.msra.mxu1 %v3803_v27 }
  0x11   : > { %s3448_s25 = sshll.u32 %s7185_s22, 2  ;;  %s7187_s19 = smov (!%p220_p4, %s4234_s19), 3 }
  0x12   : > { %s4248_s28 = scalar_lea.vmem %s6748_s0, %s3448_s25  ;;  %s222_s13 = scalar_lea.vmem %s6753_s5, %s7187_s19 }
  0x13   : > { %3623 = vmatpush3.bf16.msra.mxu0 %v3770_v1  ;;  %v3771_v2 = vld [vmem:[%s4248_s28] sm:$0xff]   ;;  %v3772_v3 = vld [vmem:[%s4248_s28 + $0x8] sm:$0xff]   ;;  %v3773_v4 = vld [vmem:[%s4248_s28 + $0x10] sm:$0xff]  }
  0x14   : > { %3624 = vmatprep.mubr.msk.bf16.mxu0 %vm471_vm0, %v3771_v2  ;;  %v3774_v5 = vld [vmem:[%s4248_s28 + $0x18] sm:$0xff]   ;;  %v3775_v6 = vld [vmem:[%s4248_s28 + $0x20] sm:$0xff]   ;;  %v3776_v7 = vld [vmem:[%s4248_s28 + $0x28] sm:$0xff]  }
  0x15   : > { %v3777_v8 = vld [vmem:[%s4248_s28 + $0x30] sm:$0xff]   ;;  %v3778_v9 = vld [vmem:[%s4248_s28 + $0x38] sm:$0xff]   ;;  %v3779_v10 = vld [vmem:[%s4248_s28 + $0x40] sm:$0xff]  }
  0x16   : > { %3625 = vmatmul.mubr.msk.bf16.vlgmr.msra.gmra.mrb[0].mxu0 %vm471_vm0, %v3772_v3  ;;  %v3780_v11 = vld [vmem:[%s4248_s28 + $0x48] sm:$0xff]   ;;  %v3781_v12 = vld [vmem:[%s4248_s28 + $0x50] sm:$0xff]   ;;  %v3782_v13 = vld [vmem:[%s4248_s28 + $0x58] sm:$0xff]  }
  0x17   : > { %3628 = vmatprep.mubr.msk.bf16.mxu0 %vm471_vm0, %v3773_v4  ;;  %v3783_v14 = vld [vmem:[%s4248_s28 + $0x60] sm:$0xff]   ;;  %v3784_v15 = vld [vmem:[%s4248_s28 + $0x68] sm:$0xff]   ;;  %v3785_v16 = vld [vmem:[%s4248_s28 + $0x70] sm:$0xff]  }
  0x18   : > { %v3786_v17 = vld [vmem:[%s4248_s28 + $0x78] sm:$0xff]   ;;  %v3787_v18 = vld [vmem:[%s4248_s28 + $0x80] sm:$0xff]   ;;  %v3788_v19 = vld [vmem:[%s4248_s28 + $0x88] sm:$0xff]  }
  0x19   : > { %v3789_v20 = vld [vmem:[%s4248_s28 + $0x90] sm:$0xff]   ;;  %v3790_v21 = vld [vmem:[%s4248_s28 + $0x98] sm:$0xff]   ;;  %v3791_v22 = vld [vmem:[%s4248_s28 + $0xa0] sm:$0xff]  }
  0x1a   : > { %v3792_v23 = vld [vmem:[%s4248_s28 + $0xa8] sm:$0xff]   ;;  %v3793_v24 = vld [vmem:[%s4248_s28 + $0xb0] sm:$0xff]   ;;  %v3794_v25 = vld [vmem:[%s4248_s28 + $0xb8] sm:$0xff]  }
  0x1b   : > { %v3795_v26 = vld [vmem:[%s4248_s28 + $0xc0] sm:$0xff]   ;;  %v3796_v28 = vld [vmem:[%s4248_s28 + $0xc8] sm:$0xff]   ;;  %v3797_v29 = vld [vmem:[%s4248_s28 + $0xd0] sm:$0xff]  }
  0x1c   : > { %v3798_v30 = vld [vmem:[%s4248_s28 + $0xd8] sm:$0xff]   ;;  %v3799_v31 = vld [vmem:[%s4248_s28 + $0xe0] sm:$0xff]   ;;  %v3800_v32 = vld [vmem:[%s4248_s28 + $0xe8] sm:$0xff]  }
  0x1d   : > { %v3801_v33 = vld [vmem:[%s4248_s28 + $0xf0] sm:$0xff]   ;;  %v3802_v34 = vld [vmem:[%s4248_s28 + $0xf8] sm:$0xff]  }
  0x1e   : > { %3629 = vmatmul.mubr.msk.bf16.gmra.mrb[4].mxu0 %vm471_vm0, %v3774_v5 }
  0x1f   : > { %3632 = vmatprep.mubr.msk.bf16.mxu0 %vm471_vm0, %v3775_v6 }
  0x26   : > { %3633 = vmatmul.mubr.msk.bf16.gmra.mrb[8].mxu0 %vm471_vm0, %v3776_v7 }
  0x27   : > { %3636 = vmatprep.mubr.msk.bf16.mxu0 %vm471_vm0, %v3777_v8 }
  0x2e   : > { %3637 = vmatmul.mubr.msk.bf16.gmra.mrb[12].mxu0 %vm471_vm0, %v3778_v9 }
  0x2f   : > { %3640 = vmatprep.mubr.msk.bf16.mxu0 %vm471_vm0, %v3779_v10 }
  0x36   : > { %3641 = vmatmul.mubr.msk.bf16.gmra.mrb[16].mxu0 %vm471_vm0, %v3780_v11 }
  0x37   : > { %3644 = vmatprep.mubr.msk.bf16.mxu0 %vm471_vm0, %v3781_v12 }
  0x3e   : > { %3645 = vmatmul.mubr.msk.bf16.gmra.mrb[20].mxu0 %vm471_vm0, %v3782_v13 }
  0x3f   : > { %3648 = vmatprep.mubr.msk.bf16.mxu0 %vm471_vm0, %v3783_v14 }
  0x46   : > { %3649 = vmatmul.mubr.msk.bf16.gmra.mrb[24].mxu0 %vm471_vm0, %v3784_v15 }
  0x47   : > { %3652 = vmatprep.mubr.msk.bf16.mxu0 %vm471_vm0, %v3785_v16 }
  0x4e   : > { %3653 = vmatmul.mubr.msk.bf16.gmra.mrb[28].mxu0 %vm471_vm0, %v3786_v17 }
  0x4f   : > { %3656 = vmatprep.mubr.msk.bf16.mxu0 %vm471_vm0, %v3787_v18 }
  0x56   : > { %3657 = vmatmul.mubr.msk.bf16.gmra.mrb[32].mxu0 %vm471_vm0, %v3788_v19 }
  0x57   : > { %3660 = vmatprep.mubr.msk.bf16.mxu0 %vm471_vm0, %v3789_v20 }
  0x5e   : > { %3661 = vmatmul.mubr.msk.bf16.gmra.mrb[36].mxu0 %vm471_vm0, %v3790_v21 }
  0x5f   : > { %3664 = vmatprep.mubr.msk.bf16.mxu0 %vm471_vm0, %v3791_v22 }
  0x66   : > { %3665 = vmatmul.mubr.msk.bf16.gmra.mrb[40].mxu0 %vm471_vm0, %v3792_v23 }
  0x67   : > { %3668 = vmatprep.mubr.msk.bf16.mxu0 %vm471_vm0, %v3793_v24 }
  0x6e   : > { %3669 = vmatmul.mubr.msk.bf16.gmra.mrb[44].mxu0 %vm471_vm0, %v3794_v25 }
  0x6f   : > { %3672 = vmatprep.mubr.msk.bf16.mxu0 %vm471_vm0, %v3795_v26 }
  0x76   : > { %3673 = vmatmul.mubr.msk.bf16.gmra.mrb[48].mxu0 %vm471_vm0, %v3796_v28 }
  0x77   : > { %3676 = vmatprep.mubr.msk.bf16.mxu0 %vm471_vm0, %v3797_v29 }
  0x7e   : > { %3677 = vmatmul.mubr.msk.bf16.gmra.mrb[52].mxu0 %vm471_vm0, %v3798_v30 }
  0x7f   : > { %3680 = vmatprep.mubr.msk.bf16.mxu0 %vm471_vm0, %v3799_v31 }
  0x86   : > { %3681 = vmatmul.mubr.msk.bf16.gmra.mrb[56].mxu0 %vm471_vm0, %v3800_v32 }
  0x87   : > { %3684 = vmatprep.mubr.msk.bf16.mxu0 %vm471_vm0, %v3801_v33 }
  0x8e   : > { %3685 = vmatmul.mubr.msk.bf16.gmra.mrb[60].mxu0 %vm471_vm0, %v3802_v34 }
  0xe9   : > { %v3626_v36 = vpop.f32.mrb[0].mxu0 }
  0xea   : > { %v611_v37 = vadd.f32 %v3626_v36, %v4320_v35  ;;  %v602_v38 = vpop.f32.mrb[1].mxu0 }
  0xeb   : > { %v603_v39 = vadd.f32 %v4320_v35, %v602_v38  ;;  %v3627_v40 = vpop.f32.mrb[2].mxu0 }
  0xec   : > { %v614_v41 = vadd.f32 %v3627_v40, %v4320_v35  ;;  %v605_v42 = vpop.f32.mrb[3].mxu0  ;;  %v859_v44 = vmax.f32 %v611_v37, 0.0 }
  0xed   : > { %v606_v43 = vadd.f32 %v4320_v35, %v605_v42  ;;  %v857_v46 = vmax.f32 %v603_v39, 0.0 }
  0xee   : > { %v860_v45 = vmax.f32 %v614_v41, 0.0 }
  0xef   : > { %v858_v47 = vmax.f32 %v606_v43, 0.0 }
  0xf0   : > { %v922_v48 = vpack.c.bf16 %v860_v45, %v859_v44 }
  0xf1   : > { %v3630_v49 = vpop.f32.mrb[4].mxu0  ;;  %v921_v50 = vpack.c.bf16 %v858_v47, %v857_v46 }
  0xf2   : > { %v627_v51 = vadd.f32 %v3630_v49, %v4320_v35  ;;  %v618_v52 = vpop.f32.mrb[5].mxu0 }
  0xf3   : > { %v619_v53 = vadd.f32 %v4320_v35, %v618_v52  ;;  %v3631_v54 = vpop.f32.mrb[6].mxu0  ;;  %3690 = vmatprep.mubr.msk.bf16.mxu1 %vm968_vm1, %v921_v50 }
  0xf4   : > { %v863_v55 = vmax.f32 %v627_v51, 0.0  ;;  %v630_v56 = vadd.f32 %v3631_v54, %v4320_v35  ;;  %v621_v57 = vpop.f32.mrb[7].mxu0  ;;  %3691 = vmatmul.mubr.msk.bf16.vlgmr.msra.gmra.mrb[0].mxu1 %vm968_vm1, %v922_v48 }
  0xf5   : > { %v861_v58 = vmax.f32 %v619_v53, 0.0  ;;  %v622_v59 = vadd.f32 %v4320_v35, %v621_v57 }
  0xf6   : > { %v864_v60 = vmax.f32 %v630_v56, 0.0 }
  0xf7   : > { %v862_v61 = vmax.f32 %v622_v59, 0.0 }
  0xf8   : > { %v924_v62 = vpack.c.bf16 %v864_v60, %v863_v55 }
  0xf9   : > { %v923_v63 = vpack.c.bf16 %v862_v61, %v861_v58  ;;  %v3634_v0 = vpop.f32.mrb[8].mxu0 }
  0xfa   : > { %v643_v1 = vadd.f32 %v3634_v0, %v4320_v35  ;;  %v634_v2 = vpop.f32.mrb[9].mxu0 }
  0xfb   : > { %v635_v3 = vadd.f32 %v4320_v35, %v634_v2  ;;  %v3635_v4 = vpop.f32.mrb[10].mxu0  ;;  %3694 = vmatprep.mubr.msk.bf16.mxu1 %vm968_vm1, %v923_v63 }
  0xfc   : > { %v867_v5 = vmax.f32 %v643_v1, 0.0  ;;  %v646_v6 = vadd.f32 %v3635_v4, %v4320_v35  ;;  %v637_v7 = vpop.f32.mrb[11].mxu0  ;;  %3695 = vmatmul.mubr.msk.bf16.gmra.mrb[4].mxu1 %vm968_vm1, %v924_v62 }
  0xfd   : > { %v865_v8 = vmax.f32 %v635_v3, 0.0  ;;  %v638_v9 = vadd.f32 %v4320_v35, %v637_v7 }
  0xfe   : > { %v868_v10 = vmax.f32 %v646_v6, 0.0 }
  0xff   : > { %v866_v11 = vmax.f32 %v638_v9, 0.0 }
 0x100   : > { %v926_v12 = vpack.c.bf16 %v868_v10, %v867_v5 }
 0x101   : > { %v925_v13 = vpack.c.bf16 %v866_v11, %v865_v8  ;;  %v3638_v14 = vpop.f32.mrb[12].mxu0 }
 0x102   : > { %v659_v15 = vadd.f32 %v3638_v14, %v4320_v35  ;;  %v650_v16 = vpop.f32.mrb[13].mxu0 }
 0x103   : > { %v651_v17 = vadd.f32 %v4320_v35, %v650_v16  ;;  %v3639_v18 = vpop.f32.mrb[14].mxu0  ;;  %3698 = vmatprep.mubr.msk.bf16.mxu1 %vm968_vm1, %v925_v13 }
 0x104   : > { %v871_v19 = vmax.f32 %v659_v15, 0.0  ;;  %v662_v20 = vadd.f32 %v3639_v18, %v4320_v35  ;;  %v653_v21 = vpop.f32.mrb[15].mxu0  ;;  %3699 = vmatmul.mubr.msk.bf16.gmra.mrb[8].mxu1 %vm968_vm1, %v926_v12 }
 0x105   : > { %v869_v22 = vmax.f32 %v651_v17, 0.0  ;;  %v654_v23 = vadd.f32 %v4320_v35, %v653_v21 }
 0x106   : > { %v872_v24 = vmax.f32 %v662_v20, 0.0 }
 0x107   : > { %v870_v25 = vmax.f32 %v654_v23, 0.0 }
 0x108   : > { %v928_v26 = vpack.c.bf16 %v872_v24, %v871_v19 }
 0x109   : > { %v927_v27 = vpack.c.bf16 %v870_v25, %v869_v22  ;;  %v3642_v28 = vpop.f32.mrb[16].mxu0 }
 0x10a   : > { %v675_v29 = vadd.f32 %v3642_v28, %v4320_v35  ;;  %v666_v30 = vpop.f32.mrb[17].mxu0 }
 0x10b   : > { %v667_v31 = vadd.f32 %v4320_v35, %v666_v30  ;;  %v3643_v32 = vpop.f32.mrb[18].mxu0  ;;  %3702 = vmatprep.mubr.msk.bf16.mxu1 %vm968_vm1, %v927_v27 }
 0x10c   : > { %v875_v33 = vmax.f32 %v675_v29, 0.0  ;;  %v678_v34 = vadd.f32 %v3643_v32, %v4320_v35  ;;  %v669_v36 = vpop.f32.mrb[19].mxu0  ;;  %3703 = vmatmul.mubr.msk.bf16.gmra.mrb[12].mxu1 %vm968_vm1, %v928_v26 }
 0x10d   : > { %v873_v37 = vmax.f32 %v667_v31, 0.0  ;;  %v670_v38 = vadd.f32 %v4320_v35, %v669_v36 }
 0x10e   : > { %v876_v39 = vmax.f32 %v678_v34, 0.0 }
 0x10f   : > { %v874_v40 = vmax.f32 %v670_v38, 0.0 }
 0x110   : > { %v930_v41 = vpack.c.bf16 %v876_v39, %v875_v33 }
 0x111   : > { %v929_v42 = vpack.c.bf16 %v874_v40, %v873_v37  ;;  %v3646_v43 = vpop.f32.mrb[20].mxu0 }
 0x112   : > { %v691_v44 = vadd.f32 %v3646_v43, %v4320_v35  ;;  %v682_v45 = vpop.f32.mrb[21].mxu0 }
 0x113   : > { %v683_v46 = vadd.f32 %v4320_v35, %v682_v45  ;;  %v3647_v47 = vpop.f32.mrb[22].mxu0  ;;  %3706 = vmatprep.mubr.msk.bf16.mxu1 %vm968_vm1, %v929_v42 }
 0x114   : > { %v879_v48 = vmax.f32 %v691_v44, 0.0  ;;  %v694_v49 = vadd.f32 %v3647_v47, %v4320_v35  ;;  %v685_v50 = vpop.f32.mrb[23].mxu0  ;;  %3707 = vmatmul.mubr.msk.bf16.gmra.mrb[16].mxu1 %vm968_vm1, %v930_v41 }
 0x115   : > { %v877_v51 = vmax.f32 %v683_v46, 0.0  ;;  %v686_v52 = vadd.f32 %v4320_v35, %v685_v50 }
 0x116   : > { %v880_v53 = vmax.f32 %v694_v49, 0.0 }
 0x117   : > { %v878_v54 = vmax.f32 %v686_v52, 0.0 }
 0x118   : > { %v932_v55 = vpack.c.bf16 %v880_v53, %v879_v48 }
 0x119   : > { %v931_v56 = vpack.c.bf16 %v878_v54, %v877_v51  ;;  %v3650_v57 = vpop.f32.mrb[24].mxu0 }
 0x11a   : > { %v707_v58 = vadd.f32 %v3650_v57, %v4320_v35  ;;  %v698_v59 = vpop.f32.mrb[25].mxu0 }
 0x11b   : > { %v699_v60 = vadd.f32 %v4320_v35, %v698_v59  ;;  %v3651_v61 = vpop.f32.mrb[26].mxu0  ;;  %3710 = vmatprep.mubr.msk.bf16.mxu1 %vm968_vm1, %v931_v56 }
 0x11c   : > { %v883_v62 = vmax.f32 %v707_v58, 0.0  ;;  %v710_v63 = vadd.f32 %v3651_v61, %v4320_v35  ;;  %v701_v0 = vpop.f32.mrb[27].mxu0  ;;  %3711 = vmatmul.mubr.msk.bf16.gmra.mrb[20].mxu1 %vm968_vm1, %v932_v55 }
 0x11d   : > { %v881_v1 = vmax.f32 %v699_v60, 0.0  ;;  %v702_v2 = vadd.f32 %v4320_v35, %v701_v0 }
 0x11e   : > { %v884_v3 = vmax.f32 %v710_v63, 0.0 }
 0x11f   : > { %v882_v4 = vmax.f32 %v702_v2, 0.0 }
 0x120   : > { %v934_v5 = vpack.c.bf16 %v884_v3, %v883_v62 }
 0x121   : > { %v933_v6 = vpack.c.bf16 %v882_v4, %v881_v1  ;;  %v3654_v7 = vpop.f32.mrb[28].mxu0 }
 0x122   : > { %v723_v8 = vadd.f32 %v3654_v7, %v4320_v35  ;;  %v714_v9 = vpop.f32.mrb[29].mxu0 }
 0x123   : > { %v715_v10 = vadd.f32 %v4320_v35, %v714_v9  ;;  %v3655_v11 = vpop.f32.mrb[30].mxu0  ;;  %3714 = vmatprep.mubr.msk.bf16.mxu1 %vm968_vm1, %v933_v6 }
 0x124   : > { %v887_v12 = vmax.f32 %v723_v8, 0.0  ;;  %v726_v13 = vadd.f32 %v3655_v11, %v4320_v35  ;;  %v717_v14 = vpop.f32.mrb[31].mxu0  ;;  %3715 = vmatmul.mubr.msk.bf16.gmra.mrb[24].mxu1 %vm968_vm1, %v934_v5 }
 0x125   : > { %v885_v15 = vmax.f32 %v715_v10, 0.0  ;;  %v718_v16 = vadd.f32 %v4320_v35, %v717_v14 }
 0x126   : > { %v888_v17 = vmax.f32 %v726_v13, 0.0 }
 0x127   : > { %v886_v18 = vmax.f32 %v718_v16, 0.0 }
 0x128   : > { %v936_v19 = vpack.c.bf16 %v888_v17, %v887_v12 }
 0x129   : > { %v935_v20 = vpack.c.bf16 %v886_v18, %v885_v15  ;;  %v3658_v21 = vpop.f32.mrb[32].mxu0 }
 0x12a   : > { %v739_v22 = vadd.f32 %v3658_v21, %v4320_v35  ;;  %v730_v23 = vpop.f32.mrb[33].mxu0 }
 0x12b   : > { %v731_v24 = vadd.f32 %v4320_v35, %v730_v23  ;;  %v3659_v25 = vpop.f32.mrb[34].mxu0  ;;  %3718 = vmatprep.mubr.msk.bf16.mxu1 %vm968_vm1, %v935_v20 }
 0x12c   : > { %v891_v26 = vmax.f32 %v739_v22, 0.0  ;;  %v742_v27 = vadd.f32 %v3659_v25, %v4320_v35  ;;  %v733_v28 = vpop.f32.mrb[35].mxu0  ;;  %3719 = vmatmul.mubr.msk.bf16.gmra.mrb[28].mxu1 %vm968_vm1, %v936_v19 }
 0x12d   : > { %v889_v29 = vmax.f32 %v731_v24, 0.0  ;;  %v734_v30 = vadd.f32 %v4320_v35, %v733_v28 }
 0x12e   : > { %v892_v31 = vmax.f32 %v742_v27, 0.0 }
 0x12f   : > { %v890_v32 = vmax.f32 %v734_v30, 0.0 }
 0x130   : > { %v938_v33 = vpack.c.bf16 %v892_v31, %v891_v26 }
 0x131   : > { %v937_v34 = vpack.c.bf16 %v890_v32, %v889_v29  ;;  %v3662_v36 = vpop.f32.mrb[36].mxu0 }
 0x132   : > { %v755_v37 = vadd.f32 %v3662_v36, %v4320_v35  ;;  %v746_v38 = vpop.f32.mrb[37].mxu0 }
 0x133   : > { %v747_v39 = vadd.f32 %v4320_v35, %v746_v38  ;;  %v3663_v40 = vpop.f32.mrb[38].mxu0  ;;  %3722 = vmatprep.mubr.msk.bf16.mxu1 %vm968_vm1, %v937_v34 }
 0x134   : > { %v895_v41 = vmax.f32 %v755_v37, 0.0  ;;  %v758_v42 = vadd.f32 %v3663_v40, %v4320_v35  ;;  %v749_v43 = vpop.f32.mrb[39].mxu0  ;;  %3723 = vmatmul.mubr.msk.bf16.gmra.mrb[32].mxu1 %vm968_vm1, %v938_v33 }
 0x135   : > { %v893_v44 = vmax.f32 %v747_v39, 0.0  ;;  %v750_v45 = vadd.f32 %v4320_v35, %v749_v43 }
 0x136   : > { %v896_v46 = vmax.f32 %v758_v42, 0.0 }
 0x137   : > { %v894_v47 = vmax.f32 %v750_v45, 0.0 }
 0x138   : > { %v940_v48 = vpack.c.bf16 %v896_v46, %v895_v41 }
 0x139   : > { %v939_v49 = vpack.c.bf16 %v894_v47, %v893_v44  ;;  %v3666_v50 = vpop.f32.mrb[40].mxu0 }
 0x13a   : > { %v771_v51 = vadd.f32 %v3666_v50, %v4320_v35  ;;  %v762_v52 = vpop.f32.mrb[41].mxu0 }
 0x13b   : > { %v763_v53 = vadd.f32 %v4320_v35, %v762_v52  ;;  %v3667_v54 = vpop.f32.mrb[42].mxu0  ;;  %3726 = vmatprep.mubr.msk.bf16.mxu1 %vm968_vm1, %v939_v49 }
 0x13c   : > { %v899_v55 = vmax.f32 %v771_v51, 0.0  ;;  %v774_v56 = vadd.f32 %v3667_v54, %v4320_v35  ;;  %v765_v57 = vpop.f32.mrb[43].mxu0  ;;  %3727 = vmatmul.mubr.msk.bf16.gmra.mrb[36].mxu1 %vm968_vm1, %v940_v48 }
 0x13d   : > { %v897_v58 = vmax.f32 %v763_v53, 0.0  ;;  %v766_v59 = vadd.f32 %v4320_v35, %v765_v57 }
 0x13e   : > { %v900_v60 = vmax.f32 %v774_v56, 0.0 }
 0x13f   : > { %v898_v61 = vmax.f32 %v766_v59, 0.0 }
 0x140   : > { %v942_v62 = vpack.c.bf16 %v900_v60, %v899_v55 }
 0x141   : > { %v941_v63 = vpack.c.bf16 %v898_v61, %v897_v58  ;;  %v3670_v0 = vpop.f32.mrb[44].mxu0 }
 0x142   : > { %v787_v1 = vadd.f32 %v3670_v0, %v4320_v35  ;;  %v778_v2 = vpop.f32.mrb[45].mxu0 }
 0x143   : > { %v779_v3 = vadd.f32 %v4320_v35, %v778_v2  ;;  %v3671_v4 = vpop.f32.mrb[46].mxu0  ;;  %3730 = vmatprep.mubr.msk.bf16.mxu1 %vm968_vm1, %v941_v63 }
 0x144   : > { %v903_v5 = vmax.f32 %v787_v1, 0.0  ;;  %v790_v6 = vadd.f32 %v3671_v4, %v4320_v35  ;;  %v781_v7 = vpop.f32.mrb[47].mxu0  ;;  %3731 = vmatmul.mubr.msk.bf16.gmra.mrb[40].mxu1 %vm968_vm1, %v942_v62 }
 0x145   : > { %v901_v8 = vmax.f32 %v779_v3, 0.0  ;;  %v782_v9 = vadd.f32 %v4320_v35, %v781_v7  ;;  %v4421_v7 = vld [vmem:[%s6752_s4] ss:$0 sm:$0xff] }
 0x146   : > { %v904_v10 = vmax.f32 %v790_v6, 0.0 }
 0x147   : > { %v902_v11 = vmax.f32 %v782_v9, 0.0 }
 0x148   : > { %v944_v12 = vpack.c.bf16 %v904_v10, %v903_v5 }
 0x149   : > { %v943_v13 = vpack.c.bf16 %v902_v11, %v901_v8  ;;  %v3674_v14 = vpop.f32.mrb[48].mxu0 }
 0x14a   : > { %v803_v15 = vadd.f32 %v3674_v14, %v4320_v35  ;;  %v794_v16 = vpop.f32.mrb[49].mxu0 }
 0x14b   : > { %3734 = vmatprep.mubr.msk.bf16.mxu1 %vm968_vm1, %v943_v13  ;;  %v795_v17 = vadd.f32 %v4320_v35, %v794_v16  ;;  %v3675_v18 = vpop.f32.mrb[50].mxu0 }
 0x14c   : > { %3735 = vmatmul.mubr.msk.bf16.gmra.mrb[44].mxu1 %vm968_vm1, %v944_v12  ;;  %v907_v19 = vmax.f32 %v803_v15, 0.0  ;;  %v806_v20 = vadd.f32 %v3675_v18, %v4320_v35  ;;  %v797_v21 = vpop.f32.mrb[51].mxu0 }
 0x14d   : > { %v905_v22 = vmax.f32 %v795_v17, 0.0  ;;  %v798_v23 = vadd.f32 %v4320_v35, %v797_v21 }
 0x14e   : > { %v908_v24 = vmax.f32 %v806_v20, 0.0 }
 0x14f   : > { %v906_v25 = vmax.f32 %v798_v23, 0.0 }
 0x150   : > { %v946_v26 = vpack.c.bf16 %v908_v24, %v907_v19 }
 0x151   : > { %v945_v27 = vpack.c.bf16 %v906_v25, %v905_v22  ;;  %v3678_v28 = vpop.f32.mrb[52].mxu0 }
 0x152   : > { %v819_v29 = vadd.f32 %v3678_v28, %v4320_v35  ;;  %v810_v30 = vpop.f32.mrb[53].mxu0 }
 0x153   : > { %3738 = vmatprep.mubr.msk.bf16.mxu1 %vm968_vm1, %v945_v27  ;;  %v811_v31 = vadd.f32 %v4320_v35, %v810_v30  ;;  %v3679_v32 = vpop.f32.mrb[54].mxu0 }
 0x154   : > { %3739 = vmatmul.mubr.msk.bf16.gmra.mrb[48].mxu1 %vm968_vm1, %v946_v26  ;;  %v911_v33 = vmax.f32 %v819_v29, 0.0  ;;  %v822_v34 = vadd.f32 %v3679_v32, %v4320_v35  ;;  %v813_v36 = vpop.f32.mrb[55].mxu0 }
 0x155   : > { %v909_v37 = vmax.f32 %v811_v31, 0.0  ;;  %v814_v38 = vadd.f32 %v4320_v35, %v813_v36 }
 0x156   : > { %v912_v39 = vmax.f32 %v822_v34, 0.0 }
 0x157   : > { %v910_v40 = vmax.f32 %v814_v38, 0.0 }
 0x158   : > { %v948_v41 = vpack.c.bf16 %v912_v39, %v911_v33 }
 0x159   : > { %v947_v42 = vpack.c.bf16 %v910_v40, %v909_v37  ;;  %v3682_v43 = vpop.f32.mrb[56].mxu0 }
 0x15a   : > { %v835_v44 = vadd.f32 %v3682_v43, %v4320_v35  ;;  %v826_v45 = vpop.f32.mrb[57].mxu0 }
 0x15b   : > { %3742 = vmatprep.mubr.msk.bf16.mxu1 %vm968_vm1, %v947_v42  ;;  %v827_v46 = vadd.f32 %v4320_v35, %v826_v45  ;;  %v3683_v47 = vpop.f32.mrb[58].mxu0 }
 0x15c   : > { %3743 = vmatmul.mubr.msk.bf16.gmra.mrb[52].mxu1 %vm968_vm1, %v948_v41  ;;  %v915_v48 = vmax.f32 %v835_v44, 0.0  ;;  %v838_v49 = vadd.f32 %v3683_v47, %v4320_v35  ;;  %v829_v50 = vpop.f32.mrb[59].mxu0 }
 0x15d   : > { %v913_v51 = vmax.f32 %v827_v46, 0.0  ;;  %v830_v52 = vadd.f32 %v4320_v35, %v829_v50 }
 0x15e   : > { %v916_v53 = vmax.f32 %v838_v49, 0.0 }
 0x15f   : > { %v914_v54 = vmax.f32 %v830_v52, 0.0 }
 0x160   : > { %v950_v55 = vpack.c.bf16 %v916_v53, %v915_v48 }
 0x161   : > { %v949_v56 = vpack.c.bf16 %v914_v54, %v913_v51  ;;  %v3686_v57 = vpop.f32.mrb[60].mxu0 }
 0x162   : > { %v851_v58 = vadd.f32 %v3686_v57, %v4320_v35  ;;  %v842_v59 = vpop.f32.mrb[61].mxu0 }
 0x163   : > { %3746 = vmatprep.mubr.msk.bf16.mxu1 %vm968_vm1, %v949_v56  ;;  %v843_v60 = vadd.f32 %v4320_v35, %v842_v59  ;;  %v3687_v61 = vpop.f32.mrb[62].mxu0 }
 0x164   : > { %3747 = vmatmul.mubr.msk.bf16.gmra.mrb[56].mxu1 %vm968_vm1, %v950_v55  ;;  %v919_v62 = vmax.f32 %v851_v58, 0.0  ;;  %v854_v63 = vadd.f32 %v3687_v61, %v4320_v35  ;;  %v845_v0 = vpop.f32.mrb[63].mxu0 }
 0x165   : > { %v917_v1 = vmax.f32 %v843_v60, 0.0  ;;  %v846_v2 = vadd.f32 %v4320_v35, %v845_v0 }
 0x166   : > { %v920_v3 = vmax.f32 %v854_v63, 0.0 }
 0x167   : > { %v918_v4 = vmax.f32 %v846_v2, 0.0 }
 0x168   : > { %v952_v5 = vpack.c.bf16 %v920_v3, %v919_v62 }
 0x169   : > { %v951_v6 = vpack.c.bf16 %v918_v4, %v917_v1 }
 0x16b   : > { %3750 = vmatprep.mubr.msk.bf16.mxu1 %vm968_vm1, %v951_v6 }
 0x16c   : > { %3751 = vmatmul.mubr.msk.bf16.gmra.mrb[60].mxu1 %vm968_vm1, %v952_v5 }
 0x1c7   : > { %v3692_v8 = vpop.f32.mrb[0].mxu1 }
 0x1c8   : > { %v4424_v9 = vadd.f32 %v3692_v8, %v4421_v7  ;;  %v1099_v10 = vpop.f32.mrb[1].mxu1 }
 0x1c9   : > { %v4427_v35 = vadd.f32 %v4421_v7, %v1099_v10  ;;  %v3693_v11 = vpop.f32.mrb[2].mxu1 }
 0x1ca   : > { %6897 = vst [vmem:[#allocation2_spill] sm:$0xff] %v4424_v9  ;;  %v4430_v12 = vadd.f32 %v3693_v11, %v4421_v7  ;;  %v1102_v13 = vpop.f32.mrb[3].mxu1  ;;  %v1361_v14 = vsel %vm1354_vm2, %v4424_v9, -inf }
 0x1cb   : > { %6898 = vst [vmem:[#allocation3_spill] sm:$0xff] %v4427_v35  ;;  %v4435_v15 = vadd.f32 %v4421_v7, %v1102_v13  ;;  %1362 = vmax.xlane.f32.xlu1 %v1361_v14  ;;  %v1355_v16 = vsel %vm1354_vm2, %v4427_v35, -inf }
 0x1cc   : > { %6899 = vst [vmem:[#allocation4_spill] sm:$0xff] %v4430_v12  ;;  %1356 = vmax.xlane.f32.xlu0 %v1355_v16  ;;  %v1364_v17 = vsel %vm1354_vm2, %v4430_v12, -inf }
 0x1cd   : > { %6900 = vst [vmem:[#allocation5_spill] sm:$0xff] %v4435_v15  ;;  %v1358_v19 = vsel %vm1354_vm2, %v4435_v15, -inf }
 0x1cf   : > { %1365 = vmax.xlane.f32.xlu1 %v1364_v17  ;;  %v3696_v18 = vpop.f32.mrb[4].mxu1 }
 0x1d0   : > { %v4444_v20 = vadd.f32 %v3696_v18, %v4421_v7  ;;  %v1115_v21 = vpop.f32.mrb[5].mxu1  ;;  %1359 = vmax.xlane.f32.xlu0 %v1358_v19 }
 0x1d1   : > { %v4447_v22 = vadd.f32 %v4421_v7, %v1115_v21  ;;  %v3697_v23 = vpop.f32.mrb[6].mxu1 }
 0x1d2   : > { %6901 = vst [vmem:[#allocation6_spill] sm:$0xff] %v4444_v20  ;;  %v4450_v24 = vadd.f32 %v3697_v23, %v4421_v7  ;;  %v1373_v25 = vsel %vm1354_vm2, %v4444_v20, -inf  ;;  %v1118_v26 = vpop.f32.mrb[7].mxu1 }
 0x1d3   : > { %6902 = vst [vmem:[#allocation7_spill] sm:$0xff] %v4447_v22  ;;  %v4455_v27 = vadd.f32 %v4421_v7, %v1118_v26  ;;  %v1367_v29 = vsel %vm1354_vm2, %v4447_v22, -inf }
 0x1d4   : > { %6903 = vst [vmem:[#allocation8_spill] sm:$0xff] %v4450_v24  ;;  %1374 = vmax.xlane.f32.xlu0 %v1373_v25  ;;  %v1376_v28 = vsel %vm1354_vm2, %v4450_v24, -inf }
 0x1d5   : > { %6904 = vst [vmem:[#allocation9_spill] sm:$0xff] %v4455_v27  ;;  %1377 = vmax.xlane.f32.xlu1 %v1376_v28  ;;  %v1370_v30 = vsel %vm1354_vm2, %v4455_v27, -inf }
 0x1d7   : > { %v3700_v31 = vpop.f32.mrb[8].mxu1 }
 0x1d8   : > { %v4464_v32 = vadd.f32 %v3700_v31, %v4421_v7  ;;  %v1131_v33 = vpop.f32.mrb[9].mxu1  ;;  %1368 = vmax.xlane.f32.xlu0 %v1367_v29 }
 0x1d9   : > { %v4467_v34 = vadd.f32 %v4421_v7, %v1131_v33  ;;  %v3701_v36 = vpop.f32.mrb[10].mxu1  ;;  %1371 = vmax.xlane.f32.xlu1 %v1370_v30 }
 0x1da   : > { %6905 = vst [vmem:[#allocation10_spill] sm:$0xff] %v4464_v32  ;;  %v4470_v37 = vadd.f32 %v3701_v36, %v4421_v7  ;;  %v1385_v38 = vsel %vm1354_vm2, %v4464_v32, -inf  ;;  %v1134_v39 = vpop.f32.mrb[11].mxu1 }
 0x1db   : > { %6906 = vst [vmem:[#allocation11_spill] sm:$0xff] %v4467_v34  ;;  %v4475_v40 = vadd.f32 %v4421_v7, %v1134_v39  ;;  %v1379_v42 = vsel %vm1354_vm2, %v4467_v34, -inf }
 0x1dc   : > { %6907 = vst [vmem:[#allocation12_spill] sm:$0xff] %v4470_v37  ;;  %1386 = vmax.xlane.f32.xlu0 %v1385_v38  ;;  %v1388_v41 = vsel %vm1354_vm2, %v4470_v37, -inf }
 0x1dd   : > { %6908 = vst [vmem:[#allocation13_spill] sm:$0xff] %v4475_v40  ;;  %1389 = vmax.xlane.f32.xlu1 %v1388_v41  ;;  %v1382_v43 = vsel %vm1354_vm2, %v4475_v40, -inf }
 0x1df   : > { %v3704_v44 = vpop.f32.mrb[12].mxu1 }
 0x1e0   : > { %v4484_v45 = vadd.f32 %v3704_v44, %v4421_v7  ;;  %v1147_v46 = vpop.f32.mrb[13].mxu1  ;;  %1380 = vmax.xlane.f32.xlu0 %v1379_v42 }
 0x1e1   : > { %v4487_v47 = vadd.f32 %v4421_v7, %v1147_v46  ;;  %v3705_v48 = vpop.f32.mrb[14].mxu1  ;;  %1383 = vmax.xlane.f32.xlu1 %v1382_v43 }
 0x1e2   : > { %6909 = vst [vmem:[#allocation14_spill] sm:$0xff] %v4484_v45  ;;  %v4490_v49 = vadd.f32 %v3705_v48, %v4421_v7  ;;  %v1397_v50 = vsel %vm1354_vm2, %v4484_v45, -inf  ;;  %v1150_v51 = vpop.f32.mrb[15].mxu1 }
 0x1e3   : > { %6910 = vst [vmem:[#allocation15_spill] sm:$0xff] %v4487_v47  ;;  %v4495_v52 = vadd.f32 %v4421_v7, %v1150_v51  ;;  %v1391_v54 = vsel %vm1354_vm2, %v4487_v47, -inf }
 0x1e4   : > { %1398 = vmax.xlane.f32.xlu0 %v1397_v50  ;;  %v1400_v53 = vsel %vm1354_vm2, %v4490_v49, -inf }
 0x1e5   : > { %1401 = vmax.xlane.f32.xlu1 %v1400_v53  ;;  %v1394_v55 = vsel %vm1354_vm2, %v4495_v52, -inf }
 0x1e7   : > { %v3708_v56 = vpop.f32.mrb[16].mxu1 }
 0x1e8   : > { %v4504_v57 = vadd.f32 %v3708_v56, %v4421_v7  ;;  %v1163_v58 = vpop.f32.mrb[17].mxu1  ;;  %1392 = vmax.xlane.f32.xlu0 %v1391_v54 }
 0x1e9   : > { %v4507_v59 = vadd.f32 %v4421_v7, %v1163_v58  ;;  %v3709_v60 = vpop.f32.mrb[18].mxu1  ;;  %1395 = vmax.xlane.f32.xlu1 %v1394_v55 }
 0x1ea   : > { %6911 = vst [vmem:[#allocation16_spill] sm:$0xff] %v4504_v57  ;;  %v4510_v61 = vadd.f32 %v3709_v60, %v4421_v7  ;;  %v1409_v62 = vsel %vm1354_vm2, %v4504_v57, -inf  ;;  %v1166_v63 = vpop.f32.mrb[19].mxu1 }
 0x1eb   : > { %6912 = vst [vmem:[#allocation17_spill] sm:$0xff] %v4507_v59  ;;  %v4515_v0 = vadd.f32 %v4421_v7, %v1166_v63  ;;  %v1403_v2 = vsel %vm1354_vm2, %v4507_v59, -inf }
 0x1ec   : > { %6913 = vst [vmem:[#allocation18_spill] sm:$0xff] %v4510_v61  ;;  %1410 = vmax.xlane.f32.xlu0 %v1409_v62  ;;  %v1412_v1 = vsel %vm1354_vm2, %v4510_v61, -inf }
 0x1ed   : > { %6914 = vst [vmem:[#allocation19_spill] sm:$0xff] %v4515_v0  ;;  %1413 = vmax.xlane.f32.xlu1 %v1412_v1  ;;  %v1406_v3 = vsel %vm1354_vm2, %v4515_v0, -inf }
 0x1ef   : > { %v3712_v4 = vpop.f32.mrb[20].mxu1 }
 0x1f0   : > { %v4524_v5 = vadd.f32 %v3712_v4, %v4421_v7  ;;  %v1179_v6 = vpop.f32.mrb[21].mxu1  ;;  %1404 = vmax.xlane.f32.xlu0 %v1403_v2 }
 0x1f1   : > { %v4527_v8 = vadd.f32 %v4421_v7, %v1179_v6  ;;  %v3713_v10 = vpop.f32.mrb[22].mxu1  ;;  %1407 = vmax.xlane.f32.xlu1 %v1406_v3 }
 0x1f2   : > { %6915 = vst [vmem:[#allocation20_spill] sm:$0xff] %v4524_v5  ;;  %v4530_v11 = vadd.f32 %v3713_v10, %v4421_v7  ;;  %v1421_v13 = vsel %vm1354_vm2, %v4524_v5, -inf  ;;  %v1182_v14 = vpop.f32.mrb[23].mxu1 }
 0x1f3   : > { %v4535_v16 = vadd.f32 %v4421_v7, %v1182_v14  ;;  %v1415_v18 = vsel %vm1354_vm2, %v4527_v8, -inf }
 0x1f4   : > { %6916 = vst [vmem:[#allocation21_spill] sm:$0xff] %v4530_v11  ;;  %1422 = vmax.xlane.f32.xlu0 %v1421_v13  ;;  %v1424_v17 = vsel %vm1354_vm2, %v4530_v11, -inf }
 0x1f5   : > { %6917 = vst [vmem:[#allocation22_spill] sm:$0xff] %v4535_v16  ;;  %1425 = vmax.xlane.f32.xlu1 %v1424_v17  ;;  %v1418_v19 = vsel %vm1354_vm2, %v4535_v16, -inf }
 0x1f7   : > { %v3716_v21 = vpop.f32.mrb[24].mxu1 }
 0x1f8   : > { %v4544_v23 = vadd.f32 %v3716_v21, %v4421_v7  ;;  %v1195_v25 = vpop.f32.mrb[25].mxu1  ;;  %1416 = vmax.xlane.f32.xlu0 %v1415_v18 }
 0x1f9   : > { %v4547_v26 = vadd.f32 %v4421_v7, %v1195_v25  ;;  %v3717_v28 = vpop.f32.mrb[26].mxu1  ;;  %1419 = vmax.xlane.f32.xlu1 %v1418_v19 }
 0x1fa   : > { %6918 = vst [vmem:[#allocation23_spill] sm:$0xff] %v4544_v23  ;;  %v4550_v29 = vadd.f32 %v3717_v28, %v4421_v7  ;;  %v1433_v30 = vsel %vm1354_vm2, %v4544_v23, -inf  ;;  %v1198_v31 = vpop.f32.mrb[27].mxu1 }
 0x1fb   : > { %6919 = vst [vmem:[#allocation24_spill] sm:$0xff] %v4547_v26  ;;  %v4555_v33 = vadd.f32 %v4421_v7, %v1198_v31  ;;  %v1427_v38 = vsel %vm1354_vm2, %v4547_v26, -inf }
 0x1fc   : > { %6920 = vst [vmem:[#allocation25_spill] sm:$0xff] %v4550_v29  ;;  %1434 = vmax.xlane.f32.xlu0 %v1433_v30  ;;  %v1436_v36 = vsel %vm1354_vm2, %v4550_v29, -inf }
 0x1fd   : > { %6921 = vst [vmem:[#allocation26_spill] sm:$0xff] %v4555_v33  ;;  %1437 = vmax.xlane.f32.xlu1 %v1436_v36  ;;  %v1430_v39 = vsel %vm1354_vm2, %v4555_v33, -inf }
 0x1ff   : > { %v3720_v41 = vpop.f32.mrb[28].mxu1 }
 0x200   : > { %v4564_v42 = vadd.f32 %v3720_v41, %v4421_v7  ;;  %v1211_v43 = vpop.f32.mrb[29].mxu1  ;;  %1428 = vmax.xlane.f32.xlu0 %v1427_v38 }
 0x201   : > { %v4567_v44 = vadd.f32 %v4421_v7, %v1211_v43  ;;  %v3721_v46 = vpop.f32.mrb[30].mxu1  ;;  %1431 = vmax.xlane.f32.xlu1 %v1430_v39 }
 0x202   : > { %6922 = vst [vmem:[#allocation27_spill] sm:$0xff] %v4564_v42  ;;  %v4570_v48 = vadd.f32 %v3721_v46, %v4421_v7  ;;  %v1445_v50 = vsel %vm1354_vm2, %v4564_v42, -inf  ;;  %v1214_v51 = vpop.f32.mrb[31].mxu1 }
 0x203   : > { %6923 = vst [vmem:[#allocation28_spill] sm:$0xff] %v4567_v44  ;;  %v4575_v53 = vadd.f32 %v4421_v7, %v1214_v51  ;;  %v1439_v55 = vsel %vm1354_vm2, %v4567_v44, -inf }
 0x204   : > { %6924 = vst [vmem:[#allocation29_spill] sm:$0xff] %v4570_v48  ;;  %1446 = vmax.xlane.f32.xlu0 %v1445_v50  ;;  %v1448_v54 = vsel %vm1354_vm2, %v4570_v48, -inf }
 0x205   : > { %6925 = vst [vmem:[#allocation30_spill] sm:$0xff] %v4575_v53  ;;  %1449 = vmax.xlane.f32.xlu1 %v1448_v54  ;;  %v1442_v56 = vsel %vm1354_vm2, %v4575_v53, -inf }
 0x207   : > { %v3724_v58 = vpop.f32.mrb[32].mxu1 }
 0x208   : > { %v4584_v60 = vadd.f32 %v3724_v58, %v4421_v7  ;;  %v1227_v62 = vpop.f32.mrb[33].mxu1  ;;  %1440 = vmax.xlane.f32.xlu0 %v1439_v55 }
 0x209   : > { %v4587_v63 = vadd.f32 %v4421_v7, %v1227_v62  ;;  %v3725_v1 = vpop.f32.mrb[34].mxu1  ;;  %1443 = vmax.xlane.f32.xlu1 %v1442_v56 }
 0x20a   : > { %6926 = vst [vmem:[#allocation31_spill] sm:$0xff] %v4584_v60  ;;  %v4590_v2 = vadd.f32 %v3725_v1, %v4421_v7  ;;  %v1457_v3 = vsel %vm1354_vm2, %v4584_v60, -inf  ;;  %v1230_v4 = vpop.f32.mrb[35].mxu1 }
 0x20b   : > { %6927 = vst [vmem:[#allocation32_spill] sm:$0xff] %v4587_v63  ;;  %v4595_v6 = vadd.f32 %v4421_v7, %v1230_v4  ;;  %v1451_v13 = vsel %vm1354_vm2, %v4587_v63, -inf }
 0x20c   : > { %6928 = vst [vmem:[#allocation33_spill] sm:$0xff] %v4590_v2  ;;  %1458 = vmax.xlane.f32.xlu0 %v1457_v3  ;;  %v1460_v10 = vsel %vm1354_vm2, %v4590_v2, -inf }
 0x20d   : > { %6929 = vst [vmem:[#allocation34_spill] sm:$0xff] %v4595_v6  ;;  %1461 = vmax.xlane.f32.xlu1 %v1460_v10  ;;  %v1454_v14 = vsel %vm1354_vm2, %v4595_v6, -inf }
 0x20f   : > { %v3728_v17 = vpop.f32.mrb[36].mxu1 }
 0x210   : > { %v4604_v18 = vadd.f32 %v3728_v17, %v4421_v7  ;;  %v1243_v19 = vpop.f32.mrb[37].mxu1  ;;  %1452 = vmax.xlane.f32.xlu0 %v1451_v13 }
 0x211   : > { %v4607_v21 = vadd.f32 %v4421_v7, %v1243_v19  ;;  %v3729_v25 = vpop.f32.mrb[38].mxu1  ;;  %1455 = vmax.xlane.f32.xlu1 %v1454_v14 }
 0x212   : > { %6930 = vst [vmem:[#allocation35_spill] sm:$0xff] %v4604_v18  ;;  %v4610_v28 = vadd.f32 %v3729_v25, %v4421_v7  ;;  %v1469_v30 = vsel %vm1354_vm2, %v4604_v18, -inf  ;;  %v1246_v31 = vpop.f32.mrb[39].mxu1 }
 0x213   : > { %6931 = vst [vmem:[#allocation36_spill] sm:$0xff] %v4607_v21  ;;  %v4615_v36 = vadd.f32 %v4421_v7, %v1246_v31  ;;  %v1463_v39 = vsel %vm1354_vm2, %v4607_v21, -inf }
 0x214   : > { %6932 = vst [vmem:[#allocation37_spill] sm:$0xff] %v4610_v28  ;;  %1470 = vmax.xlane.f32.xlu0 %v1469_v30  ;;  %v1472_v38 = vsel %vm1354_vm2, %v4610_v28, -inf }
 0x215   : > { %6933 = vst [vmem:[#allocation38_spill] sm:$0xff] %v4615_v36  ;;  %1473 = vmax.xlane.f32.xlu1 %v1472_v38  ;;  %v1466_v41 = vsel %vm1354_vm2, %v4615_v36, -inf }
 0x217   : > { %v3732_v43 = vpop.f32.mrb[40].mxu1 }
 0x218   : > { %v4624_v46 = vadd.f32 %v3732_v43, %v4421_v7  ;;  %v1259_v50 = vpop.f32.mrb[41].mxu1  ;;  %1464 = vmax.xlane.f32.xlu0 %v1463_v39 }
 0x219   : > { %v4627_v51 = vadd.f32 %v4421_v7, %v1259_v50  ;;  %v3733_v54 = vpop.f32.mrb[42].mxu1  ;;  %1467 = vmax.xlane.f32.xlu1 %v1466_v41 }
 0x21a   : > { %6934 = vst [vmem:[#allocation39_spill] sm:$0xff] %v4624_v46  ;;  %v4630_v55 = vadd.f32 %v3733_v54, %v4421_v7  ;;  %v1481_v56 = vsel %vm1354_vm2, %v4624_v46, -inf  ;;  %v1262_v58 = vpop.f32.mrb[43].mxu1 }
 0x21b   : > { %6935 = vst [vmem:[#allocation40_spill] sm:$0xff] %v4627_v51  ;;  %v4635_v62 = vadd.f32 %v4421_v7, %v1262_v58  ;;  %v1475_v3 = vsel %vm1354_vm2, %v4627_v51, -inf }
 0x21c   : > { %6936 = vst [vmem:[#allocation41_spill] sm:$0xff] %v4630_v55  ;;  %1482 = vmax.xlane.f32.xlu0 %v1481_v56  ;;  %v1484_v1 = vsel %vm1354_vm2, %v4630_v55, -inf }
 0x21d   : > { %6937 = vst [vmem:[#allocation42_spill] sm:$0xff] %v4635_v62  ;;  %1485 = vmax.xlane.f32.xlu1 %v1484_v1  ;;  %v1478_v4 = vsel %vm1354_vm2, %v4635_v62, -inf }
 0x21f   : > { %v3736_v10 = vpop.f32.mrb[44].mxu1 }
 0x220   : > { %v4644_v13 = vadd.f32 %v3736_v10, %v4421_v7  ;;  %v1275_v14 = vpop.f32.mrb[45].mxu1  ;;  %1476 = vmax.xlane.f32.xlu0 %v1475_v3 }
 0x221   : > { %v4647_v17 = vadd.f32 %v4421_v7, %v1275_v14  ;;  %v3737_v19 = vpop.f32.mrb[46].mxu1  ;;  %1479 = vmax.xlane.f32.xlu1 %v1478_v4 }
 0x222   : > { %6938 = vst [vmem:[#allocation43_spill] sm:$0xff] %v4644_v13  ;;  %v1278_v25 = vpop.f32.mrb[47].mxu1  ;;  %v1493_v30 = vsel %vm1354_vm2, %v4644_v13, -inf  ;;  %v4655_v38 = vadd.f32 %v3737_v19, %v4421_v7 }
 0x223   : > { %6939 = vst [vmem:[#allocation44_spill] sm:$0xff] %v4647_v17  ;;  %v4652_v31 = vadd.f32 %v4421_v7, %v1278_v25  ;;  %v1487_v41 = vsel %vm1354_vm2, %v4647_v17, -inf }
 0x224   : > { %1494 = vmax.xlane.f32.xlu0 %v1493_v30  ;;  %6941 = vst [vmem:[#allocation46_spill] sm:$0xff] %v4655_v38  ;;  %v1496_v56 = vsel %vm1354_vm2, %v4655_v38, -inf }
 0x225   : > { %6940 = vst [vmem:[#allocation45_spill] sm:$0xff] %v4652_v31  ;;  %v1490_v39 = vsel %vm1354_vm2, %v4652_v31, -inf }
 0x226   : > { %1491 = vmax.xlane.f32.xlu1 %v1490_v39 }
 0x227   : > { %v3740_v43 = vpop.f32.mrb[48].mxu1 }
 0x228   : > { %1488 = vmax.xlane.f32.xlu0 %v1487_v41  ;;  %v1291_v50 = vpop.f32.mrb[49].mxu1  ;;  %v4662_v54 = vadd.f32 %v3740_v43, %v4421_v7 }
 0x229   : > { %v3741_v58 = vpop.f32.mrb[50].mxu1  ;;  %v4667_v3 = vadd.f32 %v4421_v7, %v1291_v50 }
 0x22a   : > { %6942 = vst [vmem:[#allocation47_spill] sm:$0xff] %v4662_v54  ;;  %v1294_v1 = vpop.f32.mrb[51].mxu1  ;;  %v1505_v4 = vsel %vm1354_vm2, %v4662_v54, -inf  ;;  %v4672_v19 = vadd.f32 %v3741_v58, %v4421_v7 }
 0x22b   : > { %6943 = vst [vmem:[#allocation48_spill] sm:$0xff] %v4667_v3  ;;  %v1499_v25 = vsel %vm1354_vm2, %v4667_v3, -inf  ;;  %v4677_v41 = vadd.f32 %v4421_v7, %v1294_v1 }
 0x22c   : > { %1497 = vmax.xlane.f32.xlu0 %v1496_v56  ;;  %6944 = vst [vmem:[#allocation49_spill] sm:$0xff] %v4672_v19  ;;  %v1508_v43 = vsel %vm1354_vm2, %v4672_v19, -inf }
 0x22d   : > { %6945 = vst [vmem:[#allocation50_spill] sm:$0xff] %v4677_v41  ;;  %v1502_v58 = vsel %vm1354_vm2, %v4677_v41, -inf }
 0x22f   : > { %v3744_v10 = vpop.f32.mrb[52].mxu1 }
 0x230   : > { %1506 = vmax.xlane.f32.xlu0 %v1505_v4  ;;  %v1307_v14 = vpop.f32.mrb[53].mxu1  ;;  %v4684_v4 = vadd.f32 %v3744_v10, %v4421_v7 }
 0x231   : > { %v3745_v30 = vpop.f32.mrb[54].mxu1  ;;  %v4693_v1 = vadd.f32 %v4421_v7, %v1307_v14 }
 0x232   : > { %v1310_v39 = vpop.f32.mrb[55].mxu1  ;;  %6946 = vst [vmem:[#allocation51_spill] sm:$0xff] %v4684_v4 }
 0x233   : > { %6947 = vst [vmem:[#allocation52_spill] sm:$0xff] %v4693_v1  ;;  %v4702_v10 = vadd.f32 %v4421_v7, %v1310_v39  ;;  %v1511_v41 = vsel %vm1354_vm2, %v4693_v1, -inf }
 0x234   : > { %1500 = vmax.xlane.f32.xlu0 %v1499_v25  ;;  %v1517_v25 = vsel %vm1354_vm2, %v4684_v4, -inf }
 0x235   : > { %6948 = vst [vmem:[#allocation53_spill] sm:$0xff] %v4702_v10  ;;  %v1514_v14 = vsel %vm1354_vm2, %v4702_v10, -inf }
 0x237   : > { %v4681_v50 = vpop.f32.mrb[56].mxu1 }
 0x238   : > { %1509 = vmax.xlane.f32.xlu0 %v1508_v43  ;;  %v1323_v56 = vpop.f32.mrb[57].mxu1 }
 0x239   : > { %v4688_v38 = vpop.f32.mrb[58].mxu1 }
 0x23a   : > { %v4690_v31 = vpop.f32.mrb[59].mxu1 }
 0x23c   : > { %1503 = vmax.xlane.f32.xlu0 %v1502_v58 }
 0x23f   : > { %v4697_v19 = vpop.f32.mrb[60].mxu1 }
 0x240   : > { %1518 = vmax.xlane.f32.xlu0 %v1517_v25  ;;  %v4699_v43 = vpop.f32.mrb[61].mxu1 }
 0x241   : > { %v4706_v55 = vpop.f32.mrb[62].mxu1 }
 0x242   : > { %v4708_v58 = vpop.f32.mrb[63].mxu1 }
 0x244   : > { %1512 = vmax.xlane.f32.xlu0 %v1511_v41 }
 0x248   : > { %1515 = vmax.xlane.f32.xlu0 %v1514_v14 }
 0x258   : > { %v4712_v4 = vpop.xlane.xlu1 %1362 }
 0x259   : > { %6949 = vst [vmem:[#allocation54_spill] sm:$0xff] %v4712_v4  ;;  %v1549_v25 = vsub.f32 %v4424_v9, %v4712_v4  ;;  %v4716_v62 = vpop.xlane.xlu0 %1356 }
 0x25a   : > { %v1547_v39 = vsub.f32 %v4427_v35, %v4716_v62 }
 0x25b   : > { %v1615_v1 = vmul.f32 1.442695, %v1549_v25 }
 0x25c   : > { %v1611_v28 = vmul.f32 1.442695, %v1547_v39  ;;  %v4720_v3 = vpop.xlane.xlu1 %1365 }
 0x25d   : > { %3804 = vpow2.f32 %v1615_v1  ;;  %v1550_v41 = vsub.f32 %v4430_v12, %v4720_v3  ;;  %v4724_v10 = vpop.xlane.xlu0 %1359 }
 0x25e   : > { %3806 = vpow2.f32 %v1611_v28  ;;  %v1548_v14 = vsub.f32 %v4435_v15, %v4724_v10 }
 0x25f   : > { %v1617_v9 = vmul.f32 1.442695, %v1550_v41 }
 0x260   : > { %v1613_v4 = vmul.f32 1.442695, %v1548_v14 }
 0x261   : > { %3808 = vpow2.f32 %v1617_v9  ;;  %v4728_v54 = vpop.xlane.xlu0 %1374 }
 0x262   : > { %6950 = vst [vmem:[#allocation55_spill] sm:$0xff] %v4728_v54  ;;  %v1553_v25 = vsub.f32 %v4444_v20, %v4728_v54  ;;  %v4732_v39 = vpop.xlane.xlu1 %1377  ;;  %3810 = vpow2.f32 %v1613_v4  ;;  %v4744_v54 = vadd.f32 %v3745_v30, %v4421_v7  ;;  %v4755_v30 = vadd.f32 %v4421_v7, %v1323_v56 }
 0x263   : > { %6951 = vst [vmem:[#allocation56_spill] sm:$0xff] %v4732_v39  ;;  %v1554_v9 = vsub.f32 %v4450_v24, %v4732_v39  ;;  %v4768_v56 = vadd.f32 %v4421_v7, %v4690_v31  ;;  %v4781_v31 = vadd.f32 %v4681_v50, %v4421_v7  ;;  %v4794_v50 = vadd.f32 %v4688_v38, %v4421_v7 }
 0x264   : > { %v1623_v1 = vmul.f32 1.442695, %v1553_v25  ;;  %6954 = vst [vmem:[#allocation59_spill] sm:$0xff] %v4744_v54  ;;  %6957 = vst [vmem:[#allocation62_spill] sm:$0xff] %v4755_v30  ;;  %v4807_v38 = vadd.f32 %v4421_v7, %v4699_v43  ;;  %v4820_v43 = vadd.f32 %v4421_v7, %v4708_v58 }
 0x265   : > { %v4734_v35 = vpop.xlane.xlu0 %1368  ;;  %6960 = vst [vmem:[#allocation65_spill] sm:$0xff] %v4768_v56  ;;  %6962 = vst [vmem:[#allocation67_spill] sm:$0xff] %v4781_v31 }
 0x266   : > { %6952 = vst [vmem:[#allocation57_spill] sm:$0xff] %v4734_v35  ;;  %v1551_v28 = vsub.f32 %v4447_v22, %v4734_v35  ;;  %v4738_v12 = vpop.xlane.xlu1 %1371  ;;  %3812 = vpow2.f32 %v1623_v1  ;;  %v1625_v1 = vmul.f32 1.442695, %v1554_v9  ;;  %6964 = vst [vmem:[#allocation69_spill] sm:$0xff] %v4794_v50 }
 0x267   : > { %6953 = vst [vmem:[#allocation58_spill] sm:$0xff] %v4738_v12  ;;  %v3805_v15 = vpop.eup %3804  ;;  %v1552_v24 = vsub.f32 %v4455_v27, %v4738_v12  ;;  %v1523_v27 = vsel %vm1354_vm2, %v4755_v30, -inf  ;;  %6967 = vst [vmem:[#allocation72_spill] sm:$0xff] %v4807_v38 }
 0x268   : > { %v3807_v41 = vpop.eup %3806  ;;  %v1619_v14 = vmul.f32 1.442695, %v1551_v28  ;;  %v1745_v20 = vsel %vm1354_vm2, %v3805_v15, 0.0  ;;  %6970 = vst [vmem:[#allocation75_spill] sm:$0xff] %v4820_v43 }
 0x269   : > { %1746 = vadd.xlane.f32.xlu1 %v1745_v20  ;;  %v4746_v4 = vpop.xlane.xlu0 %1386  ;;  %v1739_v25 = vsel %vm1354_vm2, %v3807_v41, 0.0  ;;  %v1520_v41 = vsel %vm1354_vm2, %v4744_v54, -inf  ;;  %v1621_v9 = vmul.f32 1.442695, %v1552_v24 }
 0x26a   : > { %6955 = vst [vmem:[#allocation60_spill] sm:$0xff] %v4746_v4  ;;  %v4749_v22 = vpop.xlane.xlu1 %1389  ;;  %1740 = vadd.xlane.f32.xlu0 %v1739_v25  ;;  %3814 = vpow2.f32 %v1619_v14  ;;  %v1557_v14 = vsub.f32 %v4464_v32, %v4746_v4  ;;  %v1526_v32 = vsel %vm1354_vm2, %v4768_v56, -inf }
 0x26b   : > { %6956 = vst [vmem:[#allocation61_spill] sm:$0xff] %v4749_v22  ;;  %v3809_v35 = vpop.eup %3808  ;;  %3816 = vpow2.f32 %v1625_v1 }
 0x26c   : > { %v1748_v28 = vsel %vm1354_vm2, %v3809_v35, 0.0  ;;  %v3811_v15 = vpop.eup %3810  ;;  %3818 = vpow2.f32 %v1621_v9  ;;  %v1631_v24 = vmul.f32 1.442695, %v1557_v14 }
 0x26d   : > { %1749 = vadd.xlane.f32.xlu1 %v1748_v28  ;;  %v4757_v20 = vpop.xlane.xlu0 %1380  ;;  %v1742_v35 = vsel %vm1354_vm2, %v3811_v15, 0.0 }
 0x26e   : > { %6958 = vst [vmem:[#allocation63_spill] sm:$0xff] %v4757_v20  ;;  %v4761_v39 = vpop.xlane.xlu1 %1383  ;;  %1521 = vmax.xlane.f32.xlu0 %v1520_v41  ;;  %v1555_v1 = vsub.f32 %v4467_v34, %v4757_v20  ;;  %3820 = vpow2.f32 %v1631_v24  ;;  %v1529_v34 = vsel %vm1354_vm2, %v4781_v31, -inf }
 0x26f   : > { %6959 = vst [vmem:[#allocation64_spill] sm:$0xff] %v4761_v39  ;;  %v1556_v24 = vsub.f32 %v4475_v40, %v4761_v39  ;;  %v1535_v40 = vsel %vm1354_vm2, %v4807_v38, -inf }
 0x270   : > { %v3813_v25 = vpop.eup %3812  ;;  %v1627_v9 = vmul.f32 1.442695, %v1555_v1 }
 0x271   : > { %1743 = vadd.xlane.f32.xlu1 %v1742_v35  ;;  %v4770_v28 = vpop.xlane.xlu0 %1398  ;;  %v1757_v15 = vsel %vm1354_vm2, %v3813_v25, 0.0 }
 0x272   : > { %6961 = vst [vmem:[#allocation66_spill] sm:$0xff] %v4770_v28  ;;  %v4774_v12 = vpop.xlane.xlu1 %1401  ;;  %1524 = vmax.xlane.f32.xlu0 %v1523_v27  ;;  %v1558_v27 = vsub.f32 %v4470_v37, %v4749_v22  ;;  %3822 = vpow2.f32 %v1627_v9  ;;  %v1532_v37 = vsel %vm1354_vm2, %v4794_v50, -inf }
 0x274   : > { %v3815_v41 = vpop.eup %3814 }
 0x275   : > { %1758 = vadd.xlane.f32.xlu1 %v1757_v15  ;;  %v4783_v35 = vpop.xlane.xlu0 %1392  ;;  %v1751_v14 = vsel %vm1354_vm2, %v3815_v41, 0.0  ;;  %v3817_v25 = vpop.eup %3816 }
 0x276   : > { %6963 = vst [vmem:[#allocation68_spill] sm:$0xff] %v4783_v35  ;;  %v4787_v4 = vpop.xlane.xlu1 %1395  ;;  %1527 = vmax.xlane.f32.xlu0 %v1526_v32  ;;  %v1633_v32 = vmul.f32 1.442695, %v1558_v27  ;;  %v1760_v1 = vsel %vm1354_vm2, %v3817_v25, 0.0  ;;  %v3819_v41 = vpop.eup %3818  ;;  %v1561_v27 = vsub.f32 %v4484_v45, %v4770_v28 }
 0x277   : > { %v1754_v9 = vsel %vm1354_vm2, %v3819_v41, 0.0 }
 0x278   : > { %3824 = vpow2.f32 %v1633_v32  ;;  %v3821_v25 = vpop.eup %3820  ;;  %v1559_v32 = vsub.f32 %v4487_v47, %v4783_v35  ;;  %v4850_v35 = vadd.f32 %v4706_v55, %v4421_v7 }
 0x279   : > { %1752 = vadd.xlane.f32.xlu1 %v1751_v14  ;;  %v4796_v15 = vpop.xlane.xlu0 %1410  ;;  %v1769_v58 = vsel %vm1354_vm2, %v3821_v25, 0.0 }
 0x27a   : > { %6965 = vst [vmem:[#allocation70_spill] sm:$0xff] %v4796_v15  ;;  %v4800_v20 = vpop.xlane.xlu1 %1413  ;;  %1530 = vmax.xlane.f32.xlu0 %v1529_v34  ;;  %v1629_v34 = vmul.f32 1.442695, %v1556_v24  ;;  %v1635_v25 = vmul.f32 1.442695, %v1559_v32  ;;  %6975 = vst [vmem:[#allocation80_spill] sm:$0xff] %v4850_v35 }
 0x27b   : > { %6966 = vst [vmem:[#allocation71_spill] sm:$0xff] %v4800_v20 }
 0x27c   : > { %3826 = vpow2.f32 %v1629_v34  ;;  %v3823_v41 = vpop.eup %3822 }
 0x27d   : > { %1761 = vadd.xlane.f32.xlu1 %v1760_v1  ;;  %v4809_v14 = vpop.xlane.xlu0 %1404 }
 0x27e   : > { %6968 = vst [vmem:[#allocation73_spill] sm:$0xff] %v4809_v14  ;;  %v4813_v22 = vpop.xlane.xlu1 %1407  ;;  %1533 = vmax.xlane.f32.xlu0 %v1532_v37  ;;  %v1639_v37 = vmul.f32 1.442695, %v1561_v27  ;;  %v1562_v27 = vsub.f32 %v4490_v49, %v4774_v12 }
 0x27f   : > { %6969 = vst [vmem:[#allocation74_spill] sm:$0xff] %v4813_v22 }
 0x280   : > { %3828 = vpow2.f32 %v1639_v37  ;;  %v1641_v32 = vmul.f32 1.442695, %v1562_v27 }
 0x281   : > { %1755 = vadd.xlane.f32.xlu1 %v1754_v9  ;;  %v4822_v1 = vpop.xlane.xlu0 %1422  ;;  %v4835_v9 = vadd.f32 %v4697_v19, %v4421_v7  ;;  %v1763_v19 = vsel %vm1354_vm2, %v3823_v41, 0.0 }
 0x282   : > { %6971 = vst [vmem:[#allocation76_spill] sm:$0xff] %v4822_v1  ;;  %v4826_v39 = vpop.xlane.xlu1 %1425  ;;  %1536 = vmax.xlane.f32.xlu0 %v1535_v40  ;;  %v1569_v24 = vsub.f32 %v4524_v5, %v4822_v1  ;;  %v1538_v40 = vsel %vm1354_vm2, %v4820_v43, -inf }
 0x283   : > { %6972 = vst [vmem:[#allocation77_spill] sm:$0xff] %v4826_v39  ;;  %6973 = vst [vmem:[#allocation78_spill] sm:$0xff] %v4835_v9  ;;  %v1541_v37 = vsel %vm1354_vm2, %v4835_v9, -inf }
 0x284   : > { %v1655_v5 = vmul.f32 1.442695, %v1569_v24  ;;  %v1560_v24 = vsub.f32 %v4495_v52, %v4787_v4 }
 0x285   : > { %1770 = vadd.xlane.f32.xlu1 %v1769_v58  ;;  %v4837_v45 = vpop.xlane.xlu0 %1416  ;;  %v3825_v58 = vpop.eup %3824 }
 0x286   : > { %v1567_v34 = vsub.f32 %v4527_v8, %v4837_v45  ;;  %1539 = vmax.xlane.f32.xlu0 %v1538_v40  ;;  %v4845_v47 = vpop.xlane.xlu1 %1419  ;;  %v1772_v7 = vsel %vm1354_vm2, %v3825_v58, 0.0  ;;  %v3827_v55 = vpop.eup %3826 }
 0x287   : > { %6974 = vst [vmem:[#allocation79_spill] sm:$0xff] %v4845_v47 }
 0x288   : > { %v1651_v1 = vmul.f32 1.442695, %v1567_v34  ;;  %v1544_v34 = vsel %vm1354_vm2, %v4850_v35, -inf }
 0x289   : > { %1764 = vadd.xlane.f32.xlu1 %v1763_v19  ;;  %v4852_v28 = vpop.xlane.xlu0 %1434 }
 0x28a   : > { %6976 = vst [vmem:[#allocation81_spill] sm:$0xff] %v4852_v28  ;;  %3830 = vpow2.f32 %v1651_v1  ;;  %1542 = vmax.xlane.f32.xlu0 %v1541_v37  ;;  %v1573_v41 = vsub.f32 %v4544_v23, %v4852_v28  ;;  %v4865_v1 = vpop.xlane.xlu1 %1437  ;;  %v1766_v37 = vsel %vm1354_vm2, %v3827_v55, 0.0 }
 0x28b   : > { %3832 = vpow2.f32 %v1635_v25  ;;  %6977 = vst [vmem:[#allocation82_spill] sm:$0xff] %v4865_v1  ;;  %v1565_v25 = vsub.f32 %v4504_v57, %v4796_v15 }
 0x28c   : > { %3834 = vpow2.f32 %v1655_v5  ;;  %v1637_v5 = vmul.f32 1.442695, %v1560_v24  ;;  %v1663_v19 = vmul.f32 1.442695, %v1573_v41 }
 0x28d   : > { %1773 = vadd.xlane.f32.xlu1 %v1772_v7  ;;  %v4861_v40 = vpop.xlane.xlu0 %1428  ;;  %3836 = vpow2.f32 %v1641_v32  ;;  %v3829_v7 = vpop.eup %3828  ;;  %v1647_v28 = vmul.f32 1.442695, %v1565_v25 }
 0x28e   : > { %v1571_v27 = vsub.f32 %v4547_v26, %v4861_v40  ;;  %1545 = vmax.xlane.f32.xlu0 %v1544_v34  ;;  %v1563_v26 = vsub.f32 %v4507_v59, %v4809_v14  ;;  %v4876_v32 = vpop.xlane.xlu1 %1431  ;;  %v1781_v41 = vsel %vm1354_vm2, %v3829_v7, 0.0 }
 0x28f   : > { %6979 = vst [vmem:[#allocation84_spill] sm:$0xff] %v4876_v32 }
 0x290   : > { %v1659_v58 = vmul.f32 1.442695, %v1571_v27 }
 0x291   : > { %1767 = vadd.xlane.f32.xlu1 %v1766_v37  ;;  %v4872_v23 = vpop.xlane.xlu0 %1446  ;;  %v1564_v37 = vsub.f32 %v4515_v0, %v4813_v22 }
 0x292   : > { %6978 = vst [vmem:[#allocation83_spill] sm:$0xff] %v4872_v23  ;;  %3838 = vpow2.f32 %v1659_v58  ;;  %v1577_v24 = vsub.f32 %v4564_v42, %v4872_v23  ;;  %v4892_v14 = vpop.xlane.xlu1 %1449 }
 0x293   : > { %3840 = vpow2.f32 %v1637_v5  ;;  %6982 = vst [vmem:[#allocation87_spill] sm:$0xff] %v4892_v14 }
 0x294   : > { %v3831_v34 = vpop.eup %3830  ;;  %3842 = vpow2.f32 %v1663_v19  ;;  %v1643_v19 = vmul.f32 1.442695, %v1563_v26  ;;  %v1671_v59 = vmul.f32 1.442695, %v1577_v24  ;;  %v1566_v26 = vsub.f32 %v4510_v61, %v4800_v20 }
 0x295   : > { %v3833_v55 = vpop.eup %3832  ;;  %1782 = vadd.xlane.f32.xlu1 %v1781_v41  ;;  %v4881_v27 = vpop.xlane.xlu0 %1440  ;;  %v1799_v58 = vsel %vm1354_vm2, %v3831_v34, 0.0  ;;  %3844 = vpow2.f32 %v1647_v28  ;;  %v1645_v28 = vmul.f32 1.442695, %v1564_v37 }
 0x296   : > { %6980 = vst [vmem:[#allocation85_spill] sm:$0xff] %v4881_v27  ;;  %v3835_v5 = vpop.eup %3834  ;;  %v1575_v25 = vsub.f32 %v4567_v44, %v4881_v27  ;;  %1800 = vadd.xlane.f32.xlu0 %v1799_v58  ;;  %v1775_v7 = vsel %vm1354_vm2, %v3833_v55, 0.0  ;;  %v4906_v37 = vpop.xlane.xlu1 %1443  ;;  %v7047_v44 = vld [vmem:[#allocation9_spill] sm:$0xff] }
 0x297   : > { %v3837_v23 = vpop.eup %3836  ;;  %v1805_v34 = vsel %vm1354_vm2, %v3835_v5, 0.0  ;;  %6984 = vst [vmem:[#allocation89_spill] sm:$0xff] %v4906_v37 }
 0x298   : > { %v1667_v42 = vmul.f32 1.442695, %v1575_v25  ;;  %v1784_v55 = vsel %vm1354_vm2, %v3837_v23, 0.0 }
 0x299   : > { %1776 = vadd.xlane.f32.xlu1 %v1775_v7  ;;  %v4889_v41 = vpop.xlane.xlu0 %1458 }
 0x29a   : > { %6981 = vst [vmem:[#allocation86_spill] sm:$0xff] %v4889_v41  ;;  %3846 = vpow2.f32 %v1667_v42  ;;  %1806 = vadd.xlane.f32.xlu0 %v1805_v34  ;;  %v1581_v24 = vsub.f32 %v4584_v60, %v4889_v41 }
 0x29b   : > { %3848 = vpow2.f32 %v1643_v19  ;;  %v1649_v19 = vmul.f32 1.442695, %v1566_v26  ;;  %v1570_v26 = vsub.f32 %v4530_v11, %v4826_v39 }
 0x29c   : > { %v3839_v58 = vpop.eup %3838  ;;  %3850 = vpow2.f32 %v1671_v59  ;;  %v1568_v59 = vsub.f32 %v4535_v16, %v4845_v47  ;;  %v1679_v60 = vmul.f32 1.442695, %v1581_v24 }
 0x29d   : > { %v3841_v25 = vpop.eup %3840  ;;  %1785 = vadd.xlane.f32.xlu1 %v1784_v55  ;;  %v4899_v7 = vpop.xlane.xlu0 %1452  ;;  %v1811_v5 = vsel %vm1354_vm2, %v3839_v58, 0.0  ;;  %3852 = vpow2.f32 %v1645_v28 }
 0x29e   : > { %6983 = vst [vmem:[#allocation88_spill] sm:$0xff] %v4899_v7  ;;  %v3843_v42 = vpop.eup %3842  ;;  %v1579_v34 = vsub.f32 %v4587_v63, %v4899_v7  ;;  %1812 = vadd.xlane.f32.xlu0 %v1811_v5  ;;  %v1778_v55 = vsel %vm1354_vm2, %v3841_v25, 0.0  ;;  %v1653_v28 = vmul.f32 1.442695, %v1568_v59  ;;  %v1657_v59 = vmul.f32 1.442695, %v1570_v26 }
 0x29f   : > { %v3845_v41 = vpop.eup %3844  ;;  %v1817_v58 = vsel %vm1354_vm2, %v3843_v42, 0.0  ;;  %v1574_v26 = vsub.f32 %v4550_v29, %v4865_v1 }
 0x2a0   : > { %v1675_v23 = vmul.f32 1.442695, %v1579_v34  ;;  %v1793_v25 = vsel %vm1354_vm2, %v3845_v41, 0.0 }
 0x2a1   : > { %1779 = vadd.xlane.f32.xlu1 %v1778_v55  ;;  %v4909_v61 = vpop.xlane.xlu0 %1470 }
 0x2a2   : > { %6985 = vst [vmem:[#allocation90_spill] sm:$0xff] %v4909_v61  ;;  %3854 = vpow2.f32 %v1675_v23  ;;  %1818 = vadd.xlane.f32.xlu0 %v1817_v58  ;;  %v1585_v24 = vsub.f32 %v4604_v18, %v4909_v61  ;;  %v4920_v58 = vpop.xlane.xlu1 %1461 }
 0x2a3   : > { %3856 = vpow2.f32 %v1649_v19  ;;  %6987 = vst [vmem:[#allocation92_spill] sm:$0xff] %v4920_v58 }
 0x2a4   : > { %v3847_v5 = vpop.eup %3846  ;;  %3858 = vpow2.f32 %v1679_v60  ;;  %v1572_v60 = vsub.f32 %v4555_v33, %v4876_v32  ;;  %v1687_v18 = vmul.f32 1.442695, %v1585_v24  ;;  %v7024_v32 = vld [vmem:[#allocation2_spill] sm:$0xff] }
 0x2a5   : > { %v3849_v34 = vpop.eup %3848  ;;  %1794 = vadd.xlane.f32.xlu1 %v1793_v25  ;;  %v4917_v55 = vpop.xlane.xlu0 %1464  ;;  %v1823_v42 = vsel %vm1354_vm2, %v3847_v5, 0.0  ;;  %3860 = vpow2.f32 %v1653_v28 }
 0x2a6   : > { %6986 = vst [vmem:[#allocation91_spill] sm:$0xff] %v4917_v55  ;;  %v3851_v23 = vpop.eup %3850  ;;  %v1583_v19 = vsub.f32 %v4607_v21, %v4917_v55  ;;  %1824 = vadd.xlane.f32.xlu0 %v1823_v42  ;;  %v1787_v25 = vsel %vm1354_vm2, %v3849_v34, 0.0  ;;  %v1661_v28 = vmul.f32 1.442695, %v1572_v60  ;;  %v4932_v21 = vpop.xlane.xlu1 %1455  ;;  %v1665_v60 = vmul.f32 1.442695, %v1574_v26 }
 0x2a7   : > { %v3853_v61 = vpop.eup %3852  ;;  %v1829_v5 = vsel %vm1354_vm2, %v3851_v23, 0.0  ;;  %6989 = vst [vmem:[#allocation94_spill] sm:$0xff] %v4932_v21  ;;  %v1578_v26 = vsub.f32 %v4570_v48, %v4892_v14 }
 0x2a8   : > { %v1683_v41 = vmul.f32 1.442695, %v1583_v19  ;;  %v1790_v34 = vsel %vm1354_vm2, %v3853_v61, 0.0 }
 0x2a9   : > { %1788 = vadd.xlane.f32.xlu1 %v1787_v25  ;;  %v4927_v11 = vpop.xlane.xlu0 %1482 }
 0x2aa   : > { %6988 = vst [vmem:[#allocation93_spill] sm:$0xff] %v4927_v11  ;;  %3862 = vpow2.f32 %v1683_v41  ;;  %1830 = vadd.xlane.f32.xlu0 %v1829_v5  ;;  %v1589_v24 = vsub.f32 %v4624_v46, %v4927_v11  ;;  %v4948_v29 = vpop.xlane.xlu1 %1473 }
 0x2ab   : > { %3864 = vpow2.f32 %v1657_v59  ;;  %6992 = vst [vmem:[#allocation97_spill] sm:$0xff] %v4948_v29 }
 0x2ac   : > { %v3855_v42 = vpop.eup %3854  ;;  %3866 = vpow2.f32 %v1687_v18  ;;  %v1576_v18 = vsub.f32 %v4575_v53, %v4906_v37  ;;  %v1695_v5 = vmul.f32 1.442695, %v1589_v24 }
 0x2ad   : > { %v3857_v19 = vpop.eup %3856  ;;  %1791 = vadd.xlane.f32.xlu1 %v1790_v34  ;;  %v4937_v25 = vpop.xlane.xlu0 %1476  ;;  %v1835_v23 = vsel %vm1354_vm2, %v3855_v42, 0.0  ;;  %3868 = vpow2.f32 %v1661_v28 }
 0x2ae   : > { %6990 = vst [vmem:[#allocation95_spill] sm:$0xff] %v4937_v25  ;;  %v3859_v59 = vpop.eup %3858  ;;  %v1587_v41 = vsub.f32 %v4627_v51, %v4937_v25  ;;  %1836 = vadd.xlane.f32.xlu0 %v1835_v23  ;;  %v1796_v61 = vsel %vm1354_vm2, %v3857_v19, 0.0  ;;  %v1669_v28 = vmul.f32 1.442695, %v1576_v18  ;;  %v1580_v18 = vsub.f32 %v4595_v6, %v4932_v21 }
 0x2af   : > { %v3861_v11 = vpop.eup %3860  ;;  %v1841_v42 = vsel %vm1354_vm2, %v3859_v59, 0.0 }
 0x2b0   : > { %v1691_v46 = vmul.f32 1.442695, %v1587_v41  ;;  %v1802_v19 = vsel %vm1354_vm2, %v3861_v11, 0.0 }
 0x2b1   : > { %1797 = vadd.xlane.f32.xlu1 %v1796_v61  ;;  %v4945_v34 = vpop.xlane.xlu0 %1494 }
 0x2b2   : > { %6991 = vst [vmem:[#allocation96_spill] sm:$0xff] %v4945_v34  ;;  %3870 = vpow2.f32 %v1691_v46  ;;  %1842 = vadd.xlane.f32.xlu0 %v1841_v42  ;;  %v1593_v24 = vsub.f32 %v4644_v13, %v4945_v34  ;;  %v1673_v42 = vmul.f32 1.442695, %v1578_v26  ;;  %v1582_v26 = vsub.f32 %v4590_v2, %v4920_v58 }
 0x2b3   : > { %3872 = vpow2.f32 %v1665_v60 }
 0x2b4   : > { %v3863_v23 = vpop.eup %3862  ;;  %3874 = vpow2.f32 %v1695_v5  ;;  %v4962_v5 = vpop.xlane.xlu1 %1467  ;;  %v1703_v13 = vmul.f32 1.442695, %v1593_v24 }
 0x2b5   : > { %v3865_v41 = vpop.eup %3864  ;;  %1803 = vadd.xlane.f32.xlu1 %v1802_v19  ;;  %v4955_v61 = vpop.xlane.xlu0 %1488  ;;  %v1847_v59 = vsel %vm1354_vm2, %v3863_v23, 0.0  ;;  %3876 = vpow2.f32 %v1669_v28  ;;  %6994 = vst [vmem:[#allocation99_spill] sm:$0xff] %v4962_v5  ;;  %v1677_v28 = vmul.f32 1.442695, %v1580_v18  ;;  %v6998_v18 = vld [vmem:[#allocation47_spill] sm:$0xff] }
 0x2b6   : > { %6993 = vst [vmem:[#allocation98_spill] sm:$0xff] %v4955_v61  ;;  %v3867_v46 = vpop.eup %3866  ;;  %v1591_v60 = vsub.f32 %v4647_v17, %v4955_v61  ;;  %1848 = vadd.xlane.f32.xlu0 %v1847_v59  ;;  %v1808_v19 = vsel %vm1354_vm2, %v3865_v41, 0.0 }
 0x2b7   : > { %v3869_v34 = vpop.eup %3868  ;;  %v1853_v23 = vsel %vm1354_vm2, %v3867_v46, 0.0  ;;  %v1681_v46 = vmul.f32 1.442695, %v1582_v26  ;;  %v7001_v26 = vld [vmem:[#allocation37_spill] sm:$0xff] }
 0x2b8   : > { %v1699_v11 = vmul.f32 1.442695, %v1591_v60  ;;  %v1814_v24 = vsel %vm1354_vm2, %v3869_v34, 0.0  ;;  %v4974_v6 = vpop.xlane.xlu1 %1485 }
 0x2b9   : > { %1809 = vadd.xlane.f32.xlu1 %v1808_v19  ;;  %v4965_v48 = vpop.xlane.xlu0 %1497  ;;  %6997 = vst [vmem:[#allocation102_spill] sm:$0xff] %v4974_v6 }
 0x2ba   : > { %6995 = vst [vmem:[#allocation100_spill] sm:$0xff] %v4965_v48  ;;  %3878 = vpow2.f32 %v1699_v11  ;;  %1854 = vadd.xlane.f32.xlu0 %v1853_v23 }
 0x2bb   : > { %3880 = vpow2.f32 %v1673_v42  ;;  %v1584_v42 = vsub.f32 %v4615_v36, %v4962_v5 }
 0x2bc   : > { %v3871_v59 = vpop.eup %3870  ;;  %3882 = vpow2.f32 %v1703_v13  ;;  %v4988_v5 = vpop.xlane.xlu1 %1479 }
 0x2bd   : > { %v3873_v60 = vpop.eup %3872  ;;  %1815 = vadd.xlane.f32.xlu1 %v1814_v24  ;;  %v4971_v41 = vpop.xlane.xlu0 %1506  ;;  %v1859_v19 = vsel %vm1354_vm2, %v3871_v59, 0.0  ;;  %3884 = vpow2.f32 %v1677_v28  ;;  %v7000_v24 = vld [vmem:[#allocation48_spill] sm:$0xff]  ;;  %v1586_v28 = vsub.f32 %v7001_v26, %v4948_v29  ;;  %7002 = vst [vmem:[#allocation104_spill] sm:$0xff] %v4988_v5 }
 0x2be   : > { %6996 = vst [vmem:[#allocation101_spill] sm:$0xff] %v4971_v41  ;;  %v3875_v17 = vpop.eup %3874  ;;  %1860 = vadd.xlane.f32.xlu0 %v1859_v19  ;;  %v1597_v13 = vsub.f32 %v6998_v18, %v4971_v41  ;;  %v1820_v34 = vsel %vm1354_vm2, %v3873_v60, 0.0  ;;  %3886 = vpow2.f32 %v1681_v46  ;;  %v1685_v19 = vmul.f32 1.442695, %v1584_v42  ;;  %v7004_v42 = vld [vmem:[#allocation42_spill] sm:$0xff] }
 0x2bf   : > { %v3877_v11 = vpop.eup %3876  ;;  %v1865_v59 = vsel %vm1354_vm2, %v3875_v17, 0.0  ;;  %v1689_v46 = vmul.f32 1.442695, %v1586_v28 }
 0x2c0   : > { %v1711_v18 = vmul.f32 1.442695, %v1597_v13  ;;  %v5002_v28 = vpop.xlane.xlu1 %1491 }
 0x2c1   : > { %1821 = vadd.xlane.f32.xlu1 %v1820_v34  ;;  %v4981_v23 = vpop.xlane.xlu0 %1500  ;;  %v1826_v34 = vsel %vm1354_vm2, %v3877_v11, 0.0  ;;  %7007 = vst [vmem:[#allocation107_spill] sm:$0xff] %v5002_v28 }
 0x2c2   : > { %6999 = vst [vmem:[#allocation103_spill] sm:$0xff] %v4981_v23  ;;  %v1595_v2 = vsub.f32 %v7000_v24, %v4981_v23  ;;  %1866 = vadd.xlane.f32.xlu0 %v1865_v59  ;;  %v1588_v59 = vsub.f32 %v7004_v42, %v4988_v5  ;;  %v7012_v5 = vld [vmem:[#allocation52_spill] sm:$0xff] }
 0x2c4   : > { %v3879_v36 = vpop.eup %3878  ;;  %v1707_v60 = vmul.f32 1.442695, %v1595_v2 }
 0x2c5   : > { %v3881_v41 = vpop.eup %3880  ;;  %1827 = vadd.xlane.f32.xlu1 %v1826_v34  ;;  %v4991_v58 = vpop.xlane.xlu0 %1509  ;;  %v1871_v17 = vsel %vm1354_vm2, %v3879_v36, 0.0  ;;  %v7006_v36 = vld [vmem:[#allocation41_spill] sm:$0xff] }
 0x2c6   : > { %7003 = vst [vmem:[#allocation105_spill] sm:$0xff] %v4991_v58  ;;  %v3883_v24 = vpop.eup %3882  ;;  %3888 = vpow2.f32 %v1707_v60  ;;  %1872 = vadd.xlane.f32.xlu0 %v1871_v17  ;;  %v1832_v13 = vsel %vm1354_vm2, %v3881_v41, 0.0  ;;  %v1590_v60 = vsub.f32 %v7006_v36, %v4974_v6  ;;  %v1693_v17 = vmul.f32 1.442695, %v1588_v59 }
 0x2c7   : > { %3890 = vpow2.f32 %v1685_v19  ;;  %v3885_v2 = vpop.eup %3884  ;;  %v1877_v34 = vsel %vm1354_vm2, %v3883_v24, 0.0 }
 0x2c8   : > { %3892 = vpow2.f32 %v1711_v18  ;;  %v1838_v19 = vsel %vm1354_vm2, %v3885_v2, 0.0  ;;  %v3887_v42 = vpop.eup %3886  ;;  %v1697_v41 = vmul.f32 1.442695, %v1590_v60 }
 0x2c9   : > { %1833 = vadd.xlane.f32.xlu1 %v1832_v13  ;;  %v4997_v11 = vpop.xlane.xlu0 %1503  ;;  %3894 = vpow2.f32 %v1689_v46  ;;  %v7009_v13 = vld [vmem:[#allocation45_spill] sm:$0xff]  ;;  %v7010_v46 = vld [vmem:[#allocation51_spill] sm:$0xff]  ;;  %v1844_v36 = vsel %vm1354_vm2, %v3887_v42, 0.0 }
 0x2ca   : > { %7005 = vst [vmem:[#allocation106_spill] sm:$0xff] %v4997_v11  ;;  %1878 = vadd.xlane.f32.xlu0 %v1877_v34  ;;  %3896 = vpow2.f32 %v1693_v17  ;;  %v1592_v26 = vsub.f32 %v7009_v13, %v5002_v28  ;;  %v7013_v13 = vld [vmem:[#allocation46_spill] sm:$0xff] }
 0x2cb   : > { %3898 = vpow2.f32 %v1697_v41  ;;  %v1594_v28 = vsub.f32 %v7013_v13, %v4965_v48 }
 0x2cc   : > { %v1701_v17 = vmul.f32 1.442695, %v1592_v26 }
 0x2cd   : > { %1839 = vadd.xlane.f32.xlu1 %v1838_v19  ;;  %v5005_v18 = vpop.xlane.xlu0 %1518 }
 0x2ce   : > { %7008 = vst [vmem:[#allocation108_spill] sm:$0xff] %v5005_v18  ;;  %v1601_v34 = vsub.f32 %v7010_v46, %v5005_v18 }
 0x2d0   : > { %v3889_v24 = vpop.eup %3888  ;;  %v1719_v29 = vmul.f32 1.442695, %v1601_v34  ;;  %v7015_v34 = vld [vmem:[#allocation49_spill] sm:$0xff] }
 0x2d1   : > { %v3891_v59 = vpop.eup %3890  ;;  %1845 = vadd.xlane.f32.xlu1 %v1844_v36  ;;  %v5012_v6 = vpop.xlane.xlu0 %1512  ;;  %v1883_v2 = vsel %vm1354_vm2, %v3889_v24, 0.0  ;;  %v1705_v24 = vmul.f32 1.442695, %v1594_v28 }
 0x2d2   : > { %7011 = vst [vmem:[#allocation109_spill] sm:$0xff] %v5012_v6  ;;  %v3893_v19 = vpop.eup %3892  ;;  %v1599_v60 = vsub.f32 %v7012_v5, %v5012_v6  ;;  %1884 = vadd.xlane.f32.xlu0 %v1883_v2  ;;  %v1850_v42 = vsel %vm1354_vm2, %v3891_v59, 0.0  ;;  %v7014_v5 = vld [vmem:[#allocation50_spill] sm:$0xff]  ;;  %v1598_v59 = vsub.f32 %v7015_v34, %v4991_v58 }
 0x2d3   : > { %v3895_v18 = vpop.eup %3894  ;;  %v1889_v36 = vsel %vm1354_vm2, %v3893_v19, 0.0  ;;  %v1596_v2 = vsub.f32 %v7014_v5, %v4997_v11 }
 0x2d4   : > { %v1715_v46 = vmul.f32 1.442695, %v1599_v60  ;;  %v1856_v26 = vsel %vm1354_vm2, %v3895_v18, 0.0  ;;  %v3897_v41 = vpop.eup %3896  ;;  %v1713_v28 = vmul.f32 1.442695, %v1598_v59 }
 0x2d5   : > { %1851 = vadd.xlane.f32.xlu1 %v1850_v42  ;;  %v1709_v60 = vmul.f32 1.442695, %v1596_v2  ;;  %v5026_v42 = vpop.xlane.xlu0 %1515  ;;  %v3899_v19 = vpop.eup %3898 }
 0x2d6   : > { %3900 = vpow2.f32 %v1715_v46  ;;  %1890 = vadd.xlane.f32.xlu0 %v1889_v36  ;;  %7016 = vst [vmem:[#allocation110_spill] sm:$0xff] %v5026_v42  ;;  %v1862_v46 = vsel %vm1354_vm2, %v3897_v41, 0.0  ;;  %v1868_v18 = vsel %vm1354_vm2, %v3899_v19, 0.0 }
 0x2d7   : > { %3902 = vpow2.f32 %v1701_v17  ;;  %v7017_v17 = vld [vmem:[#allocation53_spill] sm:$0xff] }
 0x2d8   : > { %3904 = vpow2.f32 %v1719_v29  ;;  %v1600_v29 = vsub.f32 %v7017_v17, %v5026_v42 }
 0x2d9   : > { %1857 = vadd.xlane.f32.xlu1 %v1856_v26  ;;  %3906 = vpow2.f32 %v1705_v24 }
 0x2da   : > { %3908 = vpow2.f32 %v1709_v60  ;;  %v1717_v2 = vmul.f32 1.442695, %v1600_v29 }
 0x2db   : > { %3910 = vpow2.f32 %v1713_v28 }
 0x2dc   : > { %3912 = vpow2.f32 %v1717_v2 }
 0x2dd   : > { %1863 = vadd.xlane.f32.xlu1 %v1862_v46 }
 0x2e0   : > { %v3901_v36 = vpop.eup %3900 }
 0x2e1   : > { %v3903_v26 = vpop.eup %3902  ;;  %1869 = vadd.xlane.f32.xlu1 %v1868_v18  ;;  %v1895_v24 = vsel %vm1354_vm2, %v3901_v36, 0.0 }
 0x2e2   : > { %v3905_v34 = vpop.eup %3904  ;;  %1896 = vadd.xlane.f32.xlu0 %v1895_v24  ;;  %v1874_v41 = vsel %vm1354_vm2, %v3903_v26, 0.0  ;;  %v6838_v24 = vlaneseq }
 0x2e3   : > { %v3907_v58 = vpop.eup %3906  ;;  %v1901_v59 = vsel %vm1354_vm2, %v3905_v34, 0.0 }
 0x2e4   : > { %v1880_v60 = vsel %vm1354_vm2, %v3907_v58, 0.0  ;;  %v3909_v46 = vpop.eup %3908 }
 0x2e5   : > { %1875 = vadd.xlane.f32.xlu1 %v1874_v41  ;;  %v1886_v19 = vsel %vm1354_vm2, %v3909_v46, 0.0  ;;  %v3911_v18 = vpop.eup %3910 }
 0x2e6   : > { %1902 = vadd.xlane.f32.xlu0 %v1901_v59  ;;  %v1892_v36 = vsel %vm1354_vm2, %v3911_v18, 0.0  ;;  %v3913_v28 = vpop.eup %3912  ;;  %v5044_v59 = vshrl.u32 %v6838_v24, 7 }
 0x2e7   : > { %v1898_v29 = vsel %vm1354_vm2, %v3913_v28, 0.0 }
 0x2e8   : > { %v2321_v17 = vadd.s32 40, %v5044_v59  ;;  %v2326_v42 = vadd.s32 80, %v5044_v59  ;;  %v2324_v5 = vadd.s32 64, %v5044_v59  ;;  %v2325_v14 = vadd.s32 72, %v5044_v59 }
 0x2e9   : > { %1881 = vadd.xlane.f32.xlu1 %v1880_v60  ;;  %v2348_v16 = vadd.s32 256, %v5044_v59 }
 0x2ed   : > { %1887 = vadd.xlane.f32.xlu1 %v1886_v19 }
 0x2f1   : > { %1893 = vadd.xlane.f32.xlu1 %v1892_v36  ;;  %v2318_v36 = vadd.s32 16, %v5044_v59 }
 0x2f5   : > { %1899 = vadd.xlane.f32.xlu1 %v1898_v29 }
 0x2f6   : > { %v1747_v26 = vpop.xlane.xlu1 %1746 }
 0x2f7   : > { %v1741_v34 = vpop.xlane.xlu0 %1740  ;;  %3914 = vlog2.f32 %v1747_v26  ;;  %v5052_v26 = vstv %s3550_s10 }
 0x2f8   : > { %3916 = vlog2.f32 %v1741_v34  ;;  %7020 = vst [vmem:[#allocation113_spill] sm:$0xff] %v5052_v26  ;;  %v5109_v33 = vadd.s32 %v5052_v26, %v2325_v14 }
 0x2fa   : > { %v1750_v2 = vpop.xlane.xlu1 %1749  ;;  %vm2455_vm15 = vcmp.lt.s32.totalorder %v5109_v33, 1024 }
 0x2fb   : > { %v5039_v58 = vpop.xlane.xlu0 %1521  ;;  %3918 = vlog2.f32 %v1750_v2 }
 0x2fc   : > { %7018 = vst [vmem:[#allocation111_spill] sm:$0xff] %v5039_v58  ;;  %v1602_v41 = vsub.f32 %v4744_v54, %v5039_v58  ;;  %v2317_v54 = vadd.s32 8, %v5044_v59  ;;  %v5059_v58 = vadd.s32 %v5052_v26, %v2318_v36  ;;  %v2327_v36 = vadd.s32 88, %v5044_v59 }
 0x2fe   : > { %v1744_v60 = vpop.xlane.xlu1 %1743  ;;  %v1721_v46 = vmul.f32 1.442695, %v1602_v41  ;;  %v2319_v41 = vadd.s32 24, %v5044_v59  ;;  %v5104_v51 = vadd.s32 %v5052_v26, %v2327_v36  ;;  %v2338_v36 = vadd.s32 176, %v5044_v59 }
 0x2ff   : > { %v5046_v19 = vpop.xlane.xlu0 %1524  ;;  %3920 = vlog2.f32 %v1744_v60  ;;  %vm2448_vm3 = vcmp.lt.s32.totalorder %v5059_v58, 1024 }
 0x300   : > { %7019 = vst [vmem:[#allocation112_spill] sm:$0xff] %v5046_v19  ;;  %v1603_v18 = vsub.f32 %v4755_v30, %v5046_v19  ;;  %3922 = vpow2.f32 %v1721_v46  ;;  %v2322_v30 = vadd.s32 48, %v5044_v59  ;;  %v2320_v19 = vadd.s32 32, %v5044_v59 }
 0x301   : > { %v3915_v24 = vpop.eup %3914  ;;  %v2323_v46 = vadd.s32 56, %v5044_v59  ;;  %v5073_v13 = vadd.s32 %v5052_v26, %v2319_v41  ;;  %v7023_v41 = vld [vmem:[#allocation54_spill] sm:$0xff]  ;;  %vm2457_vm0 = vcmp.lt.s32.totalorder %v5104_v51, 1024 }
 0x302   : > { %v1723_v28 = vmul.f32 1.442695, %v1603_v18  ;;  %v1759_v29 = vpop.xlane.xlu1 %1758  ;;  %v3917_v2 = vpop.eup %3916  ;;  %v1936_v18 = vmul.f32 0.6931472, %v3915_v24  ;;  %v5076_v24 = vadd.s32 %v5052_v26, %v2317_v54  ;;  %v5083_v21 = vadd.s32 %v5052_v26, %v2322_v30 }
 0x303   : > { %v5054_v34 = vpop.xlane.xlu0 %1527  ;;  %v1932_v11 = vmul.f32 0.6931472, %v3917_v2  ;;  %v2330_v2 = vadd.s32 112, %v5044_v59  ;;  %v5089_v54 = vadd.s32 %v5052_v26, %v2320_v19  ;;  %v5092_v37 = vadd.s32 %v5052_v26, %v2323_v46 }
 0x304   : > { %7021 = vst [vmem:[#allocation114_spill] sm:$0xff] %v5054_v34  ;;  %3924 = vpow2.f32 %v1723_v28  ;;  %v5067_v28 = vadd.s32 %v5052_v26, %v5044_v59  ;;  %v1604_v48 = vsub.f32 %v4768_v56, %v5054_v34  ;;  %v2061_v53 = vadd.f32 %v1936_v18, %v7023_v41 }
 0x305   : > { %v3919_v23 = vpop.eup %3918  ;;  %3926 = vlog2.f32 %v1759_v29  ;;  %v5095_v56 = vadd.s32 %v5052_v26, %v2321_v17  ;;  %v5098_v30 = vadd.s32 %v5052_v26, %v2326_v42  ;;  %v5101_v29 = vadd.s32 %v5052_v26, %v2324_v5 }
 0x306   : > { %v1753_v60 = vpop.xlane.xlu1 %1752  ;;  %v2336_v18 = vadd.s32 160, %v5044_v59  ;;  %v2059_v41 = vadd.f32 %v1932_v11, %v4716_v62  ;;  %v1938_v46 = vmul.f32 0.6931472, %v3919_v23  ;;  %v1725_v1 = vmul.f32 1.442695, %v1604_v48 }
 0x307   : > { %v5080_v6 = vpop.xlane.xlu0 %1530  ;;  %3928 = vlog2.f32 %v1753_v60  ;;  %v5112_v42 = vadd.s32 %v5052_v26, %v2330_v2  ;;  %v2328_v5 = vadd.s32 96, %v5044_v59  ;;  %v5117_v55 = vsub.f32 %v7024_v32, %v2061_v53  ;;  %v7026_v60 = vld [vmem:[#allocation3_spill] sm:$0xff] }
 0x308   : > { %7022 = vst [vmem:[#allocation115_spill] sm:$0xff] %v5080_v6  ;;  %v2331_v48 = vadd.s32 120, %v5044_v59  ;;  %v5124_v14 = vadd.s32 %v5052_v26, %v2336_v18  ;;  %v2340_v11 = vadd.s32 192, %v5044_v59  ;;  %v5128_v2 = vsub.f32 %v7026_v60, %v2059_v41 }
 0x309   : > { %v3921_v34 = vpop.eup %3920  ;;  %v2062_v53 = vadd.f32 %v1938_v46, %v4720_v3  ;;  %v2329_v18 = vadd.s32 104, %v5044_v59  ;;  %v2191_v3 = vmul.f32 1.442695, %v5117_v55  ;;  %vm2446_vm4 = vcmp.lt.s32.totalorder %v5067_v28, 1024 }
 0x30a   : > { %v1762_v61 = vpop.xlane.xlu1 %1761  ;;  %v3923_v19 = vpop.eup %3922  ;;  %v1934_v39 = vmul.f32 0.6931472, %v3921_v34  ;;  %v5139_v34 = vadd.s32 %v5052_v26, %v2338_v36  ;;  %v5147_v41 = vadd.s32 %v5052_v26, %v2331_v48  ;;  %v2344_v36 = vadd.s32 224, %v5044_v59 }
 0x30b   : > { %3930 = vlog2.f32 %v1762_v61  ;;  %v5119_v62 = vpop.xlane.xlu0 %1533  ;;  %v1904_v23 = vsel %vm1354_vm2, %v3923_v19, 0.0  ;;  %v1605_v61 = vsub.f32 %v4781_v31, %v5080_v6  ;;  %v2187_v60 = vmul.f32 1.442695, %v5128_v2 }
 0x30c   : > { %7025 = vst [vmem:[#allocation54_spill] sm:$0xff] %v5119_v62  ;;  %1905 = vadd.xlane.f32.xlu1 %v1904_v23  ;;  %v1606_v19 = vsub.f32 %v4794_v50, %v5119_v62  ;;  %v2332_v23 = vadd.s32 128, %v5044_v59  ;;  %v5161_v48 = vadd.s32 %v5052_v26, %v2340_v11  ;;  %v2346_v50 = vadd.s32 240, %v5044_v59 }
 0x30d   : > { %vm2449_vm6 = vcmp.lt.s32.totalorder %v5073_v13, 1024  ;;  %v1727_v62 = vmul.f32 1.442695, %v1605_v61  ;;  %v5166_v31 = vadd.s32 %v5052_v26, %v2329_v18  ;;  %v2333_v6 = vadd.s32 136, %v5044_v59 }
 0x30e   : > { %v3925_v17 = vpop.eup %3924  ;;  %v1756_v25 = vpop.xlane.xlu1 %1755  ;;  %v1729_v63 = vmul.f32 1.442695, %v1606_v19  ;;  %vm2447_vm8 = vcmp.lt.s32.totalorder %v5076_v24, 1024  ;;  %v5181_v18 = vadd.s32 %v5052_v26, %v2344_v36  ;;  %v5184_v20 = vadd.s32 %v5052_v26, %v2332_v23 }
 0x30f   : > { %3932 = vlog2.f32 %v1756_v25  ;;  %v1907_v32 = vsel %vm1354_vm2, %v3925_v17, 0.0  ;;  %v5136_v25 = vadd.s32 %v5052_v26, %v2328_v5  ;;  %v3927_v46 = vpop.eup %3926  ;;  %v2342_v17 = vadd.s32 208, %v5044_v59 }
 0x310   : > { %3934 = vpow2.f32 %v1725_v1  ;;  %1908 = vadd.xlane.f32.xlu0 %v1907_v32  ;;  %v2060_v1 = vadd.f32 %v1934_v39, %v4724_v10  ;;  %v2334_v5 = vadd.s32 144, %v5044_v59  ;;  %v7027_v10 = vld [vmem:[#allocation4_spill] sm:$0xff]  ;;  %v5158_v32 = vpop.xlane.xlu0 %1536  ;;  %v1944_v11 = vmul.f32 0.6931472, %v3927_v46  ;;  %7033 = vst [vmem:[#allocation116_spill] sm:$0xff] %v5184_v20 }
 0x311   : > { %v5156_v39 = vsub.f32 %v7027_v10, %v2062_v53  ;;  %7028 = vst [vmem:[#allocation2_spill] sm:$0xff] %v5158_v32  ;;  %v3929_v53 = vpop.eup %3928  ;;  %3936 = vpow2.f32 %v2191_v3  ;;  %v7029_v10 = vld [vmem:[#allocation5_spill] sm:$0xff]  ;;  %v5175_v7 = vadd.s32 %v5052_v26, %v2342_v17  ;;  %v5189_v46 = vadd.s32 %v5052_v26, %v2346_v50 }
 0x312   : > { %v5171_v47 = vsub.f32 %v7029_v10, %v2060_v1  ;;  %v5178_v61 = vadd.s32 %v5052_v26, %v2334_v5  ;;  %7032 = vst [vmem:[#allocation5_spill] sm:$0xff] %v5181_v18  ;;  %v2512_v1 = vsub.f32 0.0, %v5117_v55  ;;  %3938 = vpow2.f32 %v2187_v60  ;;  %v1771_v36 = vpop.xlane.xlu1 %1770  ;;  %v7036_v55 = vld [vmem:[#allocation55_spill] sm:$0xff] }
 0x313   : > { %7030 = vst [vmem:[#allocation3_spill] sm:$0xff] %v5175_v7  ;;  %v2193_v19 = vmul.f32 1.442695, %v5156_v39  ;;  %7034 = vst [vmem:[#allocation117_spill] sm:$0xff] %v5189_v46  ;;  %v1940_v10 = vmul.f32 0.6931472, %v3929_v53  ;;  %3940 = vpow2.f32 %v1727_v62  ;;  %v1607_v5 = vsub.f32 %v4807_v38, %v5158_v32 }
 0x314   : > { %7031 = vst [vmem:[#allocation4_spill] sm:$0xff] %v5178_v61  ;;  %v5194_v0 = vadd.s32 %v5052_v26, %v2333_v6  ;;  %v2189_v22 = vmul.f32 1.442695, %v5171_v47  ;;  %v2065_v60 = vadd.f32 %v1944_v11, %v7036_v55  ;;  %3942 = vpow2.f32 %v1729_v63  ;;  %v5198_v20 = vpop.xlane.xlu0 %1539  ;;  %v7039_v63 = vld [vmem:[#allocation57_spill] sm:$0xff] }
 0x315   : > { %v3931_v3 = vpop.eup %3930  ;;  %7037 = vst [vmem:[#allocation55_spill] sm:$0xff] %v5198_v20  ;;  %v5201_v50 = vadd.s32 %v5052_v26, %v2348_v16  ;;  %v2510_v62 = vsub.f32 0.0, %v5128_v2  ;;  %v2335_v38 = vadd.s32 152, %v5044_v59  ;;  %v2350_v32 = vadd.s32 272, %v5044_v59 }
 0x316   : > { %7035 = vst [vmem:[#allocation118_spill] sm:$0xff] %v5194_v0  ;;  %v1946_v53 = vmul.f32 0.6931472, %v3931_v3  ;;  %v2576_v6 = vsel %vm2448_vm3, %v2512_v1, 0.0  ;;  %3944 = vpow2.f32 %v2193_v19  ;;  %v2513_v0 = vsub.f32 0.0, %v5156_v39 }
 0x317   : > { %7038 = vst [vmem:[#allocation119_spill] sm:$0xff] %v5201_v50  ;;  %v2063_v55 = vadd.f32 %v1940_v10, %v7039_v63  ;;  %v1731_v46 = vmul.f32 1.442695, %v1607_v5  ;;  %3946 = vlog2.f32 %v1771_v36  ;;  %v2640_v2 = vsel %vm2448_vm3, 0.0, %v2512_v1  ;;  %v7040_v50 = vld [vmem:[#allocation6_spill] sm:$0xff] }
 0x318   : > { %3948 = vpow2.f32 %v2189_v22  ;;  %v2511_v3 = vsub.f32 0.0, %v5171_v47  ;;  %v5215_v18 = vsub.f32 %v7040_v50, %v2065_v60  ;;  %v2574_v39 = vsel %vm2446_vm4, %v2510_v62, 0.0  ;;  %v5225_v22 = vpop.xlane.xlu1 %1764  ;;  %v5233_v50 = vpop.xlane.xlu0 %1542 }
 0x319   : > { %v3933_v17 = vpop.eup %3932  ;;  %v2638_v19 = vsel %vm2446_vm4, 0.0, %v2510_v62  ;;  %vm2452_vm9 = vcmp.lt.s32.totalorder %v5083_v21, 1024  ;;  %v1608_v1 = vsub.f32 %v4820_v43, %v5198_v20  ;;  %v5228_v5 = vsel %vm2833_vm5, %v2576_v6, 0.0  ;;  %7043 = vst [vmem:[#allocation57_spill] sm:$0xff] %v5233_v50 }
 0x31a   : > { %v3935_v23 = vpop.eup %3934  ;;  %v1942_v11 = vmul.f32 0.6931472, %v3933_v17  ;;  %v7041_v17 = vld [vmem:[#allocation56_spill] sm:$0xff]  ;;  %v2577_v36 = vsel %vm2449_vm6, %v2513_v0, 0.0  ;;  %v5236_v62 = vadd.s32 %v5052_v26, %v2335_v38  ;;  %v2641_v63 = vsel %vm2449_vm6, 0.0, %v2513_v0 }
 0x31b   : > { %v1910_v16 = vsel %vm1354_vm2, %v3935_v23, 0.0  ;;  %v2066_v10 = vadd.f32 %v1946_v53, %v7041_v17  ;;  %v3937_v47 = vpop.eup %3936  ;;  %v7042_v23 = vld [vmem:[#allocation58_spill] sm:$0xff]  ;;  %v5239_v53 = vsel %vm2974_vm7, %v2640_v2, 0.0  ;;  %3950 = vpow2.f32 %v1731_v46 }
 0x31c   : > { %1911 = vadd.xlane.f32.xlu1 %v1910_v16  ;;  %v2064_v60 = vadd.f32 %v1942_v11, %v7042_v23  ;;  %7044 = vst [vmem:[#allocation6_spill] sm:$0xff] %v5236_v62  ;;  %v7045_v16 = vld [vmem:[#allocation7_spill] sm:$0xff]  ;;  %v3939_v6 = vpop.eup %3938  ;;  %v2834_v43 = vsel %vm2833_vm5, %v2574_v39, 0.0  ;;  %v2975_v11 = vsel %vm2974_vm7, %v2638_v19, 0.0  ;;  %v2575_v23 = vsel %vm2447_vm8, %v2511_v3, 0.0  ;;  %v5283_v58 = vpop.xlane.xlu0 %1545 }
 0x31d   : > { %v5244_v17 = vsub.f32 %v7045_v16, %v2063_v55  ;;  %v2199_v38 = vmul.f32 1.442695, %v5215_v18  ;;  %v3941_v20 = vpop.eup %3940  ;;  %v2704_v2 = vsel %vm2448_vm3, %v3937_v47, 0.0  ;;  %v5254_v0 = vsel %vm2833_vm5, %v2577_v36, 0.0  ;;  %v7046_v55 = vld [vmem:[#allocation8_spill] sm:$0xff]  ;;  %7049 = vst [vmem:[#allocation58_spill] sm:$0xff] %v5283_v58 }
 0x31e   : > { %v5257_v16 = vsub.f32 %v7046_v55, %v2066_v10  ;;  %v1733_v46 = vmul.f32 1.442695, %v1608_v1  ;;  %v3943_v62 = vpop.eup %3942  ;;  %v5260_v39 = vsel %vm2974_vm7, %v2641_v63, 0.0  ;;  %v2516_v19 = vsub.f32 0.0, %v5215_v18  ;;  %v1774_v55 = vpop.xlane.xlu1 %1773 }
 0x31f   : > { %vm2450_vm10 = vcmp.lt.s32.totalorder %v5089_v54, 1024  ;;  %v5265_v61 = vsub.f32 %v7047_v44, %v2064_v60  ;;  %v5268_v27 = vadd.s32 %v5052_v26, %v2350_v32  ;;  %v2768_v36 = vsel %vm2448_vm3, 0.0, %v3937_v47 }
 0x320   : > { %v2639_v10 = vsel %vm2447_vm8, 0.0, %v2511_v3  ;;  %v2835_v1 = vsel %vm2833_vm5, %v2575_v23, 0.0  ;;  %v2195_v63 = vmul.f32 1.442695, %v5244_v17  ;;  %v3945_v18 = vpop.eup %3944  ;;  %v5277_v57 = vsel %vm2833_vm5, %v2704_v2, 0.0 }
 0x321   : > { %7048 = vst [vmem:[#allocation56_spill] sm:$0xff] %v5268_v27  ;;  %v2702_v44 = vsel %vm2446_vm4, %v3939_v6, 0.0  ;;  %v2766_v32 = vsel %vm2446_vm4, 0.0, %v3939_v6  ;;  %3952 = vpow2.f32 %v2199_v38  ;;  %v3947_v47 = vpop.eup %3946  ;;  %v2201_v3 = vmul.f32 1.442695, %v5257_v16 }
 0x322   : > { %3954 = vpow2.f32 %v1733_v46  ;;  %v1913_v60 = vsel %vm1354_vm2, %v3941_v20, 0.0  ;;  %v1916_v23 = vsel %vm1354_vm2, %v3943_v62, 0.0  ;;  %v3949_v27 = vpop.eup %3948  ;;  %v5289_v2 = vsel %vm2974_vm7, %v2768_v36, 0.0 }
 0x323   : > { %v2836_v15 = vadd.f32 %v2835_v1, %v2834_v43  ;;  %v2976_v7 = vsel %vm2974_vm7, %v2639_v10, 0.0  ;;  %v2197_v28 = vmul.f32 1.442695, %v5265_v61  ;;  %1914 = vadd.xlane.f32.xlu0 %v1913_v60  ;;  %1917 = vadd.xlane.f32.xlu1 %v1916_v23  ;;  %v3115_v6 = vsel %vm2833_vm5, %v2702_v44, 0.0  ;;  %v1768_v60 = vpop.xlane.xlu1 %1767 }
 0x324   : > { %3956 = vpow2.f32 %v2195_v63  ;;  %vm2451_vm11 = vcmp.lt.s32.totalorder %v5095_v56, 1024  ;;  %v1609_v20 = vsub.f32 %v4835_v9, %v5233_v50  ;;  %v1610_v62 = vsub.f32 %v4850_v35, %v5283_v58 }
 0x325   : > { %v3255_v38 = vsel %vm2974_vm7, %v2766_v32, 0.0  ;;  %v2705_v43 = vsel %vm2449_vm6, %v3945_v18, 0.0  ;;  %v2580_v46 = vsel %vm2452_vm9, %v2516_v19, 0.0  ;;  %v1952_v36 = vmul.f32 0.6931472, %v3947_v47  ;;  %v3951_v10 = vpop.eup %3950 }
 0x326   : > { %v2703_v1 = vsel %vm2447_vm8, %v3949_v27, 0.0  ;;  %v2977_v63 = vadd.f32 %v2976_v7, %v2975_v11  ;;  %v2514_v44 = vsub.f32 0.0, %v5244_v17  ;;  %3958 = vpow2.f32 %v2201_v3  ;;  %v7050_v3 = vld [vmem:[#allocation60_spill] sm:$0xff] }
 0x327   : > { %v2769_v23 = vsel %vm2449_vm6, 0.0, %v3945_v18  ;;  %v2838_v32 = vadd.f32 %v5228_v5, %v2836_v15  ;;  %v2644_v35 = vsel %vm2452_vm9, 0.0, %v2516_v19  ;;  %3960 = vpow2.f32 %v2197_v28 }
 0x328   : > { %v2767_v47 = vsel %vm2447_vm8, 0.0, %v3949_v27  ;;  %vm2453_vm12 = vcmp.lt.s32.totalorder %v5092_v37, 1024  ;;  %3962 = vlog2.f32 %v5225_v22  ;;  %v1735_v7 = vmul.f32 1.442695, %v1609_v20 }
 0x329   : > { %v1737_v17 = vmul.f32 1.442695, %v1610_v62  ;;  %v3116_v11 = vsel %vm2833_vm5, %v2703_v1, 0.0  ;;  %v2069_v13 = vadd.f32 %v1952_v36, %v7050_v3  ;;  %3964 = vlog2.f32 %v1774_v55  ;;  %v7051_v1 = vld [vmem:[#allocation10_spill] sm:$0xff] }
 0x32a   : > { %v1919_v15 = vsel %vm1354_vm2, %v3951_v10, 0.0  ;;  %v3120_v5 = vsel %vm2833_vm5, %v2705_v43, 0.0  ;;  %v2979_v19 = vadd.f32 %v5239_v53, %v2977_v63  ;;  %v2578_v27 = vsel %vm2450_vm10, %v2514_v44, 0.0  ;;  %v1783_v43 = vpop.xlane.xlu1 %1782 }
 0x32b   : > { %3966 = vpow2.f32 %v1735_v7  ;;  %1920 = vadd.xlane.f32.xlu0 %v1919_v15  ;;  %v3953_v24 = vpop.eup %3952  ;;  %v3256_v22 = vsel %vm2974_vm7, %v2767_v47, 0.0  ;;  %v2642_v18 = vsel %vm2450_vm10, 0.0, %v2514_v44  ;;  %v2515_v28 = vsub.f32 0.0, %v5265_v61  ;;  %v1801_v7 = vpop.xlane.xlu0 %1800 }
 0x32c   : > { %3968 = vpow2.f32 %v1737_v17  ;;  %v3955_v55 = vpop.eup %3954  ;;  %v3260_v20 = vsel %vm2974_vm7, %v2769_v23, 0.0  ;;  %v3117_v62 = vadd.f32 %v3116_v11, %v3115_v6  ;;  %v5329_v53 = vsel %vm2833_vm5, %v2580_v46, 0.0 }
 0x32d   : > { %3970 = vlog2.f32 %v1768_v60  ;;  %v2840_v36 = vadd.f32 %v5254_v0, %v2838_v32  ;;  %v2841_v10 = vsel %vm2833_vm5, %v2578_v27, 0.0  ;;  %vm2456_vm13 = vcmp.lt.s32.totalorder %v5098_v30, 1024 }
 0x32e   : > { %v5335_v63 = vsub.f32 %v7051_v1, %v2069_v13  ;;  %v1922_v61 = vsel %vm1354_vm2, %v3955_v55, 0.0  ;;  %v3957_v44 = vpop.eup %3956  ;;  %v2981_v23 = vadd.f32 %v5260_v39, %v2979_v19  ;;  %v3257_v6 = vadd.f32 %v3256_v22, %v3255_v38 }
 0x32f   : > { %v2982_v46 = vsel %vm2974_vm7, %v2642_v18, 0.0  ;;  %v2517_v60 = vsub.f32 0.0, %v5257_v16  ;;  %1923 = vadd.xlane.f32.xlu1 %v1922_v61  ;;  %v2708_v0 = vsel %vm2452_vm9, %v3953_v24, 0.0  ;;  %v2579_v32 = vsel %vm2451_vm11, %v2515_v28, 0.0 }
 0x330   : > { %v2643_v47 = vsel %vm2451_vm11, 0.0, %v2515_v28  ;;  %3972 = vlog2.f32 %v1783_v43  ;;  %v3959_v17 = vpop.eup %3958  ;;  %v3119_v39 = vadd.f32 %v5277_v57, %v3117_v62  ;;  %v2772_v38 = vsel %vm2452_vm9, 0.0, %v3953_v24  ;;  %v1777_v24 = vpop.xlane.xlu1 %1776 }
 0x331   : > { %v2986_v16 = vsel %vm2974_vm7, %v2644_v35, 0.0  ;;  %v2842_v11 = vadd.f32 %v2841_v10, %v2840_v36  ;;  %v3961_v3 = vpop.eup %3960  ;;  %v2706_v13 = vsel %vm2450_vm10, %v3957_v44, 0.0  ;;  %v2770_v15 = vsel %vm2450_vm10, 0.0, %v3957_v44 }
 0x332   : > { %v2983_v19 = vadd.f32 %v2982_v46, %v2981_v23  ;;  %v2207_v27 = vmul.f32 1.442695, %v5335_v63  ;;  %v3963_v22 = vpop.eup %3962  ;;  %v3259_v18 = vadd.f32 %v5289_v2, %v3257_v6  ;;  %v5358_v57 = vsel %vm2833_vm5, %v2708_v0, 0.0  ;;  %v1807_v6 = vpop.xlane.xlu0 %1806 }
 0x333   : > { %v2843_v21 = vsel %vm2833_vm5, %v2579_v32, 0.0  ;;  %v2984_v35 = vsel %vm2974_vm7, %v2643_v47, 0.0  ;;  %v3965_v28 = vpop.eup %3964  ;;  %v5363_v55 = vsel %vm2974_vm7, %v2772_v38, 0.0  ;;  %v2581_v54 = vsel %vm2453_vm12, %v2517_v60, 0.0 }
 0x334   : > { %v1948_v62 = vmul.f32 0.6931472, %v3963_v22  ;;  %3974 = vlog2.f32 %v1801_v7  ;;  %v3121_v36 = vadd.f32 %v3120_v5, %v3119_v39  ;;  %v3122_v2 = vsel %vm2833_vm5, %v2706_v13, 0.0 }
 0x335   : > { %v3967_v43 = vpop.eup %3966  ;;  %v3262_v10 = vsel %vm2974_vm7, %v2770_v15, 0.0  ;;  %v2520_v1 = vsub.f32 0.0, %v5335_v63  ;;  %v2844_v44 = vadd.f32 %v2843_v21, %v2842_v11  ;;  %v2985_v23 = vadd.f32 %v2984_v35, %v2983_v19  ;;  %v7052_v63 = vld [vmem:[#allocation63_spill] sm:$0xff] }
 0x336   : > { %v3969_v61 = vpop.eup %3968  ;;  %3976 = vpow2.f32 %v2207_v27  ;;  %v1925_v46 = vsel %vm1354_vm2, %v3967_v43, 0.0  ;;  %v3261_v32 = vadd.f32 %v3260_v20, %v3259_v18  ;;  %v2707_v47 = vsel %vm2451_vm11, %v3961_v3, 0.0  ;;  %v1786_v27 = vpop.xlane.xlu1 %1785 }
 0x337   : > { %v3971_v0 = vpop.eup %3970  ;;  %3978 = vlog2.f32 %v1777_v24  ;;  %1926 = vadd.xlane.f32.xlu0 %v1925_v46  ;;  %v1928_v5 = vsel %vm1354_vm2, %v3969_v61, 0.0  ;;  %v2771_v7 = vsel %vm2451_vm11, 0.0, %v3961_v3  ;;  %v2067_v39 = vadd.f32 %v1948_v62, %v7052_v63  ;;  %v7053_v62 = vld [vmem:[#allocation11_spill] sm:$0xff] }
 0x338   : > { %v1954_v38 = vmul.f32 0.6931472, %v3965_v28  ;;  %v1950_v11 = vmul.f32 0.6931472, %v3971_v0  ;;  %1929 = vadd.xlane.f32.xlu1 %v1928_v5  ;;  %v3123_v13 = vadd.f32 %v3122_v2, %v3121_v36  ;;  %v3263_v15 = vadd.f32 %v3262_v10, %v3261_v32  ;;  %v7054_v36 = vld [vmem:[#allocation61_spill] sm:$0xff]  ;;  %v1813_v10 = vpop.xlane.xlu0 %1812 }
 0x339   : > { %v2645_v20 = vsel %vm2453_vm12, 0.0, %v2517_v60  ;;  %v2584_v19 = vsel %vm2456_vm13, %v2520_v1, 0.0  ;;  %v2709_v18 = vsel %vm2453_vm12, %v3959_v17, 0.0  ;;  %v2846_v56 = vadd.f32 %v5329_v53, %v2844_v44  ;;  %v7055_v53 = vld [vmem:[#allocation64_spill] sm:$0xff] }
 0x33a   : > { %v3973_v22 = vpop.eup %3972  ;;  %v2987_v3 = vadd.f32 %v2986_v16, %v2985_v23  ;;  %v2648_v21 = vsel %vm2456_vm13, 0.0, %v2520_v1  ;;  %vm2454_vm14 = vcmp.lt.s32.totalorder %v5101_v29, 1024  ;;  %v2773_v35 = vsel %vm2453_vm12, 0.0, %v3959_v17  ;;  %v1780_v63 = vpop.xlane.xlu1 %1779 }
 0x33b   : > { %v3124_v60 = vsel %vm2833_vm5, %v2707_v47, 0.0  ;;  %v3264_v24 = vsel %vm2974_vm7, %v2771_v7, 0.0  ;;  %v2337_v28 = vadd.s32 168, %v5044_v59  ;;  %v2131_v43 = vsub.f32 %v7053_v62, %v2067_v39 }
 0x33c   : > { %v2070_v2 = vadd.f32 %v1954_v38, %v7054_v36  ;;  %v2068_v16 = vadd.f32 %v1950_v11, %v7055_v53  ;;  %v2352_v1 = vadd.s32 288, %v5044_v59  ;;  %v2847_v61 = vsel %vm2833_vm5, %v2581_v54, 0.0 }
 0x33d   : > { %v2988_v37 = vsel %vm2974_vm7, %v2645_v20, 0.0  ;;  %v5399_v17 = vsel %vm2833_vm5, %v2584_v19, 0.0  ;;  %v1960_v44 = vmul.f32 0.6931472, %v3973_v22  ;;  %v5402_v46 = vadd.f32 %v2847_v61, %v2846_v56  ;;  %v7056_v20 = vld [vmem:[#allocation12_spill] sm:$0xff] }
 0x33e   : > { %v3975_v23 = vpop.eup %3974  ;;  %v3125_v0 = vadd.f32 %v3124_v60, %v3123_v13  ;;  %v3265_v32 = vadd.f32 %v3264_v24, %v3263_v15  ;;  %v5405_v47 = vsel %vm2974_vm7, %v2648_v21, 0.0  ;;  %v3128_v5 = vsel %vm2833_vm5, %v2709_v18, 0.0  ;;  %v7057_v13 = vld [vmem:[#allocation13_spill] sm:$0xff]  ;;  %v7058_v21 = vld [vmem:[#allocation66_spill] sm:$0xff]  ;;  %v1795_v61 = vpop.xlane.xlu1 %1794 }
 0x33f   : > { %v3268_v54 = vsel %vm2974_vm7, %v2773_v35, 0.0  ;;  %v5409_v7 = vadd.f32 %v2988_v37, %v2987_v3  ;;  %v5412_v39 = vadd.s32 %v5052_v26, %v2337_v28  ;;  %v2203_v11 = vmul.f32 1.442695, %v2131_v43  ;;  %v1819_v28 = vpop.xlane.xlu0 %1818 }
 0x340   : > { %v3977_v38 = vpop.eup %3976  ;;  %v5415_v19 = vsub.f32 %v7056_v20, %v2070_v2  ;;  %v2132_v15 = vsub.f32 %v7057_v13, %v2068_v16  ;;  %v5419_v22 = vadd.s32 %v5052_v26, %v2352_v1  ;;  %v2518_v18 = vsub.f32 0.0, %v2131_v43  ;;  %v7059_v16 = vld [vmem:[#allocation14_spill] sm:$0xff] }
 0x341   : > { %v3979_v56 = vpop.eup %3978  ;;  %v2073_v35 = vadd.f32 %v1960_v44, %v7058_v21  ;;  %v1972_v3 = vmul.f32 0.6931472, %v3975_v23  ;;  %3980 = vlog2.f32 %v1807_v6  ;;  %v3127_v60 = vadd.f32 %v5358_v57, %v3125_v0 }
 0x342   : > { %v3267_v24 = vadd.f32 %v5363_v55, %v3265_v32  ;;  %3982 = vlog2.f32 %v1786_v27  ;;  %v2339_v62 = vadd.s32 184, %v5044_v59  ;;  %v2712_v36 = vsel %vm2456_vm13, %v3977_v38, 0.0 }
 0x343   : > { %v2776_v2 = vsel %vm2456_vm13, 0.0, %v3977_v38  ;;  %3984 = vlog2.f32 %v1780_v63  ;;  %v2354_v43 = vadd.s32 304, %v5044_v59  ;;  %v2209_v57 = vmul.f32 1.442695, %v5415_v19 }
 0x344   : > { %3986 = vpow2.f32 %v2203_v11  ;;  %v2519_v6 = vsub.f32 0.0, %v2132_v15  ;;  %v1956_v55 = vmul.f32 0.6931472, %v3979_v56  ;;  %v2582_v27 = vsel %vm2454_vm14, %v2518_v18, 0.0 }
 0x345   : > { %v2205_v53 = vmul.f32 1.442695, %v2132_v15  ;;  %vm2460_vm1 = vcmp.lt.s32.totalorder %v5112_v42, 1024  ;;  %v2137_v1 = vsub.f32 %v7059_v16, %v2073_v35  ;;  %v2079_v30 = vadd.f32 %v1972_v3, %v4837_v45  ;;  %v1789_v3 = vpop.xlane.xlu1 %1788 }
 0x346   : > { %v5437_v37 = vadd.f32 %v3128_v5, %v3127_v60  ;;  %v5439_v44 = vadd.f32 %v3268_v54, %v3267_v24  ;;  %v5442_v23 = vsel %vm2833_vm5, %v2712_v36, 0.0  ;;  %3988 = vlog2.f32 %v1813_v10  ;;  %v7060_v54 = vld [vmem:[#allocation68_spill] sm:$0xff]  ;;  %v1825_v10 = vpop.xlane.xlu0 %1824 }
 0x347   : > { %v5445_v0 = vsel %vm2974_vm7, %v2776_v2, 0.0  ;;  %v2646_v32 = vsel %vm2454_vm14, 0.0, %v2518_v18  ;;  %3990 = vlog2.f32 %v1819_v28  ;;  %v2341_v63 = vadd.s32 200, %v5044_v59  ;;  %v7061_v2 = vld [vmem:[#allocation15_spill] sm:$0xff] }
 0x348   : > { %v2849_v45 = vsel %vm2833_vm5, %v2582_v27, 0.0  ;;  %3992 = vpow2.f32 %v2209_v57  ;;  %v2583_v5 = vsel %vm2455_vm15, %v2519_v6, 0.0  ;;  %vm2466_vm2 = vcmp.lt.s32.totalorder %v5124_v14, 1024 }
 0x349   : > { %v2071_v38 = vadd.f32 %v1956_v55, %v7060_v54  ;;  %3994 = vpow2.f32 %v2205_v53  ;;  %v2647_v11 = vsel %vm2455_vm15, 0.0, %v2519_v6  ;;  %v2215_v20 = vmul.f32 1.442695, %v2137_v1 }
 0x34a   : > { %v2143_v13 = vsub.f32 %v4527_v8, %v2079_v30  ;;  %v2990_v15 = vsel %vm2974_vm7, %v2646_v32, 0.0  ;;  %v2521_v56 = vsub.f32 0.0, %v5415_v19  ;;  %3996 = vlog2.f32 %v1795_v61 }
 0x34b   : > { %v5461_v18 = vadd.s32 %v5052_v26, %v2339_v62  ;;  %v3981_v21 = vpop.eup %3980  ;;  %v2851_v35 = vsel %vm2833_vm5, %v2583_v5, 0.0  ;;  %3998 = vlog2.f32 %v1825_v10  ;;  %v5465_v60 = vadd.s32 %v5052_v26, %v2354_v43 }
 0x34c   : > { %v2356_v24 = vadd.s32 320, %v5044_v59  ;;  %v3983_v28 = vpop.eup %3982  ;;  %v2850_v8 = vadd.f32 %v2849_v45, %v5402_v46  ;;  %v2992_v36 = vsel %vm2974_vm7, %v2647_v11, 0.0  ;;  %v2524_v19 = vsub.f32 0.0, %v2137_v1 }
 0x34d   : > { %v5471_v57 = vsub.f32 %v7061_v2, %v2071_v38  ;;  %v3985_v62 = vpop.eup %3984  ;;  %v2991_v6 = vadd.f32 %v2990_v15, %v5409_v7  ;;  %4000 = vpow2.f32 %v2215_v20  ;;  %v2227_v55 = vmul.f32 1.442695, %v2143_v13 }
 0x34e   : > { %vm2458_vm3 = vcmp.lt.s32.totalorder %v5136_v25, 1024  ;;  %v5476_v43 = vadd.s32 %v5052_v26, %v2341_v63  ;;  %v3987_v27 = vpop.eup %3986  ;;  %v2585_v46 = vsel %vm2457_vm0, %v2521_v56, 0.0  ;;  %v2852_v53 = vadd.f32 %v2851_v35, %v2850_v8  ;;  %v7062_v35 = vld [vmem:[#allocation76_spill] sm:$0xff] }
 0x34f   : > { %v1976_v16 = vmul.f32 0.6931472, %v3981_v21  ;;  %4002 = vlog2.f32 %v1789_v3  ;;  %v2649_v1 = vsel %vm2457_vm0, 0.0, %v2521_v56  ;;  %v2993_v30 = vadd.f32 %v2992_v36, %v2991_v6 }
 0x350   : > { %v2530_v61 = vsub.f32 0.0, %v2143_v13  ;;  %v5483_v7 = vadd.s32 %v5052_v26, %v2356_v24  ;;  %v3989_v32 = vpop.eup %3988  ;;  %v2588_v63 = vsel %vm2460_vm1, %v2524_v19, 0.0  ;;  %v2652_v45 = vsel %vm2460_vm1, 0.0, %v2524_v19 }
 0x351   : > { %v2211_v5 = vmul.f32 1.442695, %v5471_v57  ;;  %v1962_v54 = vmul.f32 0.6931472, %v3983_v28  ;;  %v3991_v38 = vpop.eup %3990  ;;  %v2710_v10 = vsel %vm2454_vm14, %v3987_v27, 0.0  ;;  %v2855_v11 = vsel %vm2833_vm5, %v2585_v46, 0.0 }
 0x352   : > { %4004 = vpow2.f32 %v2227_v55  ;;  %v1958_v20 = vmul.f32 0.6931472, %v3985_v62  ;;  %v3993_v13 = vpop.eup %3992  ;;  %v2774_v15 = vsel %vm2454_vm14, 0.0, %v3987_v27  ;;  %v2996_v56 = vsel %vm2974_vm7, %v2649_v1, 0.0 }
 0x353   : > { %v2854_v21 = vadd.f32 %v5399_v17, %v2852_v53  ;;  %v2081_v3 = vadd.f32 %v1976_v16, %v7062_v35  ;;  %v3995_v24 = vpop.eup %3994  ;;  %v2995_v28 = vadd.f32 %v5405_v47, %v2993_v30  ;;  %v5500_v8 = vsel %vm2833_vm5, %v2588_v63, 0.0  ;;  %v7063_v16 = vld [vmem:[#allocation20_spill] sm:$0xff] }
 0x354   : > { %v5503_v36 = vsel %vm2974_vm7, %v2652_v45, 0.0  ;;  %v2594_v19 = vsel %vm2466_vm2, %v2530_v61, 0.0  ;;  %v3997_v29 = vpop.eup %3996  ;;  %v3130_v2 = vsel %vm2833_vm5, %v2710_v10, 0.0  ;;  %4006 = vpow2.f32 %v2211_v5 }
 0x355   : > { %v2522_v17 = vsub.f32 0.0, %v5471_v57  ;;  %v2074_v62 = vadd.f32 %v1962_v54, %v4774_v12  ;;  %v5510_v6 = vpop.eup %3998  ;;  %v3270_v47 = vsel %vm2974_vm7, %v2774_v15, 0.0  ;;  %v2713_v55 = vsel %vm2457_vm0, %v3993_v13, 0.0 }
 0x356   : > { %v2658_v27 = vsel %vm2466_vm2, 0.0, %v2530_v61  ;;  %v2072_v46 = vadd.f32 %v1958_v20, %v4787_v4  ;;  %v2711_v53 = vsel %vm2455_vm15, %v3995_v24, 0.0  ;;  %v2775_v57 = vsel %vm2455_vm15, 0.0, %v3995_v24 }
 0x357   : > { %v5523_v12 = vsub.f32 %v7063_v16, %v2081_v3  ;;  %v1980_v1 = vmul.f32 0.6931472, %v3989_v32  ;;  %v4001_v30 = vpop.eup %4000  ;;  %v3131_v63 = vadd.f32 %v3130_v2, %v5437_v37  ;;  %v2777_v45 = vsel %vm2457_vm0, 0.0, %v3993_v13  ;;  %v7065_v16 = vld [vmem:[#allocation81_spill] sm:$0xff] }
 0x358   : > { %v2856_v5 = vadd.f32 %v2855_v11, %v2854_v21  ;;  %v2997_v61 = vadd.f32 %v2996_v56, %v2995_v28  ;;  %vm2468_vm4 = vcmp.lt.s32.totalorder %v5139_v34, 1024  ;;  %v3271_v54 = vadd.f32 %v3270_v47, %v5439_v44 }
 0x359   : > { %v5529_v4 = vpop.eup %4002  ;;  %v3136_v33 = vsel %vm2833_vm5, %v2713_v55, 0.0  ;;  %v2586_v10 = vsel %vm2458_vm3, %v2522_v17, 0.0  ;;  %v5536_v32 = vsub.f32 %v4490_v49, %v2074_v62  ;;  %vm2459_vm6 = vcmp.lt.s32.totalorder %v5166_v31, 1024 }
 0x35a   : > { %v3132_v51 = vsel %vm2833_vm5, %v2711_v53, 0.0  ;;  %v3272_v37 = vsel %vm2974_vm7, %v2775_v57, 0.0  ;;  %v2650_v11 = vsel %vm2458_vm3, 0.0, %v2522_v17  ;;  %v2136_v20 = vsub.f32 %v4495_v52, %v2072_v46 }
 0x35b   : > { %v2716_v44 = vsel %vm2460_vm1, %v4001_v30, 0.0  ;;  %v2780_v13 = vsel %vm2460_vm1, 0.0, %v4001_v30  ;;  %v2231_v49 = vmul.f32 1.442695, %v5523_v12  ;;  %v2083_v15 = vadd.f32 %v1980_v1, %v4861_v40 }
 0x35c   : > { %v4005_v56 = vpop.eup %4004  ;;  %v3276_v21 = vsel %vm2974_vm7, %v2777_v45, 0.0  ;;  %v5552_v35 = vsel %vm2833_vm5, %v2594_v19, 0.0  ;;  %v5555_v3 = vsel %vm2974_vm7, %v2658_v27, 0.0  ;;  %v1984_v52 = vmul.f32 0.6931472, %v3991_v38  ;;  %v7064_v27 = vld [vmem:[#allocation24_spill] sm:$0xff] }
 0x35d   : > { %v3133_v24 = vadd.f32 %v3132_v51, %v3131_v63  ;;  %v3273_v28 = vadd.f32 %v3272_v37, %v3271_v54  ;;  %v2857_v2 = vsel %vm2833_vm5, %v2586_v10, 0.0  ;;  %v2217_v42 = vmul.f32 1.442695, %v5536_v32  ;;  %v1831_v63 = vpop.xlane.xlu0 %1830 }
 0x35e   : > { %v5560_v17 = vsel %vm2833_vm5, %v2716_v44, 0.0  ;;  %v5563_v40 = vsel %vm2974_vm7, %v2780_v13, 0.0  ;;  %v2998_v62 = vsel %vm2974_vm7, %v2650_v11, 0.0  ;;  %vm2461_vm8 = vcmp.lt.s32.totalorder %v5147_v41, 1024  ;;  %v4007_v47 = vpop.eup %4006  ;;  %v7067_v11 = vld [vmem:[#allocation23_spill] sm:$0xff]  ;;  %v7068_v44 = vld [vmem:[#allocation70_spill] sm:$0xff] }
 0x35f   : > { %v2213_v19 = vmul.f32 1.442695, %v2136_v20  ;;  %v2722_v38 = vsel %vm2466_vm2, %v4005_v56, 0.0  ;;  %4008 = vpow2.f32 %v2231_v49  ;;  %v2532_v55 = vsub.f32 0.0, %v5523_v12 }
 0x360   : > { %vm2470_vm9 = vcmp.lt.s32.totalorder %v5161_v48, 1024  ;;  %v2147_v46 = vsub.f32 %v7064_v27, %v2083_v15  ;;  %v2858_v53 = vadd.f32 %v2857_v2, %v2856_v5  ;;  %v2523_v57 = vsub.f32 0.0, %v2136_v20 }
 0x361   : > { %v2085_v1 = vadd.f32 %v1984_v52, %v7065_v16  ;;  %v1968_v30 = vmul.f32 0.6931472, %v3997_v29  ;;  %v3135_v45 = vadd.f32 %v5442_v23, %v3133_v24  ;;  %v3275_v54 = vadd.f32 %v5445_v0, %v3273_v28  ;;  %v7070_v16 = vld [vmem:[#allocation85_spill] sm:$0xff] }
 0x362   : > { %v2999_v10 = vadd.f32 %v2998_v62, %v2997_v61  ;;  %4010 = vpow2.f32 %v2217_v42  ;;  %v2786_v51 = vsel %vm2466_vm2, 0.0, %v4005_v56  ;;  %v5578_v12 = vsel %vm2833_vm5, %v2722_v38, 0.0  ;;  %v7066_v61 = vld [vmem:[#allocation3_spill] sm:$0xff] }
 0x363   : > { %v2714_v5 = vsel %vm2458_vm3, %v4007_v47, 0.0  ;;  %4012 = vpow2.f32 %v2213_v19  ;;  %v2778_v29 = vsel %vm2458_vm3, 0.0, %v4007_v47  ;;  %v2596_v23 = vsel %vm2468_vm4, %v2532_v55, 0.0  ;;  %v1792_v47 = vpop.xlane.xlu1 %1791 }
 0x364   : > { %v2235_v37 = vmul.f32 1.442695, %v2147_v46  ;;  %4014 = vlog2.f32 %v1831_v63  ;;  %v2587_v0 = vsel %vm2459_vm6, %v2523_v57, 0.0  ;;  %v2651_v14 = vsel %vm2459_vm6, 0.0, %v2523_v57 }
 0x365   : > { %vm2472_vm10 = vcmp.lt.s32.totalorder %v7066_v61, 1024  ;;  %v2149_v20 = vsub.f32 %v7067_v11, %v2085_v1  ;;  %v2077_v13 = vadd.f32 %v1968_v30, %v7068_v44  ;;  %v5594_v25 = vsel %vm2974_vm7, %v2786_v51, 0.0 }
 0x366   : > { %v3137_v49 = vadd.f32 %v3136_v33, %v3135_v45  ;;  %v2525_v15 = vsub.f32 0.0, %v5536_v32  ;;  %v1988_v56 = vmul.f32 0.6931472, %v5510_v6  ;;  %v3138_v52 = vsel %vm2833_vm5, %v2714_v5, 0.0  ;;  %v7069_v6 = vld [vmem:[#allocation16_spill] sm:$0xff] }
 0x367   : > { %v3277_v24 = vadd.f32 %v3276_v21, %v3275_v54  ;;  %v3278_v28 = vsel %vm2974_vm7, %v2778_v29, 0.0  ;;  %v2534_v2 = vsub.f32 0.0, %v2147_v46  ;;  %v2660_v42 = vsel %vm2468_vm4, 0.0, %v2532_v55 }
 0x368   : > { %v5603_v62 = vsel %vm2833_vm5, %v2596_v23, 0.0  ;;  %v2859_v19 = vsel %vm2833_vm5, %v2587_v0, 0.0  ;;  %v3000_v33 = vsel %vm2974_vm7, %v2651_v14, 0.0  ;;  %4016 = vpow2.f32 %v2235_v37  ;;  %v7071_v23 = vld [vmem:[#allocation4_spill] sm:$0xff] }
 0x369   : > { %v2239_v32 = vmul.f32 1.442695, %v2149_v20  ;;  %v5608_v38 = vsub.f32 %v7069_v6, %v2077_v13  ;;  %v1964_v21 = vmul.f32 0.6931472, %v5529_v4  ;;  %v4009_v27 = vpop.eup %4008  ;;  %v5611_v46 = vadd.f32 %v3138_v52, %v3137_v49  ;;  %v1837_v6 = vpop.xlane.xlu0 %1836 }
 0x36a   : > { %v2589_v55 = vsel %vm2461_vm8, %v2525_v15, 0.0  ;;  %v2653_v57 = vsel %vm2461_vm8, 0.0, %v2525_v15  ;;  %v2087_v1 = vadd.f32 %v1988_v56, %v7070_v16  ;;  %v2598_v30 = vsel %vm2470_vm9, %v2534_v2, 0.0  ;;  %v1798_v56 = vpop.xlane.xlu1 %1797 }
 0x36b   : > { %v2860_v63 = vadd.f32 %v2859_v19, %v2858_v53  ;;  %v3001_v45 = vadd.f32 %v3000_v33, %v2999_v10  ;;  %4018 = vlog2.f32 %v1792_v47  ;;  %v3279_v51 = vadd.f32 %v3278_v28, %v3277_v24  ;;  %v7072_v10 = vld [vmem:[#allocation73_spill] sm:$0xff] }
 0x36c   : > { %v4011_v54 = vpop.eup %4010  ;;  %v5621_v4 = vsel %vm2974_vm7, %v2660_v42, 0.0  ;;  %v2662_v5 = vsel %vm2470_vm9, 0.0, %v2534_v2  ;;  %v2536_v29 = vsub.f32 0.0, %v2149_v20  ;;  %vm2464_vm11 = vcmp.lt.s32.totalorder %v7071_v23, 1024  ;;  %v7073_v20 = vld [vmem:[#allocation28_spill] sm:$0xff]  ;;  %v7074_v47 = vld [vmem:[#allocation5_spill] sm:$0xff] }
 0x36d   : > { %v4013_v37 = vpop.eup %4012  ;;  %v2724_v0 = vsel %vm2468_vm4, %v4009_v27, 0.0  ;;  %4020 = vpow2.f32 %v2239_v32  ;;  %v2223_v53 = vmul.f32 1.442695, %v5608_v38  ;;  %v2075_v14 = vadd.f32 %v1964_v21, %v7072_v10  ;;  %v7075_v32 = vld [vmem:[#allocation116_spill] sm:$0xff] }
 0x36e   : > { %v4015_v11 = vpop.eup %4014  ;;  %v2863_v44 = vsel %vm2833_vm5, %v2589_v55, 0.0  ;;  %v3004_v13 = vsel %vm2974_vm7, %v2653_v57, 0.0  ;;  %v5633_v49 = vsel %vm2833_vm5, %v2598_v30, 0.0  ;;  %v5636_v15 = vsub.f32 %v7073_v20, %v2087_v1 }
 0x36f   : > { %v2788_v52 = vsel %vm2468_vm4, 0.0, %v4009_v27  ;;  %v5641_v24 = vsel %vm2974_vm7, %v2662_v5, 0.0  ;;  %v2862_v28 = vadd.f32 %v5500_v8, %v2860_v63  ;;  %v3003_v2 = vadd.f32 %v5503_v36, %v3001_v45  ;;  %v7076_v36 = vld [vmem:[#allocation17_spill] sm:$0xff] }
 0x370   : > { %v5646_v42 = vsel %vm2833_vm5, %v2724_v0, 0.0  ;;  %v2717_v19 = vsel %vm2461_vm8, %v4011_v54, 0.0  ;;  %v2600_v33 = vsel %vm2472_vm10, %v2536_v29, 0.0  ;;  %v2664_v34 = vsel %vm2472_vm10, 0.0, %v2536_v29  ;;  %v1804_v29 = vpop.xlane.xlu1 %1803 }
 0x371   : > { %vm2474_vm12 = vcmp.lt.s32.totalorder %v7074_v47, 1024  ;;  %vm2462_vm13 = vcmp.lt.s32.totalorder %v7075_v32, 1024  ;;  %v2781_v8 = vsel %vm2461_vm8, 0.0, %v4011_v54  ;;  %4022 = vpow2.f32 %v2223_v53  ;;  %v7094_v47 = vld [vmem:[#allocation119_spill] sm:$0xff] }
 0x372   : > { %v2139_v21 = vsub.f32 %v7076_v36, %v2075_v14  ;;  %v1992_v27 = vmul.f32 0.6931472, %v4015_v11  ;;  %v2715_v55 = vsel %vm2459_vm6, %v4013_v37, 0.0  ;;  %v2779_v57 = vsel %vm2459_vm6, 0.0, %v4013_v37  ;;  %v4017_v1 = vpop.eup %4016  ;;  %v7077_v14 = vld [vmem:[#allocation83_spill] sm:$0xff] }
 0x373   : > { %v2243_v16 = vmul.f32 1.442695, %v5636_v15  ;;  %4024 = vlog2.f32 %v1798_v56  ;;  %v5665_v30 = vsel %vm2974_vm7, %v2788_v52, 0.0  ;;  %v5668_v41 = vsel %vm2833_vm5, %v2600_v33, 0.0  ;;  %v7078_v33 = vld [vmem:[#allocation117_spill] sm:$0xff] }
 0x374   : > { %v2528_v63 = vsub.f32 0.0, %v5608_v38  ;;  %4026 = vlog2.f32 %v1837_v6  ;;  %v3144_v45 = vsel %vm2833_vm5, %v2717_v19, 0.0  ;;  %v5673_v54 = vsel %vm2974_vm7, %v2781_v8, 0.0 }
 0x375   : > { %v5676_v31 = vsel %vm2974_vm7, %v2664_v34, 0.0  ;;  %v5678_v5 = vadd.f32 %v2863_v44, %v2862_v28  ;;  %v4019_v37 = vpop.eup %4018  ;;  %v3140_v0 = vsel %vm2833_vm5, %v2715_v55, 0.0  ;;  %v3280_v53 = vsel %vm2974_vm7, %v2779_v57, 0.0  ;;  %v1843_v34 = vpop.xlane.xlu0 %1842 }
 0x376   : > { %v2219_v10 = vmul.f32 1.442695, %v2139_v21  ;;  %v2089_v38 = vadd.f32 %v1992_v27, %v7077_v14  ;;  %v2726_v11 = vsel %vm2470_vm9, %v4017_v1, 0.0  ;;  %v2790_v20 = vsel %vm2470_vm9, 0.0, %v4017_v1  ;;  %v7079_v27 = vld [vmem:[#allocation74_spill] sm:$0xff] }
 0x377   : > { %4028 = vpow2.f32 %v2243_v16  ;;  %v1966_v56 = vmul.f32 0.6931472, %v4019_v37  ;;  %v4021_v52 = vpop.eup %4020  ;;  %v2592_v44 = vsel %vm2464_vm11, %v2528_v63, 0.0  ;;  %v2538_v28 = vsub.f32 0.0, %v5636_v15  ;;  %v7080_v16 = vld [vmem:[#allocation27_spill] sm:$0xff] }
 0x378   : > { %v2526_v19 = vsub.f32 0.0, %v2139_v21  ;;  %vm2476_vm14 = vcmp.lt.s32.totalorder %v7078_v33, 1024  ;;  %4030 = vlog2.f32 %v1804_v29  ;;  %v3141_v6 = vadd.f32 %v3140_v0, %v5611_v46  ;;  %v7081_v29 = vld [vmem:[#allocation19_spill] sm:$0xff] }
 0x379   : > { %v3281_v8 = vadd.f32 %v3280_v53, %v3279_v51  ;;  %v3005_v36 = vadd.f32 %v3004_v13, %v3003_v2  ;;  %v2076_v48 = vadd.f32 %v1966_v56, %v7079_v27  ;;  %v5694_v55 = vsel %vm2833_vm5, %v2726_v11, 0.0  ;;  %v1810_v11 = vpop.xlane.xlu1 %1809 }
 0x37a   : > { %v2656_v57 = vsel %vm2464_vm11, 0.0, %v2528_v63  ;;  %4032 = vpow2.f32 %v2219_v10  ;;  %v2153_v15 = vsub.f32 %v7080_v16, %v2089_v38  ;;  %v5700_v21 = vsel %vm2974_vm7, %v2790_v20, 0.0  ;;  %v7082_v38 = vld [vmem:[#allocation118_spill] sm:$0xff] }
 0x37b   : > { %v2728_v1 = vsel %vm2472_vm10, %v4021_v52, 0.0  ;;  %v5705_v46 = vsel %vm2833_vm5, %v2592_v44, 0.0  ;;  %4034 = vlog2.f32 %v1843_v34  ;;  %v4023_v51 = vpop.eup %4022  ;;  %v2792_v13 = vsel %vm2472_vm10, 0.0, %v4021_v52 }
 0x37c   : > { %v2602_v2 = vsel %vm2474_vm12, %v2538_v28, 0.0  ;;  %v2590_v63 = vsel %vm2462_vm13, %v2526_v19, 0.0  ;;  %v2140_v37 = vsub.f32 %v7081_v29, %v2076_v48  ;;  %v3143_v53 = vadd.f32 %v5560_v17, %v3141_v6 }
 0x37d   : > { %v4025_v0 = vpop.eup %4024  ;;  %v3283_v10 = vadd.f32 %v5563_v40, %v3281_v8  ;;  %v5717_v14 = vsel %vm2974_vm7, %v2656_v57, 0.0  ;;  %v2654_v61 = vsel %vm2462_vm13, 0.0, %v2526_v19  ;;  %vm2463_vm15 = vcmp.lt.s32.totalorder %v7082_v38, 1024  ;;  %v1849_v8 = vpop.xlane.xlu0 %1848 }
 0x37e   : > { %v4027_v20 = vpop.eup %4026  ;;  %v5723_v56 = vsel %vm2833_vm5, %v2728_v1, 0.0  ;;  %v2666_v52 = vsel %vm2474_vm12, 0.0, %v2538_v28  ;;  %v2247_v44 = vmul.f32 1.442695, %v2153_v15  ;;  %v1970_v17 = vmul.f32 0.6931472, %v4025_v0 }
 0x37f   : > { %7083 = vst [vmem:[#allocation7_spill] sm:$0xff] %v5723_v56  ;;  %v5728_v40 = vsel %vm2974_vm7, %v2792_v13, 0.0  ;;  %v5731_v34 = vsel %vm2833_vm5, %v2602_v2, 0.0  ;;  %v2865_v19 = vsel %vm2833_vm5, %v2590_v63, 0.0  ;;  %v2540_v6 = vsub.f32 0.0, %v2153_v15  ;;  %v7087_v2 = vld [vmem:[#allocation71_spill] sm:$0xff] }
 0x380   : > { %7084 = vst [vmem:[#allocation8_spill] sm:$0xff] %v5728_v40  ;;  %7085 = vst [vmem:[#allocation9_spill] sm:$0xff] %v5731_v34  ;;  %v2720_v27 = vsel %vm2464_vm11, %v4023_v51, 0.0  ;;  %v3006_v48 = vsel %vm2974_vm7, %v2654_v61, 0.0  ;;  %v2221_v57 = vmul.f32 1.442695, %v2140_v37  ;;  %4036 = vlog2.f32 %v1810_v11 }
 0x381   : > { %v4029_v28 = vpop.eup %4028  ;;  %v5738_v16 = vsel %vm2974_vm7, %v2666_v52, 0.0  ;;  %v5740_v1 = vadd.f32 %v3144_v45, %v3143_v53  ;;  %v1996_v13 = vmul.f32 0.6931472, %v4027_v20  ;;  %v2078_v29 = vadd.f32 %v1970_v17, %v7087_v2 }
 0x382   : > { %7086 = vst [vmem:[#allocation60_spill] sm:$0xff] %v5738_v16  ;;  %v4031_v0 = vpop.eup %4030  ;;  %v2784_v15 = vsel %vm2464_vm11, 0.0, %v4023_v51  ;;  %v2866_v63 = vadd.f32 %v2865_v19, %v5678_v5  ;;  %v5747_v9 = vadd.f32 %v5673_v54, %v3283_v10  ;;  %4038 = vpow2.f32 %v2247_v44  ;;  %v7088_v10 = vld [vmem:[#allocation88_spill] sm:$0xff]  ;;  %v7090_v44 = vld [vmem:[#allocation18_spill] sm:$0xff] }
 0x383   : > { %v5750_v61 = vsel %vm2833_vm5, %v2720_v27, 0.0  ;;  %v3007_v11 = vadd.f32 %v3006_v48, %v3005_v36  ;;  %v2604_v45 = vsel %vm2476_vm14, %v2540_v6, 0.0  ;;  %4040 = vlog2.f32 %v1849_v8  ;;  %v7089_v36 = vld [vmem:[#allocation6_spill] sm:$0xff]  ;;  %v1855_v8 = vpop.xlane.xlu0 %1854  ;;  %v1816_v27 = vpop.xlane.xlu1 %1815 }
 0x384   : > { %v4033_v53 = vpop.eup %4032  ;;  %v2730_v20 = vsel %vm2474_vm12, %v4029_v28, 0.0  ;;  %v2668_v23 = vsel %vm2476_vm14, 0.0, %v2540_v6  ;;  %4042 = vpow2.f32 %v2221_v57  ;;  %v2527_v5 = vsub.f32 0.0, %v2140_v37 }
 0x385   : > { %v4035_v54 = vpop.eup %4034  ;;  %v5759_v51 = vsel %vm2974_vm7, %v2784_v15, 0.0  ;;  %v2091_v52 = vadd.f32 %v1996_v13, %v7088_v10  ;;  %vm2465_vm0 = vcmp.lt.s32.totalorder %v7089_v36, 1024  ;;  %v2142_v17 = vsub.f32 %v7090_v44, %v2078_v29 }
 0x386   : > { %v1974_v19 = vmul.f32 0.6931472, %v4031_v0  ;;  %v2343_v48 = vadd.s32 216, %v5044_v59  ;;  %v2358_v2 = vadd.s32 336, %v5044_v59  ;;  %v2345_v6 = vadd.s32 232, %v5044_v59 }
 0x387   : > { %v5768_v37 = vadd.s32 352, %v5044_v59  ;;  %v2794_v57 = vsel %vm2474_vm12, 0.0, %v4029_v28  ;;  %v5773_v13 = vsel %vm2833_vm5, %v2730_v20, 0.0  ;;  %v5776_v29 = vsel %vm2833_vm5, %v2604_v45, 0.0  ;;  %v7095_v45 = vld [vmem:[#allocation32_spill] sm:$0xff] }
 0x388   : > { %7091 = vst [vmem:[#allocation10_spill] sm:$0xff] %v5773_v13  ;;  %7092 = vst [vmem:[#allocation63_spill] sm:$0xff] %v5776_v29  ;;  %v5779_v0 = vsel %vm2974_vm7, %v2668_v23, 0.0  ;;  %v2718_v15 = vsel %vm2462_vm13, %v4033_v53, 0.0  ;;  %v2591_v10 = vsel %vm2463_vm15, %v2527_v5, 0.0  ;;  %v2655_v44 = vsel %vm2463_vm15, 0.0, %v2527_v5 }
 0x389   : > { %7093 = vst [vmem:[#allocation11_spill] sm:$0xff] %v5779_v0  ;;  %vm2478_vm1 = vcmp.lt.s32.totalorder %v7094_v47, 1024  ;;  %v2000_v28 = vmul.f32 0.6931472, %v4035_v54  ;;  %v2782_v20 = vsel %vm2462_vm13, 0.0, %v4033_v53  ;;  %v2155_v58 = vsub.f32 %v7095_v45, %v2091_v52  ;;  %v7096_v23 = vld [vmem:[#allocation79_spill] sm:$0xff]  ;;  %v1861_v52 = vpop.xlane.xlu0 %1860 }
 0x38a   : > { %v2225_v50 = vmul.f32 1.442695, %v2142_v17  ;;  %v2080_v0 = vadd.f32 %v1974_v19, %v7096_v23  ;;  %v4037_v29 = vpop.eup %4036  ;;  %v5793_v13 = vsel %vm2974_vm7, %v2794_v57, 0.0  ;;  %4044 = vlog2.f32 %v1855_v8  ;;  %v7099_v23 = vld [vmem:[#allocation86_spill] sm:$0xff] }
 0x38b   : > { %7097 = vst [vmem:[#allocation61_spill] sm:$0xff] %v5793_v13  ;;  %v5796_v40 = vadd.s32 %v5052_v26, %v2343_v48  ;;  %v5799_v5 = vadd.s32 %v5052_v26, %v2358_v2  ;;  %v3146_v54 = vsel %vm2833_vm5, %v2718_v15, 0.0  ;;  %v2867_v32 = vsel %vm2833_vm5, %v2591_v10, 0.0  ;;  %v1822_v13 = vpop.xlane.xlu1 %1821  ;;  %v7100_v15 = vld [vmem:[#allocation22_spill] sm:$0xff] }
 0x38c   : > { %v3008_v53 = vsel %vm2974_vm7, %v2655_v44, 0.0  ;;  %v5805_v19 = vadd.s32 %v5052_v26, %v2345_v6  ;;  %v4039_v45 = vpop.eup %4038  ;;  %v3286_v57 = vsel %vm2974_vm7, %v2782_v20, 0.0  ;;  %v2529_v8 = vsub.f32 0.0, %v2142_v17  ;;  %v7101_v26 = vld [vmem:[#allocation56_spill] sm:$0xff] }
 0x38d   : > { %7098 = vst [vmem:[#allocation64_spill] sm:$0xff] %v5799_v5  ;;  %v2093_v48 = vadd.f32 %v2000_v28, %v7099_v23  ;;  %4046 = vlog2.f32 %v1816_v27  ;;  %v4041_v2 = vpop.eup %4040  ;;  %v2251_v56 = vmul.f32 1.442695, %v2155_v58  ;;  %vm2467_vm2 = vcmp.lt.s32.totalorder %v5412_v39, 1024 }
 0x38e   : > { %4048 = vpow2.f32 %v2225_v50  ;;  %v2144_v10 = vsub.f32 %v7100_v15, %v2080_v0  ;;  %v1978_v44 = vmul.f32 0.6931472, %v4037_v29  ;;  %v4043_v5 = vpop.eup %4042  ;;  %v3147_v6 = vadd.f32 %v3146_v54, %v5740_v1  ;;  %v7102_v0 = vld [vmem:[#allocation31_spill] sm:$0xff] }
 0x38f   : > { %v2868_v16 = vadd.f32 %v2867_v32, %v2866_v63  ;;  %v3009_v34 = vadd.f32 %v3008_v53, %v3007_v11  ;;  %vm2480_vm3 = vcmp.lt.s32.totalorder %v7101_v26, 1024  ;;  %4050 = vlog2.f32 %v1861_v52 }
 0x390   : > { %v3287_v17 = vadd.f32 %v3286_v57, %v5747_v9  ;;  %v2732_v27 = vsel %vm2476_vm14, %v4039_v45, 0.0  ;;  %v2542_v28 = vsub.f32 0.0, %v2155_v58  ;;  %4052 = vlog2.f32 %v1822_v13  ;;  %v7103_v9 = vld [vmem:[#allocation77_spill] sm:$0xff] }
 0x391   : > { %v2593_v50 = vsel %vm2465_vm0, %v2529_v8, 0.0  ;;  %v2657_v29 = vsel %vm2465_vm0, 0.0, %v2529_v8  ;;  %v2157_v1 = vsub.f32 %v7102_v0, %v2093_v48  ;;  %v2004_v63 = vmul.f32 0.6931472, %v4041_v2 }
 0x392   : > { %v2719_v11 = vsel %vm2463_vm15, %v4043_v5, 0.0  ;;  %4054 = vpow2.f32 %v2251_v56  ;;  %v2229_v20 = vmul.f32 1.442695, %v2144_v10  ;;  %v2082_v54 = vadd.f32 %v1978_v44, %v7103_v9  ;;  %v7106_v9 = vld [vmem:[#allocation36_spill] sm:$0xff] }
 0x393   : > { %v2796_v58 = vsel %vm2476_vm14, 0.0, %v4039_v45  ;;  %v2783_v13 = vsel %vm2463_vm15, 0.0, %v4043_v5  ;;  %v2870_v32 = vadd.f32 %v5705_v46, %v2868_v16  ;;  %v3011_v53 = vadd.f32 %v5717_v14, %v3009_v34  ;;  %v7104_v5 = vld [vmem:[#allocation91_spill] sm:$0xff]  ;;  %v7105_v34 = vld [vmem:[#allocation21_spill] sm:$0xff] }
 0x394   : > { %v2606_v52 = vsel %vm2478_vm1, %v2542_v28, 0.0  ;;  %v2670_v57 = vsel %vm2478_vm1, 0.0, %v2542_v28  ;;  %v2871_v56 = vsel %vm2833_vm5, %v2593_v50, 0.0  ;;  %v3012_v8 = vsel %vm2974_vm7, %v2657_v29, 0.0  ;;  %v4045_v23 = vpop.eup %4044 }
 0x395   : > { %v3148_v33 = vsel %vm2833_vm5, %v2719_v11, 0.0  ;;  %v2255_v45 = vmul.f32 1.442695, %v2157_v1  ;;  %v2531_v38 = vsub.f32 0.0, %v2144_v10  ;;  %v2095_v48 = vadd.f32 %v2004_v63, %v7104_v5 }
 0x396   : > { %v3288_v46 = vsel %vm2974_vm7, %v2783_v13, 0.0  ;;  %v2544_v14 = vsub.f32 0.0, %v2157_v1  ;;  %4056 = vpow2.f32 %v2229_v20  ;;  %vm2469_vm4 = vcmp.lt.s32.totalorder %v5461_v18, 1024 }
 0x397   : > { %v5841_v16 = vsub.f32 %v7105_v34, %v2082_v54  ;;  %v4047_v2 = vpop.eup %4046  ;;  %v5844_v15 = vsel %vm2833_vm5, %v2732_v27, 0.0  ;;  %v5847_v44 = vsel %vm2974_vm7, %v2796_v58, 0.0  ;;  %v5850_v10 = vsel %vm2833_vm5, %v2606_v52, 0.0 }
 0x398   : > { %v2872_v28 = vadd.f32 %v2871_v56, %v2870_v32  ;;  %v4049_v50 = vpop.eup %4048  ;;  %v3149_v29 = vadd.f32 %v3148_v33, %v3147_v6  ;;  %v5853_v0 = vsel %vm2974_vm7, %v2670_v57, 0.0  ;;  %v3013_v1 = vadd.f32 %v3012_v8, %v3011_v53 }
 0x399   : > { %vm2482_vm6 = vcmp.lt.s32.totalorder %v5419_v22, 1024  ;;  %v2008_v63 = vmul.f32 0.6931472, %v4045_v23  ;;  %v4051_v11 = vpop.eup %4050  ;;  %v3289_v20 = vadd.f32 %v3288_v46, %v3287_v17  ;;  %4058 = vpow2.f32 %v2255_v45 }
 0x39a   : > { %v2595_v27 = vsel %vm2467_vm2, %v2531_v38, 0.0  ;;  %v5859_v54 = vsub.f32 %v7106_v9, %v2095_v48  ;;  %v4053_v58 = vpop.eup %4052  ;;  %v2608_v6 = vsel %vm2480_vm3, %v2544_v14, 0.0  ;;  %v2659_v13 = vsel %vm2467_vm2, 0.0, %v2531_v38  ;;  %v7107_v38 = vld [vmem:[#allocation90_spill] sm:$0xff] }
 0x39b   : > { %v2233_v32 = vmul.f32 1.442695, %v5841_v16  ;;  %v1982_v53 = vmul.f32 0.6931472, %v4047_v2  ;;  %v2721_v17 = vsel %vm2465_vm0, %v4049_v50, 0.0  ;;  %v2785_v52 = vsel %vm2465_vm0, 0.0, %v4049_v50 }
 0x39c   : > { %v2672_v57 = vsel %vm2480_vm3, 0.0, %v2544_v14  ;;  %v2874_v56 = vadd.f32 %v5552_v35, %v2872_v28  ;;  %v4055_v8 = vpop.eup %4054  ;;  %v3151_v23 = vadd.f32 %v5750_v61, %v3149_v29  ;;  %v2875_v33 = vsel %vm2833_vm5, %v2595_v27, 0.0  ;;  %v7108_v61 = vld [vmem:[#allocation84_spill] sm:$0xff] }
 0x39d   : > { %v3015_v45 = vadd.f32 %v5555_v3, %v3013_v1  ;;  %v2097_v5 = vadd.f32 %v2008_v63, %v7107_v38  ;;  %v3291_v48 = vadd.f32 %v5759_v51, %v3289_v20  ;;  %v3016_v46 = vsel %vm2974_vm7, %v2659_v13, 0.0  ;;  %v7109_v63 = vld [vmem:[#allocation35_spill] sm:$0xff] }
 0x39e   : > { %v2259_v36 = vmul.f32 1.442695, %v5859_v54  ;;  %v2533_v34 = vsub.f32 0.0, %v5841_v16  ;;  %v3152_v14 = vsel %vm2833_vm5, %v2721_v17, 0.0  ;;  %v3292_v35 = vsel %vm2974_vm7, %v2785_v52, 0.0  ;;  %v7110_v17 = vld [vmem:[#allocation26_spill] sm:$0xff] }
 0x39f   : > { %4060 = vpow2.f32 %v2233_v32  ;;  %v2084_v2 = vadd.f32 %v1982_v53, %v7108_v61  ;;  %v2734_v3 = vsel %vm2478_vm1, %v4055_v8, 0.0  ;;  %v5887_v28 = vsel %vm2833_vm5, %v2608_v6, 0.0 }
 0x3a0   : > { %v2876_v51 = vadd.f32 %v2875_v33, %v2874_v56  ;;  %v2546_v50 = vsub.f32 0.0, %v5859_v54  ;;  %vm2471_vm8 = vcmp.lt.s32.totalorder %v5476_v43, 1024  ;;  %v4057_v29 = vpop.eup %4056  ;;  %v5892_v16 = vsel %vm2974_vm7, %v2672_v57, 0.0 }
 0x3a1   : > { %v3017_v1 = vadd.f32 %v3016_v46, %v3015_v45  ;;  %v5895_v20 = vsub.f32 %v7109_v63, %v2097_v5  ;;  %v2012_v27 = vmul.f32 0.6931472, %v4051_v11  ;;  %v3153_v9 = vadd.f32 %v3152_v14, %v3151_v23  ;;  %v7111_v45 = vld [vmem:[#allocation95_spill] sm:$0xff]  ;;  %v1828_v5 = vpop.xlane.xlu1 %1827  ;;  %v7113_v63 = vld [vmem:[#allocation40_spill] sm:$0xff] }
 0x3a2   : > { %v3293_v13 = vadd.f32 %v3292_v35, %v3291_v48  ;;  %v2597_v6 = vsel %vm2469_vm4, %v2533_v34, 0.0  ;;  %v1986_v32 = vmul.f32 0.6931472, %v4053_v58  ;;  %v2798_v54 = vsel %vm2478_vm1, 0.0, %v4055_v8 }
 0x3a3   : > { %v5902_v53 = vsel %vm2833_vm5, %v2734_v3, 0.0  ;;  %4062 = vpow2.f32 %v2259_v36  ;;  %v2148_v52 = vsub.f32 %v7110_v17, %v2084_v2  ;;  %v4059_v57 = vpop.eup %4058  ;;  %v2723_v56 = vsel %vm2467_vm2, %v4057_v29, 0.0  ;;  %v7112_v36 = vld [vmem:[#allocation82_spill] sm:$0xff]  ;;  %v1867_v2 = vpop.xlane.xlu0 %1866 }
 0x3a4   : > { %v2787_v11 = vsel %vm2467_vm2, 0.0, %v4057_v29  ;;  %v2610_v23 = vsel %vm2482_vm6, %v2546_v50, 0.0  ;;  %v2878_v58 = vadd.f32 %v5603_v62, %v2876_v51  ;;  %v2661_v47 = vsel %vm2469_vm4, 0.0, %v2533_v34 }
 0x3a5   : > { %v2879_v8 = vsel %vm2833_vm5, %v2597_v6, 0.0  ;;  %v2263_v33 = vmul.f32 1.442695, %v5895_v20  ;;  %v2099_v38 = vadd.f32 %v2012_v27, %v7111_v45  ;;  %v3155_v48 = vadd.f32 %v5578_v12, %v3153_v9  ;;  %v7114_v6 = vld [vmem:[#allocation25_spill] sm:$0xff] }
 0x3a6   : > { %v3295_v39 = vadd.f32 %v5594_v25, %v3293_v13  ;;  %v3019_v46 = vadd.f32 %v5621_v4, %v3017_v1  ;;  %vm2484_vm9 = vcmp.lt.s32.totalorder %v5465_v60, 1024  ;;  %v2086_v62 = vadd.f32 %v1986_v32, %v7112_v36 }
 0x3a7   : > { %v3156_v14 = vsel %vm2833_vm5, %v2723_v56, 0.0  ;;  %v3296_v34 = vsel %vm2974_vm7, %v2787_v11, 0.0  ;;  %v2237_v35 = vmul.f32 1.442695, %v2148_v52  ;;  %v2535_v61 = vsub.f32 0.0, %v2148_v52  ;;  %v1834_v52 = vpop.xlane.xlu1 %1833 }
 0x3a8   : > { %v5925_v3 = vsel %vm2974_vm7, %v2798_v54, 0.0  ;;  %v2674_v12 = vsel %vm2482_vm6, 0.0, %v2546_v50  ;;  %v2880_v25 = vadd.f32 %v2879_v8, %v2878_v58  ;;  %v3020_v4 = vsel %vm2974_vm7, %v2661_v47, 0.0 }
 0x3a9   : > { %vm2473_vm10 = vcmp.lt.s32.totalorder %v5796_v40, 1024  ;;  %v4061_v51 = vpop.eup %4060  ;;  %v2736_v29 = vsel %vm2480_vm3, %v4059_v57, 0.0  ;;  %v5934_v1 = vsel %vm2833_vm5, %v2610_v23, 0.0  ;;  %4064 = vpow2.f32 %v2263_v33 }
 0x3aa   : > { %v5937_v27 = vsub.f32 %v7113_v63, %v2099_v38  ;;  %v3157_v9 = vadd.f32 %v3156_v14, %v3155_v48  ;;  %v3297_v13 = vadd.f32 %v3296_v34, %v3295_v39  ;;  %v2150_v50 = vsub.f32 %v7114_v6, %v2086_v62 }
 0x3ab   : > { %4066 = vlog2.f32 %v1867_v2  ;;  %v2800_v32 = vsel %vm2480_vm3, 0.0, %v4059_v57  ;;  %v3021_v54 = vadd.f32 %v3020_v4, %v3019_v46  ;;  %v2599_v17 = vsel %vm2471_vm8, %v2535_v61, 0.0  ;;  %v1840_v14 = vpop.xlane.xlu1 %1839 }
 0x3ac   : > { %4068 = vpow2.f32 %v2237_v35  ;;  %vm2486_vm11 = vcmp.lt.s32.totalorder %v5483_v7, 1024  ;;  %v5946_v56 = vsel %vm2974_vm7, %v2674_v12, 0.0  ;;  %v2725_v11 = vsel %vm2469_vm4, %v4061_v51, 0.0 }
 0x3ad   : > { %v2882_v23 = vadd.f32 %v5633_v49, %v2880_v25  ;;  %4070 = vlog2.f32 %v1828_v5  ;;  %v4063_v58 = vpop.eup %4062  ;;  %v2789_v26 = vsel %vm2469_vm4, 0.0, %v4061_v51  ;;  %v2548_v57 = vsub.f32 0.0, %v5895_v20 }
 0x3ae   : > { %v2663_v47 = vsel %vm2471_vm8, 0.0, %v2535_v61  ;;  %v2267_v8 = vmul.f32 1.442695, %v5937_v27  ;;  %v3159_v33 = vadd.f32 %v5646_v42, %v3157_v9  ;;  %v3299_v45 = vadd.f32 %v5665_v30, %v3297_v13  ;;  %v1873_v30 = vpop.xlane.xlu0 %1872 }
 0x3af   : > { %v2883_v38 = vsel %vm2833_vm5, %v2599_v17, 0.0  ;;  %v2241_v48 = vmul.f32 1.442695, %v2150_v50  ;;  %v3160_v49 = vsel %vm2833_vm5, %v2725_v11, 0.0  ;;  %v3023_v5 = vadd.f32 %v5641_v24, %v3021_v54 }
 0x3b0   : > { %v2537_v18 = vsub.f32 0.0, %v2150_v50  ;;  %4072 = vlog2.f32 %v1834_v52  ;;  %v5963_v20 = vsel %vm2833_vm5, %v2736_v29, 0.0  ;;  %v2738_v39 = vsel %vm2482_vm6, %v4063_v58, 0.0 }
 0x3b1   : > { %v3300_v46 = vsel %vm2974_vm7, %v2789_v26, 0.0  ;;  %v3024_v42 = vsel %vm2974_vm7, %v2663_v47, 0.0  ;;  %v2802_v36 = vsel %vm2482_vm6, 0.0, %v4063_v58  ;;  %v2612_v62 = vsel %vm2484_vm9, %v2548_v57, 0.0 }
 0x3b2   : > { %v2884_v24 = vadd.f32 %v2883_v38, %v2882_v23  ;;  %4074 = vpow2.f32 %v2267_v8  ;;  %v3161_v34 = vadd.f32 %v3160_v49, %v3159_v33  ;;  %v2676_v35 = vsel %vm2484_vm9, 0.0, %v2548_v57  ;;  %v1879_v23 = vpop.xlane.xlu0 %1878  ;;  %v1846_v8 = vpop.xlane.xlu1 %1845  ;;  %v7115_v49 = vld [vmem:[#allocation89_spill] sm:$0xff] }
 0x3b3   : > { %v2550_v61 = vsub.f32 0.0, %v5937_v27  ;;  %4076 = vpow2.f32 %v2241_v48  ;;  %v4065_v2 = vpop.eup %4064  ;;  %v3301_v12 = vadd.f32 %v3300_v46, %v3299_v45  ;;  %v3025_v25 = vadd.f32 %v3024_v42, %v3023_v5 }
 0x3b4   : > { %v2601_v22 = vsel %vm2473_vm10, %v2537_v18, 0.0  ;;  %4078 = vlog2.f32 %v1873_v30  ;;  %v5979_v51 = vsel %vm2974_vm7, %v2800_v32, 0.0  ;;  %v5982_v29 = vsel %vm2833_vm5, %v2738_v39, 0.0 }
 0x3b5   : > { %v4067_v4 = vpop.eup %4066  ;;  %v5985_v63 = vsel %vm2974_vm7, %v2802_v36, 0.0  ;;  %4080 = vlog2.f32 %v1840_v14  ;;  %v5988_v9 = vsel %vm2833_vm5, %v2612_v62, 0.0  ;;  %v5991_v13 = vsel %vm2974_vm7, %v2676_v35, 0.0  ;;  %v7117_v36 = vld [vmem:[#allocation30_spill] sm:$0xff] }
 0x3b6   : > { %v4069_v27 = vpop.eup %4068  ;;  %v2665_v6 = vsel %vm2473_vm10, 0.0, %v2537_v18  ;;  %v2886_v50 = vadd.f32 %v5668_v41, %v2884_v24  ;;  %v3163_v54 = vadd.f32 %v5694_v55, %v3161_v34  ;;  %v2614_v17 = vsel %vm2486_vm11, %v2550_v61, 0.0  ;;  %v7116_v18 = vld [vmem:[#allocation93_spill] sm:$0xff] }
 0x3b7   : > { %v4071_v32 = vpop.eup %4070  ;;  %v2887_v52 = vsel %vm2833_vm5, %v2601_v22, 0.0  ;;  %v2016_v11 = vmul.f32 0.6931472, %v4067_v4  ;;  %v3303_v58 = vadd.f32 %v5700_v21, %v3301_v12  ;;  %v2678_v26 = vsel %vm2486_vm11, 0.0, %v2550_v61  ;;  %v7118_v34 = vld [vmem:[#allocation113_spill] sm:$0xff]  ;;  %v7119_v61 = vld [vmem:[#allocation87_spill] sm:$0xff] }
 0x3b8   : > { %v3027_v57 = vadd.f32 %v5676_v31, %v3025_v25  ;;  %v1990_v47 = vmul.f32 0.6931472, %v4071_v32  ;;  %v2740_v41 = vsel %vm2484_vm9, %v4065_v2, 0.0  ;;  %v2804_v55 = vsel %vm2484_vm9, 0.0, %v4065_v2 }
 0x3b9   : > { %v3028_v33 = vsel %vm2974_vm7, %v2665_v6, 0.0  ;;  %v2347_v45 = vadd.s32 248, %v5044_v59  ;;  %v2727_v21 = vsel %vm2471_vm8, %v4069_v27, 0.0  ;;  %v2888_v48 = vadd.f32 %v2887_v52, %v2886_v50  ;;  %v7120_v50 = vld [vmem:[#allocation39_spill] sm:$0xff] }
 0x3ba   : > { %v4073_v38 = vpop.eup %4072  ;;  %v2088_v5 = vadd.f32 %v1990_v47, %v7115_v49  ;;  %4082 = vlog2.f32 %v1879_v23  ;;  %v2791_v31 = vsel %vm2471_vm8, 0.0, %v4069_v27  ;;  %v2101_v39 = vadd.f32 %v2016_v11, %v7116_v18 }
 0x3bb   : > { %v1994_v46 = vmul.f32 0.6931472, %v4073_v38  ;;  %4084 = vlog2.f32 %v1846_v8  ;;  %v6017_v42 = vsel %vm2833_vm5, %v2614_v17, 0.0  ;;  %v6020_v30 = vsel %vm2974_vm7, %v2678_v26, 0.0  ;;  %v7121_v17 = vld [vmem:[#allocation9_spill] sm:$0xff] }
 0x3bc   : > { %v4075_v60 = vpop.eup %4074  ;;  %vm2475_vm12 = vcmp.lt.s32.totalorder %v5805_v19, 1024  ;;  %v2152_v62 = vsub.f32 %v7117_v36, %v2088_v5  ;;  %v6025_v14 = vsel %vm2833_vm5, %v2740_v41, 0.0  ;;  %v3029_v43 = vadd.f32 %v3028_v33, %v3027_v57  ;;  %v7122_v57 = vld [vmem:[#allocation29_spill] sm:$0xff]  ;;  %v7123_v33 = vld [vmem:[#allocation60_spill] sm:$0xff] }
 0x3bd   : > { %v4077_v24 = vpop.eup %4076  ;;  %v6029_v35 = vadd.s32 %v7118_v34, %v5768_v37  ;;  %v2090_v2 = vadd.f32 %v1994_v46, %v7119_v61  ;;  %v6033_v25 = vsel %vm2974_vm7, %v2804_v55, 0.0  ;;  %v3164_v22 = vsel %vm2833_vm5, %v2727_v21, 0.0  ;;  %v7126_v61 = vld [vmem:[#allocation8_spill] sm:$0xff] }
 0x3be   : > { %v4079_v12 = vpop.eup %4078  ;;  %v3304_v4 = vsel %vm2974_vm7, %v2791_v31, 0.0  ;;  %v2245_v27 = vmul.f32 1.442695, %v2152_v62  ;;  %v6038_v32 = vsub.f32 %v7120_v50, %v2101_v39  ;;  %v2890_v52 = vadd.f32 %v7121_v17, %v2888_v48  ;;  %v7124_v48 = vld [vmem:[#allocation64_spill] sm:$0xff] }
 0x3bf   : > { %v4081_v6 = vpop.eup %4080  ;;  %v6042_v37 = vadd.s32 %v7118_v34, %v2347_v45  ;;  %v2349_v11 = vadd.s32 264, %v5044_v59  ;;  %v2742_v23 = vsel %vm2486_vm11, %v4075_v60, 0.0  ;;  %v2539_v26 = vsub.f32 0.0, %v2152_v62  ;;  %v7125_v62 = vld [vmem:[#allocation7_spill] sm:$0xff] }
 0x3c0   : > { %4086 = vpow2.f32 %v2245_v27  ;;  %v6048_v47 = vsub.f32 %v7122_v57, %v2090_v2  ;;  %v3165_v8 = vadd.f32 %v3164_v22, %v3163_v54  ;;  %v3305_v41 = vadd.f32 %v3304_v4, %v3303_v58  ;;  %v1885_v58 = vpop.xlane.xlu0 %1884  ;;  %v7127_v4 = vld [vmem:[#allocation98_spill] sm:$0xff]  ;;  %v1852_v57 = vpop.xlane.xlu1 %1851 }
 0x3c1   : > { %v2806_v55 = vsel %vm2486_vm11, 0.0, %v4075_v60  ;;  %v3031_v38 = vadd.f32 %v7123_v33, %v3029_v43  ;;  %v2729_v45 = vsel %vm2473_vm10, %v4077_v24, 0.0  ;;  %v2793_v21 = vsel %vm2473_vm10, 0.0, %v4077_v24 }
 0x3c2   : > { %vm2488_vm13 = vcmp.lt.s32.totalorder %v7124_v48, 1024  ;;  %v2020_v49 = vmul.f32 0.6931472, %v4079_v12  ;;  %v1998_v5 = vmul.f32 0.6931472, %v4081_v6  ;;  %v6059_v31 = vsel %vm2833_vm5, %v2742_v23, 0.0 }
 0x3c3   : > { %v2271_v54 = vmul.f32 1.442695, %v6038_v32  ;;  %vm2477_vm14 = vcmp.lt.s32.totalorder %v6042_v37, 1024  ;;  %v2362_v7 = vadd.s32 368, %v5044_v59  ;;  %v6065_v39 = vsel %vm2974_vm7, %v2806_v55, 0.0  ;;  %v7128_v6 = vld [vmem:[#allocation94_spill] sm:$0xff] }
 0x3c4   : > { %v4083_v18 = vpop.eup %4082  ;;  %v2603_v40 = vsel %vm2475_vm12, %v2539_v26, 0.0  ;;  %v2249_v46 = vmul.f32 1.442695, %v6048_v47  ;;  %v6071_v60 = vadd.s32 %v7118_v34, %v2349_v11  ;;  %v3167_v24 = vadd.f32 %v7125_v62, %v3165_v8 }
 0x3c5   : > { %v4085_v36 = vpop.eup %4084  ;;  %v3168_v43 = vsel %vm2833_vm5, %v2729_v45, 0.0  ;;  %v3307_v2 = vadd.f32 %v7126_v61, %v3305_v41  ;;  %v3308_v12 = vsel %vm2974_vm7, %v2793_v21, 0.0  ;;  %v2667_v22 = vsel %vm2475_vm12, 0.0, %v2539_v26  ;;  %v7129_v41 = vld [vmem:[#allocation34_spill] sm:$0xff] }
 0x3c6   : > { %v2103_v27 = vadd.f32 %v2020_v49, %v7127_v4  ;;  %v2092_v50 = vadd.f32 %v1998_v5, %v7128_v6  ;;  %4088 = vlog2.f32 %v1885_v58  ;;  %v2891_v17 = vsel %vm2833_vm5, %v2603_v40, 0.0  ;;  %v7130_v58 = vld [vmem:[#allocation44_spill] sm:$0xff]  ;;  %v7134_v4 = vld [vmem:[#allocation61_spill] sm:$0xff] }
 0x3c7   : > { %4090 = vpow2.f32 %v2271_v54  ;;  %v2024_v11 = vmul.f32 0.6931472, %v4083_v18  ;;  %v2351_v23 = vadd.s32 280, %v5044_v59  ;;  %vm2490_vm15 = vcmp.lt.s32.totalorder %v6029_v35, 1024 }
 0x3c8   : > { %4092 = vpow2.f32 %v2249_v46  ;;  %v2541_v8 = vsub.f32 0.0, %v6048_v47  ;;  %v6086_v55 = vsub.f32 %v7129_v41, %v2092_v50  ;;  %v2002_v26 = vmul.f32 0.6931472, %v4085_v36  ;;  %v7131_v46 = vld [vmem:[#allocation96_spill] sm:$0xff] }
 0x3c9   : > { %v3169_v33 = vadd.f32 %v3168_v43, %v3167_v24  ;;  %v3309_v45 = vadd.f32 %v3308_v12, %v3307_v2  ;;  %v2552_v21 = vsub.f32 0.0, %v6038_v32  ;;  %v3032_v49 = vsel %vm2974_vm7, %v2667_v22, 0.0  ;;  %v7132_v43 = vld [vmem:[#allocation92_spill] sm:$0xff]  ;;  %v7133_v12 = vld [vmem:[#allocation10_spill] sm:$0xff] }
 0x3ca   : > { %v4087_v5 = vpop.eup %4086  ;;  %v2892_v54 = vadd.f32 %v2891_v17, %v2890_v52  ;;  %v2167_v18 = vsub.f32 %v7130_v58, %v2103_v27  ;;  %v6092_v40 = vadd.s32 %v7118_v34, %v2362_v7  ;;  %4094 = vlog2.f32 %v1852_v57  ;;  %v7135_v17 = vld [vmem:[#allocation63_spill] sm:$0xff] }
 0x3cb   : > { %v2105_v47 = vadd.f32 %v2024_v11, %v7131_v46  ;;  %vm2479_vm0 = vcmp.lt.s32.totalorder %v6071_v60, 1024  ;;  %v6097_v36 = vadd.s32 %v7118_v34, %v2351_v23  ;;  %v2364_v62 = vadd.s32 384, %v5044_v59  ;;  %v7137_v58 = vld [vmem:[#allocation11_spill] sm:$0xff] }
 0x3cc   : > { %v3033_v32 = vadd.f32 %v3032_v49, %v3031_v38  ;;  %v2605_v24 = vsel %vm2477_vm14, %v2541_v8, 0.0  ;;  %v2253_v52 = vmul.f32 1.442695, %v6086_v55  ;;  %v2094_v61 = vadd.f32 %v2002_v26, %v7132_v43  ;;  %v7136_v26 = vld [vmem:[#allocation43_spill] sm:$0xff] }
 0x3cd   : > { %v2616_v7 = vsel %vm2488_vm13, %v2552_v21, 0.0  ;;  %v2731_v2 = vsel %vm2475_vm12, %v4087_v5, 0.0  ;;  %v3171_v22 = vadd.f32 %v7133_v12, %v3169_v33  ;;  %v3311_v27 = vadd.f32 %v7134_v4, %v3309_v45 }
 0x3ce   : > { %v2795_v38 = vsel %vm2475_vm12, 0.0, %v4087_v5  ;;  %v2275_v6 = vmul.f32 1.442695, %v2167_v18  ;;  %v2669_v50 = vsel %vm2477_vm14, 0.0, %v2541_v8  ;;  %v2894_v11 = vadd.f32 %v7135_v17, %v2892_v54  ;;  %v7138_v5 = vld [vmem:[#allocation33_spill] sm:$0xff] }
 0x3cf   : > { %v2680_v23 = vsel %vm2488_vm13, 0.0, %v2552_v21  ;;  %v2554_v57 = vsub.f32 0.0, %v2167_v18  ;;  %v2895_v41 = vsel %vm2833_vm5, %v2605_v24, 0.0  ;;  %v2169_v49 = vsub.f32 %v7136_v26, %v2105_v47 }
 0x3d0   : > { %v4089_v33 = vpop.eup %4088  ;;  %v3172_v45 = vsel %vm2833_vm5, %v2731_v2, 0.0  ;;  %v3035_v19 = vadd.f32 %v7137_v58, %v3033_v32  ;;  %vm2492_vm1 = vcmp.lt.s32.totalorder %v6092_v40, 1024  ;;  %4096 = vpow2.f32 %v2253_v52 }
 0x3d1   : > { %v6123_v8 = vsub.f32 %v7138_v5, %v2094_v61  ;;  %v4091_v54 = vpop.eup %4090  ;;  %v3312_v46 = vsel %vm2974_vm7, %v2795_v38, 0.0  ;;  %v3036_v21 = vsel %vm2974_vm7, %v2669_v50, 0.0  ;;  %v6128_v18 = vadd.s32 %v7118_v34, %v2364_v62 }
 0x3d2   : > { %v2353_v47 = vadd.s32 296, %v5044_v59  ;;  %v4093_v24 = vpop.eup %4092  ;;  %v6132_v43 = vsel %vm2833_vm5, %v2616_v7, 0.0  ;;  %4098 = vpow2.f32 %v2275_v6  ;;  %v2896_v32 = vadd.f32 %v2895_v41, %v2894_v11 }
 0x3d3   : > { %v2543_v52 = vsub.f32 0.0, %v6086_v55  ;;  %vm2481_vm2 = vcmp.lt.s32.totalorder %v6097_v36, 1024  ;;  %v6137_v61 = vsel %vm2974_vm7, %v2680_v23, 0.0  ;;  %v3173_v2 = vadd.f32 %v3172_v45, %v3171_v22  ;;  %v1858_v23 = vpop.xlane.xlu1 %1857 }
 0x3d4   : > { %v2618_v62 = vsel %vm2490_vm15, %v2554_v57, 0.0  ;;  %v2279_v12 = vmul.f32 1.442695, %v2169_v49  ;;  %v4095_v4 = vpop.eup %4094  ;;  %v3313_v38 = vadd.f32 %v3312_v46, %v3311_v27  ;;  %v2682_v7 = vsel %vm2490_vm15, 0.0, %v2554_v57 }
 0x3d5   : > { %v3037_v50 = vadd.f32 %v3036_v21, %v3035_v19  ;;  %v2257_v6 = vmul.f32 1.442695, %v6123_v8  ;;  %v2744_v55 = vsel %vm2488_vm13, %v4091_v54, 0.0  ;;  %v2733_v17 = vsel %vm2477_vm14, %v4093_v24, 0.0 }
 0x3d6   : > { %v2556_v11 = vsub.f32 0.0, %v2169_v49  ;;  %v2028_v22 = vmul.f32 0.6931472, %v4089_v33  ;;  %v2808_v41 = vsel %vm2488_vm13, 0.0, %v4091_v54  ;;  %v2797_v27 = vsel %vm2477_vm14, 0.0, %v4093_v24  ;;  %v7139_v54 = vld [vmem:[#allocation103_spill] sm:$0xff] }
 0x3d7   : > { %v2607_v57 = vsel %vm2479_vm0, %v2543_v52, 0.0  ;;  %v2898_v26 = vadd.f32 %v5850_v10, %v2896_v32  ;;  %v3175_v45 = vadd.f32 %v5844_v15, %v3173_v2  ;;  %4100 = vpow2.f32 %v2279_v12  ;;  %v7140_v32 = vld [vmem:[#allocation99_spill] sm:$0xff] }
 0x3d8   : > { %v2671_v58 = vsel %vm2479_vm0, 0.0, %v2543_v52  ;;  %v2006_v49 = vmul.f32 0.6931472, %v4095_v4  ;;  %v3176_v33 = vsel %vm2833_vm5, %v2733_v17, 0.0  ;;  %v3315_v48 = vadd.f32 %v5847_v44, %v3313_v38  ;;  %v1864_v4 = vpop.xlane.xlu1 %1863  ;;  %v1891_v17 = vpop.xlane.xlu0 %1890 }
 0x3d9   : > { %v3039_v19 = vadd.f32 %v5853_v0, %v3037_v50  ;;  %4102 = vpow2.f32 %v2257_v6  ;;  %v3316_v37 = vsel %vm2974_vm7, %v2797_v27, 0.0  ;;  %v2899_v5 = vsel %vm2833_vm5, %v2607_v57, 0.0 }
 0x3da   : > { %v2545_v10 = vsub.f32 0.0, %v6123_v8  ;;  %v2107_v15 = vadd.f32 %v2028_v22, %v7139_v54  ;;  %v4097_v46 = vpop.eup %4096  ;;  %v6166_v21 = vsel %vm2833_vm5, %v2618_v62, 0.0  ;;  %v6169_v24 = vsel %vm2974_vm7, %v2682_v7, 0.0 }
 0x3db   : > { %v3040_v44 = vsel %vm2974_vm7, %v2671_v58, 0.0  ;;  %v2096_v0 = vadd.f32 %v2006_v49, %v7140_v32  ;;  %v3177_v52 = vadd.f32 %v3176_v33, %v3175_v45  ;;  %v2620_v2 = vsel %vm2492_vm1, %v2556_v11, 0.0 }
 0x3dc   : > { %v2684_v8 = vsel %vm2492_vm1, 0.0, %v2556_v11  ;;  %v6178_v12 = vadd.s32 %v7118_v34, %v2353_v47  ;;  %v4099_v62 = vpop.eup %4098  ;;  %v6181_v38 = vsel %vm2833_vm5, %v2744_v55, 0.0  ;;  %v6184_v7 = vsel %vm2974_vm7, %v2808_v41, 0.0  ;;  %v7141_v47 = vld [vmem:[#allocation48_spill] sm:$0xff] }
 0x3dd   : > { %v3317_v50 = vadd.f32 %v3316_v37, %v3315_v48  ;;  %v2900_v6 = vadd.f32 %v2899_v5, %v2898_v26  ;;  %v2735_v22 = vsel %vm2479_vm0, %v4097_v46, 0.0  ;;  %v3041_v27 = vadd.f32 %v3040_v44, %v3039_v19  ;;  %v7142_v26 = vld [vmem:[#allocation38_spill] sm:$0xff] }
 0x3de   : > { %v2609_v11 = vsel %vm2481_vm2, %v2545_v10, 0.0  ;;  %v6191_v57 = vsub.f32 %v7141_v47, %v2107_v15  ;;  %v6194_v45 = vsel %vm2833_vm5, %v2620_v2, 0.0  ;;  %v6197_v55 = vsel %vm2974_vm7, %v2684_v8, 0.0 }
 0x3df   : > { %v2799_v41 = vsel %vm2479_vm0, 0.0, %v4097_v46  ;;  %v2160_v58 = vsub.f32 %v7142_v26, %v2096_v0  ;;  %v2746_v49 = vsel %vm2490_vm15, %v4099_v62, 0.0  ;;  %v3179_v33 = vadd.f32 %v5902_v53, %v3177_v52 }
 0x3e0   : > { %v2673_v48 = vsel %vm2481_vm2, 0.0, %v2545_v10  ;;  %vm2494_vm3 = vcmp.lt.s32.totalorder %v6128_v18, 1024  ;;  %4104 = vlog2.f32 %v1891_v17  ;;  %v3180_v19 = vsel %vm2833_vm5, %v2735_v22, 0.0  ;;  %v1870_v10 = vpop.xlane.xlu1 %1869 }
 0x3e1   : > { %v3319_v37 = vadd.f32 %v5925_v3, %v3317_v50  ;;  %v2902_v60 = vadd.f32 %v5887_v28, %v2900_v6  ;;  %v2903_v5 = vsel %vm2833_vm5, %v2609_v11, 0.0  ;;  %v4101_v54 = vpop.eup %4100  ;;  %v3320_v15 = vsel %vm2974_vm7, %v2799_v41, 0.0 }
 0x3e2   : > { %v3043_v46 = vadd.f32 %v5892_v16, %v3041_v27  ;;  %v2283_v53 = vmul.f32 1.442695, %v6191_v57  ;;  %4106 = vlog2.f32 %v1858_v23  ;;  %v2810_v32 = vsel %vm2490_vm15, 0.0, %v4099_v62 }
 0x3e3   : > { %v4103_v44 = vpop.eup %4102  ;;  %v6218_v0 = vsel %vm2833_vm5, %v2746_v49, 0.0  ;;  %v3044_v28 = vsel %vm2974_vm7, %v2673_v48, 0.0  ;;  %v2547_v3 = vsub.f32 0.0, %v2160_v58  ;;  %v3181_v52 = vadd.f32 %v3180_v19, %v3179_v33  ;;  %v1897_v19 = vpop.xlane.xlu0 %1896 }
 0x3e4   : > { %vm2483_vm4 = vcmp.lt.s32.totalorder %v6178_v12, 1024  ;;  %v2261_v2 = vmul.f32 1.442695, %v2160_v58  ;;  %4108 = vlog2.f32 %v1864_v4  ;;  %v2748_v16 = vsel %vm2492_vm1, %v4101_v54, 0.0  ;;  %v1876_v47 = vpop.xlane.xlu1 %1875 }
 0x3e5   : > { %v3321_v23 = vadd.f32 %v3320_v15, %v3319_v37  ;;  %v2904_v8 = vadd.f32 %v2903_v5, %v2902_v60  ;;  %4110 = vlog2.f32 %v1870_v10  ;;  %v2812_v35 = vsel %vm2492_vm1, 0.0, %v4101_v54 }
 0x3e6   : > { %v2737_v62 = vsel %vm2481_vm2, %v4103_v44, 0.0  ;;  %v3045_v50 = vadd.f32 %v3044_v28, %v3043_v46  ;;  %4112 = vpow2.f32 %v2283_v53  ;;  %v2801_v6 = vsel %vm2481_vm2, 0.0, %v4103_v44 }
 0x3e7   : > { %v2558_v17 = vsub.f32 0.0, %v6191_v57  ;;  %v2611_v4 = vsel %vm2483_vm4, %v2547_v3, 0.0  ;;  %v2366_v22 = vadd.s32 400, %v5044_v59  ;;  %v3183_v27 = vadd.f32 %v5963_v20, %v3181_v52 }
 0x3e8   : > { %4114 = vpow2.f32 %v2261_v2  ;;  %v2675_v40 = vsel %vm2483_vm4, 0.0, %v2547_v3  ;;  %v2355_v11 = vadd.s32 312, %v5044_v59  ;;  %v6239_v41 = vsel %vm2974_vm7, %v2810_v32, 0.0 }
 0x3e9   : > { %v3184_v36 = vsel %vm2833_vm5, %v2737_v62, 0.0  ;;  %v3323_v57 = vadd.f32 %v5979_v51, %v3321_v23  ;;  %v2906_v26 = vadd.f32 %v5934_v1, %v2904_v8  ;;  %v6245_v49 = vsel %vm2833_vm5, %v2748_v16, 0.0 }
 0x3ea   : > { %v4105_v58 = vpop.eup %4104  ;;  %v3324_v20 = vsel %vm2974_vm7, %v2801_v6, 0.0  ;;  %v2907_v33 = vsel %vm2833_vm5, %v2611_v4, 0.0  ;;  %v3047_v48 = vadd.f32 %v5946_v56, %v3045_v50  ;;  %v6251_v37 = vsel %vm2974_vm7, %v2812_v35, 0.0  ;;  %v7143_v6 = vld [vmem:[#allocation97_spill] sm:$0xff] }
 0x3eb   : > { %v2622_v60 = vsel %vm2494_vm3, %v2558_v17, 0.0  ;;  %v3048_v51 = vsel %vm2974_vm7, %v2675_v40, 0.0  ;;  %4116 = vlog2.f32 %v1876_v47  ;;  %v3185_v5 = vadd.f32 %v3184_v36, %v3183_v27  ;;  %v7144_v27 = vld [vmem:[#allocation101_spill] sm:$0xff]  ;;  %v7145_v47 = vld [vmem:[#allocation104_spill] sm:$0xff] }
 0x3ec   : > { %v4107_v1 = vpop.eup %4106  ;;  %v2686_v54 = vsel %vm2494_vm3, 0.0, %v2558_v17  ;;  %v6259_v15 = vadd.s32 %v7118_v34, %v2366_v22  ;;  %v6262_v56 = vadd.s32 %v7118_v34, %v2355_v11  ;;  %v3325_v46 = vadd.f32 %v3324_v20, %v3323_v57 }
 0x3ed   : > { %v2908_v53 = vadd.f32 %v2907_v33, %v2906_v26  ;;  %v2032_v10 = vmul.f32 0.6931472, %v4105_v58  ;;  %4118 = vlog2.f32 %v1897_v19  ;;  %v3049_v32 = vadd.f32 %v3048_v51, %v3047_v48  ;;  %v7146_v26 = vld [vmem:[#allocation37_spill] sm:$0xff]  ;;  %v1903_v48 = vpop.xlane.xlu0 %1902  ;;  %v7147_v19 = vld [vmem:[#allocation42_spill] sm:$0xff] }
 0x3ee   : > { %v4109_v44 = vpop.eup %4108  ;;  %v2010_v28 = vmul.f32 0.6931472, %v4107_v1  ;;  %v2357_v3 = vadd.s32 328, %v5044_v59  ;;  %v2359_v52 = vadd.s32 344, %v5044_v59  ;;  %v6267_v16 = vsel %vm2833_vm5, %v2622_v60, 0.0 }
 0x3ef   : > { %v4111_v2 = vpop.eup %4110  ;;  %v6270_v23 = vsel %vm2974_vm7, %v2686_v54, 0.0  ;;  %v2014_v8 = vmul.f32 0.6931472, %v4109_v44  ;;  %v2368_v35 = vadd.s32 416, %v5044_v59  ;;  %v3187_v50 = vadd.f32 %v5982_v29, %v3185_v5  ;;  %v7148_v54 = vld [vmem:[#allocation102_spill] sm:$0xff] }
 0x3f0   : > { %v4113_v62 = vpop.eup %4112  ;;  %vm2485_vm6 = vcmp.lt.s32.totalorder %v6262_v56, 1024  ;;  %v2098_v17 = vadd.f32 %v2010_v28, %v7143_v6  ;;  %v2018_v4 = vmul.f32 0.6931472, %v4111_v2  ;;  %v3327_v22 = vadd.f32 %v5985_v63, %v3325_v46 }
 0x3f1   : > { %v2109_v40 = vadd.f32 %v2032_v10, %v7144_v27  ;;  %v2910_v11 = vadd.f32 %v5988_v9, %v2908_v53  ;;  %v2100_v36 = vadd.f32 %v2014_v8, %v7145_v47  ;;  %v3051_v20 = vadd.f32 %v5991_v13, %v3049_v32  ;;  %v1882_v53 = vpop.xlane.xlu1 %1881  ;;  %v7149_v32 = vld [vmem:[#allocation47_spill] sm:$0xff] }
 0x3f2   : > { %v4115_v57 = vpop.eup %4114  ;;  %v2162_v58 = vsub.f32 %v7146_v26, %v2098_v17  ;;  %v6283_v29 = vadd.s32 %v7118_v34, %v2357_v3  ;;  %v6286_v33 = vadd.s32 %v7118_v34, %v2359_v52  ;;  %v2750_v63 = vsel %vm2494_vm3, %v4113_v62, 0.0  ;;  %v7150_v17 = vld [vmem:[#allocation41_spill] sm:$0xff] }
 0x3f3   : > { %v2164_v60 = vsub.f32 %v7147_v19, %v2100_v36  ;;  %v6292_v9 = vadd.s32 %v7118_v34, %v2368_v35  ;;  %v2361_v51 = vadd.s32 360, %v5044_v59  ;;  %v2814_v13 = vsel %vm2494_vm3, 0.0, %v4113_v62 }
 0x3f4   : > { %v2265_v1 = vmul.f32 1.442695, %v2162_v58  ;;  %v2549_v5 = vsub.f32 0.0, %v2162_v58  ;;  %v2102_v46 = vadd.f32 %v2018_v4, %v7148_v54  ;;  %v2739_v44 = vsel %vm2483_vm4, %v4115_v57, 0.0 }
 0x3f5   : > { %v4117_v10 = vpop.eup %4116  ;;  %v6301_v28 = vsub.f32 %v7149_v32, %v2109_v40  ;;  %v2269_v3 = vmul.f32 1.442695, %v2164_v60  ;;  %4120 = vlog2.f32 %v1903_v48  ;;  %v2803_v52 = vsel %vm2483_vm4, 0.0, %v4115_v57  ;;  %v1888_v48 = vpop.xlane.xlu1 %1887 }
 0x3f6   : > { %4122 = vpow2.f32 %v2265_v1  ;;  %v2613_v18 = vsel %vm2485_vm6, %v2549_v5, 0.0  ;;  %v2677_v2 = vsel %vm2485_vm6, 0.0, %v2549_v5  ;;  %vm2496_vm8 = vcmp.lt.s32.totalorder %v6259_v15, 1024 }
 0x3f7   : > { %v4119_v8 = vpop.eup %4118  ;;  %v2911_v35 = vsel %vm2833_vm5, %v2613_v18, 0.0  ;;  %vm2487_vm9 = vcmp.lt.s32.totalorder %v6283_v29, 1024  ;;  %v2551_v62 = vsub.f32 0.0, %v2164_v60  ;;  %4124 = vlog2.f32 %v1882_v53 }
 0x3f8   : > { %v3188_v6 = vsel %vm2833_vm5, %v2739_v44, 0.0  ;;  %v3052_v12 = vsel %vm2974_vm7, %v2677_v2, 0.0  ;;  %v2166_v4 = vsub.f32 %v7150_v17, %v2102_v46  ;;  %v2022_v27 = vmul.f32 0.6931472, %v4117_v10  ;;  %v7152_v44 = vld [vmem:[#allocation109_spill] sm:$0xff] }
 0x3f9   : > { %v6316_v40 = vsel %vm2833_vm5, %v2750_v63, 0.0  ;;  %v3328_v47 = vsel %vm2974_vm7, %v2803_v52, 0.0  ;;  %v2912_v36 = vadd.f32 %v2911_v35, %v2910_v11  ;;  %4126 = vpow2.f32 %v2269_v3  ;;  %v7153_v35 = vld [vmem:[#allocation45_spill] sm:$0xff] }
 0x3fa   : > { %v6320_v57 = vsel %vm2974_vm7, %v2814_v13, 0.0  ;;  %v2287_v26 = vmul.f32 1.442695, %v6301_v28  ;;  %vm2489_vm10 = vcmp.lt.s32.totalorder %v6286_v33, 1024  ;;  %v2036_v58 = vmul.f32 0.6931472, %v4119_v8 }
 0x3fb   : > { %v3189_v19 = vadd.f32 %v3188_v6, %v3187_v50  ;;  %v2560_v60 = vsub.f32 0.0, %v6301_v28  ;;  %v3053_v1 = vadd.f32 %v3052_v12, %v3051_v20  ;;  %v2615_v63 = vsel %vm2487_vm9, %v2551_v62, 0.0  ;;  %v7151_v13 = vld [vmem:[#allocation107_spill] sm:$0xff] }
 0x3fc   : > { %v3329_v5 = vadd.f32 %v3328_v47, %v3327_v22  ;;  %v2273_v54 = vmul.f32 1.442695, %v2166_v4  ;;  %v6328_v11 = vadd.s32 %v7118_v34, %v2361_v51  ;;  %v2104_v46 = vadd.f32 %v2022_v27, %v7151_v13  ;;  %v7154_v47 = vld [vmem:[#allocation52_spill] sm:$0xff] }
 0x3fd   : > { %v2679_v53 = vsel %vm2487_vm9, 0.0, %v2551_v62  ;;  %v2914_v10 = vadd.f32 %v6017_v42, %v2912_v36  ;;  %v2370_v50 = vadd.s32 432, %v5044_v59  ;;  %4128 = vlog2.f32 %v1888_v48 }
 0x3fe   : > { %v2915_v20 = vsel %vm2833_vm5, %v2615_v63, 0.0  ;;  %v2111_v32 = vadd.f32 %v2036_v58, %v7152_v44  ;;  %v2363_v22 = vadd.s32 376, %v5044_v59  ;;  %v6339_v28 = vadd.s32 392, %v5044_v59 }
 0x3ff   : > { %v4121_v51 = vpop.eup %4120  ;;  %4130 = vpow2.f32 %v2287_v26  ;;  %v3191_v3 = vadd.f32 %v6025_v14, %v3189_v19  ;;  %v3055_v52 = vadd.f32 %v6020_v30, %v3053_v1  ;;  %v2553_v18 = vsub.f32 0.0, %v2166_v4 }
 0x400   : > { %v4123_v42 = vpop.eup %4122  ;;  %v3331_v2 = vadd.f32 %v6033_v25, %v3329_v5  ;;  %v3056_v8 = vsel %vm2974_vm7, %v2679_v53, 0.0  ;;  %4132 = vpow2.f32 %v2273_v54  ;;  %v2168_v62 = vsub.f32 %v7153_v35, %v2104_v46 }
 0x401   : > { %v4125_v6 = vpop.eup %4124  ;;  %v2741_v12 = vsel %vm2485_vm6, %v4123_v42, 0.0  ;;  %v2805_v17 = vsel %vm2485_vm6, 0.0, %v4123_v42  ;;  %v2916_v27 = vadd.f32 %v2915_v20, %v2914_v10  ;;  %v6351_v14 = vadd.s32 408, %v5044_v59  ;;  %v7155_v42 = vld [vmem:[#allocation100_spill] sm:$0xff] }
 0x402   : > { %v2624_v30 = vsel %vm2496_vm8, %v2560_v60, 0.0  ;;  %v3192_v25 = vsel %vm2833_vm5, %v2741_v12, 0.0  ;;  %v3332_v4 = vsel %vm2974_vm7, %v2805_v17, 0.0  ;;  %v6358_v36 = vsub.f32 %v7154_v47, %v2111_v32 }
 0x403   : > { %v4127_v26 = vpop.eup %4126  ;;  %v2688_v58 = vsel %vm2496_vm8, 0.0, %v2560_v60  ;;  %v3193_v56 = vadd.f32 %v3192_v25, %v3191_v3  ;;  %v3057_v48 = vadd.f32 %v3056_v8, %v3055_v52  ;;  %v2617_v19 = vsel %vm2489_vm10, %v2553_v18, 0.0 }
 0x404   : > { %v3333_v1 = vadd.f32 %v3332_v4, %v3331_v2  ;;  %v2681_v63 = vsel %vm2489_vm10, 0.0, %v2553_v18  ;;  %v2277_v5 = vmul.f32 1.442695, %v2168_v62  ;;  %v2026_v54 = vmul.f32 0.6931472, %v4125_v6 }
 0x405   : > { %v2743_v13 = vsel %vm2487_vm9, %v4127_v26, 0.0  ;;  %v2918_v46 = vadd.f32 %v6132_v43, %v2916_v27  ;;  %vm2491_vm11 = vcmp.lt.s32.totalorder %v6328_v11, 1024  ;;  %v2040_v53 = vmul.f32 0.6931472, %v4121_v51 }
 0x406   : > { %v2807_v60 = vsel %vm2487_vm9, 0.0, %v4127_v26  ;;  %v2919_v10 = vsel %vm2833_vm5, %v2617_v19, 0.0  ;;  %v2291_v20 = vmul.f32 1.442695, %v6358_v36  ;;  %v6375_v44 = vadd.s32 %v7118_v34, %v2363_v22 }
 0x407   : > { %v4129_v32 = vpop.eup %4128  ;;  %v3195_v3 = vadd.f32 %v6059_v31, %v3193_v56  ;;  %v3059_v52 = vadd.f32 %v6137_v61, %v3057_v48  ;;  %v3060_v43 = vsel %vm2974_vm7, %v2681_v63, 0.0  ;;  %v2555_v18 = vsub.f32 0.0, %v2168_v62  ;;  %v7156_v31 = vld [vmem:[#allocation108_spill] sm:$0xff]  ;;  %v1894_v48 = vpop.xlane.xlu1 %1893  ;;  %v7158_v63 = vld [vmem:[#allocation51_spill] sm:$0xff] }
 0x408   : > { %v3196_v51 = vsel %vm2833_vm5, %v2743_v13, 0.0  ;;  %v3335_v29 = vadd.f32 %v6065_v39, %v3333_v1  ;;  %4134 = vpow2.f32 %v2277_v5  ;;  %v2106_v2 = vadd.f32 %v2026_v54, %v7155_v42  ;;  %v7157_v39 = vld [vmem:[#allocation46_spill] sm:$0xff] }
 0x409   : > { %v4131_v8 = vpop.eup %4130  ;;  %v6384_v35 = vsel %vm2833_vm5, %v2624_v30, 0.0  ;;  %v3336_v22 = vsel %vm2974_vm7, %v2807_v60, 0.0  ;;  %v2920_v6 = vadd.f32 %v2919_v10, %v2918_v46  ;;  %vm2498_vm12 = vcmp.lt.s32.totalorder %v6292_v9, 1024  ;;  %v7159_v46 = vld [vmem:[#allocation106_spill] sm:$0xff] }
 0x40a   : > { %v2113_v61 = vadd.f32 %v2040_v53, %v7156_v31  ;;  %v4133_v12 = vpop.eup %4132  ;;  %4136 = vpow2.f32 %v2291_v20  ;;  %v6390_v62 = vadd.s32 %v7118_v34, %v2370_v50  ;;  %v2170_v17 = vsub.f32 %v7157_v39, %v2106_v2 }
 0x40b   : > { %v2030_v27 = vmul.f32 0.6931472, %v4129_v32  ;;  %v6394_v25 = vsel %vm2974_vm7, %v2688_v58, 0.0  ;;  %v3197_v30 = vadd.f32 %v3196_v51, %v3195_v3  ;;  %v3061_v4 = vadd.f32 %v3060_v43, %v3059_v52  ;;  %v1900_v42 = vpop.xlane.xlu1 %1899 }
 0x40c   : > { %v2619_v47 = vsel %vm2491_vm11, %v2555_v18, 0.0  ;;  %v2752_v26 = vsel %vm2496_vm8, %v4131_v8, 0.0  ;;  %v3337_v56 = vadd.f32 %v3336_v22, %v3335_v29  ;;  %vm2493_vm13 = vcmp.lt.s32.totalorder %v6375_v44, 1024  ;;  %v7160_v29 = vld [vmem:[#allocation50_spill] sm:$0xff] }
 0x40d   : > { %v6403_v50 = vadd.s32 %v7118_v34, %v6339_v28  ;;  %v2745_v58 = vsel %vm2489_vm10, %v4133_v12, 0.0  ;;  %v2683_v19 = vsel %vm2491_vm11, 0.0, %v2555_v18  ;;  %v2922_v1 = vadd.f32 %v6166_v21, %v2920_v6 }
 0x40e   : > { %v2177_v5 = vsub.f32 %v7158_v63, %v2113_v61  ;;  %v2809_v54 = vsel %vm2489_vm10, 0.0, %v4133_v12  ;;  %v2923_v13 = vsel %vm2833_vm5, %v2619_v47, 0.0  ;;  %vm2500_vm14 = vcmp.lt.s32.totalorder %v6390_v62, 1024 }
 0x40f   : > { %v2281_v28 = vmul.f32 1.442695, %v2170_v17  ;;  %v2108_v53 = vadd.f32 %v2030_v27, %v7159_v46  ;;  %v2816_v60 = vsel %vm2496_vm8, 0.0, %v4131_v8  ;;  %v3199_v10 = vadd.f32 %v6181_v38, %v3197_v30 }
 0x410   : > { %v3063_v20 = vadd.f32 %v6169_v24, %v3061_v4  ;;  %v2557_v21 = vsub.f32 0.0, %v2170_v17  ;;  %v3200_v32 = vsel %vm2833_vm5, %v2745_v58, 0.0  ;;  %v3339_v33 = vadd.f32 %v6184_v7, %v3337_v56 }
 0x411   : > { %v2562_v3 = vsub.f32 0.0, %v6358_v36  ;;  %v3064_v52 = vsel %vm2974_vm7, %v2683_v19, 0.0  ;;  %v3340_v43 = vsel %vm2974_vm7, %v2809_v54, 0.0  ;;  %v2924_v18 = vadd.f32 %v2923_v13, %v2922_v1 }
 0x412   : > { %v2295_v51 = vmul.f32 1.442695, %v2177_v5  ;;  %vm2495_vm15 = vcmp.lt.s32.totalorder %v6403_v50, 1024  ;;  %v4135_v15 = vpop.eup %4134  ;;  %v6427_v38 = vsel %vm2833_vm5, %v2752_v26, 0.0  ;;  %v6430_v24 = vsel %vm2974_vm7, %v2816_v60, 0.0  ;;  %v1906_v26 = vpop.xlane.xlu1 %1905 }
 0x413   : > { %4138 = vpow2.f32 %v2281_v28  ;;  %v2172_v7 = vsub.f32 %v7160_v29, %v2108_v53  ;;  %v3201_v36 = vadd.f32 %v3200_v32, %v3199_v10  ;;  %v3065_v2 = vadd.f32 %v3064_v52, %v3063_v20 }
 0x414   : > { %v2621_v8 = vsel %vm2493_vm13, %v2557_v21, 0.0  ;;  %4140 = vlog2.f32 %v1894_v48  ;;  %v4137_v22 = vpop.eup %4136  ;;  %v3341_v6 = vadd.f32 %v3340_v43, %v3339_v33  ;;  %v2626_v31 = vsel %vm2498_vm12, %v2562_v3, 0.0 }
 0x415   : > { %v2690_v61 = vsel %vm2498_vm12, 0.0, %v2562_v3  ;;  %v2564_v12 = vsub.f32 0.0, %v2177_v5  ;;  %v2747_v39 = vsel %vm2491_vm11, %v4135_v15, 0.0  ;;  %4142 = vpow2.f32 %v2295_v51  ;;  %v1909_v5 = vpop.xlane.xlu0 %1908 }
 0x416   : > { %v2685_v17 = vsel %vm2493_vm13, 0.0, %v2557_v21  ;;  %v2926_v27 = vadd.f32 %v6194_v45, %v2924_v18  ;;  %v2811_v30 = vsel %vm2491_vm11, 0.0, %v4135_v15  ;;  %v2927_v4 = vsel %vm2833_vm5, %v2621_v8, 0.0  ;;  %v1912_v51 = vpop.xlane.xlu1 %1911 }
 0x417   : > { %v2285_v47 = vmul.f32 1.442695, %v2172_v7  ;;  %4144 = vlog2.f32 %v1900_v42  ;;  %v2754_v56 = vsel %vm2498_vm12, %v4137_v22, 0.0  ;;  %v3203_v48 = vadd.f32 %v6218_v0, %v3201_v36 }
 0x418   : > { %v3067_v58 = vadd.f32 %v6197_v55, %v3065_v2  ;;  %v2559_v19 = vsub.f32 0.0, %v2172_v7  ;;  %v2818_v1 = vsel %vm2498_vm12, 0.0, %v4137_v22  ;;  %v3204_v45 = vsel %vm2833_vm5, %v2747_v39, 0.0 }
 0x419   : > { %v3343_v11 = vadd.f32 %v6239_v41, %v3341_v6  ;;  %v3068_v63 = vsel %vm2974_vm7, %v2685_v17, 0.0  ;;  %v3344_v54 = vsel %vm2974_vm7, %v2811_v30, 0.0  ;;  %v2628_v13 = vsel %vm2500_vm14, %v2564_v12, 0.0 }
 0x41a   : > { %v2928_v28 = vadd.f32 %v2927_v4, %v2926_v27  ;;  %4146 = vlog2.f32 %v1906_v26  ;;  %v6460_v55 = vsel %vm2833_vm5, %v2626_v31, 0.0  ;;  %v6463_v0 = vsel %vm2974_vm7, %v2690_v61, 0.0  ;;  %v7161_v61 = vld [vmem:[#allocation105_spill] sm:$0xff]  ;;  %v1915_v4 = vpop.xlane.xlu0 %1914 }
 0x41b   : > { %v2692_v9 = vsel %vm2500_vm14, 0.0, %v2564_v12  ;;  %4148 = vpow2.f32 %v2285_v47  ;;  %v3205_v41 = vadd.f32 %v3204_v45, %v3203_v48  ;;  %v3069_v46 = vadd.f32 %v3068_v63, %v3067_v58  ;;  %v7163_v48 = vld [vmem:[#allocation110_spill] sm:$0xff] }
 0x41c   : > { %v2623_v53 = vsel %vm2495_vm15, %v2559_v19, 0.0  ;;  %4150 = vlog2.f32 %v1909_v5  ;;  %v6470_v10 = vsel %vm2833_vm5, %v2754_v56, 0.0  ;;  %v6473_v20 = vsel %vm2974_vm7, %v2818_v1, 0.0 }
 0x41d   : > { %v4139_v60 = vpop.eup %4138  ;;  %v3345_v21 = vadd.f32 %v3344_v54, %v3343_v11  ;;  %v6476_v32 = vsel %vm2833_vm5, %v2628_v13, 0.0  ;;  %v2687_v3 = vsel %vm2495_vm15, 0.0, %v2559_v19  ;;  %v2930_v52 = vadd.f32 %v6267_v16, %v2928_v28 }
 0x41e   : > { %v4141_v33 = vpop.eup %4140  ;;  %v6483_v43 = vadd.s32 %v7118_v34, %v6351_v14  ;;  %v2369_v18 = vadd.s32 424, %v5044_v59  ;;  %v6487_v15 = vsel %vm2974_vm7, %v2692_v9, 0.0  ;;  %v2931_v29 = vsel %vm2833_vm5, %v2623_v53, 0.0  ;;  %v7164_v9 = vld [vmem:[#allocation53_spill] sm:$0xff] }
 0x41f   : > { %v2034_v7 = vmul.f32 0.6931472, %v4141_v33  ;;  %v2371_v42 = vadd.s32 440, %v5044_v59  ;;  %v4143_v36 = vpop.eup %4142  ;;  %v2749_v2 = vsel %vm2493_vm13, %v4139_v60, 0.0  ;;  %v2813_v16 = vsel %vm2493_vm13, 0.0, %v4139_v60  ;;  %v7165_v60 = vld [vmem:[#allocation111_spill] sm:$0xff] }
 0x420   : > { %v3207_v14 = vadd.f32 %v6245_v49, %v3205_v41  ;;  %v3071_v8 = vadd.f32 %v6270_v23, %v3069_v46  ;;  %v3347_v6 = vadd.f32 %v6251_v37, %v3345_v21  ;;  %v3072_v31 = vsel %vm2974_vm7, %v2687_v3, 0.0  ;;  %v7162_v23 = vld [vmem:[#allocation49_spill] sm:$0xff] }
 0x421   : > { %v4145_v22 = vpop.eup %4144  ;;  %v2110_v12 = vadd.f32 %v2034_v7, %v7161_v61  ;;  %4152 = vlog2.f32 %v1912_v51  ;;  %v2932_v39 = vadd.f32 %v2931_v29, %v2930_v52  ;;  %vm2497_vm0 = vcmp.lt.s32.totalorder %v6483_v43, 1024  ;;  %v1918_v52 = vpop.xlane.xlu1 %1917 }
 0x422   : > { %v6502_v17 = vadd.s32 %v7118_v34, %v2369_v18  ;;  %v2038_v44 = vmul.f32 0.6931472, %v4145_v22  ;;  %v3208_v27 = vsel %vm2833_vm5, %v2749_v2, 0.0  ;;  %v3348_v49 = vsel %vm2974_vm7, %v2813_v16, 0.0  ;;  %v1921_v61 = vpop.xlane.xlu0 %1920 }
 0x423   : > { %v2174_v30 = vsub.f32 %v7162_v23, %v2110_v12  ;;  %v6508_v37 = vadd.s32 %v7118_v34, %v2371_v42  ;;  %v2756_v26 = vsel %vm2500_vm14, %v4143_v36, 0.0  ;;  %v3073_v56 = vadd.f32 %v3072_v31, %v3071_v8  ;;  %v7166_v8 = vld [vmem:[#allocation59_spill] sm:$0xff] }
 0x424   : > { %v4147_v47 = vpop.eup %4146  ;;  %v2112_v58 = vadd.f32 %v2038_v44, %v7163_v48  ;;  %v2372_v19 = vadd.s32 448, %v5044_v59  ;;  %v2820_v45 = vsel %vm2500_vm14, 0.0, %v4143_v36  ;;  %v3209_v13 = vadd.f32 %v3208_v27, %v3207_v14  ;;  %v7167_v44 = vld [vmem:[#allocation112_spill] sm:$0xff] }
 0x425   : > { %v4149_v1 = vpop.eup %4148  ;;  %v2289_v11 = vmul.f32 1.442695, %v2174_v30  ;;  %v2561_v63 = vsub.f32 0.0, %v2174_v30  ;;  %v2042_v5 = vmul.f32 0.6931472, %v4147_v47  ;;  %v3349_v28 = vadd.f32 %v3348_v49, %v3347_v6  ;;  %v1924_v30 = vpop.xlane.xlu1 %1923 }
 0x426   : > { %v4151_v54 = vpop.eup %4150  ;;  %v2176_v41 = vsub.f32 %v7164_v9, %v2112_v58  ;;  %4154 = vlog2.f32 %v1915_v4  ;;  %v2934_v62 = vadd.f32 %v6384_v35, %v2932_v39  ;;  %v3075_v33 = vadd.f32 %v6394_v25, %v3073_v56  ;;  %v7169_v9 = vld [vmem:[#allocation114_spill] sm:$0xff] }
 0x427   : > { %4156 = vpow2.f32 %v2289_v11  ;;  %v2625_v46 = vsel %vm2497_vm0, %v2561_v63, 0.0  ;;  %v2689_v53 = vsel %vm2497_vm0, 0.0, %v2561_v63  ;;  %v2114_v21 = vadd.f32 %v2042_v5, %v7165_v60  ;;  %v7168_v5 = vld [vmem:[#allocation62_spill] sm:$0xff] }
 0x428   : > { %vm2499_vm1 = vcmp.lt.s32.totalorder %v6502_v17, 1024  ;;  %v2293_v3 = vmul.f32 1.442695, %v2176_v41  ;;  %v2751_v18 = vsel %vm2495_vm15, %v4149_v1, 0.0  ;;  %v2815_v51 = vsel %vm2495_vm15, 0.0, %v4149_v1 }
 0x429   : > { %v2935_v29 = vsel %vm2833_vm5, %v2625_v46, 0.0  ;;  %v2044_v7 = vmul.f32 0.6931472, %v4151_v54  ;;  %v6531_v42 = vsel %vm2833_vm5, %v2756_v26, 0.0  ;;  %v3076_v35 = vsel %vm2974_vm7, %v2689_v53, 0.0 }
 0x42a   : > { %v2563_v36 = vsub.f32 0.0, %v2176_v41  ;;  %v2373_v25 = vadd.s32 456, %v5044_v59  ;;  %v3211_v16 = vadd.f32 %v6316_v40, %v3209_v13  ;;  %v3351_v14 = vadd.f32 %v6320_v57, %v3349_v28 }
 0x42b   : > { %v4153_v2 = vpop.eup %4152  ;;  %v2178_v22 = vsub.f32 %v7166_v8, %v2114_v21  ;;  %4158 = vlog2.f32 %v1918_v52  ;;  %v3212_v50 = vsel %vm2833_vm5, %v2751_v18, 0.0  ;;  %v3352_v6 = vsel %vm2974_vm7, %v2815_v51, 0.0 }
 0x42c   : > { %v2936_v31 = vadd.f32 %v2935_v29, %v2934_v62  ;;  %4160 = vpow2.f32 %v2293_v3  ;;  %v6541_v12 = vsel %vm2974_vm7, %v2820_v45, 0.0  ;;  %v3077_v39 = vadd.f32 %v3076_v35, %v3075_v33 }
 0x42d   : > { %vm2501_vm2 = vcmp.lt.s32.totalorder %v6508_v37, 1024  ;;  %v2115_v40 = vadd.f32 %v2044_v7, %v7167_v44  ;;  %v2627_v57 = vsel %vm2499_vm1, %v2563_v36, 0.0  ;;  %v6548_v27 = vadd.s32 %v7118_v34, %v2372_v19  ;;  %v7170_v7 = vld [vmem:[#allocation65_spill] sm:$0xff] }
 0x42e   : > { %v2046_v49 = vmul.f32 0.6931472, %v4153_v2  ;;  %v2374_v23 = vadd.s32 464, %v5044_v59  ;;  %v3213_v4 = vadd.f32 %v3212_v50, %v3211_v16  ;;  %v3353_v47 = vadd.f32 %v3352_v6, %v3351_v14  ;;  %v7171_v14 = vld [vmem:[#allocation115_spill] sm:$0xff] }
 0x42f   : > { %v2297_v26 = vmul.f32 1.442695, %v2178_v22  ;;  %4162 = vlog2.f32 %v1921_v61  ;;  %v2691_v48 = vsel %vm2499_vm1, 0.0, %v2563_v36  ;;  %v2938_v58 = vadd.f32 %v6460_v55, %v2936_v31 }
 0x430   : > { %v4155_v56 = vpop.eup %4154  ;;  %v6555_v1 = vadd.s32 %v7118_v34, %v2373_v25  ;;  %v2375_v19 = vadd.s32 472, %v5044_v59  ;;  %v2939_v11 = vsel %vm2833_vm5, %v2627_v57, 0.0  ;;  %v3079_v63 = vadd.f32 %v6463_v0, %v3077_v39 }
 0x431   : > { %v4157_v45 = vpop.eup %4156  ;;  %v2179_v54 = vsub.f32 %v7168_v5, %v2115_v40  ;;  %4164 = vlog2.f32 %v1924_v30  ;;  %v2565_v55 = vsub.f32 0.0, %v2178_v22  ;;  %v2116_v41 = vadd.f32 %v2046_v49, %v7169_v9 }
 0x432   : > { %v2753_v13 = vsel %vm2497_vm0, %v4157_v45, 0.0  ;;  %v2817_v28 = vsel %vm2497_vm0, 0.0, %v4157_v45  ;;  %v3215_v46 = vadd.f32 %v6427_v38, %v3213_v4  ;;  %v3355_v53 = vadd.f32 %v6430_v24, %v3353_v47  ;;  %v7173_v45 = vld [vmem:[#allocation54_spill] sm:$0xff] }
 0x433   : > { %v3080_v60 = vsel %vm2974_vm7, %v2691_v48, 0.0  ;;  %4166 = vpow2.f32 %v2297_v26  ;;  %v3216_v0 = vsel %vm2833_vm5, %v2753_v13, 0.0  ;;  %v3356_v21 = vsel %vm2974_vm7, %v2817_v28, 0.0 }
 0x434   : > { %v2940_v62 = vadd.f32 %v2939_v11, %v2938_v58  ;;  %v2048_v33 = vmul.f32 0.6931472, %v4155_v56  ;;  %vm2502_vm3 = vcmp.lt.s32.totalorder %v6548_v27, 1024  ;;  %v2299_v43 = vmul.f32 1.442695, %v2179_v54 }
 0x435   : > { %v4159_v3 = vpop.eup %4158  ;;  %v6573_v52 = vadd.s32 %v7118_v34, %v2374_v23  ;;  %v2376_v38 = vadd.s32 480, %v5044_v59  ;;  %v3081_v24 = vadd.f32 %v3080_v60, %v3079_v63  ;;  %v2629_v51 = vsel %vm2501_vm2, %v2565_v55, 0.0 }
 0x436   : > { %v4161_v18 = vpop.eup %4160  ;;  %v2566_v29 = vsub.f32 0.0, %v2179_v54  ;;  %v2180_v35 = vsub.f32 %v7170_v7, %v2116_v41  ;;  %v3217_v36 = vadd.f32 %v3216_v0, %v3215_v46  ;;  %v3357_v25 = vadd.f32 %v3356_v21, %v3355_v53  ;;  %v7174_v46 = vld [vmem:[#allocation2_spill] sm:$0xff]  ;;  %v7175_v21 = vld [vmem:[#allocation69_spill] sm:$0xff] }
 0x437   : > { %v2693_v2 = vsel %vm2501_vm2, 0.0, %v2565_v55  ;;  %vm2503_vm4 = vcmp.lt.s32.totalorder %v6555_v1, 1024  ;;  %v2942_v16 = vadd.f32 %v6476_v32, %v2940_v62  ;;  %v2117_v8 = vadd.f32 %v2048_v33, %v7171_v14 }
 0x438   : > { %v6585_v22 = vadd.s32 %v7118_v34, %v2375_v19  ;;  %v2050_v50 = vmul.f32 0.6931472, %v4159_v3  ;;  %v2755_v31 = vsel %vm2499_vm1, %v4161_v18, 0.0  ;;  %v2819_v61 = vsel %vm2499_vm1, 0.0, %v4161_v18 }
 0x439   : > { %v4163_v6 = vpop.eup %4162  ;;  %v2943_v39 = vsel %vm2833_vm5, %v2629_v51, 0.0  ;;  %4168 = vpow2.f32 %v2299_v43  ;;  %v3083_v44 = vadd.f32 %v6487_v15, %v3081_v24  ;;  %v3084_v32 = vsel %vm2974_vm7, %v2693_v2, 0.0  ;;  %v7172_v15 = vld [vmem:[#allocation67_spill] sm:$0xff]  ;;  %v1927_v51 = vpop.xlane.xlu0 %1926 }
 0x43a   : > { %v2630_v40 = vsel %vm2502_vm3, %v2566_v29, 0.0  ;;  %v2301_v57 = vmul.f32 1.442695, %v2180_v35  ;;  %v3219_v23 = vadd.f32 %v6470_v10, %v3217_v36  ;;  %v3359_v30 = vadd.f32 %v6473_v20, %v3357_v25  ;;  %v1930_v25 = vpop.xlane.xlu1 %1929 }
 0x43b   : > { %v4165_v49 = vpop.eup %4164  ;;  %v2694_v17 = vsel %vm2502_vm3, 0.0, %v2566_v29  ;;  %v2567_v4 = vsub.f32 0.0, %v2180_v35  ;;  %v3220_v47 = vsel %vm2833_vm5, %v2755_v31, 0.0  ;;  %v3360_v26 = vsel %vm2974_vm7, %v2819_v61, 0.0 }
 0x43c   : > { %v2181_v56 = vsub.f32 %v7172_v15, %v2117_v8  ;;  %v2052_v48 = vmul.f32 0.6931472, %v4163_v6  ;;  %v2944_v19 = vadd.f32 %v2943_v39, %v2942_v16  ;;  %vm2504_vm6 = vcmp.lt.s32.totalorder %v6573_v52, 1024  ;;  %v7176_v16 = vld [vmem:[#allocation72_spill] sm:$0xff]  ;;  %v7177_v8 = vld [vmem:[#allocation55_spill] sm:$0xff]  ;;  %v7181_v52 = vld [vmem:[#allocation78_spill] sm:$0xff] }
 0x43d   : > { %v4167_v58 = vpop.eup %4166  ;;  %v2118_v11 = vadd.f32 %v2050_v50, %v7173_v45  ;;  %v6606_v10 = vadd.s32 %v7118_v34, %v2376_v38  ;;  %v3085_v20 = vadd.f32 %v3084_v32, %v3083_v44  ;;  %v2945_v63 = vsel %vm2833_vm5, %v2630_v40, 0.0 }
 0x43e   : > { %v3086_v5 = vsel %vm2974_vm7, %v2694_v17, 0.0  ;;  %4170 = vpow2.f32 %v2301_v57  ;;  %v3221_v54 = vadd.f32 %v3220_v47, %v3219_v23  ;;  %v3361_v13 = vadd.f32 %v3360_v26, %v3359_v30  ;;  %v7178_v57 = vld [vmem:[#allocation75_spill] sm:$0xff] }
 0x43f   : > { %v2631_v28 = vsel %vm2503_vm4, %v2567_v4, 0.0  ;;  %v2695_v55 = vsel %vm2503_vm4, 0.0, %v2567_v4  ;;  %vm2505_vm8 = vcmp.lt.s32.totalorder %v6585_v22, 1024  ;;  %v2757_v9 = vsel %vm2501_vm2, %v4167_v58, 0.0 }
 0x440   : > { %v2303_v41 = vmul.f32 1.442695, %v2181_v56  ;;  %v2119_v53 = vadd.f32 %v2052_v48, %v7174_v46  ;;  %v2054_v60 = vmul.f32 0.6931472, %v4165_v49  ;;  %v2821_v0 = vsel %vm2501_vm2, 0.0, %v4167_v58 }
 0x441   : > { %v2182_v62 = vsub.f32 %v7175_v21, %v2118_v11  ;;  %v2377_v33 = vadd.s32 488, %v5044_v59  ;;  %v2378_v3 = vadd.s32 496, %v5044_v59  ;;  %v2946_v43 = vadd.f32 %v2945_v63, %v2944_v19 }
 0x442   : > { %v3087_v38 = vadd.f32 %v3086_v5, %v3085_v20  ;;  %v2947_v18 = vsel %vm2833_vm5, %v2631_v28, 0.0  ;;  %v3088_v24 = vsel %vm2974_vm7, %v2695_v55, 0.0  ;;  %v3223_v7 = vadd.f32 %v6531_v42, %v3221_v54 }
 0x443   : > { %v4169_v29 = vpop.eup %4168  ;;  %v3224_v35 = vsel %vm2833_vm5, %v2757_v9, 0.0  ;;  %v3363_v37 = vadd.f32 %v6541_v12, %v3361_v13  ;;  %v2568_v36 = vsub.f32 0.0, %v2181_v56  ;;  %v3364_v2 = vsel %vm2974_vm7, %v2821_v0, 0.0 }
 0x444   : > { %4172 = vpow2.f32 %v2303_v41  ;;  %vm2506_vm9 = vcmp.lt.s32.totalorder %v6606_v10, 1024  ;;  %v2183_v14 = vsub.f32 %v7176_v16, %v2119_v53  ;;  %v2120_v50 = vadd.f32 %v2054_v60, %v7177_v8  ;;  %v7180_v8 = vld [vmem:[#allocation58_spill] sm:$0xff] }
 0x445   : > { %v2305_v6 = vmul.f32 1.442695, %v2182_v62  ;;  %4174 = vlog2.f32 %v1927_v51  ;;  %v2758_v42 = vsel %vm2502_vm3, %v4169_v29, 0.0  ;;  %v2822_v31 = vsel %vm2502_vm3, 0.0, %v4169_v29 }
 0x446   : > { %v2569_v12 = vsub.f32 0.0, %v2182_v62  ;;  %4176 = vlog2.f32 %v1930_v25  ;;  %v4196_v61 = vmov 0   ;;  %v4197_v39 = vmov 1  }
 0x447   : > { %3765 = vset.pattern.permute.xlu1 %v4196_v61  ;;  %3764 = vset.pattern.permute.xlu0 %v4197_v39  ;;  %v2632_v44 = vsel %vm2504_vm6, %v2568_v36, 0.0  ;;  %v2696_v32 = vsel %vm2504_vm6, 0.0, %v2568_v36  ;;  %v2307_v40 = vmul.f32 1.442695, %v2183_v14  ;;  %v2184_v49 = vsub.f32 %v7178_v57, %v2120_v50  ;;  %v7179_v36 = vld [vmem:[#allocation57_spill] sm:$0xff]  ;;  %v7182_v57 = vld [vmem:[#allocation80_spill] sm:$0xff] }
 0x448   : > { %v4171_v23 = vpop.eup %4170  ;;  %v2948_v27 = vadd.f32 %v2947_v18, %v2946_v43  ;;  %v3089_v30 = vadd.f32 %v3088_v24, %v3087_v38  ;;  %v6644_v17 = vadd.s32 %v7118_v34, %v2377_v33  ;;  %v6647_v4 = vadd.s32 %v7118_v34, %v2378_v3 }
 0x449   : > { %v3225_v47 = vadd.f32 %v3224_v35, %v3223_v7  ;;  %v3365_v26 = vadd.f32 %v3364_v2, %v3363_v37  ;;  %v3226_v15 = vsel %vm2833_vm5, %v2758_v42, 0.0  ;;  %4178 = vpow2.f32 %v2305_v6 }
 0x44a   : > { %v3366_v56 = vsel %vm2974_vm7, %v2822_v31, 0.0  ;;  %v2949_v48 = vsel %vm2833_vm5, %v2632_v44, 0.0  ;;  %v3090_v58 = vsel %vm2974_vm7, %v2696_v32, 0.0  ;;  %v2633_v19 = vsel %vm2505_vm8, %v2569_v12, 0.0 }
 0x44b   : > { %v2697_v45 = vsel %vm2505_vm8, 0.0, %v2569_v12  ;;  %4180 = vpow2.f32 %v2307_v40  ;;  %v2570_v11 = vsub.f32 0.0, %v2183_v14  ;;  %v2309_v20 = vmul.f32 1.442695, %v2184_v49 }
 0x44c   : > { %v3227_v63 = vadd.f32 %v3226_v15, %v3225_v47  ;;  %v2759_v5 = vsel %vm2503_vm4, %v4171_v23, 0.0  ;;  %v2823_v54 = vsel %vm2503_vm4, 0.0, %v4171_v23  ;;  %v2379_v13 = vadd.s32 504, %v5044_v59 }
 0x44d   : > { %v3367_v28 = vadd.f32 %v3366_v56, %v3365_v26  ;;  %v2950_v55 = vadd.f32 %v2949_v48, %v2948_v27  ;;  %v2951_v9 = vsel %vm2833_vm5, %v2633_v19, 0.0  ;;  %v2571_v41 = vsub.f32 0.0, %v2184_v49 }
 0x44e   : > { %v4173_v46 = vpop.eup %4172  ;;  %v3091_v53 = vadd.f32 %v3090_v58, %v3089_v30  ;;  %v3092_v60 = vsel %vm2974_vm7, %v2697_v45, 0.0  ;;  %vm2507_vm10 = vcmp.lt.s32.totalorder %v6644_v17, 1024  ;;  %vm2508_vm11 = vcmp.lt.s32.totalorder %v6647_v4, 1024 }
 0x44f   : > { %v4175_v0 = vpop.eup %4174  ;;  %v3228_v21 = vsel %vm2833_vm5, %v2759_v5, 0.0  ;;  %v3368_v1 = vsel %vm2974_vm7, %v2823_v54, 0.0  ;;  %v2634_v59 = vsel %vm2506_vm9, %v2570_v11, 0.0  ;;  %4182 = vpow2.f32 %v2309_v20 }
 0x450   : > { %v4177_v62 = vpop.eup %4176  ;;  %v2952_v33 = vadd.f32 %v2951_v9, %v2950_v55  ;;  %v2698_v3 = vsel %vm2506_vm9, 0.0, %v2570_v11  ;;  %v2056_v43 = vmul.f32 0.6931472, %v4175_v0  ;;  %v6673_v38 = vadd.s32 %v7118_v34, %v2379_v13 }
 0x451   : > { %v2760_v18 = vsel %vm2504_vm6, %v4173_v46, 0.0  ;;  %v3093_v24 = vadd.f32 %v3092_v60, %v3091_v53  ;;  %v2635_v51 = vsel %vm2507_vm10, %v2571_v41, 0.0  ;;  %v2058_v29 = vmul.f32 0.6931472, %v4177_v62 }
 0x452   : > { %v2824_v7 = vsel %vm2504_vm6, 0.0, %v4173_v46  ;;  %v2953_v35 = vsel %vm2833_vm5, %v2634_v59, 0.0  ;;  %v2699_v37 = vsel %vm2507_vm10, 0.0, %v2571_v41  ;;  %v2121_v25 = vadd.f32 %v2056_v43, %v7179_v36 }
 0x453   : > { %v4179_v34 = vpop.eup %4178  ;;  %v3229_v2 = vadd.f32 %v3228_v21, %v3227_v63  ;;  %v3369_v16 = vadd.f32 %v3368_v1, %v3367_v28  ;;  %v3094_v14 = vsel %vm2974_vm7, %v2698_v3, 0.0  ;;  %v2122_v50 = vadd.f32 %v2058_v29, %v7180_v8 }
 0x454   : > { %v3230_v6 = vsel %vm2833_vm5, %v2760_v18, 0.0  ;;  %v2955_v42 = vsel %vm2833_vm5, %v2635_v51, 0.0  ;;  %v2185_v31 = vsub.f32 %v7181_v52, %v2121_v25  ;;  %vm2509_vm12 = vcmp.lt.s32.totalorder %v6673_v38, 1024 }
 0x455   : > { %v4181_v12 = vpop.eup %4180  ;;  %v3370_v44 = vsel %vm2974_vm7, %v2824_v7, 0.0  ;;  %v2954_v32 = vadd.f32 %v2953_v35, %v2952_v33  ;;  %v3096_v40 = vsel %vm2974_vm7, %v2699_v37, 0.0  ;;  %v2186_v49 = vsub.f32 %v7182_v57, %v2122_v50 }
 0x456   : > { %v2761_v23 = vsel %vm2505_vm8, %v4179_v34, 0.0  ;;  %v3095_v27 = vadd.f32 %v3094_v14, %v3093_v24  ;;  %v2311_v30 = vmul.f32 1.442695, %v2185_v31  ;;  %v2572_v47 = vsub.f32 0.0, %v2185_v31 }
 0x457   : > { %v2825_v26 = vsel %vm2505_vm8, 0.0, %v4179_v34  ;;  %v2956_v15 = vadd.f32 %v2955_v42, %v2954_v32  ;;  %v2313_v56 = vmul.f32 1.442695, %v2186_v49  ;;  %v2573_v48 = vsub.f32 0.0, %v2186_v49 }
 0x458   : > { %v2762_v58 = vsel %vm2506_vm9, %v4181_v12, 0.0  ;;  %v3097_v19 = vadd.f32 %v3096_v40, %v3095_v27  ;;  %4184 = vpow2.f32 %v2311_v30  ;;  %v2636_v45 = vsel %vm2508_vm11, %v2572_v47, 0.0 }
 0x459   : > { %v4183_v11 = vpop.eup %4182  ;;  %v2700_v20 = vsel %vm2508_vm11, 0.0, %v2572_v47  ;;  %v2957_v63 = vsel %vm2833_vm5, %v2636_v45, 0.0  ;;  %4186 = vpow2.f32 %v2313_v56  ;;  %v2637_v22 = vsel %vm2509_vm12, %v2573_v48, 0.0 }
 0x45a   : > { %v2958_v5 = vadd.f32 %v2957_v63, %v2956_v15  ;;  %v3098_v54 = vsel %vm2974_vm7, %v2700_v20, 0.0  ;;  %v2701_v13 = vsel %vm2509_vm12, 0.0, %v2573_v48  ;;  %v2959_v28 = vsel %vm2833_vm5, %v2637_v22, 0.0 }
 0x45b   : > { %v3232_v55 = vsel %vm2833_vm5, %v2761_v23, 0.0  ;;  %v2826_v9 = vsel %vm2506_vm9, 0.0, %v4181_v12  ;;  %v3099_v41 = vadd.f32 %v3098_v54, %v3097_v19  ;;  %v3100_v46 = vsel %vm2974_vm7, %v2701_v13, 0.0 }
 0x45c   : > { %v3231_v53 = vadd.f32 %v3230_v6, %v3229_v2  ;;  %v3372_v60 = vsel %vm2974_vm7, %v2825_v26, 0.0  ;;  %v2763_v0 = vsel %vm2507_vm10, %v4183_v11, 0.0  ;;  %v2960_v21 = vadd.f32 %v2959_v28, %v2958_v5 }
 0x45d   : > { %v3371_v1 = vadd.f32 %v3370_v44, %v3369_v16  ;;  %v3234_v59 = vsel %vm2833_vm5, %v2762_v58, 0.0  ;;  %v2827_v62 = vsel %vm2507_vm10, 0.0, %v4183_v11  ;;  %v3101_v33 = vadd.f32 %v3100_v46, %v3099_v41 }
 0x45e   : > { %v3233_v3 = vadd.f32 %v3232_v55, %v3231_v53  ;;  %v3374_v10 = vsel %vm2974_vm7, %v2826_v9, 0.0  ;;  %v2961_v43 = vrot.slane %v2960_v21, 4  ;;  %v3236_v51 = vsel %vm2833_vm5, %v2763_v0, 0.0 }
 0x45f   : > { %v3373_v18 = vadd.f32 %v3372_v60, %v3371_v1  ;;  %v3102_v24 = vrot.slane %v3101_v33, 4  ;;  %v3376_v35 = vsel %vm2974_vm7, %v2827_v62, 0.0  ;;  %v7183_v54 = vlaneseq }
 0x460   : > { %v2962_v29 = vadd.f32 %v2961_v43, %v2960_v21  ;;  %v3235_v7 = vadd.f32 %v3234_v59, %v3233_v3 }
 0x461   : > { %v3103_v37 = vadd.f32 %v3102_v24, %v3101_v33  ;;  %v3375_v36 = vadd.f32 %v3374_v10, %v3373_v18  ;;  %v2831_v13 = vand.u32 127, %v7183_v54 }
 0x462   : > { %v4185_v25 = vpop.eup %4184  ;;  %v2963_v34 = vrot.slane %v2962_v29, 2  ;;  %v3237_v2 = vadd.f32 %v3236_v51, %v3235_v7 }
 0x463   : > { %v4187_v17 = vpop.eup %4186  ;;  %v3104_v16 = vrot.slane %v3103_v37, 2  ;;  %v2764_v14 = vsel %vm2508_vm11, %v4185_v25, 0.0  ;;  %v2828_v8 = vsel %vm2508_vm11, 0.0, %v4185_v25  ;;  %v3377_v50 = vadd.f32 %v3376_v35, %v3375_v36 }
 0x464   : > { %v2964_v6 = vadd.f32 %v2963_v34, %v2962_v29  ;;  %v2765_v42 = vsel %vm2509_vm12, %v4187_v17, 0.0  ;;  %v3238_v52 = vsel %vm2833_vm5, %v2764_v14, 0.0  ;;  %v2829_v31 = vsel %vm2509_vm12, 0.0, %v4187_v17 }
 0x465   : > { %v3105_v12 = vadd.f32 %v3104_v16, %v3103_v37  ;;  %v3239_v44 = vadd.f32 %v3238_v52, %v3237_v2  ;;  %v3240_v32 = vsel %vm2833_vm5, %v2765_v42, 0.0  ;;  %v3378_v40 = vsel %vm2974_vm7, %v2828_v8, 0.0 }
 0x466   : > { %v2965_v57 = vrot.slane %v2964_v6, 1  ;;  %v3379_v49 = vadd.f32 %v3378_v40, %v3377_v50  ;;  %v3380_v4 = vsel %vm2974_vm7, %v2829_v31, 0.0  ;;  %vm2832_vm5 = vcmp.eq.s32.totalorder %v2831_v13, 0 }
 0x467   : > { %v3106_v23 = vrot.slane %v3105_v12, 1  ;;  %v3241_v27 = vadd.f32 %v3240_v32, %v3239_v44  ;;  %vm2973_vm7 = vcmp.eq.s32.totalorder %v2831_v13, 1  ;;  %vm3114_vm13 = vcmp.eq.s32.totalorder %v2831_v13, 2 }
 0x468   : > { %v2966_v30 = vadd.f32 %v2965_v57, %v2964_v6  ;;  %v3381_v47 = vadd.f32 %v3380_v4, %v3379_v49  ;;  %vm3254_vm14 = vcmp.eq.s32.totalorder %v2831_v13, 3 }
 0x469   : > { %v3107_v26 = vadd.f32 %v3106_v23, %v3105_v12  ;;  %v3242_v15 = vrot.slane %v3241_v27, 4 }
 0x46a   : > { %2969 = vperm.xlu0 %3764, %v2966_v30   ;;  %v3382_v56 = vrot.slane %v3381_v47, 4 }
 0x46b   : > { %3110 = vperm.xlu1 %3765, %v3107_v26   ;;  %v3243_v38 = vadd.f32 %v3242_v15, %v3241_v27 }
 0x46c   : > { %v3383_v48 = vadd.f32 %v3382_v56, %v3381_v47 }
 0x46d   : > { %v3244_v58 = vrot.slane %v3243_v38, 2 }
 0x46e   : > { %v3384_v19 = vrot.slane %v3383_v48, 2  ;;  %3768 = vset.pattern.permute.xlu0 %v4196_v61 }
 0x46f   : > { %3766 = vset.pattern.permute.xlu1 %v4197_v39  ;;  %v3245_v45 = vadd.f32 %v3244_v58, %v3243_v38 }
 0x470   : > { %v3385_v11 = vadd.f32 %v3384_v19, %v3383_v48 }
 0x471   : > { %v3246_v20 = vrot.slane %v3245_v45, 1 }
 0x472   : > { %v3386_v22 = vrot.slane %v3385_v11, 1 }
 0x473   : > { %v3247_v63 = vadd.f32 %v3246_v20, %v3245_v45 }
 0x474   : > { %v3387_v5 = vadd.f32 %v3386_v22, %v3385_v11 }
 0x475   : > { %3250 = vperm.xlu1 %3766, %v3247_v63  }
 0x479   : > { %3767 = vset.pattern.permute.xlu1 %v4196_v61 }
 0x47a   : > { %3390 = vperm.xlu1 %3767, %v3387_v5  }
 0x4e9   : > { %v2970_v55 = vpop.permute.xlu0 %2969 }
 0x4ea   : > { %v3111_v28 = vpop.permute.xlu1 %3110  ;;  %v2972_v39 = vsel %vm2832_vm5, %v2970_v55, 0.0 }
 0x4eb   : > { %v3113_v41 = vsel %vm2973_vm7, %v3111_v28, %v2972_v39 }
 0x4f4   : > { %v3251_v9 = vpop.permute.xlu1 %3250 }
 0x4f5   : > { %v3253_v46 = vsel %vm3114_vm13, %v3251_v9, %v3113_v41 }
 0x4f9   : > { %v3391_v61 = vpop.permute.xlu1 %3390 }
 0x4fa   : > { %v3393_v53 = vsel %vm3254_vm14, %v3391_v61, %v3253_v46 }
 0x4fb   : > { %3394 = vst [vmem:[%s222_s13] sm:$0x1] %v3393_v53 }
 0x4fc PF: > { %s15_s18 = sadd.s32 1, %s4194_s18  }
 0x4fd   : > { %p12_p5 = scmp.ge.s32.totalorder %s15_s18, 6  }
 0x4ff   :  { %14 = sbr.rel (!%p12_p5) target bundleno = 1 (0x1), region = 70 }

</bundles_post_ra>
